<compile_context>
chip_gen: v7x
topology: tpu7x:2x2x1
jax: 0.10.0
libtpu: 0.0.40
codegen_flags: <defaults>
</compile_context>

<pallas_src>
import functools

import jax
import jax.numpy as jnp
from jax.experimental import pallas as pl
from jax.experimental.pallas import tpu as pltpu


def _window_attn_kernel(x_ref, wqkv_ref, bqkv_ref, wproj_ref, bproj_ref,
                        bias_ref, *rest, num_heads, has_mask):
    # x_ref:    (TB, N, C)    bf16
    # wqkv_ref: (C, 3C) bf16  bqkv_ref: (1, 3C) f32 (scale folded into Q part)
    # wproj_ref:(C, C)  bf16  bproj_ref:(1, C)  f32
    # bias_ref: (H, N, N) f32 relative-position bias
    # mask_ref: (TB, N, N) f32 additive shift mask (only if has_mask)
    # o_ref:    (TB, N, C) output dtype
    if has_mask:
        mask_ref, o_ref = rest
    else:
        (o_ref,) = rest
        mask_ref = None

    tb, n, c = x_ref.shape
    dh = c // num_heads

    # ---- fused QKV projection: one big MXU matmul, f32 accumulation ----
    x2d = x_ref[...].reshape(tb * n, c)                         # bf16 (TB*N, C)
    qkv = jnp.dot(x2d, wqkv_ref[...],
                  preferred_element_type=jnp.float32)           # (TB*N, 3C) f32
    qkv = qkv + bqkv_ref[...]                                   # + bias (f32)
    qkv = qkv.astype(jnp.bfloat16)                              # bf16 for attention matmuls

    bias = bias_ref[...]                                        # (H, N, N) f32
    mask = mask_ref[...] if has_mask else None                  # (TB, N, N) f32

    # ---- per-head attention, batched over the TB windows in this block ----
    head_outs = []
    for h in range(num_heads):
        lo = h * dh
        q = qkv[:, lo:lo + dh].reshape(tb, n, dh)               # (TB, N, Dh) bf16
        k = qkv[:, c + lo:c + lo + dh].reshape(tb, n, dh)
        v = qkv[:, 2 * c + lo:2 * c + lo + dh].reshape(tb, n, dh)

        s = jnp.einsum("bnd,bmd->bnm", q, k,
                       preferred_element_type=jnp.float32)      # (TB, N, N) f32
        s = s + bias[h]                                         # broadcast over TB
        if has_mask:
            s = s + mask

        # numerically stable softmax (f32); reciprocal on the EUP slot
        s = s - jnp.max(s, axis=-1, keepdims=True)
        p = jnp.exp(s)
        p = p * pl.reciprocal(jnp.sum(p, axis=-1, keepdims=True), approx=True)

        head_outs.append(
            jnp.einsum("bnm,bmd->bnd", p.astype(jnp.bfloat16), v,
                       preferred_element_type=jnp.float32))     # (TB, N, Dh) f32

    out = jnp.concatenate(head_outs, axis=-1)                   # (TB, N, C) f32

    # ---- output projection: one big MXU matmul ----
    out2d = out.reshape(tb * n, c).astype(jnp.bfloat16)
    y = jnp.dot(out2d, wproj_ref[...],
                preferred_element_type=jnp.float32)             # (TB*N, C) f32
    y = y + bproj_ref[...]
    o_ref[...] = y.reshape(tb, n, c).astype(o_ref.dtype)


def make_relative_position_index(window_size):
    wh, ww = window_size
    coords_h = jnp.arange(wh)
    coords_w = jnp.arange(ww)
    coords = jnp.stack(jnp.meshgrid(coords_h, coords_w, indexing="ij"))  # (2, Wh, Ww)
    coords_flatten = coords.reshape(2, -1)                               # (2, N)
    rel = coords_flatten[:, :, None] - coords_flatten[:, None, :]        # (2, N, N)
    rel = jnp.transpose(rel, (1, 2, 0))                                  # (N, N, 2)
    rel = rel.at[:, :, 0].add(wh - 1)
    rel = rel.at[:, :, 1].add(ww - 1)
    rel = rel.at[:, :, 0].multiply(2 * ww - 1)
    return rel.sum(-1)                                                   # (N, N)


def _choose_block_windows(num_windows_total, n_mask_windows, target=128):
    """Largest TB that divides B_, is a multiple of nW, and is <= target windows.
    Prefers >= 2 grid steps (megacore / pipeline) when possible."""
    groups = num_windows_total // n_mask_windows
    best = 1
    for g in range(1, groups + 1):
        if groups % g == 0 and g * n_mask_windows <= target:
            best = g
    if best == groups and groups > 1:          # would collapse grid to 1 step
        for g in range(best - 1, 0, -1):
            if groups % g == 0:
                best = g
                break
    return best * n_mask_windows


def window_attention(x, params, window_size, num_heads, mask=None,
                     qk_scale=None, block_windows=None,
                     compute_dtype=jnp.bfloat16, vmem_limit_bytes=None):
    """x: (B_, N, C); mask: (nW, N, N) or None.  Returns (B_, N, C) in x.dtype."""
    B_, N, C = x.shape
    head_dim = C // num_heads
    scale = qk_scale if qk_scale is not None else head_dim ** (-0.5)

    # --- glue: gather relative-position bias table into dense (H, N, N) ---
    rpi = make_relative_position_index(window_size).reshape(-1)          # (N*N,)
    bias = params["rel_pos_bias_table"][rpi]                             # (N*N, H)
    bias = bias.reshape(N, N, num_heads).transpose(2, 0, 1)              # (H, N, N)
    bias = bias.astype(jnp.float32)

    has_mask = mask is not None
    nW = mask.shape[0] if has_mask else 1
    assert B_ % nW == 0

    TB = block_windows if block_windows is not None else _choose_block_windows(B_, nW)
    assert B_ % TB == 0 and TB % nW == 0

    # --- fold the qk scale into the Q columns of the QKV projection (free) ---
    w_qkv = params["w_qkv"]
    b_qkv = params["b_qkv"]
    w_qkv = jnp.concatenate([w_qkv[:, :C] * scale, w_qkv[:, C:]], axis=1)
    b_qkv = jnp.concatenate([b_qkv[:C] * scale, b_qkv[C:]])

    w_qkv = w_qkv.astype(compute_dtype)                                  # (C, 3C) bf16
    b_qkv = b_qkv.reshape(1, 3 * C).astype(jnp.float32)
    w_proj = params["w_proj"].astype(compute_dtype)                      # (C, C) bf16
    b_proj = params["b_proj"].reshape(1, C).astype(jnp.float32)
    x_in = x.astype(compute_dtype)

    inputs = [x_in, w_qkv, b_qkv, w_proj, b_proj, bias]
    in_specs = [
        pl.BlockSpec((TB, N, C), lambda b: (b, 0, 0)),                   # x (batched windows)
        pl.BlockSpec((C, 3 * C), lambda b: (0, 0)),                      # w_qkv (resident)
        pl.BlockSpec((1, 3 * C), lambda b: (0, 0)),                      # b_qkv
        pl.BlockSpec((C, C), lambda b: (0, 0)),                          # w_proj
        pl.BlockSpec((1, C), lambda b: (0, 0)),                          # b_proj
        pl.BlockSpec((num_heads, N, N), lambda b: (0, 0, 0)),            # rel-pos bias
    ]
    if has_mask:
        # Windows inside every TB block cycle through the nW mask slots, since
        # TB % nW == 0 and blocks start at multiples of nW.
        mask_block = jnp.tile(mask.astype(jnp.float32), (TB // nW, 1, 1))  # (TB, N, N)
        inputs.append(mask_block)
        in_specs.append(pl.BlockSpec((TB, N, N), lambda b: (0, 0, 0)))

    kernel = functools.partial(_window_attn_kernel,
                               num_heads=num_heads, has_mask=has_mask)

    # advisory cost estimate for XLA scheduling around the custom call
    flops = 2 * B_ * N * C * (3 * C + 2 * N + C)
    cost = pl.CostEstimate(
        flops=int(flops),
        transcendentals=int(B_ * num_heads * N * N),
        bytes_accessed=int(B_ * N * C * 2 + B_ * N * C * 4 + 4 * C * C * 2),
    )

    compiler_kwargs = dict(dimension_semantics=("parallel",))
    if vmem_limit_bytes is not None:
        compiler_kwargs["vmem_limit_bytes"] = vmem_limit_bytes

    return pl.pallas_call(
        kernel,
        out_shape=jax.ShapeDtypeStruct((B_, N, C), x.dtype),
        grid_spec=pl.GridSpec(
            grid=(B_ // TB,),
            in_specs=in_specs,
            out_specs=pl.BlockSpec((TB, N, C), lambda b: (b, 0, 0)),
        ),
        compiler_params=pltpu.CompilerParams(**compiler_kwargs),
        cost_estimate=cost,
    )(*inputs)


def reference_window_attention(x, params, window_size, num_heads, mask=None,
                               qk_scale=None):
    """Pure-JAX (f32) reference mirroring the PyTorch forward."""
    B_, N, C = x.shape
    head_dim = C // num_heads
    scale = qk_scale if qk_scale is not None else head_dim ** (-0.5)

    qkv = x @ params["w_qkv"] + params["b_qkv"]                          # (B_, N, 3C)
    qkv = qkv.reshape(B_, N, 3, num_heads, head_dim).transpose(2, 0, 3, 1, 4)
    q, k, v = qkv[0], qkv[1], qkv[2]                                     # (B_, H, N, Dh)
    q = q * scale
    attn = jnp.einsum("bhnd,bhmd->bhnm", q, k)

    rpi = make_relative_position_index(window_size).reshape(-1)
    bias = params["rel_pos_bias_table"][rpi].reshape(N, N, num_heads)
    bias = bias.transpose(2, 0, 1)
    attn = attn + bias[None]

    if mask is not None:
        nW = mask.shape[0]
        attn = attn.reshape(B_ // nW, nW, num_heads, N, N) + mask[None, :, None]
        attn = attn.reshape(-1, num_heads, N, N)
    attn = jax.nn.softmax(attn, axis=-1)

    out = jnp.einsum("bhnm,bhmd->bhnd", attn, v)
    out = out.transpose(0, 2, 1, 3).reshape(B_, N, C)
    return out @ params["w_proj"] + params["b_proj"]


def init_params(key, dim, window_size, num_heads):
    wh, ww = window_size
    k1, k2, k3, k4, k5 = jax.random.split(key, 5)
    table_size = (2 * wh - 1) * (2 * ww - 1)
    return {
        # trunc_normal(std=0.02) approximated deterministically with normal*0.02
        "rel_pos_bias_table": 0.02 * jax.random.normal(
            k1, (table_size, num_heads), jnp.float32),
        # stored as (in, out) so kernel does x @ W  (== x @ W_pt.T in PyTorch)
        "w_qkv": 0.05 * jax.random.normal(k2, (dim, 3 * dim), jnp.float32),
        "b_qkv": 0.01 * jax.random.normal(k3, (3 * dim,), jnp.float32),
        "w_proj": 0.05 * jax.random.normal(k4, (dim, dim), jnp.float32),
        "b_proj": 0.01 * jax.random.normal(k5, (dim,), jnp.float32),
    }
    # NOTE: attn_drop / proj_drop are identity in eval mode -> omitted.


if __name__ == "__main__":
    dim = 32
    window_size = (4, 4)
    num_heads = 4
    N = window_size[0] * window_size[1]          # 16
    nW = 4
    batch = 8
    B_ = batch * nW                              # 32 windows total

    key = jax.random.PRNGKey(0)
    kx, kp, km = jax.random.split(key, 3)
    x = jax.random.normal(kx, (B_, N, dim), jnp.float32)
    params = init_params(kp, dim, window_size, num_heads)

    # shifted-window style additive mask: 0 / -100 pattern
    mask_bits = jax.random.bernoulli(km, 0.2, (nW, N, N))
    mask = jnp.where(mask_bits, -100.0, 0.0).astype(jnp.float32)

    # no-mask path (bf16 matmuls + approx reciprocal -> looser tolerance)
    out = jax.block_until_ready(
        window_attention(x, params, window_size, num_heads, mask=None))
    ref = reference_window_attention(x, params, window_size, num_heads, mask=None)
    assert jnp.allclose(out, ref, atol=2e-2, rtol=2e-2), "mismatch (mask=None)"

    # masked path
    out_m = jax.block_until_ready(
        window_attention(x, params, window_size, num_heads, mask=mask))
    ref_m = reference_window_attention(x, params, window_size, num_heads, mask=mask)
    assert jnp.allclose(out_m, ref_m, atol=2e-2, rtol=2e-2), "mismatch (mask)"

    print("KERNEL_OK")
</pallas_src>

<mosaic_0001>
module attributes {stable_mosaic.version = 11 : i64} {
  func.func @_window_attn_kernel(%arg0: i32, %arg1: memref<16x16x32xbf16, #tpu.memory_space<vmem>>, %arg2: memref<32x96xbf16, #tpu.memory_space<vmem>>, %arg3: memref<1x96xf32, #tpu.memory_space<vmem>>, %arg4: memref<32x32xbf16, #tpu.memory_space<vmem>>, %arg5: memref<1x32xf32, #tpu.memory_space<vmem>>, %arg6: memref<4x16x16xf32, #tpu.memory_space<vmem>>, %arg7: memref<16x16x32xf32, #tpu.memory_space<vmem>>) attributes {dimension_semantics = [#tpu.dimension_semantics<parallel>], iteration_bounds = array<i64: 2>, scalar_prefetch = 0 : i64, scratch_operands = 0 : i64, tpu.core_type = #tpu.core_type<tc>, window_params = [{transform_indices = @transform_0, window_bounds = array<i64: 16, 16, 32>}, {pipeline_mode = #tpu.pipeline_mode<synchronous>, transform_indices = @transform_1, window_bounds = array<i64: 32, 96>}, {pipeline_mode = #tpu.pipeline_mode<synchronous>, transform_indices = @transform_2, window_bounds = array<i64: 1, 96>}, {pipeline_mode = #tpu.pipeline_mode<synchronous>, transform_indices = @transform_3, window_bounds = array<i64: 32, 32>}, {pipeline_mode = #tpu.pipeline_mode<synchronous>, transform_indices = @transform_4, window_bounds = array<i64: 1, 32>}, {pipeline_mode = #tpu.pipeline_mode<synchronous>, transform_indices = @transform_5, window_bounds = array<i64: 4, 16, 16>}, {transform_indices = @transform_6, window_bounds = array<i64: 16, 16, 32>}]} {
    %c0 = arith.constant 0 : index
    %c0_0 = arith.constant 0 : index
    %c0_1 = arith.constant 0 : index
    %0 = vector.load %arg1[%c0, %c0_0, %c0_1] : memref<16x16x32xbf16, #tpu.memory_space<vmem>>, vector<16x16x32xbf16>
    %1 = vector.shape_cast %0 : vector<16x16x32xbf16> to vector<256x32xbf16>
    %c0_2 = arith.constant 0 : index
    %c0_3 = arith.constant 0 : index
    %2 = vector.load %arg2[%c0_2, %c0_3] : memref<32x96xbf16, #tpu.memory_space<vmem>>, vector<32x96xbf16>
    %cst = arith.constant dense<0.000000e+00> : vector<256x96xf32>
    %3 = tpu.matmul %1, %2, %cst {dimension_numbers = #tpu.dot_dimension_numbers<[1], [0], [0], [1], [0, 0, 1, 1], [], []>} : vector<256x32xbf16>, vector<32x96xbf16>, vector<256x96xf32> -> vector<256x96xf32>
    %c0_4 = arith.constant 0 : index
    %c0_5 = arith.constant 0 : index
    %4 = vector.load %arg3[%c0_4, %c0_5] : memref<1x96xf32, #tpu.memory_space<vmem>>, vector<1x96xf32>
    %5 = vector.broadcast %4 : vector<1x96xf32> to vector<256x96xf32>
    %6 = arith.addf %3, %5 : vector<256x96xf32>
    %7 = arith.truncf %6 : vector<256x96xf32> to vector<256x96xbf16>
    %c0_6 = arith.constant 0 : index
    %c0_7 = arith.constant 0 : index
    %c0_8 = arith.constant 0 : index
    %8 = vector.load %arg6[%c0_6, %c0_7, %c0_8] : memref<4x16x16xf32, #tpu.memory_space<vmem>>, vector<4x16x16xf32>
    %9 = vector.extract_strided_slice %7 {offsets = [0, 0], sizes = [256, 8], strides = [1, 1]} : vector<256x96xbf16> to vector<256x8xbf16>
    %10 = vector.shape_cast %9 : vector<256x8xbf16> to vector<16x16x8xbf16>
    %11 = vector.extract_strided_slice %7 {offsets = [0, 32], sizes = [256, 8], strides = [1, 1]} : vector<256x96xbf16> to vector<256x8xbf16>
    %12 = vector.shape_cast %11 : vector<256x8xbf16> to vector<16x16x8xbf16>
    %13 = vector.extract_strided_slice %7 {offsets = [0, 64], sizes = [256, 8], strides = [1, 1]} : vector<256x96xbf16> to vector<256x8xbf16>
    %14 = vector.shape_cast %13 : vector<256x8xbf16> to vector<16x16x8xbf16>
    "tpu.trace_start"() <{level = 10 : i32, message = "bnd,bmd->bnm"}> : () -> ()
    %cst_9 = arith.constant dense<0.000000e+00> : vector<16x16x16xf32>
    %15 = tpu.matmul %10, %12, %cst_9 {dimension_numbers = #tpu.dot_dimension_numbers<[2], [2], [1], [1], [0, 0, 0, 1, 1, 1], [0], [0]>} : vector<16x16x8xbf16>, vector<16x16x8xbf16>, vector<16x16x16xf32> -> vector<16x16x16xf32>
    "tpu.trace_stop"() : () -> ()
    %16 = vector.extract_strided_slice %8 {offsets = [0, 0, 0], sizes = [1, 16, 16], strides = [1, 1, 1]} : vector<4x16x16xf32> to vector<1x16x16xf32>
    %17 = vector.shape_cast %16 : vector<1x16x16xf32> to vector<16x16xf32>
    %18 = vector.shape_cast %17 : vector<16x16xf32> to vector<1x16x16xf32>
    %19 = vector.broadcast %18 : vector<1x16x16xf32> to vector<16x16x16xf32>
    %20 = arith.addf %15, %19 : vector<16x16x16xf32>
    %cst_10 = arith.constant dense<0xFF800000> : vector<16x16xf32>
    %21 = vector.multi_reduction <maximumf>, %20, %cst_10 [2] : vector<16x16x16xf32> to vector<16x16xf32>
    %22 = vector.shape_cast %21 : vector<16x16xf32> to vector<16x16x1xf32>
    %23 = vector.broadcast %22 : vector<16x16x1xf32> to vector<16x16x16xf32>
    %24 = arith.subf %20, %23 : vector<16x16x16xf32>
    %25 = math.exp %24 : vector<16x16x16xf32>
    %cst_11 = arith.constant dense<0.000000e+00> : vector<16x16xf32>
    %26 = vector.multi_reduction <add>, %25, %cst_11 [2] : vector<16x16x16xf32> to vector<16x16xf32>
    %27 = vector.shape_cast %26 : vector<16x16xf32> to vector<16x16x1xf32>
    %28 = tpu.reciprocal %27 {approx = true} : vector<16x16x1xf32> -> vector<16x16x1xf32>
    %29 = vector.broadcast %28 : vector<16x16x1xf32> to vector<16x16x16xf32>
    %30 = arith.mulf %25, %29 : vector<16x16x16xf32>
    %31 = arith.truncf %30 : vector<16x16x16xf32> to vector<16x16x16xbf16>
    "tpu.trace_start"() <{level = 10 : i32, message = "bnm,bmd->bnd"}> : () -> ()
    %cst_12 = arith.constant dense<0.000000e+00> : vector<16x16x8xf32>
    %32 = tpu.matmul %31, %14, %cst_12 {dimension_numbers = #tpu.dot_dimension_numbers<[2], [1], [1], [2], [0, 0, 0, 1, 1, 2], [0], [0]>} : vector<16x16x16xbf16>, vector<16x16x8xbf16>, vector<16x16x8xf32> -> vector<16x16x8xf32>
    "tpu.trace_stop"() : () -> ()
    %33 = vector.extract_strided_slice %7 {offsets = [0, 8], sizes = [256, 8], strides = [1, 1]} : vector<256x96xbf16> to vector<256x8xbf16>
    %34 = vector.shape_cast %33 : vector<256x8xbf16> to vector<16x16x8xbf16>
    %35 = vector.extract_strided_slice %7 {offsets = [0, 40], sizes = [256, 8], strides = [1, 1]} : vector<256x96xbf16> to vector<256x8xbf16>
    %36 = vector.shape_cast %35 : vector<256x8xbf16> to vector<16x16x8xbf16>
    %37 = vector.extract_strided_slice %7 {offsets = [0, 72], sizes = [256, 8], strides = [1, 1]} : vector<256x96xbf16> to vector<256x8xbf16>
    %38 = vector.shape_cast %37 : vector<256x8xbf16> to vector<16x16x8xbf16>
    "tpu.trace_start"() <{level = 10 : i32, message = "bnd,bmd->bnm"}> : () -> ()
    %cst_13 = arith.constant dense<0.000000e+00> : vector<16x16x16xf32>
    %39 = tpu.matmul %34, %36, %cst_13 {dimension_numbers = #tpu.dot_dimension_numbers<[2], [2], [1], [1], [0, 0, 0, 1, 1, 1], [0], [0]>} : vector<16x16x8xbf16>, vector<16x16x8xbf16>, vector<16x16x16xf32> -> vector<16x16x16xf32>
    "tpu.trace_stop"() : () -> ()
    %40 = vector.extract_strided_slice %8 {offsets = [1, 0, 0], sizes = [1, 16, 16], strides = [1, 1, 1]} : vector<4x16x16xf32> to vector<1x16x16xf32>
    %41 = vector.shape_cast %40 : vector<1x16x16xf32> to vector<16x16xf32>
    %42 = vector.shape_cast %41 : vector<16x16xf32> to vector<1x16x16xf32>
    %43 = vector.broadcast %42 : vector<1x16x16xf32> to vector<16x16x16xf32>
    %44 = arith.addf %39, %43 : vector<16x16x16xf32>
    %cst_14 = arith.constant dense<0xFF800000> : vector<16x16xf32>
    %45 = vector.multi_reduction <maximumf>, %44, %cst_14 [2] : vector<16x16x16xf32> to vector<16x16xf32>
    %46 = vector.shape_cast %45 : vector<16x16xf32> to vector<16x16x1xf32>
    %47 = vector.broadcast %46 : vector<16x16x1xf32> to vector<16x16x16xf32>
    %48 = arith.subf %44, %47 : vector<16x16x16xf32>
    %49 = math.exp %48 : vector<16x16x16xf32>
    %cst_15 = arith.constant dense<0.000000e+00> : vector<16x16xf32>
    %50 = vector.multi_reduction <add>, %49, %cst_15 [2] : vector<16x16x16xf32> to vector<16x16xf32>
    %51 = vector.shape_cast %50 : vector<16x16xf32> to vector<16x16x1xf32>
    %52 = tpu.reciprocal %51 {approx = true} : vector<16x16x1xf32> -> vector<16x16x1xf32>
    %53 = vector.broadcast %52 : vector<16x16x1xf32> to vector<16x16x16xf32>
    %54 = arith.mulf %49, %53 : vector<16x16x16xf32>
    %55 = arith.truncf %54 : vector<16x16x16xf32> to vector<16x16x16xbf16>
    "tpu.trace_start"() <{level = 10 : i32, message = "bnm,bmd->bnd"}> : () -> ()
    %cst_16 = arith.constant dense<0.000000e+00> : vector<16x16x8xf32>
    %56 = tpu.matmul %55, %38, %cst_16 {dimension_numbers = #tpu.dot_dimension_numbers<[2], [1], [1], [2], [0, 0, 0, 1, 1, 2], [0], [0]>} : vector<16x16x16xbf16>, vector<16x16x8xbf16>, vector<16x16x8xf32> -> vector<16x16x8xf32>
    "tpu.trace_stop"() : () -> ()
    %57 = vector.extract_strided_slice %7 {offsets = [0, 16], sizes = [256, 8], strides = [1, 1]} : vector<256x96xbf16> to vector<256x8xbf16>
    %58 = vector.shape_cast %57 : vector<256x8xbf16> to vector<16x16x8xbf16>
    %59 = vector.extract_strided_slice %7 {offsets = [0, 48], sizes = [256, 8], strides = [1, 1]} : vector<256x96xbf16> to vector<256x8xbf16>
    %60 = vector.shape_cast %59 : vector<256x8xbf16> to vector<16x16x8xbf16>
    %61 = vector.extract_strided_slice %7 {offsets = [0, 80], sizes = [256, 8], strides = [1, 1]} : vector<256x96xbf16> to vector<256x8xbf16>
    %62 = vector.shape_cast %61 : vector<256x8xbf16> to vector<16x16x8xbf16>
    "tpu.trace_start"() <{level = 10 : i32, message = "bnd,bmd->bnm"}> : () -> ()
    %cst_17 = arith.constant dense<0.000000e+00> : vector<16x16x16xf32>
    %63 = tpu.matmul %58, %60, %cst_17 {dimension_numbers = #tpu.dot_dimension_numbers<[2], [2], [1], [1], [0, 0, 0, 1, 1, 1], [0], [0]>} : vector<16x16x8xbf16>, vector<16x16x8xbf16>, vector<16x16x16xf32> -> vector<16x16x16xf32>
    "tpu.trace_stop"() : () -> ()
    %64 = vector.extract_strided_slice %8 {offsets = [2, 0, 0], sizes = [1, 16, 16], strides = [1, 1, 1]} : vector<4x16x16xf32> to vector<1x16x16xf32>
    %65 = vector.shape_cast %64 : vector<1x16x16xf32> to vector<16x16xf32>
    %66 = vector.shape_cast %65 : vector<16x16xf32> to vector<1x16x16xf32>
    %67 = vector.broadcast %66 : vector<1x16x16xf32> to vector<16x16x16xf32>
    %68 = arith.addf %63, %67 : vector<16x16x16xf32>
    %cst_18 = arith.constant dense<0xFF800000> : vector<16x16xf32>
    %69 = vector.multi_reduction <maximumf>, %68, %cst_18 [2] : vector<16x16x16xf32> to vector<16x16xf32>
    %70 = vector.shape_cast %69 : vector<16x16xf32> to vector<16x16x1xf32>
    %71 = vector.broadcast %70 : vector<16x16x1xf32> to vector<16x16x16xf32>
    %72 = arith.subf %68, %71 : vector<16x16x16xf32>
    %73 = math.exp %72 : vector<16x16x16xf32>
    %cst_19 = arith.constant dense<0.000000e+00> : vector<16x16xf32>
    %74 = vector.multi_reduction <add>, %73, %cst_19 [2] : vector<16x16x16xf32> to vector<16x16xf32>
    %75 = vector.shape_cast %74 : vector<16x16xf32> to vector<16x16x1xf32>
    %76 = tpu.reciprocal %75 {approx = true} : vector<16x16x1xf32> -> vector<16x16x1xf32>
    %77 = vector.broadcast %76 : vector<16x16x1xf32> to vector<16x16x16xf32>
    %78 = arith.mulf %73, %77 : vector<16x16x16xf32>
    %79 = arith.truncf %78 : vector<16x16x16xf32> to vector<16x16x16xbf16>
    "tpu.trace_start"() <{level = 10 : i32, message = "bnm,bmd->bnd"}> : () -> ()
    %cst_20 = arith.constant dense<0.000000e+00> : vector<16x16x8xf32>
    %80 = tpu.matmul %79, %62, %cst_20 {dimension_numbers = #tpu.dot_dimension_numbers<[2], [1], [1], [2], [0, 0, 0, 1, 1, 2], [0], [0]>} : vector<16x16x16xbf16>, vector<16x16x8xbf16>, vector<16x16x8xf32> -> vector<16x16x8xf32>
    "tpu.trace_stop"() : () -> ()
    %81 = vector.extract_strided_slice %7 {offsets = [0, 24], sizes = [256, 8], strides = [1, 1]} : vector<256x96xbf16> to vector<256x8xbf16>
    %82 = vector.shape_cast %81 : vector<256x8xbf16> to vector<16x16x8xbf16>
    %83 = vector.extract_strided_slice %7 {offsets = [0, 56], sizes = [256, 8], strides = [1, 1]} : vector<256x96xbf16> to vector<256x8xbf16>
    %84 = vector.shape_cast %83 : vector<256x8xbf16> to vector<16x16x8xbf16>
    %85 = vector.extract_strided_slice %7 {offsets = [0, 88], sizes = [256, 8], strides = [1, 1]} : vector<256x96xbf16> to vector<256x8xbf16>
    %86 = vector.shape_cast %85 : vector<256x8xbf16> to vector<16x16x8xbf16>
    "tpu.trace_start"() <{level = 10 : i32, message = "bnd,bmd->bnm"}> : () -> ()
    %cst_21 = arith.constant dense<0.000000e+00> : vector<16x16x16xf32>
    %87 = tpu.matmul %82, %84, %cst_21 {dimension_numbers = #tpu.dot_dimension_numbers<[2], [2], [1], [1], [0, 0, 0, 1, 1, 1], [0], [0]>} : vector<16x16x8xbf16>, vector<16x16x8xbf16>, vector<16x16x16xf32> -> vector<16x16x16xf32>
    "tpu.trace_stop"() : () -> ()
    %88 = vector.extract_strided_slice %8 {offsets = [3, 0, 0], sizes = [1, 16, 16], strides = [1, 1, 1]} : vector<4x16x16xf32> to vector<1x16x16xf32>
    %89 = vector.shape_cast %88 : vector<1x16x16xf32> to vector<16x16xf32>
    %90 = vector.shape_cast %89 : vector<16x16xf32> to vector<1x16x16xf32>
    %91 = vector.broadcast %90 : vector<1x16x16xf32> to vector<16x16x16xf32>
    %92 = arith.addf %87, %91 : vector<16x16x16xf32>
    %cst_22 = arith.constant dense<0xFF800000> : vector<16x16xf32>
    %93 = vector.multi_reduction <maximumf>, %92, %cst_22 [2] : vector<16x16x16xf32> to vector<16x16xf32>
    %94 = vector.shape_cast %93 : vector<16x16xf32> to vector<16x16x1xf32>
    %95 = vector.broadcast %94 : vector<16x16x1xf32> to vector<16x16x16xf32>
    %96 = arith.subf %92, %95 : vector<16x16x16xf32>
    %97 = math.exp %96 : vector<16x16x16xf32>
    %cst_23 = arith.constant dense<0.000000e+00> : vector<16x16xf32>
    %98 = vector.multi_reduction <add>, %97, %cst_23 [2] : vector<16x16x16xf32> to vector<16x16xf32>
    %99 = vector.shape_cast %98 : vector<16x16xf32> to vector<16x16x1xf32>
    %100 = tpu.reciprocal %99 {approx = true} : vector<16x16x1xf32> -> vector<16x16x1xf32>
    %101 = vector.broadcast %100 : vector<16x16x1xf32> to vector<16x16x16xf32>
    %102 = arith.mulf %97, %101 : vector<16x16x16xf32>
    %103 = arith.truncf %102 : vector<16x16x16xf32> to vector<16x16x16xbf16>
    "tpu.trace_start"() <{level = 10 : i32, message = "bnm,bmd->bnd"}> : () -> ()
    %cst_24 = arith.constant dense<0.000000e+00> : vector<16x16x8xf32>
    %104 = tpu.matmul %103, %86, %cst_24 {dimension_numbers = #tpu.dot_dimension_numbers<[2], [1], [1], [2], [0, 0, 0, 1, 1, 2], [0], [0]>} : vector<16x16x16xbf16>, vector<16x16x8xbf16>, vector<16x16x8xf32> -> vector<16x16x8xf32>
    "tpu.trace_stop"() : () -> ()
    %105 = tpu.concatenate %32, %56, %80, %104 in 2 : vector<16x16x8xf32>, vector<16x16x8xf32>, vector<16x16x8xf32>, vector<16x16x8xf32> -> vector<16x16x32xf32>
    %106 = vector.shape_cast %105 : vector<16x16x32xf32> to vector<256x32xf32>
    %107 = arith.truncf %106 : vector<256x32xf32> to vector<256x32xbf16>
    %c0_25 = arith.constant 0 : index
    %c0_26 = arith.constant 0 : index
    %108 = vector.load %arg4[%c0_25, %c0_26] : memref<32x32xbf16, #tpu.memory_space<vmem>>, vector<32x32xbf16>
    %cst_27 = arith.constant dense<0.000000e+00> : vector<256x32xf32>
    %109 = tpu.matmul %107, %108, %cst_27 {dimension_numbers = #tpu.dot_dimension_numbers<[1], [0], [0], [1], [0, 0, 1, 1], [], []>} : vector<256x32xbf16>, vector<32x32xbf16>, vector<256x32xf32> -> vector<256x32xf32>
    %c0_28 = arith.constant 0 : index
    %c0_29 = arith.constant 0 : index
    %110 = vector.load %arg5[%c0_28, %c0_29] : memref<1x32xf32, #tpu.memory_space<vmem>>, vector<1x32xf32>
    %111 = vector.broadcast %110 : vector<1x32xf32> to vector<256x32xf32>
    %112 = arith.addf %109, %111 : vector<256x32xf32>
    %113 = vector.shape_cast %112 : vector<256x32xf32> to vector<16x16x32xf32>
    %c0_30 = arith.constant 0 : index
    %c0_31 = arith.constant 0 : index
    %c0_32 = arith.constant 0 : index
    %114 = vector.load %arg7[%c0_30, %c0_31, %c0_32] : memref<16x16x32xf32, #tpu.memory_space<vmem>>, vector<16x16x32xf32>
    tpu.vector_store %arg7[%c0_30, %c0_31, %c0_32], %113 {strides = array<i32>} : memref<16x16x32xf32, #tpu.memory_space<vmem>>, vector<16x16x32xf32>,
    return
  }
  func.func @transform_0(%arg0: i32) -> (i32, i32, i32) {
    %c0_i32 = arith.constant 0 : i32
    %c0_i32_0 = arith.constant 0 : i32
    %c0_i32_1 = arith.constant 0 : i32
    return %arg0, %c0_i32, %c0_i32_0 : i32, i32, i32
  }
  func.func @transform_1(%arg0: i32) -> (i32, i32) {
    %c0_i32 = arith.constant 0 : i32
    %c0_i32_0 = arith.constant 0 : i32
    %c0_i32_1 = arith.constant 0 : i32
    return %c0_i32, %c0_i32_0 : i32, i32
  }
  func.func @transform_2(%arg0: i32) -> (i32, i32) {
    %c0_i32 = arith.constant 0 : i32
    %c0_i32_0 = arith.constant 0 : i32
    %c0_i32_1 = arith.constant 0 : i32
    return %c0_i32, %c0_i32_0 : i32, i32
  }
  func.func @transform_3(%arg0: i32) -> (i32, i32) {
    %c0_i32 = arith.constant 0 : i32
    %c0_i32_0 = arith.constant 0 : i32
    %c0_i32_1 = arith.constant 0 : i32
    return %c0_i32, %c0_i32_0 : i32, i32
  }
  func.func @transform_4(%arg0: i32) -> (i32, i32) {
    %c0_i32 = arith.constant 0 : i32
    %c0_i32_0 = arith.constant 0 : i32
    %c0_i32_1 = arith.constant 0 : i32
    return %c0_i32, %c0_i32_0 : i32, i32
  }
  func.func @transform_5(%arg0: i32) -> (i32, i32, i32) {
    %c0_i32 = arith.constant 0 : i32
    %c0_i32_0 = arith.constant 0 : i32
    %c0_i32_1 = arith.constant 0 : i32
    %c0_i32_2 = arith.constant 0 : i32
    return %c0_i32, %c0_i32_0, %c0_i32_1 : i32, i32, i32
  }
  func.func @transform_6(%arg0: i32) -> (i32, i32, i32) {
    %c0_i32 = arith.constant 0 : i32
    %c0_i32_0 = arith.constant 0 : i32
    %c0_i32_1 = arith.constant 0 : i32
    return %arg0, %c0_i32, %c0_i32_0 : i32, i32, i32
  }
}

</mosaic_0001>

<bundles_post_ra>
// kernel: tpu_custom_call.1
= control target key start
LH: loop header
LB: loop body
LE: loop exit
PB: predicated region body
PF: predicated region fallthrough
CT: control target
= control target key end

     0   :  { %11 = vsyncpa [#allocation3], 0  ;;  %s15383_s0 = inlined_call_operand.hbm [shape: bf16[32,16,32], index: 0, kind: input, shape index: {}]   ;;  %s15384_s1 = inlined_call_operand.hbm [shape: bf16[32,96], index: 1, kind: input, shape index: {}]   ;;  %s15385_s2 = inlined_call_operand.vmem [shape: f32[1,96], index: 2, kind: input, shape index: {}]   ;;  %s15386_s3 = inlined_call_operand.hbm [shape: bf16[32,32], index: 3, kind: input, shape index: {}]   ;;  %s15387_s4 = inlined_call_operand.vmem [shape: f32[1,32], index: 4, kind: input, shape index: {}]   ;;  %s15388_s5 = inlined_call_operand.hbm [shape: f32[4,16,16], index: 5, kind: input, shape index: {}]   ;;  %s15389_s6 = inlined_call_operand.hbm [shape: f32[32,16,32], index: 6, kind: output, shape index: {}]  }
   0x1   :  { %13 = vsyncpa [#allocation3 + $0x1], 0 }
   0x2   :  { %14 = vsyncpa [#allocation6], 0 }
   0x3   :  { %15 = vsyncpa [#allocation9], 0 }
   0x4   :  { %16 = vsyncpa [#allocation4], 0 }
   0x5   :  { %18 = vsyncpa [#allocation4 + $0x1], 0  ;;  %s11760_s21 = smov 0   ;;  %s11762_s22 = smov 0  }
   0x6   :  { %s11764_s23 = smov 0   ;;  %s11766_s24 = smov 0  }
   0x7 LB: > { %s11781_s25 = sadd.s32 4294967295, %s11697_s24   ;;  %s9295_s26 = sadd.s32 4294967294, %s11697_s24   ;;  %s11697_s24 = sphi %s11766_s24, %s15741_s24   ;;  %s11693_s23 = sphi %s11764_s23, %s15740_s23   ;;  %s11689_s22 = sphi %s11762_s22, %s15739_s22   ;;  %s11685_s21 = sphi %s11760_s21, %s15738_s21  }
   0x8   : > { %p44_p0 = scmp.ne.s32.totalorder %s11689_s22, %s11685_s21  ;;  %p15390_p1 = scmp.eq.s32.totalorder %s11781_s25, 0 }
   0x9   : > { %p179_p3 = scmp.eq.s32.totalorder %s9295_s26, 1  ;;  %p9296_p5 = scmp.ge.s32.totalorder %s11697_s24, 1 }
   0xa   : > { %p11790_p4 = por %p15390_p1, %p44_p0  ;;  %p186_p7 = scmp.lt.s32.totalorder %s11697_s24, 3 }
   0xb   : > { %p11795_p6 = por %p179_p3, %p44_p0  ;;  %s11699_s30 = smov [#allocation5]  }
   0xc   : > { %s15444_s27 = scalar_select %p11790_p4, 1, 0 }
   0xd   : > { %s15445_s28 = scalar_select %p11795_p6, 1, 0 }
   0xe   : > { %p11800_p8 = pnand %p9296_p5, %p186_p7  ;;  %s198_s7 = sshll.u32 %s11699_s30, 4  ;;  %s11804_s7 = int_to_ptr.vmem [resolvable:$true] %s198_s7 }
   0xf   : > { %s11700_s9 = smov [#allocation7]   ;;  %s11701_s11 = smov [#allocation8]  }
  0x10   : > { %s15446_s29 = scalar_select %p11800_p8, 1, 0 }
  0x11   : > { %p10655_p9 = pneg %p11800_p8  ;;  %s214_s10 = sshll.u32 %s11700_s9, 4  ;;  %s11815_s10 = int_to_ptr.vmem [resolvable:$true] %s214_s10 }
  0x12   : > { %s11817_s12 = sshll.u32 %s11701_s11, 4  ;;  %s11509_s15 = scalar_lea.hbm %s15384_s1, 256  ;;  %s231_s12 = int_to_ptr.vmem [resolvable:$true] %s11817_s12 }
  0x13   : > { %p11811_p11 = pnand %p10655_p9, %p15390_p1  ;;  %p11510_p12 = scmp.ne.s32.totalorder %s15384_s1, %s11509_s15 }
  0x14   : > { %p11516_p5 = scmp.lt.u32.totalorder %s11509_s15, %s15384_s1 }
  0x15   : > { %p11827_p13 = pneg %p11811_p11 }
  0x17   : > { %p11512_p0 = pnand %p11827_p13, %p11510_p12 }
  0x19   : > { %p11513_p3 = pneg %p11512_p0 }
  0x1b   : > { %p11518_p7 = pnand %p11516_p5, %p11513_p3 }
  0x1d   : > { %11521 = shalt.err (!%p11518_p7)
}
  0x1e   : > { %s11522_s26 = scalar_lea.vmem %s11804_s7, 256  ;;  %p11530_p2 = scmp.lt.s32.totalorder %s11804_s7, %s11804_s7 }
  0x1f   : > { %p11523_p9 = scmp.ne.s32.totalorder %s11804_s7, %s11522_s26  ;;  %p11531_p6 = scmp.lt.s32.totalorder %s11522_s26, %s11522_s26 }
  0x21   : > { %p11525_p10 = pnand %p11523_p9, %p11827_p13  ;;  %p11532_p12 = por %p11531_p6, %p11530_p2 }
  0x23   : > { %p11526_p1 = pneg %p11525_p10 }
  0x25   : > { %p11533_p0 = pnand %p11532_p12, %p11526_p1 }
  0x27   : > { %11536 = shalt.err (!%p11533_p0)
}
  0x28   : > { %s11702_s30 = smov 64   ;;  %s11703_s9 = smov 4  }
  0x29   : > { %10658 = dma.hbm_to_vmem [thread:$0]  (!%p11811_p11), %s15384_s1, 256, %s11804_s7, [#allocation6], %s11702_s30, %s11702_s30, %s11703_s9  }
  0x2a   : > { %s11537_s16 = scalar_lea.hbm %s15386_s3, 256 }
  0x2b   : > { %p11538_p1 = scmp.ne.s32.totalorder %s15386_s3, %s11537_s16  ;;  %p11544_p10 = scmp.lt.u32.totalorder %s11537_s16, %s15386_s3 }
  0x2d   : > { %p11540_p2 = pnand %p11538_p1, %p11827_p13 }
  0x2f   : > { %p11541_p6 = pneg %p11540_p2 }
  0x31   : > { %p11546_p3 = pnand %p11544_p10, %p11541_p6 }
  0x33   : > { %11549 = shalt.err (!%p11546_p3)
}
  0x34   : > { %s11550_s7 = scalar_lea.vmem %s11815_s10, 256  ;;  %p11558_p12 = scmp.lt.s32.totalorder %s11815_s10, %s11815_s10 }
  0x35   : > { %p11551_p5 = scmp.ne.s32.totalorder %s11815_s10, %s11550_s7  ;;  %p11559_p0 = scmp.lt.s32.totalorder %s11550_s7, %s11550_s7 }
  0x37   : > { %p11553_p7 = pnand %p11551_p5, %p11827_p13  ;;  %p11560_p1 = por %p11559_p0, %p11558_p12 }
  0x39   : > { %p11554_p9 = pneg %p11553_p7 }
  0x3b   : > { %p11561_p2 = pnand %p11560_p1, %p11554_p9 }
  0x3d   : > { %11564 = shalt.err (!%p11561_p2)
}
  0x3e   : > { %10661 = dma.hbm_to_vmem [thread:$0]  (!%p11811_p11), %s15386_s3, 256, %s11815_s10, [#allocation6], %s11702_s30, %s11702_s30, %s11703_s9  }
  0x3f   : > { %s11565_s16 = scalar_lea.hbm %s15388_s5, 1024 }
  0x40   : > { %p11566_p6 = scmp.ne.s32.totalorder %s15388_s5, %s11565_s16  ;;  %p11572_p5 = scmp.lt.u32.totalorder %s11565_s16, %s15388_s5 }
  0x42   : > { %p11568_p10 = pnand %p11566_p6, %p11827_p13 }
  0x44   : > { %p11569_p3 = pneg %p11568_p10 }
  0x46   : > { %p11574_p7 = pnand %p11572_p5, %p11569_p3 }
  0x48   : > { %11577 = shalt.err (!%p11574_p7)
}
  0x49   : > { %s11578_s7 = scalar_lea.vmem %s231_s12, 1024  ;;  %p11586_p1 = scmp.lt.s32.totalorder %s231_s12, %s231_s12 }
  0x4a   : > { %p11579_p9 = scmp.ne.s32.totalorder %s231_s12, %s11578_s7  ;;  %p11587_p2 = scmp.lt.s32.totalorder %s11578_s7, %s11578_s7 }
  0x4c   : > { %p11581_p12 = pnand %p11579_p9, %p11827_p13  ;;  %p11588_p4 = por %p11587_p2, %p11586_p1 }
  0x4e   : > { %p11582_p0 = pneg %p11581_p12 }
  0x50   : > { %p11589_p8 = pnand %p11588_p4, %p11582_p0 }
  0x52   : > { %11592 = shalt.err (!%p11589_p8)
}
  0x53   : > { %s11704_s10 = smov 128   ;;  %s11705_s18 = smov 8  }
  0x54   : > { %10664 = dma.hbm_to_vmem [thread:$0]  (!%p11811_p11), %s15388_s5, 1024, %s231_s12, [#allocation9], %s11704_s10, %s11704_s10, %s11705_s18  }
  0x55   : > { %s11897_s14 = sadd.s32 1, %s11697_s24   ;;  %s31_s16 = sadd.s32 1, %s11693_s23 }
  0x56   : > { %s28_s15 = ssub.s32 %s11697_s24, %s11897_s14  ;;  %p38_p8 = scmp.ne.s32.totalorder %s11693_s23, %s11689_s22 }
  0x57   : > { %p29_p4 = scmp.eq.s32.totalorder %s28_s15, 0  ;;  %p39_p13 = scmp.eq.s32.totalorder %s11697_s24, 0 }
  0x58   : > { %p10676_p6 = scmp.lt.s32.totalorder %s11697_s24, 2  ;;  %p15449_p3 = scmp.eq.s32.totalorder %s11781_s25, 1 }
  0x59   : > { %s11907_s17 = scalar_select %p29_p4, %s11693_s23, %s31_s16  }
  0x5a   : > { %p40_p10 = por %p39_p13, %p38_p8  ;;  %p11911_p5 = por %p15449_p3, %p38_p8 }
  0x5b   : > { %s244_s8 = sand.u32 1, %s11693_s23   ;;  %s9500_s20 = sshll.u32 %s11697_s24, 11 }
  0x5c   : > { %s9301_s12 = sshll.u32 %s244_s8, 7  ;;  %s11920_s10 = scalar_lea.hbm %s15383_s0, %s9500_s20 }
  0x5d   : > { %s248_s18 = scalar_lea.vmem [#allocation2], %s9301_s12  ;;  %p11922_p11 = pnand %p10676_p6, %p40_p10 }
  0x5e   : > { %s256_s11 = sshll.u32 %s248_s18, 4  ;;  %s11928_s15 = scalar_lea.sflag [#allocation3], %s244_s8  ;;  %s11926_s11 = int_to_ptr.vmem [resolvable:$true] %s256_s11 }
  0x5f   : > { %s11593_s16 = scalar_lea.hbm %s11920_s10, 2048  ;;  %p11595_p9 = pneg %p11922_p11 }
  0x60   : > { %p11594_p7 = scmp.ne.s32.totalorder %s11920_s10, %s11593_s16  ;;  %s11598_s26 = scalar_lea.hbm %s15383_s0, 4096 }
  0x61   : > { %p11599_p1 = scmp.lt.u32.totalorder %s11920_s10, %s15383_s0  ;;  %p11600_p2 = scmp.lt.u32.totalorder %s11598_s26, %s11593_s16 }
  0x62   : > { %p11596_p12 = pnand %p11595_p9, %p11594_p7  ;;  %p11602_p8 = scmp.lt.u32.totalorder %s11593_s16, %s11920_s10 }
  0x63   : > { %p11601_p4 = por %p11600_p2, %p11599_p1 }
  0x64   : > { %p11597_p0 = pneg %p11596_p12 }
  0x65   : > { %p11603_p13 = por %p11602_p8, %p11601_p4 }
  0x67   : > { %p11604_p6 = pnand %p11603_p13, %p11597_p0 }
  0x69   : > { %11607 = shalt.err (!%p11604_p6)
}
  0x6a   : > { %s11608_s8 = scalar_lea.vmem %s11926_s11, 2048  ;;  %s11706_s20 = smov [#allocation2]  }
  0x6b   : > { %p11609_p10 = scmp.ne.s32.totalorder %s11926_s11, %s11608_s8  ;;  %s11613_s12 = sshll.u32 %s11706_s20, 4  ;;  %s11614_s12 = int_to_ptr.vmem [resolvable:$false] %s11613_s12 }
  0x6c   : > { %s11615_s7 = scalar_lea.vmem %s11614_s12, 4096  ;;  %p11616_p12 = scmp.lt.s32.totalorder %s11926_s11, %s11614_s12 }
  0x6d   : > { %p11611_p3 = pnand %p11609_p10, %p11595_p9  ;;  %p11617_p1 = scmp.lt.s32.totalorder %s11615_s7, %s11608_s8 }
  0x6f   : > { %p11612_p7 = pneg %p11611_p3  ;;  %p11618_p2 = por %p11617_p1, %p11616_p12 }
  0x71   : > { %p11619_p4 = pnand %p11618_p2, %p11612_p7 }
  0x73   : > { %11622 = shalt.err (!%p11619_p4)
}
  0x74   : > { %10668 = dma.hbm_to_vmem [thread:$0]  (!%p11922_p11), %s11920_s10, 2048, %s11926_s11, %s11928_s15, %s11702_s30, %s11702_s30, %s11703_s9  }
  0x75   : > { %p15452_p9 = scmp.ne.s32.totalorder %s15446_s29, 0 }
  0x77   : > { %268 = sbr.rel (%p15452_p9) target bundleno = 3526 (0xdc6), region = 44 }
  0x7e   : > { %s11962_s16 = sand.u32 1, %s11689_s22   ;;  %p15453_p0 = scmp.ne.s32.totalorder %s15444_s27, 0 }
  0x7f   : > { %s9306_s26 = sshll.u32 %s11962_s16, 7  ;;  %s271_s18 = scalar_lea.sflag [#allocation3], %s11962_s16 }
  0x80   : > { %s11966_s8 = scalar_lea.vmem [#allocation2], %s9306_s26 }
  0x81   : > { %11668 = dma.done.wait (%p15453_p0), %s271_s18, 2048  }
  0x82   : > { %11670 = vsyncadd (%p15453_p0), %s271_s18, 4294965248  ;;  %p15454_p11 = scmp.eq.s32.totalorder %s11781_s25, 0 }
  0x84   : > { %11672 = dma.done.wait (%p15454_p11), [#allocation6], 512   ;;  %p15455_p8 = pmov %p15454_p11 }
  0x86   : > { %11674 = vsyncadd (%p15455_p8), [#allocation6], 4294966784  ;;  %p15456_p13 = pmov %p15455_p8 }
  0x87   : > { %p15457_p6 = pmov %p15455_p8 }
  0x88   : > { %11676 = dma.done.wait (%p15456_p13), [#allocation9], 1024  }
  0x89   : > { %11678 = vsyncadd (%p15457_p6), [#allocation9], 4294966272  ;;  %v10977_v0 = vld [vmem:[#allocation5] sm:$0xff]   ;;  %v10978_v1 = vld [vmem:[#allocation5 + $0x8] sm:$0xff]   ;;  %vm453_vm0 = vcmask 261120   ;;  %v15393_v18 = vmov 0.0  }
  0x8a   : > { %9795 = vmatprep.subr.bf16.mxu0 %v10977_v0  ;;  %v10979_v2 = vld [vmem:[%s11966_s8] sm:$0xff]   ;;  %10635 = vmatprep.subr.bf16.mxu1 %v10977_v0  ;;  %v10980_v3 = vld [vmem:[%s11966_s8 + $0x8] sm:$0xff]   ;;  %v10981_v4 = vld [vmem:[%s11966_s8 + $0x10] sm:$0xff]   ;;  %vm11708_vm1 = vmmov 0   ;;  %s11709_s30 = smov 96   ;;  %s11710_s9 = smov 64  }
  0x8b   : > { %9796 = vmatpush3.bf16.msra.mxu0 %v10977_v0  ;;  %10637 = vmatpush3.bf16.msra.mxu1 %v10977_v0  ;;  %v10984_v5 = vld [vmem:[%s11966_s8 + $0x40] sm:$0xff]   ;;  %v10986_v6 = vld [vmem:[%s11966_s8 + $0x48] sm:$0xff]   ;;  %v10988_v7 = vld [vmem:[%s11966_s8 + $0x50] sm:$0xff]   ;;  %vm690_vm2 = vcmask 64512   ;;  %vm1488_vm3 = vcmask 130048   ;;  %s11711_s10 = smov 88  }
  0x8c   : > { %9797 = vmatprep.subr.bf16.mxu0 %v10978_v1  ;;  %9799 = vmatprep.mubr.msk.bf16.mxu0 %vm453_vm0, %v10979_v2  ;;  %v10982_v8 = vld [vmem:[%s11966_s8 + $0x18] sm:$0xff]   ;;  %v10983_v9 = vld [vmem:[%s11966_s8 + $0x20] sm:$0xff]   ;;  %v10985_v12 = vld [vmem:[%s11966_s8 + $0x28] sm:$0xff]   ;;  %s11712_s11 = smov 120   ;;  %s11713_s13 = smov 56   ;;  %vm8865_vm4 = vcmask 195584  }
  0x8d   : > { %10636 = vmatprep.subr.bf16.mxu1 %v10978_v1  ;;  %9815 = vmatprep.mubr.msk.bf16.mxu1 %vm453_vm0, %v10984_v5  ;;  %v10990_v10 = vld [vmem:[%s11966_s8 + $0x58] sm:$0xff]   ;;  %v10991_v11 = vld [vmem:[%s11966_s8 + $0x60] sm:$0xff]   ;;  %v10987_v13 = vld [vmem:[%s11966_s8 + $0x30] sm:$0xff]   ;;  %s11714_s15 = smov 80   ;;  %s11715_s20 = smov 112  }
  0x8e   : > { %v10992_v14 = vld [vmem:[%s11966_s8 + $0x68] sm:$0xff]   ;;  %v10993_v15 = vld [vmem:[%s11966_s8 + $0x70] sm:$0xff]   ;;  %v10989_v16 = vld [vmem:[%s11966_s8 + $0x38] sm:$0xff]   ;;  %s11716_s12 = smov 48   ;;  %s11717_s7 = smov 72  }
  0x8f   : > { %9798 = vmatpush3.bf16.msra.mxu0 %v10978_v1  ;;  %10638 = vmatpush3.bf16.msra.mxu1 %v10978_v1  ;;  %v10994_v17 = vld [vmem:[%s11966_s8 + $0x78] sm:$0xff]   ;;  %v12017_v20 = vld [vmem:[%s15385_s2] ss:$0 sm:$0xff]  ;;  %s11718_s26 = smov 104   ;;  %s11719_s18 = smov 40  }
  0x90   : > { %9831 = vmatprep.subr.bf16.mxu1 %v15393_v18  ;;  %9879 = vmatprep.subr.bf16.mxu0 %v15393_v18  ;;  %s11720_s8 = smov 8   ;;  %s11721_s27 = smov 16  }
  0x91   : > { %s11722_s29 = smov 24  }
  0x92   : > { %9800 = vmatmul.mubr.msk.bf16.vlgmr.msra.gmra.mrb[0].mxu0 %vm453_vm0, %v10980_v3  ;;  %9816 = vmatmul.mubr.msk.bf16.vlgmr.msra.gmra.mrb[0].mxu1 %vm453_vm0, %v10986_v6 }
  0x93   : > { %9803 = vmatprep.mubr.msk.bf16.mxu0 %vm453_vm0, %v10981_v4  ;;  %9819 = vmatprep.mubr.msk.bf16.mxu1 %vm453_vm0, %v10988_v7 }
  0x9a   : > { %9804 = vmatmul.mubr.msk.bf16.gmra.mrb[4].mxu0 %vm453_vm0, %v10982_v8  ;;  %9820 = vmatmul.mubr.msk.bf16.gmra.mrb[4].mxu1 %vm453_vm0, %v10990_v10 }
  0x9b   : > { %9807 = vmatprep.mubr.msk.bf16.mxu0 %vm453_vm0, %v10983_v9  ;;  %9823 = vmatprep.mubr.msk.bf16.mxu1 %vm453_vm0, %v10991_v11 }
  0xa2   : > { %9808 = vmatmul.mubr.msk.bf16.gmra.mrb[8].mxu0 %vm453_vm0, %v10985_v12  ;;  %9824 = vmatmul.mubr.msk.bf16.gmra.mrb[8].mxu1 %vm453_vm0, %v10992_v14 }
  0xa3   : > { %9811 = vmatprep.mubr.msk.bf16.mxu0 %vm453_vm0, %v10987_v13  ;;  %9827 = vmatprep.mubr.msk.bf16.mxu1 %vm453_vm0, %v10993_v15 }
  0xaa   : > { %9812 = vmatmul.mubr.msk.bf16.gmra.mrb[12].mxu0 %vm453_vm0, %v10989_v16  ;;  %9828 = vmatmul.mubr.msk.bf16.gmra.mrb[12].mxu1 %vm453_vm0, %v10994_v17 }
  0xab   : > { %9833 = vmatprep.mubr.msk.bf16.mxu1 %vm11708_vm1, %v15393_v18  ;;  %9881 = vmatprep.mubr.msk.bf16.mxu0 %vm11708_vm1, %v15393_v18 }
 0x165   : > { %v9801_v19 = vpop.f32.mrb[0].mxu0  ;;  %v9817_v22 = vpop.f32.mrb[0].mxu1 }
 0x166   : > { %v536_v21 = vpop.f32.mrb[1].mxu0  ;;  %v609_v24 = vadd.f32 %v9817_v22, %v12017_v20  ;;  %v600_v25 = vpop.f32.mrb[1].mxu1  ;;  %v545_v26 = vadd.f32 %v9801_v19, %v12017_v20 }
 0x167   : > { %v9802_v23 = vpop.f32.mrb[2].mxu0  ;;  %v601_v29 = vadd.f32 %v12017_v20, %v600_v25  ;;  %v9818_v30 = vpop.f32.mrb[2].mxu1  ;;  %v537_v31 = vadd.f32 %v12017_v20, %v536_v21 }
 0x168   : > { %v548_v27 = vadd.f32 %v9802_v23, %v12017_v20  ;;  %v539_v28 = vpop.f32.mrb[3].mxu0  ;;  %v612_v33 = vadd.f32 %v9818_v30, %v12017_v20  ;;  %v603_v34 = vpop.f32.mrb[3].mxu1 }
 0x169   : > { %v540_v32 = vadd.f32 %v12017_v20, %v539_v28  ;;  %v604_v36 = vadd.f32 %v12017_v20, %v603_v34 }
 0x16a   : > { %v12030_v35 = vpack.c.bf16 %v548_v27, %v545_v26  ;;  %v12035_v38 = vpack.c.bf16 %v612_v33, %v609_v24 }
 0x16b   : > { %v12033_v37 = vpack.c.bf16 %v540_v32, %v537_v31  ;;  %v12037_v39 = vpack.c.bf16 %v604_v36, %v601_v29 }
 0x16d   : > { %v9805_v40 = vpop.f32.mrb[4].mxu0  ;;  %688 = vrot.lane.b32.xlu0 %v12033_v37, %s11709_s30  ;;  %v9821_v42 = vpop.f32.mrb[4].mxu1 }
 0x16e   : > { %v552_v41 = vpop.f32.mrb[5].mxu0  ;;  %v625_v44 = vadd.f32 %v9821_v42, %v12017_v20  ;;  %v616_v45 = vpop.f32.mrb[5].mxu1  ;;  %v561_v46 = vadd.f32 %v9805_v40, %v12017_v20 }
 0x16f   : > { %v9806_v43 = vpop.f32.mrb[6].mxu0  ;;  %v617_v49 = vadd.f32 %v12017_v20, %v616_v45  ;;  %v9822_v50 = vpop.f32.mrb[6].mxu1  ;;  %v553_v51 = vadd.f32 %v12017_v20, %v552_v41 }
 0x170   : > { %v564_v47 = vadd.f32 %v9806_v43, %v12017_v20  ;;  %v555_v48 = vpop.f32.mrb[7].mxu0  ;;  %v628_v53 = vadd.f32 %v9822_v50, %v12017_v20  ;;  %v619_v54 = vpop.f32.mrb[7].mxu1 }
 0x171   : > { %v556_v52 = vadd.f32 %v12017_v20, %v555_v48  ;;  %739 = vrot.lane.b32.xlu0 %v12030_v35, %s11709_s30  ;;  %v620_v56 = vadd.f32 %v12017_v20, %v619_v54 }
 0x172   : > { %v12050_v55 = vpack.c.bf16 %v564_v47, %v561_v46  ;;  %v12055_v58 = vpack.c.bf16 %v628_v53, %v625_v44 }
 0x173   : > { %v12053_v57 = vpack.c.bf16 %v556_v52, %v553_v51  ;;  %v12057_v59 = vpack.c.bf16 %v620_v56, %v617_v49 }
 0x175   : > { %v9809_v60 = vpop.f32.mrb[8].mxu0  ;;  %789 = vrot.lane.b32.xlu1 %v12053_v57, %s11709_s30  ;;  %v9825_v62 = vpop.f32.mrb[8].mxu1 }
 0x176   : > { %v568_v61 = vpop.f32.mrb[9].mxu0  ;;  %v641_v0 = vadd.f32 %v9825_v62, %v12017_v20  ;;  %v632_v1 = vpop.f32.mrb[9].mxu1  ;;  %v577_v2 = vadd.f32 %v9809_v60, %v12017_v20 }
 0x177   : > { %v9810_v63 = vpop.f32.mrb[10].mxu0  ;;  %v633_v5 = vadd.f32 %v12017_v20, %v632_v1  ;;  %v9826_v6 = vpop.f32.mrb[10].mxu1  ;;  %v569_v7 = vadd.f32 %v12017_v20, %v568_v61 }
 0x178   : > { %v580_v3 = vadd.f32 %v9810_v63, %v12017_v20  ;;  %v571_v4 = vpop.f32.mrb[11].mxu0  ;;  %v644_v9 = vadd.f32 %v9826_v6, %v12017_v20  ;;  %v635_v10 = vpop.f32.mrb[11].mxu1 }
 0x179   : > { %v572_v8 = vadd.f32 %v12017_v20, %v571_v4  ;;  %839 = vrot.lane.b32.xlu1 %v12050_v55, %s11709_s30  ;;  %v636_v12 = vadd.f32 %v12017_v20, %v635_v10 }
 0x17a   : > { %v12070_v11 = vpack.c.bf16 %v580_v3, %v577_v2  ;;  %v12075_v14 = vpack.c.bf16 %v644_v9, %v641_v0 }
 0x17b   : > { %v12073_v13 = vpack.c.bf16 %v572_v8, %v569_v7  ;;  %v12077_v15 = vpack.c.bf16 %v636_v12, %v633_v5 }
 0x17d   : > { %v9813_v16 = vpop.f32.mrb[12].mxu0  ;;  %939 = vrot.lane.b32.xlu1 %v12070_v11, %s11709_s30  ;;  %889 = vrot.lane.b32.xlu0 %v12073_v13, %s11709_s30  ;;  %v9829_v19 = vpop.f32.mrb[12].mxu1 }
 0x17e   : > { %v584_v17 = vpop.f32.mrb[13].mxu0  ;;  %v657_v22 = vadd.f32 %v9829_v19, %v12017_v20  ;;  %v648_v23 = vpop.f32.mrb[13].mxu1  ;;  %v593_v24 = vadd.f32 %v9813_v16, %v12017_v20 }
 0x17f   : > { %v9814_v21 = vpop.f32.mrb[14].mxu0  ;;  %v649_v27 = vadd.f32 %v12017_v20, %v648_v23  ;;  %v9830_v28 = vpop.f32.mrb[14].mxu1  ;;  %v585_v29 = vadd.f32 %v12017_v20, %v584_v17 }
 0x180   : > { %v596_v25 = vadd.f32 %v9814_v21, %v12017_v20  ;;  %v587_v26 = vpop.f32.mrb[15].mxu0  ;;  %v660_v31 = vadd.f32 %v9830_v28, %v12017_v20  ;;  %v651_v32 = vpop.f32.mrb[15].mxu1  ;;  %v12245_v21 = vld [vmem:[#allocation8] sm:$0xff] }
 0x181   : > { %v588_v30 = vadd.f32 %v12017_v20, %v587_v26  ;;  %v652_v34 = vadd.f32 %v12017_v20, %v651_v32 }
 0x182   : > { %v12090_v33 = vpack.c.bf16 %v596_v25, %v593_v24  ;;  %v12095_v40 = vpack.c.bf16 %v660_v31, %v657_v22 }
 0x183   : > { %v12093_v36 = vpack.c.bf16 %v588_v30, %v585_v29  ;;  %v12099_v41 = vpack.c.bf16 %v652_v34, %v649_v27 }
 0x184   : > { %1039 = vrot.lane.b32.xlu1 %v12090_v33, %s11709_s30 }
 0x185   : > { %989 = vrot.lane.b32.xlu0 %v12093_v36, %s11709_s30 }
 0x188   : > { %1139 = vrot.lane.b32.xlu1 %v12035_v38, %s11709_s30 }
 0x189   : > { %1089 = vrot.lane.b32.xlu0 %v12037_v39, %s11709_s30 }
 0x18c   : > { %1239 = vrot.lane.b32.xlu1 %v12055_v58, %s11709_s30 }
 0x18d   : > { %1189 = vrot.lane.b32.xlu0 %v12057_v59, %s11709_s30 }
 0x190   : > { %1339 = vrot.lane.b32.xlu1 %v12075_v14, %s11709_s30 }
 0x191   : > { %1289 = vrot.lane.b32.xlu0 %v12077_v15, %s11709_s30 }
 0x194   : > { %1439 = vrot.lane.b32.xlu1 %v12095_v40, %s11709_s30 }
 0x195   : > { %1389 = vrot.lane.b32.xlu0 %v12099_v41, %s11709_s30  ;;  %s9310_s30 = sshll.u32 %s11962_s16, 8 }
 0x198   : > { %1857 = vrot.lane.b32.xlu1 %v12033_v37, %s11710_s9 }
 0x199   : > { %1904 = vrot.lane.b32.xlu0 %v12030_v35, %s11710_s9 }
 0x19c   : > { %1951 = vrot.lane.b32.xlu1 %v12053_v57, %s11710_s9 }
 0x19d   : > { %1998 = vrot.lane.b32.xlu0 %v12050_v55, %s11710_s9 }
 0x1a0   : > { %2045 = vrot.lane.b32.xlu1 %v12073_v13, %s11710_s9 }
 0x1a1   : > { %2092 = vrot.lane.b32.xlu0 %v12070_v11, %s11710_s9 }
 0x1a4   : > { %2233 = vrot.lane.b32.xlu1 %v12037_v39, %s11710_s9 }
 0x1a5   : > { %2186 = vrot.lane.b32.xlu0 %v12090_v33, %s11710_s9 }
 0x1a8   : > { %2327 = vrot.lane.b32.xlu1 %v12057_v59, %s11710_s9 }
 0x1a9   : > { %2280 = vrot.lane.b32.xlu0 %v12035_v38, %s11710_s9 }
 0x1ac   : > { %2374 = vrot.lane.b32.xlu1 %v12055_v58, %s11710_s9 }
 0x1ad   : > { %2421 = vrot.lane.b32.xlu0 %v12077_v15, %s11710_s9 }
 0x1b0   : > { %2468 = vrot.lane.b32.xlu1 %v12075_v14, %s11710_s9 }
 0x1b4   : > { %2139 = vrot.lane.b32.xlu1 %v12093_v36, %s11710_s9 }
 0x1df   : > { %v689_v20 = vpop.permute.xlu0 %688 }
 0x1e0   : > { %v695_v42 = vsel %vm690_vm2, %v689_v20, 0 }
 0x1e1   : > { %9832 = vmatpush3.bf16.xpose.msra.mxu1 %v695_v42 }
 0x1e2   : > { %9837 = vmatprep.subr.bf16.mxu1 %v15393_v18 }
 0x1e3   : > { %v740_v43 = vpop.permute.xlu0 %739 }
 0x1e4   : > { %v745_v44 = vsel %vm690_vm2, %v740_v43, 0 }
 0x1e7   : > { %v790_v45 = vpop.permute.xlu1 %789 }
 0x1e8   : > { %9834 = vmatmul.mubr.msk.bf16.vlgmr.msra.gmra.mrb[16].mxu1 %vm690_vm2, %v12033_v37  ;;  %v795_v46 = vsel %vm690_vm2, %v790_v45, 0 }
 0x1e9   : > { %9838 = vmatpush3.bf16.xpose.msra.mxu1 %v745_v44  ;;  %9839 = vmatprep.mubr.msk.bf16.mxu1 %vm11708_vm1, %v15393_v18 }
 0x1ea   : > { %9843 = vmatprep.subr.bf16.mxu1 %v15393_v18 }
 0x1eb   : > { %v840_v48 = vpop.permute.xlu1 %839 }
 0x1ec   : > { %v845_v50 = vsel %vm690_vm2, %v840_v48, 0  ;;  %v12254_v48 = vld [vmem:[#allocation8 + $0x8] sm:$0xff] }
 0x1ef   : > { %v890_v47 = vpop.permute.xlu0 %889  ;;  %v940_v51 = vpop.permute.xlu1 %939 }
 0x1f0   : > { %9840 = vmatmul.mubr.msk.bf16.vlgmr.msra.gmra.mrb[20].mxu1 %vm690_vm2, %v12030_v35  ;;  %v895_v56 = vsel %vm690_vm2, %v890_v47, 0  ;;  %v945_v63 = vsel %vm690_vm2, %v940_v51, 0 }
 0x1f1   : > { %9844 = vmatpush3.bf16.xpose.msra.mxu1 %v795_v46  ;;  %9845 = vmatprep.mubr.msk.bf16.mxu1 %vm11708_vm1, %v15393_v18 }
 0x1f2   : > { %9849 = vmatprep.subr.bf16.mxu1 %v15393_v18 }
 0x1f6   : > { %v1040_v54 = vpop.permute.xlu1 %1039 }
 0x1f7   : > { %v990_v49 = vpop.permute.xlu0 %989  ;;  %v1045_v8 = vsel %vm690_vm2, %v1040_v54, 0 }
 0x1f8   : > { %9846 = vmatmul.mubr.msk.bf16.vlgmr.msra.gmra.mrb[24].mxu1 %vm690_vm2, %v12053_v57  ;;  %v995_v3 = vsel %vm690_vm2, %v990_v49, 0 }
 0x1f9   : > { %9850 = vmatpush3.bf16.xpose.msra.mxu1 %v845_v50  ;;  %9851 = vmatprep.mubr.msk.bf16.mxu1 %vm11708_vm1, %v15393_v18 }
 0x1fa   : > { %9855 = vmatprep.subr.bf16.mxu1 %v15393_v18  ;;  %v1140_v62 = vpop.permute.xlu1 %1139 }
 0x1fb   : > { %v1090_v52 = vpop.permute.xlu0 %1089  ;;  %v1145_v10 = vsel %vm690_vm2, %v1140_v62, 0 }
 0x1fc   : > { %v1095_v53 = vsel %vm690_vm2, %v1090_v52, 0 }
 0x1fd   : > { %9880 = vmatpush3.bf16.xpose.msra.mxu0 %v1095_v53 }
 0x1fe   : > { %9891 = vmatprep.subr.bf16.mxu0 %v15393_v18  ;;  %v1240_v1 = vpop.permute.xlu1 %1239 }
 0x1ff   : > { %v1190_v60 = vpop.permute.xlu0 %1189  ;;  %v1245_v12 = vsel %vm690_vm2, %v1240_v1, 0 }
 0x200   : > { %9852 = vmatmul.mubr.msk.bf16.vlgmr.msra.gmra.mrb[28].mxu1 %vm690_vm2, %v12050_v55  ;;  %v1195_v61 = vsel %vm690_vm2, %v1190_v60, 0 }
 0x201   : > { %9856 = vmatpush3.bf16.xpose.msra.mxu1 %v895_v56  ;;  %9857 = vmatprep.mubr.msk.bf16.mxu1 %vm11708_vm1, %v15393_v18 }
 0x202   : > { %9861 = vmatprep.subr.bf16.mxu1 %v15393_v18  ;;  %v1340_v4 = vpop.permute.xlu1 %1339 }
 0x203   : > { %v1290_v0 = vpop.permute.xlu0 %1289  ;;  %v1345_v16 = vsel %vm690_vm2, %v1340_v4, 0 }
 0x204   : > { %9882 = vmatmul.mubr.msk.bf16.vlgmr.msra.gmra.mrb[16].mxu0 %vm690_vm2, %v12037_v39  ;;  %v1295_v2 = vsel %vm690_vm2, %v1290_v0, 0 }
 0x205   : > { %9892 = vmatpush3.bf16.xpose.msra.mxu0 %v1195_v61  ;;  %9893 = vmatprep.mubr.msk.bf16.mxu0 %vm11708_vm1, %v15393_v18 }
 0x206   : > { %9903 = vmatprep.subr.bf16.mxu0 %v15393_v18  ;;  %v1440_v7 = vpop.permute.xlu1 %1439 }
 0x207   : > { %v1390_v5 = vpop.permute.xlu0 %1389  ;;  %v1445_v17 = vsel %vm690_vm2, %v1440_v7, 0 }
 0x208   : > { %9858 = vmatmul.mubr.msk.bf16.vlgmr.msra.gmra.mrb[32].mxu1 %vm690_vm2, %v12073_v13  ;;  %v1395_v6 = vsel %vm690_vm2, %v1390_v5, 0 }
 0x209   : > { %9862 = vmatpush3.bf16.xpose.msra.mxu1 %v945_v63  ;;  %9863 = vmatprep.mubr.msk.bf16.mxu1 %vm11708_vm1, %v15393_v18 }
 0x20a   : > { %9867 = vmatprep.subr.bf16.mxu1 %v15393_v18  ;;  %v1858_v9 = vpop.permute.xlu1 %1857 }
 0x20b   : > { %v1905_v19 = vpop.permute.xlu0 %1904 }
 0x20c   : > { %9894 = vmatmul.mubr.msk.bf16.vlgmr.msra.gmra.mrb[20].mxu0 %vm690_vm2, %v12057_v59 }
 0x20d   : > { %9904 = vmatpush3.bf16.xpose.msra.mxu0 %v1295_v2  ;;  %9905 = vmatprep.mubr.msk.bf16.mxu0 %vm11708_vm1, %v15393_v18 }
 0x20e   : > { %9915 = vmatprep.subr.bf16.mxu0 %v15393_v18 }
 0x210   : > { %9864 = vmatmul.mubr.msk.bf16.vlgmr.msra.gmra.mrb[36].mxu1 %vm690_vm2, %v12070_v11 }
 0x211   : > { %9868 = vmatpush3.bf16.xpose.msra.mxu1 %v995_v3  ;;  %9869 = vmatprep.mubr.msk.bf16.mxu1 %vm11708_vm1, %v15393_v18 }
 0x212   : > { %9873 = vmatprep.subr.bf16.mxu1 %v15393_v18 }
 0x214   : > { %9906 = vmatmul.mubr.msk.bf16.vlgmr.msra.gmra.mrb[24].mxu0 %vm690_vm2, %v12077_v15 }
 0x215   : > { %9916 = vmatpush3.bf16.xpose.msra.mxu0 %v1395_v6  ;;  %9917 = vmatprep.mubr.msk.bf16.mxu0 %vm11708_vm1, %v15393_v18 }
 0x216   : > { %9927 = vmatprep.subr.bf16.mxu0 %v15393_v18 }
 0x218   : > { %9870 = vmatmul.mubr.msk.bf16.vlgmr.msra.gmra.mrb[40].mxu1 %vm690_vm2, %v12093_v36 }
 0x219   : > { %9874 = vmatpush3.bf16.xpose.msra.mxu1 %v1045_v8  ;;  %9875 = vmatprep.mubr.msk.bf16.mxu1 %vm11708_vm1, %v15393_v18 }
 0x21a   : > { %9885 = vmatprep.subr.bf16.mxu1 %v15393_v18 }
 0x21c   : > { %9918 = vmatmul.mubr.msk.bf16.vlgmr.msra.gmra.mrb[28].mxu0 %vm690_vm2, %v12099_v41 }
 0x21d   : > { %9928 = vmatpush3.bf16.msra.mxu0 %v1858_v9  ;;  %9929 = vmatprep.mubr.msk.bf16.mxu0 %vm11708_vm1, %v15393_v18 }
 0x21e   : > { %9939 = vmatprep.subr.bf16.mxu0 %v15393_v18 }
 0x220   : > { %9876 = vmatmul.mubr.msk.bf16.vlgmr.msra.gmra.mrb[44].mxu1 %vm690_vm2, %v12090_v33 }
 0x221   : > { %9886 = vmatpush3.bf16.xpose.msra.mxu1 %v1145_v10  ;;  %9887 = vmatprep.mubr.msk.bf16.mxu1 %vm11708_vm1, %v15393_v18 }
 0x222   : > { %9897 = vmatprep.subr.bf16.mxu1 %v15393_v18 }
 0x228   : > { %9888 = vmatmul.mubr.msk.bf16.vlgmr.msra.gmra.mrb[48].mxu1 %vm690_vm2, %v12035_v38 }
 0x229   : > { %9898 = vmatpush3.bf16.xpose.msra.mxu1 %v1245_v12  ;;  %9899 = vmatprep.mubr.msk.bf16.mxu1 %vm11708_vm1, %v15393_v18 }
 0x22a   : > { %9909 = vmatprep.subr.bf16.mxu1 %v15393_v18 }
 0x230   : > { %9900 = vmatmul.mubr.msk.bf16.vlgmr.msra.gmra.mrb[52].mxu1 %vm690_vm2, %v12055_v58 }
 0x231   : > { %9910 = vmatpush3.bf16.xpose.msra.mxu1 %v1345_v16  ;;  %9911 = vmatprep.mubr.msk.bf16.mxu1 %vm11708_vm1, %v15393_v18 }
 0x232   : > { %9921 = vmatprep.subr.bf16.mxu1 %v15393_v18 }
 0x238   : > { %9912 = vmatmul.mubr.msk.bf16.vlgmr.msra.gmra.mrb[56].mxu1 %vm690_vm2, %v12075_v14 }
 0x239   : > { %9922 = vmatpush3.bf16.xpose.msra.mxu1 %v1445_v17  ;;  %9923 = vmatprep.mubr.msk.bf16.mxu1 %vm11708_vm1, %v15393_v18 }
 0x23a   : > { %9933 = vmatprep.subr.bf16.mxu1 %v15393_v18 }
 0x240   : > { %9924 = vmatmul.mubr.msk.bf16.vlgmr.msra.gmra.mrb[60].mxu1 %vm690_vm2, %v12095_v40 }
 0x241   : > { %9934 = vmatpush3.bf16.msra.mxu1 %v1905_v19  ;;  %9935 = vmatprep.mubr.msk.bf16.mxu1 %vm11708_vm1, %v15393_v18 }
 0x242   : > { %9945 = vmatprep.subr.bf16.mxu1 %v15393_v18 }
 0x2bb   : > { %v731_v22 = vpop.f32.mrb[16].mxu1 }
 0x2bc   : > { %v9835_v23 = vpop.f32.mrb[17].mxu1  ;;  %v12248_v24 = vadd.f32 %v731_v22, %v12245_v21 }
 0x2bd   : > { %v734_v25 = vpop.f32.mrb[18].mxu1 }
 0x2be   : > { %v9836_v26 = vpop.f32.mrb[19].mxu1  ;;  %v1489_v27 = vsel %vm1488_vm3, %v12248_v24, -inf  ;;  %v12265_v56 = vadd.f32 %v734_v25, %v12254_v48 }
 0x2bf   : > { %1490 = vmax.xlane.f32.xlu0 %v1489_v27 }
 0x2c0   : > { %v1492_v2 = vsel %vm1488_vm3, %v12265_v56, -inf }
 0x2c3   : > { %v781_v28 = vpop.f32.mrb[20].mxu1 }
 0x2c4   : > { %v9841_v29 = vpop.f32.mrb[21].mxu1  ;;  %v12270_v63 = vadd.f32 %v781_v28, %v12245_v21 }
 0x2c5   : > { %v784_v30 = vpop.f32.mrb[22].mxu1 }
 0x2c6   : > { %v9842_v31 = vpop.f32.mrb[23].mxu1  ;;  %v1495_v5 = vsel %vm1488_vm3, %v12270_v63, -inf  ;;  %v12282_v7 = vadd.f32 %v784_v30, %v12254_v48 }
 0x2c8   : > { %v1498_v19 = vsel %vm1488_vm3, %v12282_v7, -inf }
 0x2cb   : > { %v831_v32 = vpop.f32.mrb[24].mxu1 }
 0x2cc   : > { %v9847_v34 = vpop.f32.mrb[25].mxu1  ;;  %v12287_v12 = vadd.f32 %v831_v32, %v12245_v21 }
 0x2cd   : > { %v834_v20 = vpop.f32.mrb[26].mxu1 }
 0x2ce   : > { %v9848_v42 = vpop.f32.mrb[27].mxu1  ;;  %v1501_v26 = vsel %vm1488_vm3, %v12287_v12, -inf  ;;  %v12302_v31 = vadd.f32 %v834_v20, %v12254_v48 }
 0x2d3   : > { %v881_v43 = vpop.f32.mrb[28].mxu1 }
 0x2d4   : > { %v9853_v44 = vpop.f32.mrb[29].mxu1 }
 0x2d5   : > { %v12252_v45 = vpop.f32.mrb[30].mxu1  ;;  %v12307_v44 = vadd.f32 %v881_v43, %v12245_v21 }
 0x2d6   : > { %v9854_v46 = vpop.f32.mrb[31].mxu1 }
 0x2d7   : > { %v1131_v47 = vpop.f32.mrb[16].mxu0 }
 0x2d8   : > { %v9883_v49 = vpop.f32.mrb[17].mxu0  ;;  %v12257_v50 = vadd.f32 %v1131_v47, %v12245_v21 }
 0x2d9   : > { %v1134_v51 = vpop.f32.mrb[18].mxu0  ;;  %v1504_v49 = vsel %vm1488_vm3, %v12302_v31, -inf }
 0x2da   : > { %v9884_v52 = vpop.f32.mrb[19].mxu0  ;;  %v1537_v53 = vsel %vm1488_vm3, %v12257_v50, -inf  ;;  %v12262_v54 = vadd.f32 %v1134_v51, %v12254_v48 }
 0x2db   : > { %v931_v60 = vpop.f32.mrb[32].mxu1  ;;  %1538 = vmax.xlane.f32.xlu1 %v1537_v53  ;;  %v1507_v53 = vsel %vm1488_vm3, %v12307_v44, -inf }
 0x2dc   : > { %v9859_v61 = vpop.f32.mrb[33].mxu1  ;;  %v1540_v62 = vsel %vm1488_vm3, %v12262_v54, -inf }
 0x2dd   : > { %v12272_v0 = vpop.f32.mrb[34].mxu1  ;;  %1541 = vmax.xlane.f32.xlu0 %v1540_v62 }
 0x2de   : > { %v9860_v1 = vpop.f32.mrb[35].mxu1 }
 0x2df   : > { %1493 = vmax.xlane.f32.xlu1 %v1492_v2  ;;  %v1231_v3 = vpop.f32.mrb[20].mxu0  ;;  %v12323_v2 = vadd.f32 %v12252_v45, %v12254_v48 }
 0x2e0   : > { %v9895_v4 = vpop.f32.mrb[21].mxu0  ;;  %v12279_v6 = vadd.f32 %v1231_v3, %v12245_v21 }
 0x2e1   : > { %1496 = vmax.xlane.f32.xlu0 %v1495_v5  ;;  %v1234_v8 = vpop.f32.mrb[22].mxu0  ;;  %v12326_v4 = vadd.f32 %v931_v60, %v12245_v21 }
 0x2e2   : > { %v9896_v9 = vpop.f32.mrb[23].mxu0  ;;  %v1549_v10 = vsel %vm1488_vm3, %v12279_v6, -inf  ;;  %v12292_v22 = vadd.f32 %v1234_v8, %v12254_v48 }
 0x2e3   : > { %v981_v16 = vpop.f32.mrb[36].mxu1  ;;  %1550 = vmax.xlane.f32.xlu1 %v1549_v10 }
 0x2e4   : > { %v9865_v17 = vpop.f32.mrb[37].mxu1  ;;  %v1552_v29 = vsel %vm1488_vm3, %v12292_v22, -inf }
 0x2e5   : > { %v984_v23 = vpop.f32.mrb[38].mxu1  ;;  %1499 = vmax.xlane.f32.xlu0 %v1498_v19  ;;  %v1510_v17 = vsel %vm1488_vm3, %v12323_v2, -inf }
 0x2e6   : > { %v9866_v25 = vpop.f32.mrb[39].mxu1 }
 0x2e7   : > { %1502 = vmax.xlane.f32.xlu1 %v1501_v26  ;;  %v1331_v27 = vpop.f32.mrb[24].mxu0  ;;  %v12336_v25 = vadd.f32 %v981_v16, %v12245_v21  ;;  %v1513_v26 = vsel %vm1488_vm3, %v12326_v4, -inf }
 0x2e8   : > { %v9907_v28 = vpop.f32.mrb[25].mxu0  ;;  %v12299_v30 = vadd.f32 %v1331_v27, %v12245_v21  ;;  %v12342_v27 = vadd.f32 %v12272_v0, %v12254_v48 }
 0x2e9   : > { %1553 = vmax.xlane.f32.xlu0 %v1552_v29  ;;  %v1334_v32 = vpop.f32.mrb[26].mxu0  ;;  %v1519_v16 = vsel %vm1488_vm3, %v12336_v25, -inf }
 0x2ea   : > { %v9908_v34 = vpop.f32.mrb[27].mxu0  ;;  %v1561_v42 = vsel %vm1488_vm3, %v12299_v30, -inf  ;;  %v12312_v51 = vadd.f32 %v1334_v32, %v12254_v48  ;;  %v1516_v0 = vsel %vm1488_vm3, %v12342_v27, -inf }
 0x2eb   : > { %v1031_v46 = vpop.f32.mrb[40].mxu1  ;;  %1562 = vmax.xlane.f32.xlu1 %v1561_v42  ;;  %v12352_v34 = vadd.f32 %v984_v23, %v12254_v48 }
 0x2ec   : > { %v9871_v47 = vpop.f32.mrb[41].mxu1  ;;  %v1564_v43 = vsel %vm1488_vm3, %v12312_v51, -inf  ;;  %v12347_v29 = vadd.f32 %v1031_v46, %v12245_v21 }
 0x2ed   : > { %v1034_v20 = vpop.f32.mrb[42].mxu1  ;;  %1505 = vmax.xlane.f32.xlu0 %v1504_v49  ;;  %v1522_v23 = vsel %vm1488_vm3, %v12352_v34, -inf }
 0x2ee   : > { %v9872_v52 = vpop.f32.mrb[43].mxu1  ;;  %v1525_v46 = vsel %vm1488_vm3, %v12347_v29, -inf }
 0x2ef   : > { %1508 = vmax.xlane.f32.xlu1 %v1507_v53  ;;  %v1431_v61 = vpop.f32.mrb[28].mxu0  ;;  %v12362_v53 = vadd.f32 %v1034_v20, %v12254_v48 }
 0x2f0   : > { %v9919_v62 = vpop.f32.mrb[29].mxu0  ;;  %v12319_v1 = vadd.f32 %v1431_v61, %v12245_v21 }
 0x2f1   : > { %1565 = vmax.xlane.f32.xlu0 %v1564_v43  ;;  %v1434_v3 = vpop.f32.mrb[30].mxu0  ;;  %v1528_v20 = vsel %vm1488_vm3, %v12362_v53, -inf }
 0x2f2   : > { %v9920_v5 = vpop.f32.mrb[31].mxu0  ;;  %v1573_v8 = vsel %vm1488_vm3, %v12319_v1, -inf  ;;  %v12333_v19 = vadd.f32 %v1434_v3, %v12254_v48 }
 0x2f3   : > { %v1081_v9 = vpop.f32.mrb[44].mxu1  ;;  %1574 = vmax.xlane.f32.xlu1 %v1573_v8 }
 0x2f4   : > { %v9877_v10 = vpop.f32.mrb[45].mxu1  ;;  %v1576_v28 = vsel %vm1488_vm3, %v12333_v19, -inf  ;;  %v12357_v49 = vadd.f32 %v1081_v9, %v12245_v21 }
 0x2f5   : > { %v1084_v45 = vpop.f32.mrb[46].mxu1  ;;  %1511 = vmax.xlane.f32.xlu0 %v1510_v17 }
 0x2f6   : > { %v9878_v60 = vpop.f32.mrb[47].mxu1  ;;  %v1531_v62 = vsel %vm1488_vm3, %v12357_v49, -inf  ;;  %v12372_v3 = vadd.f32 %v1084_v45, %v12254_v48 }
 0x2f7   : > { %1514 = vmax.xlane.f32.xlu1 %v1513_v26 }
 0x2f8   : > { %v1534_v45 = vsel %vm1488_vm3, %v12372_v3, -inf }
 0x2f9   : > { %1577 = vmax.xlane.f32.xlu0 %v1576_v28 }
 0x2fb   : > { %v1181_v32 = vpop.f32.mrb[48].mxu1  ;;  %1520 = vmax.xlane.f32.xlu1 %v1519_v16 }
 0x2fc   : > { %v9889_v42 = vpop.f32.mrb[49].mxu1  ;;  %v12367_v61 = vadd.f32 %v1181_v32, %v12245_v21 }
 0x2fd   : > { %v1184_v47 = vpop.f32.mrb[50].mxu1  ;;  %1517 = vmax.xlane.f32.xlu0 %v1516_v0 }
 0x2fe   : > { %v9890_v52 = vpop.f32.mrb[51].mxu1  ;;  %v1543_v17 = vsel %vm1488_vm3, %v12367_v61, -inf  ;;  %v12382_v60 = vadd.f32 %v1184_v47, %v12254_v48 }
 0x2ff   : > { %1526 = vmax.xlane.f32.xlu1 %v1525_v46 }
 0x300   : > { %v1546_v0 = vsel %vm1488_vm3, %v12382_v60, -inf }
 0x301   : > { %1523 = vmax.xlane.f32.xlu0 %v1522_v23 }
 0x303   : > { %v1281_v43 = vpop.f32.mrb[52].mxu1  ;;  %1532 = vmax.xlane.f32.xlu1 %v1531_v62 }
 0x304   : > { %v9901_v5 = vpop.f32.mrb[53].mxu1  ;;  %v12377_v9 = vadd.f32 %v1281_v43, %v12245_v21 }
 0x305   : > { %v1284_v8 = vpop.f32.mrb[54].mxu1  ;;  %1529 = vmax.xlane.f32.xlu0 %v1528_v20 }
 0x306   : > { %v9902_v10 = vpop.f32.mrb[55].mxu1  ;;  %v1555_v26 = vsel %vm1488_vm3, %v12377_v9, -inf  ;;  %v12389_v16 = vadd.f32 %v1284_v8, %v12254_v48 }
 0x307   : > { %1544 = vmax.xlane.f32.xlu1 %v1543_v17 }
 0x308   : > { %v1558_v62 = vsel %vm1488_vm3, %v12389_v16, -inf }
 0x309   : > { %1535 = vmax.xlane.f32.xlu0 %v1534_v45 }
 0x30b   : > { %v1381_v28 = vpop.f32.mrb[56].mxu1  ;;  %1556 = vmax.xlane.f32.xlu1 %v1555_v26 }
 0x30c   : > { %v12392_v32 = vadd.f32 %v1381_v28, %v12245_v21  ;;  %v9913_v42 = vpop.f32.mrb[57].mxu1 }
 0x30d   : > { %v1384_v47 = vpop.f32.mrb[58].mxu1  ;;  %1547 = vmax.xlane.f32.xlu0 %v1546_v0 }
 0x30e   : > { %v9914_v52 = vpop.f32.mrb[59].mxu1  ;;  %v1567_v46 = vsel %vm1488_vm3, %v12392_v32, -inf  ;;  %v12399_v23 = vadd.f32 %v1384_v47, %v12254_v48  ;;  %v12421_v47 = vpop.permute.xlu1 %1951 }
 0x30f   : > { %1568 = vmax.xlane.f32.xlu1 %v1567_v46 }
 0x310   : > { %v1570_v8 = vsel %vm1488_vm3, %v12399_v23, -inf }
 0x311   : > { %1559 = vmax.xlane.f32.xlu0 %v1558_v62 }
 0x313   : > { %v1481_v43 = vpop.f32.mrb[60].mxu1 }
 0x314   : > { %v12404_v5 = vadd.f32 %v1481_v43, %v12245_v21  ;;  %v9925_v20 = vpop.f32.mrb[61].mxu1  ;;  %v12415_v21 = vpop.permute.xlu0 %1998 }
 0x315   : > { %v1484_v10 = vpop.f32.mrb[62].mxu1  ;;  %1571 = vmax.xlane.f32.xlu0 %v1570_v8 }
 0x316   : > { %v12409_v17 = vadd.f32 %v1484_v10, %v12254_v48  ;;  %v9926_v45 = vpop.f32.mrb[63].mxu1  ;;  %v1579_v26 = vsel %vm1488_vm3, %v12404_v5, -inf  ;;  %v12425_v48 = vpop.permute.xlu1 %2045 }
 0x317   : > { %1580 = vmax.xlane.f32.xlu1 %v1579_v26  ;;  %15461 = vst [vmem:[#allocation18_spill] sm:$0xff] %v12425_v48 }
 0x318   : > { %v1582_v28 = vsel %vm1488_vm3, %v12409_v17, -inf  ;;  %v12417_v42 = vpop.permute.xlu0 %2092 }
 0x319   : > { %1583 = vmax.xlane.f32.xlu0 %v1582_v28  ;;  %15458 = vst [vmem:[#allocation15_spill] sm:$0xff] %v12417_v42 }
 0x31a   : > { %v12429_v62 = vpop.permute.xlu1 %2233 }
 0x31b   : > { %15463 = vst [vmem:[#allocation20_spill] sm:$0xff] %v12429_v62 }
 0x31c   : > { %v12419_v0 = vpop.permute.xlu0 %2186 }
 0x31d   : > { %15459 = vst [vmem:[#allocation16_spill] sm:$0xff] %v12419_v0 }
 0x31e   : > { %v12432_v10 = vpop.permute.xlu1 %2327 }
 0x31f   : > { %15464 = vst [vmem:[#allocation21_spill] sm:$0xff] %v12432_v10 }
 0x320   : > { %v12423_v52 = vpop.permute.xlu0 %2280 }
 0x321   : > { %15460 = vst [vmem:[#allocation17_spill] sm:$0xff] %v12423_v52 }
 0x322   : > { %v12434_v45 = vpop.permute.xlu1 %2374 }
 0x323   : > { %15465 = vst [vmem:[#allocation22_spill] sm:$0xff] %v12434_v45 }
 0x324   : > { %v12427_v46 = vpop.permute.xlu0 %2421 }
 0x325   : > { %15462 = vst [vmem:[#allocation19_spill] sm:$0xff] %v12427_v46 }
 0x326   : > { %v12440_v18 = vpop.permute.xlu1 %2468 }
 0x327   : > { %15466 = vst [vmem:[#allocation23_spill] sm:$0xff] %v12440_v18 }
 0x32a   : > { %v12442_v46 = vpop.permute.xlu1 %2139 }
 0x32b   : > { %15467 = vst [vmem:[#allocation24_spill] sm:$0xff] %v12442_v46 }
 0x34c   : > { %v1491_v43 = vpop.xlane.xlu0 %1490 }
 0x34d   : > { %v1585_v20 = vsub.f32 %v12248_v24, %v1491_v43 }
 0x34f   : > { %v1617_v8 = vmul.f32 1.442695, %v1585_v20 }
 0x351   : > { %10997 = vpow2.f32 %v1617_v8 }
 0x35b   : > { %v12436_v26 = vpop.eup %10997 }
 0x35c   : > { %v1681_v28 = vsel %vm1488_vm3, %v12436_v26, 0.0 }
 0x35d   : > { %1682 = vadd.xlane.f32.xlu1 %v1681_v28 }
 0x368   : > { %v1539_v52 = vpop.xlane.xlu1 %1538 }
 0x369   : > { %v1601_v62 = vsub.f32 %v12257_v50, %v1539_v52 }
 0x36a   : > { %v1542_v24 = vpop.xlane.xlu0 %1541 }
 0x36b   : > { %v1649_v43 = vmul.f32 1.442695, %v1601_v62  ;;  %v1602_v20 = vsub.f32 %v12262_v54, %v1542_v24 }
 0x36c   : > { %v1494_v8 = vpop.xlane.xlu1 %1493 }
 0x36d   : > { %10999 = vpow2.f32 %v1649_v43  ;;  %v1586_v45 = vsub.f32 %v12265_v56, %v1494_v8  ;;  %v1651_v10 = vmul.f32 1.442695, %v1602_v20 }
 0x36e   : > { %v1497_v0 = vpop.xlane.xlu0 %1496 }
 0x36f   : > { %v1619_v42 = vmul.f32 1.442695, %v1586_v45  ;;  %v1587_v28 = vsub.f32 %v12270_v63, %v1497_v0 }
 0x370   : > { %v1551_v48 = vpop.xlane.xlu1 %1550 }
 0x371   : > { %11001 = vpow2.f32 %v1619_v42  ;;  %v1621_v18 = vmul.f32 1.442695, %v1587_v28  ;;  %v1605_v46 = vsub.f32 %v12279_v6, %v1551_v48 }
 0x372   : > { %11003 = vpow2.f32 %v1651_v10  ;;  %v1500_v50 = vpop.xlane.xlu0 %1499 }
 0x373   : > { %11005 = vpow2.f32 %v1621_v18  ;;  %v1657_v52 = vmul.f32 1.442695, %v1605_v46  ;;  %v1588_v54 = vsub.f32 %v12282_v7, %v1500_v50 }
 0x374   : > { %v1503_v62 = vpop.xlane.xlu1 %1502 }
 0x375   : > { %11007 = vpow2.f32 %v1657_v52  ;;  %v1623_v24 = vmul.f32 1.442695, %v1588_v54  ;;  %v1589_v56 = vsub.f32 %v12287_v12, %v1503_v62 }
 0x376   : > { %v1554_v43 = vpop.xlane.xlu0 %1553 }
 0x377   : > { %v12451_v45 = vpop.eup %10999  ;;  %11009 = vpow2.f32 %v1623_v24  ;;  %v1625_v63 = vmul.f32 1.442695, %v1589_v56  ;;  %v1606_v42 = vsub.f32 %v12292_v22, %v1554_v43 }
 0x378   : > { %v1563_v0 = vpop.xlane.xlu1 %1562  ;;  %v1729_v6 = vsel %vm1488_vm3, %v12451_v45, 0.0 }
 0x379   : > { %11011 = vpow2.f32 %v1625_v63  ;;  %v1659_v18 = vmul.f32 1.442695, %v1606_v42  ;;  %v1609_v7 = vsub.f32 %v12299_v30, %v1563_v0  ;;  %1730 = vadd.xlane.f32.xlu1 %v1729_v6 }
 0x37a   : > { %v1506_v48 = vpop.xlane.xlu0 %1505 }
 0x37b   : > { %v12457_v46 = vpop.eup %11001  ;;  %11013 = vpow2.f32 %v1659_v18  ;;  %v1665_v12 = vmul.f32 1.442695, %v1609_v7  ;;  %v1590_v10 = vsub.f32 %v12302_v31, %v1506_v48 }
 0x37c   : > { %v12460_v20 = vpop.eup %11003  ;;  %v1509_v8 = vpop.xlane.xlu1 %1508  ;;  %v1684_v22 = vsel %vm1488_vm3, %v12457_v46, 0.0 }
 0x37d   : > { %v12464_v28 = vpop.eup %11005  ;;  %11015 = vpow2.f32 %v1665_v12  ;;  %v1627_v50 = vmul.f32 1.442695, %v1590_v10  ;;  %v1591_v30 = vsub.f32 %v12307_v44, %v1509_v8  ;;  %1685 = vadd.xlane.f32.xlu0 %v1684_v22  ;;  %v1732_v43 = vsel %vm1488_vm3, %v12460_v20, 0.0 }
 0x37e   : > { %v1566_v52 = vpop.xlane.xlu0 %1565  ;;  %v1687_v54 = vsel %vm1488_vm3, %v12464_v28, 0.0 }
 0x37f   : > { %v12469_v62 = vpop.eup %11007  ;;  %11017 = vpow2.f32 %v1627_v50  ;;  %v1629_v31 = vmul.f32 1.442695, %v1591_v30  ;;  %v1610_v24 = vsub.f32 %v12312_v51, %v1566_v52  ;;  %1688 = vadd.xlane.f32.xlu1 %v1687_v54 }
 0x380   : > { %v1575_v56 = vpop.xlane.xlu1 %1574  ;;  %v1741_v6 = vsel %vm1488_vm3, %v12469_v62, 0.0 }
 0x381   : > { %v12474_v63 = vpop.eup %11009  ;;  %11019 = vpow2.f32 %v1629_v31  ;;  %v1667_v44 = vmul.f32 1.442695, %v1610_v24  ;;  %v1613_v42 = vsub.f32 %v12319_v1, %v1575_v56  ;;  %1733 = vadd.xlane.f32.xlu0 %v1732_v43 }
 0x382   : > { %v1512_v0 = vpop.xlane.xlu0 %1511  ;;  %v1690_v12 = vsel %vm1488_vm3, %v12474_v63, 0.0 }
 0x383   : > { %v12479_v18 = vpop.eup %11011  ;;  %11021 = vpow2.f32 %v1667_v44  ;;  %v1673_v51 = vmul.f32 1.442695, %v1613_v42  ;;  %v1592_v7 = vsub.f32 %v12323_v2, %v1512_v0  ;;  %1742 = vadd.xlane.f32.xlu1 %v1741_v6 }
 0x384   : > { %v1515_v48 = vpop.xlane.xlu1 %1514  ;;  %v1693_v50 = vsel %vm1488_vm3, %v12479_v18, 0.0 }
 0x385   : > { %v12484_v10 = vpop.eup %11013  ;;  %11023 = vpow2.f32 %v1673_v51  ;;  %v1631_v1 = vmul.f32 1.442695, %v1592_v7  ;;  %v1593_v8 = vsub.f32 %v12326_v4, %v1515_v48  ;;  %1691 = vadd.xlane.f32.xlu0 %v1690_v12 }
 0x386   : > { %v1578_v22 = vpop.xlane.xlu0 %1577  ;;  %v1744_v31 = vsel %vm1488_vm3, %v12484_v10, 0.0 }
 0x387   : > { %v12489_v30 = vpop.eup %11015  ;;  %11025 = vpow2.f32 %v1631_v1  ;;  %v1633_v2 = vmul.f32 1.442695, %v1593_v8  ;;  %v1614_v52 = vsub.f32 %v12333_v19, %v1578_v22  ;;  %1694 = vadd.xlane.f32.xlu1 %v1693_v50 }
 0x388   : > { %v1521_v54 = vpop.xlane.xlu1 %1520  ;;  %v1753_v44 = vsel %vm1488_vm3, %v12489_v30, 0.0 }
 0x389   : > { %v12494_v24 = vpop.eup %11017  ;;  %11027 = vpow2.f32 %v1633_v2  ;;  %v1675_v4 = vmul.f32 1.442695, %v1614_v52  ;;  %v1595_v56 = vsub.f32 %v12336_v25, %v1521_v54  ;;  %1745 = vadd.xlane.f32.xlu0 %v1744_v31 }
 0x38a   : > { %v1518_v43 = vpop.xlane.xlu0 %1517  ;;  %v1696_v51 = vsel %vm1488_vm3, %v12494_v24, 0.0 }
 0x38b   : > { %v12499_v42 = vpop.eup %11019  ;;  %11029 = vpow2.f32 %v1675_v4  ;;  %v1637_v19 = vmul.f32 1.442695, %v1595_v56  ;;  %v1594_v0 = vsub.f32 %v12342_v27, %v1518_v43  ;;  %1754 = vadd.xlane.f32.xlu1 %v1753_v44 }
 0x38c   : > { %v1527_v6 = vpop.xlane.xlu1 %1526  ;;  %v1699_v1 = vsel %vm1488_vm3, %v12499_v42, 0.0 }
 0x38d   : > { %v12504_v7 = vpop.eup %11021  ;;  %11031 = vpow2.f32 %v1637_v19  ;;  %v1635_v25 = vmul.f32 1.442695, %v1594_v0  ;;  %v1597_v48 = vsub.f32 %v12347_v29, %v1527_v6  ;;  %1697 = vadd.xlane.f32.xlu0 %v1696_v51 }
 0x38e   : > { %v1524_v12 = vpop.xlane.xlu0 %1523  ;;  %v1756_v2 = vsel %vm1488_vm3, %v12504_v7, 0.0 }
 0x38f   : > { %v12509_v8 = vpop.eup %11023  ;;  %11033 = vpow2.f32 %v1635_v25  ;;  %v1641_v27 = vmul.f32 1.442695, %v1597_v48  ;;  %v1596_v22 = vsub.f32 %v12352_v34, %v1524_v12  ;;  %1700 = vadd.xlane.f32.xlu1 %v1699_v1 }
 0x390   : > { %v1533_v50 = vpop.xlane.xlu1 %1532  ;;  %v1765_v4 = vsel %vm1488_vm3, %v12509_v8, 0.0 }
 0x391   : > { %v12514_v52 = vpop.eup %11025  ;;  %11035 = vpow2.f32 %v1641_v27  ;;  %v1639_v29 = vmul.f32 1.442695, %v1596_v22  ;;  %v1599_v54 = vsub.f32 %v12357_v49, %v1533_v50  ;;  %1757 = vadd.xlane.f32.xlu0 %v1756_v2 }
 0x392   : > { %v1530_v31 = vpop.xlane.xlu0 %1529  ;;  %v1702_v19 = vsel %vm1488_vm3, %v12514_v52, 0.0 }
 0x393   : > { %v12519_v56 = vpop.eup %11027  ;;  %11037 = vpow2.f32 %v1639_v29  ;;  %v1645_v34 = vmul.f32 1.442695, %v1599_v54  ;;  %v1598_v43 = vsub.f32 %v12362_v53, %v1530_v31  ;;  %1766 = vadd.xlane.f32.xlu1 %v1765_v4 }
 0x394   : > { %v1545_v44 = vpop.xlane.xlu1 %1544  ;;  %v1705_v25 = vsel %vm1488_vm3, %v12519_v56, 0.0 }
 0x395   : > { %v12524_v0 = vpop.eup %11029  ;;  %11039 = vpow2.f32 %v1645_v34  ;;  %v1643_v49 = vmul.f32 1.442695, %v1598_v43  ;;  %v1603_v6 = vsub.f32 %v12367_v61, %v1545_v44  ;;  %1703 = vadd.xlane.f32.xlu0 %v1702_v19 }
 0x396   : > { %v1536_v51 = vpop.xlane.xlu0 %1535  ;;  %v1768_v27 = vsel %vm1488_vm3, %v12524_v0, 0.0 }
 0x397   : > { %v12529_v48 = vpop.eup %11031  ;;  %11041 = vpow2.f32 %v1643_v49  ;;  %v1653_v53 = vmul.f32 1.442695, %v1603_v6  ;;  %v1600_v12 = vsub.f32 %v12372_v3, %v1536_v51  ;;  %1706 = vadd.xlane.f32.xlu1 %v1705_v25 }
 0x398   : > { %v1557_v1 = vpop.xlane.xlu1 %1556  ;;  %v1711_v29 = vsel %vm1488_vm3, %v12529_v48, 0.0 }
 0x399   : > { %v12534_v22 = vpop.eup %11033  ;;  %11043 = vpow2.f32 %v1653_v53  ;;  %v1647_v61 = vmul.f32 1.442695, %v1600_v12  ;;  %v1607_v50 = vsub.f32 %v12377_v9, %v1557_v1  ;;  %1769 = vadd.xlane.f32.xlu0 %v1768_v27 }
 0x39a   : > { %v1548_v2 = vpop.xlane.xlu0 %1547  ;;  %v1708_v34 = vsel %vm1488_vm3, %v12534_v22, 0.0 }
 0x39b   : > { %v12539_v54 = vpop.eup %11035  ;;  %11045 = vpow2.f32 %v1647_v61  ;;  %v1661_v3 = vmul.f32 1.442695, %v1607_v50  ;;  %v1604_v31 = vsub.f32 %v12382_v60, %v1548_v2  ;;  %1712 = vadd.xlane.f32.xlu1 %v1711_v29 }
 0x39c   : > { %v1569_v4 = vpop.xlane.xlu1 %1568  ;;  %v1717_v49 = vsel %vm1488_vm3, %v12539_v54, 0.0 }
 0x39d   : > { %v12544_v43 = vpop.eup %11037  ;;  %11047 = vpow2.f32 %v1661_v3  ;;  %v1655_v9 = vmul.f32 1.442695, %v1604_v31  ;;  %v1611_v44 = vsub.f32 %v12392_v32, %v1569_v4  ;;  %1709 = vadd.xlane.f32.xlu0 %v1708_v34 }
 0x39e   : > { %v1560_v19 = vpop.xlane.xlu0 %1559  ;;  %v1714_v25 = vsel %vm1488_vm3, %v12544_v43, 0.0 }
 0x39f   : > { %v12549_v6 = vpop.eup %11039  ;;  %11049 = vpow2.f32 %v1655_v9  ;;  %v1669_v60 = vmul.f32 1.442695, %v1611_v44  ;;  %v1608_v51 = vsub.f32 %v12389_v16, %v1560_v19  ;;  %1718 = vadd.xlane.f32.xlu1 %v1717_v49 }
 0x3a0   : > { %v1723_v1 = vsel %vm1488_vm3, %v12549_v6, 0.0 }
 0x3a1   : > { %v12554_v53 = vpop.eup %11041  ;;  %11051 = vpow2.f32 %v1669_v60  ;;  %v1663_v12 = vmul.f32 1.442695, %v1608_v51  ;;  %1715 = vadd.xlane.f32.xlu0 %v1714_v25 }
 0x3a2   : > { %v1572_v32 = vpop.xlane.xlu0 %1571  ;;  %v1720_v16 = vsel %vm1488_vm3, %v12554_v53, 0.0 }
 0x3a3   : > { %v12558_v27 = vpop.eup %11043  ;;  %11053 = vpow2.f32 %v1663_v12  ;;  %v1612_v61 = vsub.f32 %v12399_v23, %v1572_v32  ;;  %1724 = vadd.xlane.f32.xlu1 %v1723_v1 }
 0x3a4   : > { %v1735_v29 = vsel %vm1488_vm3, %v12558_v27, 0.0  ;;  %v1581_v25 = vpop.xlane.xlu1 %1580 }
 0x3a5   : > { %v12563_v50 = vpop.eup %11045  ;;  %v1671_v2 = vmul.f32 1.442695, %v1612_v61  ;;  %1721 = vadd.xlane.f32.xlu0 %v1720_v16  ;;  %v1615_v12 = vsub.f32 %v12404_v5, %v1581_v25 }
 0x3a6   : > { %v1726_v31 = vsel %vm1488_vm3, %v12563_v50, 0.0  ;;  %v1584_v32 = vpop.xlane.xlu0 %1583 }
 0x3a7   : > { %v12567_v3 = vpop.eup %11047  ;;  %11055 = vpow2.f32 %v1671_v2  ;;  %1736 = vadd.xlane.f32.xlu1 %v1735_v29  ;;  %v1677_v1 = vmul.f32 1.442695, %v1615_v12  ;;  %v1616_v61 = vsub.f32 %v12409_v17, %v1584_v32 }
 0x3a8   : > { %v1747_v23 = vsel %vm1488_vm3, %v12567_v3, 0.0 }
 0x3a9   : > { %v12571_v4 = vpop.eup %11049  ;;  %1727 = vadd.xlane.f32.xlu0 %v1726_v31  ;;  %11057 = vpow2.f32 %v1677_v1  ;;  %v1679_v16 = vmul.f32 1.442695, %v1616_v61 }
 0x3aa   : > { %v1738_v9 = vsel %vm1488_vm3, %v12571_v4, 0.0 }
 0x3ab   : > { %v12575_v34 = vpop.eup %11051  ;;  %1748 = vadd.xlane.f32.xlu1 %v1747_v23  ;;  %11059 = vpow2.f32 %v1679_v16 }
 0x3ac   : > { %v1759_v19 = vsel %vm1488_vm3, %v12575_v34, 0.0 }
 0x3ad   : > { %v12579_v44 = vpop.eup %11053  ;;  %1739 = vadd.xlane.f32.xlu0 %v1738_v9 }
 0x3ae   : > { %v1750_v49 = vsel %vm1488_vm3, %v12579_v44, 0.0 }
 0x3af   : > { %1760 = vadd.xlane.f32.xlu1 %v1759_v19 }
 0x3b1   : > { %v12585_v60 = vpop.eup %11055  ;;  %1751 = vadd.xlane.f32.xlu0 %v1750_v49 }
 0x3b2   : > { %v1762_v51 = vsel %vm1488_vm3, %v12585_v60, 0.0 }
 0x3b3   : > { %v12595_v2 = vpop.eup %11057 }
 0x3b4   : > { %v1771_v29 = vsel %vm1488_vm3, %v12595_v2, 0.0 }
 0x3b5   : > { %1763 = vadd.xlane.f32.xlu0 %v1762_v51  ;;  %v12599_v31 = vpop.eup %11059 }
 0x3b6   : > { %v1774_v23 = vsel %vm1488_vm3, %v12599_v31, 0.0 }
 0x3c0   : > { %2562 = vrot.lane.b32.xlu1 %v12095_v40, %s11710_s9 }
 0x3cb   : > { %2515 = vrot.lane.b32.xlu0 %v12099_v41, %s11710_s9 }
 0x3e4   : > { %1772 = vadd.xlane.f32.xlu1 %v1771_v29 }
 0x3ea   : > { %1775 = vadd.xlane.f32.xlu0 %v1774_v23  ;;  %v1683_v5 = vpop.xlane.xlu1 %1682 }
 0x3eb   : > { %11061 = vrcp.f32 %v1683_v5 }
 0x3f5   : > { %2662 = vrot.lane.b32.xlu1 %v12030_v35, %s11711_s10  ;;  %v11062_v12 = vpop.eup %11061 }
 0x3f6   : > { %v1809_v61 = vmul.f32 %v11062_v12, %v12436_v26  ;;  %v15468_v26 = vmov 0.0  }
 0x3f9   : > { %2713 = vrot.lane.b32.xlu1 %v12053_v57, %s11711_s10 }
 0x3fd   : > { %2764 = vrot.lane.b32.xlu1 %v12050_v55, %s11711_s10 }
 0x400   : > { %2611 = vrot.lane.b32.xlu0 %v12033_v37, %s11711_s10 }
 0x401   : > { %2815 = vrot.lane.b32.xlu1 %v12073_v13, %s11711_s10 }
 0x404   : > { %2609 = vrot.lane.b32.xlu0 %v12033_v37, %s11712_s11 }
 0x405   : > { %2866 = vrot.lane.b32.xlu1 %v12070_v11, %s11711_s10 }
 0x406   : > { %v12617_v17 = vpop.xlane.xlu1 %1730 }
 0x408   : > { %2660 = vrot.lane.b32.xlu0 %v12030_v35, %s11712_s11 }
 0x409   : > { %2917 = vrot.lane.b32.xlu1 %v12093_v36, %s11711_s10 }
 0x40a   : > { %v1686_v9 = vpop.xlane.xlu0 %1685 }
 0x40b   : > { %11063 = vrcp.f32 %v1686_v9 }
 0x40c   : > { %v1689_v19 = vpop.xlane.xlu1 %1688  ;;  %2711 = vrot.lane.b32.xlu0 %v12053_v57, %s11712_s11 }
 0x40d   : > { %2968 = vrot.lane.b32.xlu1 %v12090_v33, %s11711_s10  ;;  %11065 = vrcp.f32 %v1689_v19 }
 0x40e   : > { %v12627_v49 = vpop.xlane.xlu0 %1733 }
 0x410   : > { %v12629_v51 = vpop.xlane.xlu1 %1742  ;;  %2762 = vrot.lane.b32.xlu0 %v12050_v55, %s11712_s11 }
 0x411   : > { %3019 = vrot.lane.b32.xlu1 %v12037_v39, %s11711_s10 }
 0x412   : > { %v1692_v25 = vpop.xlane.xlu0 %1691 }
 0x413   : > { %11067 = vrcp.f32 %v1692_v25 }
 0x414   : > { %v1695_v32 = vpop.xlane.xlu1 %1694  ;;  %2813 = vrot.lane.b32.xlu0 %v12073_v13, %s11712_s11 }
 0x415   : > { %v11064_v1 = vpop.eup %11063  ;;  %3070 = vrot.lane.b32.xlu1 %v12035_v38, %s11711_s10  ;;  %11069 = vrcp.f32 %v1695_v32 }
 0x416   : > { %v1810_v16 = vmul.f32 %v11064_v1, %v12457_v46  ;;  %v12641_v29 = vpop.xlane.xlu0 %1745 }
 0x417   : > { %v11066_v19 = vpop.eup %11065 }
 0x418   : > { %v12643_v23 = vpop.xlane.xlu1 %1754  ;;  %2864 = vrot.lane.b32.xlu0 %v12070_v11, %s11712_s11  ;;  %v1841_v5 = vpack.c.bf16 %v1810_v16, %v1809_v61  ;;  %v1811_v12 = vmul.f32 %v11066_v19, %v12464_v28 }
 0x419   : > { %3121 = vrot.lane.b32.xlu1 %v12057_v59, %s11711_s10 }
 0x41a   : > { %9930 = vmatmul.mubr.msk.bf16.vlgmr.msra.gmra.mrb[32].mxu0 %vm1488_vm3, %v1841_v5  ;;  %v1698_v9 = vpop.xlane.xlu0 %1697 }
 0x41b   : > { %9940 = vmatpush3.bf16.msra.mxu0 %v12421_v47  ;;  %11071 = vrcp.f32 %v1698_v9  ;;  %9941 = vmatprep.mubr.msk.bf16.mxu0 %vm11708_vm1, %v15468_v26 }
 0x41c   : > { %v1701_v46 = vpop.xlane.xlu1 %1700  ;;  %2915 = vrot.lane.b32.xlu0 %v12093_v36, %s11712_s11  ;;  %9951 = vmatprep.subr.bf16.mxu0 %v15468_v26 }
 0x41d   : > { %v11068_v25 = vpop.eup %11067  ;;  %3172 = vrot.lane.b32.xlu1 %v12055_v58, %s11711_s10  ;;  %11073 = vrcp.f32 %v1701_v46 }
 0x41e   : > { %v1812_v32 = vmul.f32 %v11068_v25, %v12474_v63  ;;  %v12660_v1 = vpop.xlane.xlu0 %1757 }
 0x41f   : > { %v11070_v5 = vpop.eup %11069 }
 0x420   : > { %v12662_v47 = vpop.xlane.xlu1 %1766  ;;  %2966 = vrot.lane.b32.xlu0 %v12090_v33, %s11712_s11  ;;  %v1842_v61 = vpack.c.bf16 %v1812_v32, %v1811_v12  ;;  %v1813_v9 = vmul.f32 %v11070_v5, %v12479_v18 }
 0x421   : > { %3223 = vrot.lane.b32.xlu1 %v12077_v15, %s11711_s10 }
 0x422   : > { %9936 = vmatmul.mubr.msk.bf16.vlgmr.msra.gmra.mrb[64].mxu1 %vm1488_vm3, %v1842_v61  ;;  %v1704_v16 = vpop.xlane.xlu0 %1703  ;;  %v15469_v61 = vld [vmem:[#allocation18_spill] sm:$0xff] }
 0x423   : > { %9946 = vmatpush3.bf16.msra.mxu1 %v12415_v21  ;;  %11075 = vrcp.f32 %v1704_v16  ;;  %9947 = vmatprep.mubr.msk.bf16.mxu1 %vm11708_vm1, %v15468_v26 }
 0x424   : > { %v1707_v28 = vpop.xlane.xlu1 %1706  ;;  %3017 = vrot.lane.b32.xlu0 %v12037_v39, %s11712_s11  ;;  %9957 = vmatprep.subr.bf16.mxu1 %v15468_v26 }
 0x425   : > { %v11072_v63 = vpop.eup %11071  ;;  %3274 = vrot.lane.b32.xlu1 %v12075_v14, %s11711_s10  ;;  %11077 = vrcp.f32 %v1707_v28 }
 0x426   : > { %v1814_v19 = vmul.f32 %v11072_v63, %v12494_v24  ;;  %v12679_v46 = vpop.xlane.xlu0 %1769 }
 0x427   : > { %v11074_v32 = vpop.eup %11073 }
 0x428   : > { %v1713_v21 = vpop.xlane.xlu1 %1712  ;;  %3068 = vrot.lane.b32.xlu0 %v12035_v38, %s11712_s11  ;;  %v1843_v25 = vpack.c.bf16 %v1814_v19, %v1813_v9  ;;  %v1815_v16 = vmul.f32 %v11074_v32, %v12499_v42 }
 0x429   : > { %3325 = vrot.lane.b32.xlu1 %v12099_v41, %s11711_s10 }
 0x42a   : > { %9942 = vmatmul.mubr.msk.bf16.vlgmr.msra.gmra.mrb[36].mxu0 %vm1488_vm3, %v1843_v25  ;;  %v1710_v12 = vpop.xlane.xlu0 %1709  ;;  %v15470_v25 = vld [vmem:[#allocation15_spill] sm:$0xff] }
 0x42b   : > { %9952 = vmatpush3.bf16.msra.mxu0 %v15469_v61  ;;  %11079 = vrcp.f32 %v1710_v12  ;;  %9953 = vmatprep.mubr.msk.bf16.mxu0 %vm11708_vm1, %v15468_v26 }
 0x42c   : > { %v1719_v18 = vpop.xlane.xlu1 %1718  ;;  %3119 = vrot.lane.b32.xlu0 %v12057_v59, %s11712_s11  ;;  %9963 = vmatprep.subr.bf16.mxu0 %v15468_v26  ;;  %11081 = vrcp.f32 %v1713_v21 }
 0x42d   : > { %v11076_v24 = vpop.eup %11075  ;;  %3376 = vrot.lane.b32.xlu1 %v12095_v40, %s11711_s10 }
 0x42e   : > { %v1816_v5 = vmul.f32 %v11076_v24, %v12514_v52  ;;  %v1716_v28 = vpop.xlane.xlu0 %1715 }
 0x42f   : > { %11083 = vrcp.f32 %v1716_v28  ;;  %v11078_v21 = vpop.eup %11077  ;;  %v15471_v28 = vld [vmem:[#allocation24_spill] sm:$0xff] }
 0x430   : > { %3170 = vrot.lane.b32.xlu0 %v12055_v58, %s11712_s11  ;;  %v1844_v63 = vpack.c.bf16 %v1816_v5, %v1815_v16  ;;  %11085 = vrcp.f32 %v1719_v18  ;;  %v1725_v9 = vpop.xlane.xlu1 %1724  ;;  %v1817_v52 = vmul.f32 %v11078_v21, %v12519_v56 }
 0x431   : > { %3374 = vrot.lane.b32.xlu1 %v12095_v40, %s11712_s11 }
 0x432   : > { %9948 = vmatmul.mubr.msk.bf16.vlgmr.msra.gmra.mrb[68].mxu1 %vm1488_vm3, %v1844_v63  ;;  %v1722_v19 = vpop.xlane.xlu0 %1721 }
 0x433   : > { %9958 = vmatpush3.bf16.msra.mxu1 %v15470_v25  ;;  %11087 = vrcp.f32 %v1722_v19  ;;  %9959 = vmatprep.mubr.msk.bf16.mxu1 %vm11708_vm1, %v15468_v26  ;;  %v15472_v19 = vld [vmem:[#allocation16_spill] sm:$0xff] }
 0x434   : > { %3221 = vrot.lane.b32.xlu0 %v12077_v15, %s11712_s11  ;;  %9969 = vmatprep.subr.bf16.mxu1 %v15468_v26  ;;  %11089 = vrcp.f32 %v1725_v9  ;;  %v1737_v56 = vpop.xlane.xlu1 %1736 }
 0x435   : > { %v11080_v42 = vpop.eup %11079  ;;  %3793 = vrot.lane.b32.xlu1 %v12033_v37, %s11713_s13  ;;  %11091 = vrcp.f32 %v12627_v49 }
 0x436   : > { %v1818_v12 = vmul.f32 %v11080_v42, %v12534_v22  ;;  %v1728_v32 = vpop.xlane.xlu0 %1727  ;;  %v11082_v61 = vpop.eup %11081 }
 0x437   : > { %11093 = vrcp.f32 %v1728_v32  ;;  %v1819_v16 = vmul.f32 %v11082_v61, %v12529_v48  ;;  %v15473_v32 = vld [vmem:[#allocation20_spill] sm:$0xff] }
 0x438   : > { %3272 = vrot.lane.b32.xlu0 %v12075_v14, %s11712_s11  ;;  %v1845_v18 = vpack.c.bf16 %v1818_v12, %v1817_v52  ;;  %11095 = vrcp.f32 %v12617_v17  ;;  %v1749_v52 = vpop.xlane.xlu1 %1748 }
 0x439   : > { %v11084_v24 = vpop.eup %11083  ;;  %3887 = vrot.lane.b32.xlu1 %v12053_v57, %s11713_s13 }
 0x43a   : > { %v1820_v49 = vmul.f32 %v11084_v24, %v12544_v43  ;;  %9954 = vmatmul.mubr.msk.bf16.vlgmr.msra.gmra.mrb[40].mxu0 %vm1488_vm3, %v1845_v18  ;;  %v1740_v22 = vpop.xlane.xlu0 %1739  ;;  %v11086_v5 = vpop.eup %11085  ;;  %v15474_v24 = vld [vmem:[#allocation17_spill] sm:$0xff] }
 0x43b   : > { %9964 = vmatpush3.bf16.msra.mxu0 %v15471_v28  ;;  %11097 = vrcp.f32 %v1740_v22  ;;  %9965 = vmatprep.mubr.msk.bf16.mxu0 %vm11708_vm1, %v15468_v26  ;;  %v1821_v43 = vmul.f32 %v11086_v5, %v12539_v54 }
 0x43c   : > { %3323 = vrot.lane.b32.xlu0 %v12099_v41, %s11712_s11  ;;  %v1846_v17 = vpack.c.bf16 %v1820_v49, %v1819_v16  ;;  %9975 = vmatprep.subr.bf16.mxu0 %v15468_v26  ;;  %11099 = vrcp.f32 %v1737_v56  ;;  %v1761_v56 = vpop.xlane.xlu1 %1760  ;;  %s15235_s11 = scalar_lea.vmem [#allocation10], %s9310_s30 }
 0x43d   : > { %v11088_v48 = vpop.eup %11087  ;;  %3981 = vrot.lane.b32.xlu1 %v12073_v13, %s11713_s13  ;;  %11101 = vrcp.f32 %v12641_v29 }
 0x43e   : > { %v1822_v63 = vmul.f32 %v11088_v48, %v12554_v53  ;;  %9960 = vmatmul.mubr.msk.bf16.vlgmr.msra.gmra.mrb[72].mxu1 %vm1488_vm3, %v1846_v17  ;;  %v11090_v9 = vpop.eup %11089  ;;  %v1752_v25 = vpop.xlane.xlu0 %1751  ;;  %11103 = vrcp.f32 %v12629_v51  ;;  %v15476_v48 = vld [vmem:[#allocation22_spill] sm:$0xff] }
 0x43f   : > { %9970 = vmatpush3.bf16.msra.mxu1 %v15472_v19  ;;  %9971 = vmatprep.mubr.msk.bf16.mxu1 %vm11708_vm1, %v15468_v26  ;;  %v11092_v21 = vpop.eup %11091  ;;  %v1823_v53 = vmul.f32 %v11090_v9, %v12549_v6  ;;  %11105 = vrcp.f32 %v1752_v25  ;;  %v15477_v9 = vld [vmem:[#allocation19_spill] sm:$0xff] }
 0x440   : > { %3840 = vrot.lane.b32.xlu0 %v12030_v35, %s11713_s13  ;;  %v1847_v42 = vpack.c.bf16 %v1822_v63, %v1821_v43  ;;  %9981 = vmatprep.subr.bf16.mxu1 %v15468_v26  ;;  %v1826_v61 = vmul.f32 %v11092_v21, %v12460_v20  ;;  %11107 = vrcp.f32 %v1749_v52  ;;  %v15478_v25 = vld [vmem:[#allocation23_spill] sm:$0xff] }
 0x441   : > { %v11094_v54 = vpop.eup %11093  ;;  %4075 = vrot.lane.b32.xlu1 %v12093_v36, %s11713_s13  ;;  %11109 = vrcp.f32 %v12660_v1 }
 0x442   : > { %v1824_v29 = vmul.f32 %v11094_v54, %v12563_v50  ;;  %9966 = vmatmul.mubr.msk.bf16.vlgmr.msra.gmra.mrb[44].mxu0 %vm1488_vm3, %v1847_v42  ;;  %v11096_v12 = vpop.eup %11095  ;;  %v1764_v16 = vpop.xlane.xlu0 %1763  ;;  %11111 = vrcp.f32 %v12643_v23 }
 0x443   : > { %9976 = vmatpush3.bf16.msra.mxu0 %v15473_v32  ;;  %9977 = vmatprep.mubr.msk.bf16.mxu0 %vm11708_vm1, %v15468_v26  ;;  %v1825_v50 = vmul.f32 %v11096_v12, %v12451_v45  ;;  %11113 = vrcp.f32 %v1764_v16  ;;  %v2563_v32 = vpop.permute.xlu1 %2562 }
 0x444   : > { %3934 = vrot.lane.b32.xlu0 %v12050_v55, %s11713_s13  ;;  %v1848_v51 = vpack.c.bf16 %v1824_v29, %v1823_v53  ;;  %9987 = vmatprep.subr.bf16.mxu0 %v15468_v26  ;;  %11115 = vrcp.f32 %v1761_v56 }
 0x445   : > { %v11098_v6 = vpop.eup %11097  ;;  %4169 = vrot.lane.b32.xlu1 %v12037_v39, %s11713_s13  ;;  %v1849_v49 = vpack.c.bf16 %v1826_v61, %v1825_v50  ;;  %11117 = vrcp.f32 %v12679_v46 }
 0x446   : > { %9972 = vmatmul.mubr.msk.bf16.vlgmr.msra.gmra.mrb[76].mxu1 %vm1488_vm3, %v1848_v51  ;;  %v11100_v18 = vpop.eup %11099  ;;  %v1828_v20 = vmul.f32 %v11098_v6, %v12571_v4  ;;  %v15475_v4 = vld [vmem:[#allocation21_spill] sm:$0xff]  ;;  %11119 = vrcp.f32 %v12662_v47  ;;  %v2516_v29 = vpop.permute.xlu0 %2515 }
 0x447   : > { %9982 = vmatpush3.bf16.msra.mxu1 %v15474_v24  ;;  %9983 = vmatprep.mubr.msk.bf16.mxu1 %vm11708_vm1, %v15468_v26  ;;  %v11102_v45 = vpop.eup %11101  ;;  %v1827_v1 = vmul.f32 %v11100_v18, %v12558_v27 }
 0x448   : > { %4028 = vrot.lane.b32.xlu0 %v12070_v11, %s11713_s13  ;;  %9993 = vmatprep.subr.bf16.mxu1 %v15468_v26  ;;  %v11104_v22 = vpop.eup %11103  ;;  %v1830_v5 = vmul.f32 %v11102_v45, %v12484_v10 }
 0x449   : > { %4263 = vrot.lane.b32.xlu1 %v12057_v59, %s11713_s13  ;;  %v1850_v23 = vpack.c.bf16 %v1828_v20, %v1827_v1  ;;  %v11106_v28 = vpop.eup %11105  ;;  %v1829_v27 = vmul.f32 %v11104_v22, %v12469_v62 }
 0x44a   : > { %9978 = vmatmul.mubr.msk.bf16.vlgmr.msra.gmra.mrb[48].mxu0 %vm1488_vm3, %v1849_v49  ;;  %v11108_v17 = vpop.eup %11107  ;;  %v1832_v10 = vmul.f32 %v11106_v28, %v12579_v44 }
 0x44b   : > { %9988 = vmatpush3.bf16.msra.mxu0 %v15475_v4  ;;  %9989 = vmatprep.mubr.msk.bf16.mxu0 %vm11708_vm1, %v15468_v26  ;;  %v1851_v43 = vpack.c.bf16 %v1830_v5, %v1829_v27  ;;  %v11110_v63 = vpop.eup %11109  ;;  %v1831_v62 = vmul.f32 %v11108_v17, %v12567_v3 }
 0x44c   : > { %4122 = vrot.lane.b32.xlu0 %v12090_v33, %s11713_s13  ;;  %9999 = vmatprep.subr.bf16.mxu0 %v15468_v26  ;;  %v11112_v46 = vpop.eup %11111  ;;  %v1834_v44 = vmul.f32 %v11110_v63, %v12504_v7 }
 0x44d   : > { %4310 = vrot.lane.b32.xlu1 %v12055_v58, %s11713_s13  ;;  %v1852_v19 = vpack.c.bf16 %v1832_v10, %v1831_v62  ;;  %v11114_v47 = vpop.eup %11113  ;;  %v1833_v21 = vmul.f32 %v11112_v46, %v12489_v30 }
 0x44e   : > { %9984 = vmatmul.mubr.msk.bf16.vlgmr.msra.gmra.mrb[80].mxu1 %vm1488_vm3, %v1850_v23  ;;  %v11116_v3 = vpop.eup %11115  ;;  %v1836_v42 = vmul.f32 %v11114_v47, %v12585_v60 }
 0x44f   : > { %9994 = vmatpush3.bf16.msra.mxu1 %v15476_v48  ;;  %9995 = vmatprep.mubr.msk.bf16.mxu1 %vm11708_vm1, %v15468_v26  ;;  %v1853_v7 = vpack.c.bf16 %v1834_v44, %v1833_v21  ;;  %v11118_v54 = vpop.eup %11117  ;;  %v1835_v53 = vmul.f32 %v11116_v3, %v12575_v34 }
 0x450   : > { %4216 = vrot.lane.b32.xlu0 %v12035_v38, %s11713_s13  ;;  %10005 = vmatprep.subr.bf16.mxu1 %v15468_v26  ;;  %v11120_v30 = vpop.eup %11119  ;;  %v1838_v52 = vmul.f32 %v11118_v54, %v12524_v0 }
 0x451   : > { %4404 = vrot.lane.b32.xlu1 %v12075_v14, %s11713_s13  ;;  %v1854_v12 = vpack.c.bf16 %v1836_v42, %v1835_v53  ;;  %v1837_v60 = vmul.f32 %v11120_v30, %v12509_v8 }
 0x452   : > { %9990 = vmatmul.mubr.msk.bf16.vlgmr.msra.gmra.mrb[52].mxu0 %vm1488_vm3, %v1851_v43 }
 0x453   : > { %10000 = vmatpush3.bf16.msra.mxu0 %v15477_v9  ;;  %10001 = vmatprep.mubr.msk.bf16.mxu0 %vm11708_vm1, %v15468_v26  ;;  %v1855_v34 = vpack.c.bf16 %v1838_v52, %v1837_v60 }
 0x454   : > { %4357 = vrot.lane.b32.xlu0 %v12077_v15, %s11713_s13  ;;  %10011 = vmatprep.subr.bf16.mxu0 %v15468_v26 }
 0x456   : > { %9996 = vmatmul.mubr.msk.bf16.vlgmr.msra.gmra.mrb[84].mxu1 %vm1488_vm3, %v1852_v19 }
 0x457   : > { %10006 = vmatpush3.bf16.msra.mxu1 %v15478_v25  ;;  %10007 = vmatprep.mubr.msk.bf16.mxu1 %vm11708_vm1, %v15468_v26 }
 0x458   : > { %10017 = vmatprep.subr.bf16.mxu1 %v15468_v26 }
 0x45a   : > { %10002 = vmatmul.mubr.msk.bf16.vlgmr.msra.gmra.mrb[56].mxu0 %vm1488_vm3, %v1853_v7 }
 0x45b   : > { %10012 = vmatpush3.bf16.msra.mxu0 %v2516_v29  ;;  %10013 = vmatprep.mubr.msk.bf16.mxu0 %vm11708_vm1, %v15468_v26 }
 0x45c   : > { %10023 = vmatprep.subr.bf16.mxu0 %v15468_v26 }
 0x45e   : > { %10008 = vmatmul.mubr.msk.bf16.vlgmr.msra.gmra.mrb[88].mxu1 %vm1488_vm3, %v1854_v12 }
 0x45f   : > { %10018 = vmatpush3.bf16.msra.mxu1 %v2563_v32  ;;  %10019 = vmatprep.mubr.msk.bf16.mxu1 %vm11708_vm1, %v15468_v26 }
 0x460   : > { %10029 = vmatprep.subr.bf16.mxu1 %v15468_v26 }
 0x462   : > { %10014 = vmatmul.mubr.msk.bf16.vlgmr.msra.gmra.mrb[60].mxu0 %vm1488_vm3, %v1855_v34 }
 0x463   : > { %10025 = vmatprep.mubr.msk.bf16.mxu0 %vm11708_vm1, %v15468_v26 }
 0x471   : > { %v1773_v0 = vpop.xlane.xlu1 %1772 }
 0x472   : > { %11121 = vrcp.f32 %v1773_v0 }
 0x475   : > { %v2663_v61 = vpop.permute.xlu1 %2662 }
 0x476   : > { %v2668_v23 = vsel %vm690_vm2, %v2663_v61, 0 }
 0x477   : > { %v1776_v51 = vpop.xlane.xlu0 %1775 }
 0x478   : > { %11123 = vrcp.f32 %v1776_v51 }
 0x479   : > { %v2714_v8 = vpop.permute.xlu1 %2713 }
 0x47a   : > { %v2719_v22 = vsel %vm690_vm2, %v2714_v8, 0 }
 0x47b   : > { %v2612_v6 = vpop.permute.xlu0 %2611 }
 0x47c   : > { %v2617_v50 = vsel %vm690_vm2, %v2612_v6, 0  ;;  %v11122_v20 = vpop.eup %11121 }
 0x47d   : > { %v2765_v18 = vpop.permute.xlu1 %2764  ;;  %10024 = vmatpush3.bf16.xpose.msra.mxu0 %v2617_v50  ;;  %v1839_v45 = vmul.f32 %v11122_v20, %v12595_v2 }
 0x47e   : > { %10035 = vmatprep.subr.bf16.mxu0 %v15468_v26  ;;  %v2770_v48 = vsel %vm690_vm2, %v2765_v18, 0 }
 0x47f   : > { %v2610_v24 = vpop.permute.xlu0 %2609 }
 0x481   : > { %v2816_v16 = vpop.permute.xlu1 %2815 }
 0x482   : > { %v11124_v49 = vpop.eup %11123  ;;  %v2821_v27 = vsel %vm690_vm2, %v2816_v16, 0 }
 0x483   : > { %v1840_v1 = vmul.f32 %v11124_v49, %v12599_v31  ;;  %v2661_v56 = vpop.permute.xlu0 %2660 }
 0x484   : > { %10026 = vmatmul.mubr.msk.bf16.vlgmr.msra.gmra.mrb[64].mxu0 %vm690_vm2, %v2610_v24 }
 0x485   : > { %v2867_v4 = vpop.permute.xlu1 %2866  ;;  %10036 = vmatpush3.bf16.xpose.msra.mxu0 %v2719_v22  ;;  %v1856_v5 = vpack.c.bf16 %v1840_v1, %v1839_v45  ;;  %10037 = vmatprep.mubr.msk.bf16.mxu0 %vm11708_vm1, %v15468_v26 }
 0x486   : > { %10047 = vmatprep.subr.bf16.mxu0 %v15468_v26  ;;  %v2872_v9 = vsel %vm690_vm2, %v2867_v4, 0 }
 0x487   : > { %10020 = vmatmul.mubr.msk.bf16.vlgmr.msra.gmra.mrb[92].mxu1 %vm1488_vm3, %v1856_v5  ;;  %v2712_v2 = vpop.permute.xlu0 %2711 }
 0x488   : > { %10030 = vmatpush3.bf16.xpose.msra.mxu1 %v2668_v23  ;;  %10031 = vmatprep.mubr.msk.bf16.mxu1 %vm11708_vm1, %v15468_v26 }
 0x489   : > { %v2918_v31 = vpop.permute.xlu1 %2917  ;;  %10041 = vmatprep.subr.bf16.mxu1 %v15468_v26 }
 0x48a   : > { %v2923_v62 = vsel %vm690_vm2, %v2918_v31, 0 }
 0x48b   : > { %v2763_v28 = vpop.permute.xlu0 %2762 }
 0x48c   : > { %10038 = vmatmul.mubr.msk.bf16.vlgmr.msra.gmra.mrb[68].mxu0 %vm690_vm2, %v2712_v2 }
 0x48d   : > { %v2969_v17 = vpop.permute.xlu1 %2968  ;;  %10048 = vmatpush3.bf16.xpose.msra.mxu0 %v2821_v27  ;;  %10049 = vmatprep.mubr.msk.bf16.mxu0 %vm11708_vm1, %v15468_v26 }
 0x48e   : > { %10059 = vmatprep.subr.bf16.mxu0 %v15468_v26  ;;  %v2974_v25 = vsel %vm690_vm2, %v2969_v17, 0 }
 0x48f   : > { %10032 = vmatmul.mubr.msk.bf16.vlgmr.msra.gmra.mrb[96].mxu1 %vm690_vm2, %v2661_v56  ;;  %v2814_v10 = vpop.permute.xlu0 %2813 }
 0x490   : > { %10042 = vmatpush3.bf16.xpose.msra.mxu1 %v2770_v48  ;;  %10043 = vmatprep.mubr.msk.bf16.mxu1 %vm11708_vm1, %v15468_v26 }
 0x491   : > { %v3020_v43 = vpop.permute.xlu1 %3019  ;;  %10053 = vmatprep.subr.bf16.mxu1 %v15468_v26 }
 0x492   : > { %v3025_v21 = vsel %vm690_vm2, %v3020_v43, 0 }
 0x493   : > { %v2865_v63 = vpop.permute.xlu0 %2864 }
 0x494   : > { %10050 = vmatmul.mubr.msk.bf16.vlgmr.msra.gmra.mrb[72].mxu0 %vm690_vm2, %v2814_v10 }
 0x495   : > { %v3071_v46 = vpop.permute.xlu1 %3070  ;;  %10060 = vmatpush3.bf16.xpose.msra.mxu0 %v2923_v62  ;;  %10061 = vmatprep.mubr.msk.bf16.mxu0 %vm11708_vm1, %v15468_v26 }
 0x496   : > { %10071 = vmatprep.subr.bf16.mxu0 %v15468_v26  ;;  %v3076_v30 = vsel %vm690_vm2, %v3071_v46, 0 }
 0x497   : > { %10044 = vmatmul.mubr.msk.bf16.vlgmr.msra.gmra.mrb[100].mxu1 %vm690_vm2, %v2763_v28  ;;  %v2916_v44 = vpop.permute.xlu0 %2915 }
 0x498   : > { %10054 = vmatpush3.bf16.xpose.msra.mxu1 %v2872_v9  ;;  %10055 = vmatprep.mubr.msk.bf16.mxu1 %vm11708_vm1, %v15468_v26 }
 0x499   : > { %v3122_v19 = vpop.permute.xlu1 %3121  ;;  %10065 = vmatprep.subr.bf16.mxu1 %v15468_v26 }
 0x49a   : > { %v3127_v53 = vsel %vm690_vm2, %v3122_v19, 0 }
 0x49b   : > { %v2967_v47 = vpop.permute.xlu0 %2966 }
 0x49c   : > { %10062 = vmatmul.mubr.msk.bf16.vlgmr.msra.gmra.mrb[76].mxu0 %vm690_vm2, %v2916_v44 }
 0x49d   : > { %v3173_v3 = vpop.permute.xlu1 %3172  ;;  %10072 = vmatpush3.bf16.xpose.msra.mxu0 %v3025_v21  ;;  %10073 = vmatprep.mubr.msk.bf16.mxu0 %vm11708_vm1, %v15468_v26 }
 0x49e   : > { %10083 = vmatprep.subr.bf16.mxu0 %v15468_v26  ;;  %v3178_v34 = vsel %vm690_vm2, %v3173_v3, 0 }
 0x49f   : > { %10056 = vmatmul.mubr.msk.bf16.vlgmr.msra.gmra.mrb[104].mxu1 %vm690_vm2, %v2865_v63  ;;  %v3018_v42 = vpop.permute.xlu0 %3017 }
 0x4a0   : > { %10066 = vmatpush3.bf16.xpose.msra.mxu1 %v2974_v25  ;;  %10067 = vmatprep.mubr.msk.bf16.mxu1 %vm11708_vm1, %v15468_v26 }
 0x4a1   : > { %v3224_v7 = vpop.permute.xlu1 %3223  ;;  %10077 = vmatprep.subr.bf16.mxu1 %v15468_v26 }
 0x4a2   : > { %v3229_v32 = vsel %vm690_vm2, %v3224_v7, 0 }
 0x4a3   : > { %v3069_v54 = vpop.permute.xlu0 %3068 }
 0x4a4   : > { %10074 = vmatmul.mubr.msk.bf16.vlgmr.msra.gmra.mrb[80].mxu0 %vm690_vm2, %v3018_v42 }
 0x4a5   : > { %v3275_v29 = vpop.permute.xlu1 %3274  ;;  %10084 = vmatpush3.bf16.xpose.msra.mxu0 %v3127_v53  ;;  %10085 = vmatprep.mubr.msk.bf16.mxu0 %vm11708_vm1, %v15468_v26 }
 0x4a6   : > { %10095 = vmatprep.subr.bf16.mxu0 %v15468_v26  ;;  %v3280_v50 = vsel %vm690_vm2, %v3275_v29, 0 }
 0x4a7   : > { %10068 = vmatmul.mubr.msk.bf16.vlgmr.msra.gmra.mrb[108].mxu1 %vm690_vm2, %v2967_v47  ;;  %v3120_v52 = vpop.permute.xlu0 %3119 }
 0x4a8   : > { %10078 = vmatpush3.bf16.xpose.msra.mxu1 %v3076_v30  ;;  %10079 = vmatprep.mubr.msk.bf16.mxu1 %vm11708_vm1, %v15468_v26 }
 0x4a9   : > { %10089 = vmatprep.subr.bf16.mxu1 %v15468_v26  ;;  %v3326_v12 = vpop.permute.xlu1 %3325 }
 0x4aa   : > { %v3331_v51 = vsel %vm690_vm2, %v3326_v12, 0 }
 0x4ab   : > { %v3171_v60 = vpop.permute.xlu0 %3170 }
 0x4ac   : > { %10086 = vmatmul.mubr.msk.bf16.vlgmr.msra.gmra.mrb[84].mxu0 %vm690_vm2, %v3120_v52 }
 0x4ad   : > { %10096 = vmatpush3.bf16.xpose.msra.mxu0 %v3229_v32  ;;  %10097 = vmatprep.mubr.msk.bf16.mxu0 %vm11708_vm1, %v15468_v26  ;;  %v3377_v61 = vpop.permute.xlu1 %3376 }
 0x4ae   : > { %10107 = vmatprep.subr.bf16.mxu0 %v15468_v26  ;;  %v3382_v20 = vsel %vm690_vm2, %v3377_v61, 0 }
 0x4af   : > { %10080 = vmatmul.mubr.msk.bf16.vlgmr.msra.gmra.mrb[112].mxu1 %vm690_vm2, %v3069_v54  ;;  %v3222_v0 = vpop.permute.xlu0 %3221 }
 0x4b0   : > { %10090 = vmatpush3.bf16.xpose.msra.mxu1 %v3178_v34  ;;  %10091 = vmatprep.mubr.msk.bf16.mxu1 %vm11708_vm1, %v15468_v26 }
 0x4b1   : > { %10101 = vmatprep.subr.bf16.mxu1 %v15468_v26  ;;  %v3375_v6 = vpop.permute.xlu1 %3374 }
 0x4b3   : > { %v3273_v8 = vpop.permute.xlu0 %3272 }
 0x4b4   : > { %10098 = vmatmul.mubr.msk.bf16.vlgmr.msra.gmra.mrb[88].mxu0 %vm690_vm2, %v3222_v0 }
 0x4b5   : > { %10108 = vmatpush3.bf16.xpose.msra.mxu0 %v3331_v51  ;;  %10109 = vmatprep.mubr.msk.bf16.mxu0 %vm11708_vm1, %v15468_v26  ;;  %v3794_v24 = vpop.permute.xlu1 %3793 }
 0x4b6   : > { %10119 = vmatprep.subr.bf16.mxu0 %v15468_v26 }
 0x4b7   : > { %10092 = vmatmul.mubr.msk.bf16.vlgmr.msra.gmra.mrb[116].mxu1 %vm690_vm2, %v3171_v60  ;;  %v3324_v18 = vpop.permute.xlu0 %3323 }
 0x4b8   : > { %10102 = vmatpush3.bf16.xpose.msra.mxu1 %v3280_v50  ;;  %10103 = vmatprep.mubr.msk.bf16.mxu1 %vm11708_vm1, %v15468_v26 }
 0x4b9   : > { %10113 = vmatprep.subr.bf16.mxu1 %v15468_v26 }
 0x4bb   : > { %v3841_v16 = vpop.permute.xlu0 %3840 }
 0x4bc   : > { %10110 = vmatmul.mubr.msk.bf16.vlgmr.msra.gmra.mrb[92].mxu0 %vm690_vm2, %v3324_v18 }
 0x4bd   : > { %10120 = vmatpush3.bf16.msra.mxu0 %v3794_v24  ;;  %10121 = vmatprep.mubr.msk.bf16.mxu0 %vm11708_vm1, %v15468_v26 }
 0x4be   : > { %10131 = vmatprep.subr.bf16.mxu0 %v15468_v26 }
 0x4bf   : > { %10104 = vmatmul.mubr.msk.bf16.vlgmr.msra.gmra.mrb[120].mxu1 %vm690_vm2, %v3273_v8 }
 0x4c0   : > { %10114 = vmatpush3.bf16.xpose.msra.mxu1 %v3382_v20  ;;  %10115 = vmatprep.mubr.msk.bf16.mxu1 %vm11708_vm1, %v15468_v26 }
 0x4c1   : > { %10125 = vmatprep.subr.bf16.mxu1 %v15468_v26 }
 0x4c7   : > { %10116 = vmatmul.mubr.msk.bf16.vlgmr.msra.gmra.mrb[124].mxu1 %vm690_vm2, %v3375_v6 }
 0x4c8   : > { %10126 = vmatpush3.bf16.msra.mxu1 %v3841_v16  ;;  %10127 = vmatprep.mubr.msk.bf16.mxu1 %vm11708_vm1, %v15468_v26 }
 0x4c9   : > { %10137 = vmatprep.subr.bf16.mxu1 %v15468_v26 }
 0x4ed   : > { %v12907_v49 = vpop.f32.mrb[32].mxu0 }
 0x4ee   : > { %15479 = vst [vmem:[#allocation18_spill] sm:$0xff] %v12907_v49  ;;  %v9931_v45 = vpop.f32.mrb[33].mxu0 }
 0x4ef   : > { %v12909_v1 = vpop.f32.mrb[34].mxu0 }
 0x4f0   : > { %15480 = vst [vmem:[#allocation15_spill] sm:$0xff] %v12909_v1  ;;  %v9932_v56 = vpop.f32.mrb[35].mxu0 }
 0x4f5   : > { %v12911_v22 = vpop.f32.mrb[64].mxu1 }
 0x4f6   : > { %15481 = vst [vmem:[#allocation24_spill] sm:$0xff] %v12911_v22  ;;  %v9937_v4 = vpop.f32.mrb[65].mxu1 }
 0x4f7   : > { %v12913_v5 = vpop.f32.mrb[66].mxu1 }
 0x4f8   : > { %15482 = vst [vmem:[#allocation16_spill] sm:$0xff] %v12913_v5  ;;  %v9938_v23 = vpop.f32.mrb[67].mxu1 }
 0x4fd   : > { %v12915_v2 = vpop.f32.mrb[36].mxu0 }
 0x4fe   : > { %15483 = vst [vmem:[#allocation20_spill] sm:$0xff] %v12915_v2  ;;  %v9943_v31 = vpop.f32.mrb[37].mxu0 }
 0x4ff   : > { %v12917_v28 = vpop.f32.mrb[38].mxu0 }
 0x500   : > { %15484 = vst [vmem:[#allocation17_spill] sm:$0xff] %v12917_v28  ;;  %v9944_v27 = vpop.f32.mrb[39].mxu0 }
 0x505   : > { %v12919_v17 = vpop.f32.mrb[68].mxu1 }
 0x506   : > { %15485 = vst [vmem:[#allocation21_spill] sm:$0xff] %v12919_v17  ;;  %v9949_v48 = vpop.f32.mrb[69].mxu1 }
 0x507   : > { %v12921_v10 = vpop.f32.mrb[70].mxu1 }
 0x508   : > { %15486 = vst [vmem:[#allocation22_spill] sm:$0xff] %v12921_v10  ;;  %v9950_v43 = vpop.f32.mrb[71].mxu1 }
 0x50d   : > { %v12923_v63 = vpop.f32.mrb[40].mxu0 }
 0x50e   : > { %15487 = vst [vmem:[#allocation19_spill] sm:$0xff] %v12923_v63  ;;  %v9955_v62 = vpop.f32.mrb[41].mxu0 }
 0x50f   : > { %v12925_v46 = vpop.f32.mrb[42].mxu0 }
 0x510   : > { %15488 = vst [vmem:[#allocation23_spill] sm:$0xff] %v12925_v46  ;;  %v9956_v9 = vpop.f32.mrb[43].mxu0 }
 0x511   : > { %v12927_v44 = vpop.f32.mrb[72].mxu1 }
 0x512   : > { %15489 = vst [vmem:[#allocation25_spill] sm:$0xff] %v12927_v44  ;;  %v9961_v19 = vpop.f32.mrb[73].mxu1 }
 0x513   : > { %v12929_v47 = vpop.f32.mrb[74].mxu1 }
 0x514   : > { %15490 = vst [vmem:[#allocation26_spill] sm:$0xff] %v12929_v47  ;;  %v9962_v21 = vpop.f32.mrb[75].mxu1 }
 0x515   : > { %v12931_v3 = vpop.f32.mrb[44].mxu0 }
 0x516   : > { %15491 = vst [vmem:[#allocation27_spill] sm:$0xff] %v12931_v3  ;;  %v9967_v25 = vpop.f32.mrb[45].mxu0 }
 0x517   : > { %v12933_v42 = vpop.f32.mrb[46].mxu0 }
 0x518   : > { %15492 = vst [vmem:[#allocation28_spill] sm:$0xff] %v12933_v42  ;;  %v9968_v7 = vpop.f32.mrb[47].mxu0 }
 0x519   : > { %v12935_v54 = vpop.f32.mrb[76].mxu1  ;;  %v12967_v7 = vld [vmem:[#allocation8 + $0x10] sm:$0xff] }
 0x51a   : > { %15493 = vst [vmem:[#allocation29_spill] sm:$0xff] %v12935_v54  ;;  %v9973_v53 = vpop.f32.mrb[77].mxu1 }
 0x51b   : > { %v12937_v29 = vpop.f32.mrb[78].mxu1 }
 0x51c   : > { %15494 = vst [vmem:[#allocation30_spill] sm:$0xff] %v12937_v29  ;;  %v9974_v30 = vpop.f32.mrb[79].mxu1 }
 0x51d   : > { %v12939_v52 = vpop.f32.mrb[48].mxu0  ;;  %v12969_v30 = vld [vmem:[#allocation8 + $0x18] sm:$0xff] }
 0x51e   : > { %15495 = vst [vmem:[#allocation31_spill] sm:$0xff] %v12939_v52  ;;  %v9979_v12 = vpop.f32.mrb[49].mxu0 }
 0x51f   : > { %v12941_v60 = vpop.f32.mrb[50].mxu0 }
 0x520   : > { %15496 = vst [vmem:[#allocation32_spill] sm:$0xff] %v12941_v60  ;;  %v9980_v32 = vpop.f32.mrb[51].mxu0 }
 0x521   : > { %v12943_v34 = vpop.f32.mrb[80].mxu1 }
 0x522   : > { %15497 = vst [vmem:[#allocation33_spill] sm:$0xff] %v12943_v34  ;;  %v9985_v0 = vpop.f32.mrb[81].mxu1 }
 0x523   : > { %v12945_v61 = vpop.f32.mrb[82].mxu1 }
 0x524   : > { %15498 = vst [vmem:[#allocation34_spill] sm:$0xff] %v12945_v61  ;;  %v9986_v51 = vpop.f32.mrb[83].mxu1 }
 0x525   : > { %v12947_v8 = vpop.f32.mrb[52].mxu0 }
 0x526   : > { %15499 = vst [vmem:[#allocation35_spill] sm:$0xff] %v12947_v8  ;;  %v9991_v6 = vpop.f32.mrb[53].mxu0 }
 0x527   : > { %v12949_v50 = vpop.f32.mrb[54].mxu0 }
 0x528   : > { %15500 = vst [vmem:[#allocation36_spill] sm:$0xff] %v12949_v50  ;;  %v9992_v18 = vpop.f32.mrb[55].mxu0 }
 0x529   : > { %v12951_v24 = vpop.f32.mrb[84].mxu1 }
 0x52a   : > { %15501 = vst [vmem:[#allocation37_spill] sm:$0xff] %v12951_v24  ;;  %v9997_v20 = vpop.f32.mrb[85].mxu1 }
 0x52b   : > { %v12953_v16 = vpop.f32.mrb[86].mxu1 }
 0x52c   : > { %15502 = vst [vmem:[#allocation38_spill] sm:$0xff] %v12953_v16  ;;  %v9998_v45 = vpop.f32.mrb[87].mxu1 }
 0x52d   : > { %v12955_v56 = vpop.f32.mrb[56].mxu0 }
 0x52e   : > { %15503 = vst [vmem:[#allocation39_spill] sm:$0xff] %v12955_v56  ;;  %v10003_v4 = vpop.f32.mrb[57].mxu0 }
 0x52f   : > { %v12957_v23 = vpop.f32.mrb[58].mxu0 }
 0x530   : > { %15504 = vst [vmem:[#allocation40_spill] sm:$0xff] %v12957_v23  ;;  %v10004_v31 = vpop.f32.mrb[59].mxu0 }
 0x531   : > { %v12959_v27 = vpop.f32.mrb[88].mxu1 }
 0x532   : > { %15505 = vst [vmem:[#allocation41_spill] sm:$0xff] %v12959_v27  ;;  %v10009_v48 = vpop.f32.mrb[89].mxu1 }
 0x533   : > { %v12961_v43 = vpop.f32.mrb[90].mxu1 }
 0x534   : > { %15506 = vst [vmem:[#allocation42_spill] sm:$0xff] %v12961_v43  ;;  %v10010_v62 = vpop.f32.mrb[91].mxu1 }
 0x535   : > { %v12963_v9 = vpop.f32.mrb[60].mxu0 }
 0x536   : > { %15507 = vst [vmem:[#allocation43_spill] sm:$0xff] %v12963_v9  ;;  %v10015_v19 = vpop.f32.mrb[61].mxu0 }
 0x537   : > { %v12965_v21 = vpop.f32.mrb[62].mxu0 }
 0x538   : > { %15508 = vst [vmem:[#allocation44_spill] sm:$0xff] %v12965_v21  ;;  %v10016_v25 = vpop.f32.mrb[63].mxu0 }
 0x557   : > { %v2653_v53 = vpop.f32.mrb[64].mxu0 }
 0x558   : > { %v12972_v12 = vadd.f32 %v2653_v53, %v12967_v7  ;;  %v10027_v32 = vpop.f32.mrb[65].mxu0 }
 0x559   : > { %v2656_v0 = vpop.f32.mrb[66].mxu0 }
 0x55a   : > { %v12975_v51 = vadd.f32 %v2656_v0, %v12969_v30  ;;  %v12977_v6 = vpop.f32.mrb[92].mxu1  ;;  %v10028_v18 = vpop.f32.mrb[67].mxu0  ;;  %v3425_v20 = vsel %vm1488_vm3, %v12972_v12, -inf }
 0x55b   : > { %15509 = vst [vmem:[#allocation45_spill] sm:$0xff] %v12977_v6  ;;  %v10021_v45 = vpop.f32.mrb[93].mxu1  ;;  %3426 = vmax.xlane.f32.xlu0 %v3425_v20 }
 0x55c   : > { %v12981_v4 = vpop.f32.mrb[94].mxu1  ;;  %v3428_v31 = vsel %vm1488_vm3, %v12975_v51, -inf }
 0x55d   : > { %15510 = vst [vmem:[#allocation46_spill] sm:$0xff] %v12981_v4  ;;  %v10022_v48 = vpop.f32.mrb[95].mxu1  ;;  %3429 = vmax.xlane.f32.xlu1 %v3428_v31 }
 0x55f   : > { %v2755_v62 = vpop.f32.mrb[68].mxu0 }
 0x560   : > { %v12986_v19 = vadd.f32 %v2755_v62, %v12967_v7  ;;  %v10039_v25 = vpop.f32.mrb[69].mxu0 }
 0x561   : > { %v2758_v53 = vpop.f32.mrb[70].mxu0 }
 0x562   : > { %v2704_v32 = vpop.f32.mrb[96].mxu1  ;;  %v10040_v0 = vpop.f32.mrb[71].mxu0  ;;  %v3437_v18 = vsel %vm1488_vm3, %v12986_v19, -inf }
 0x563   : > { %v12991_v20 = vadd.f32 %v2704_v32, %v12967_v7  ;;  %v10033_v45 = vpop.f32.mrb[97].mxu1  ;;  %3438 = vmax.xlane.f32.xlu1 %v3437_v18  ;;  %v12999_v0 = vadd.f32 %v2758_v53, %v12969_v30 }
 0x564   : > { %v2707_v6 = vpop.f32.mrb[98].mxu1 }
 0x565   : > { %v12994_v48 = vadd.f32 %v2707_v6, %v12969_v30  ;;  %v10034_v31 = vpop.f32.mrb[99].mxu1  ;;  %v3431_v62 = vsel %vm1488_vm3, %v12991_v20, -inf }
 0x566   : > { %3432 = vmax.xlane.f32.xlu0 %v3431_v62  ;;  %v3440_v62 = vsel %vm1488_vm3, %v12999_v0, -inf }
 0x567   : > { %v2857_v25 = vpop.f32.mrb[72].mxu0  ;;  %v3434_v32 = vsel %vm1488_vm3, %v12994_v48, -inf }
 0x568   : > { %v10051_v4 = vpop.f32.mrb[73].mxu0  ;;  %v13007_v27 = vadd.f32 %v2857_v25, %v12967_v7 }
 0x569   : > { %v2860_v9 = vpop.f32.mrb[74].mxu0 }
 0x56a   : > { %3435 = vmax.xlane.f32.xlu0 %v3434_v32  ;;  %v2806_v18 = vpop.f32.mrb[100].mxu1  ;;  %v10052_v45 = vpop.f32.mrb[75].mxu0 }
 0x56b   : > { %v13004_v6 = vadd.f32 %v2806_v18, %v12967_v7  ;;  %v10045_v31 = vpop.f32.mrb[101].mxu1 }
 0x56c   : > { %v2809_v21 = vpop.f32.mrb[102].mxu1  ;;  %v13017_v31 = vadd.f32 %v2860_v9, %v12969_v30 }
 0x56d   : > { %v13010_v4 = vadd.f32 %v2809_v21, %v12969_v30  ;;  %v10046_v53 = vpop.f32.mrb[103].mxu1  ;;  %v3443_v32 = vsel %vm1488_vm3, %v13004_v6, -inf  ;;  %v3449_v21 = vsel %vm1488_vm3, %v13007_v27, -inf }
 0x56e   : > { %3441 = vmax.xlane.f32.xlu0 %v3440_v62  ;;  %3444 = vmax.xlane.f32.xlu1 %v3443_v32  ;;  %v3452_v16 = vsel %vm1488_vm3, %v13017_v31, -inf }
 0x56f   : > { %v2959_v45 = vpop.f32.mrb[76].mxu0  ;;  %v3446_v25 = vsel %vm1488_vm3, %v13010_v4, -inf }
 0x570   : > { %v10063_v18 = vpop.f32.mrb[77].mxu0 }
 0x571   : > { %v2962_v43 = vpop.f32.mrb[78].mxu0  ;;  %v13027_v18 = vadd.f32 %v2959_v45, %v12967_v7 }
 0x572   : > { %3447 = vmax.xlane.f32.xlu0 %v3446_v25  ;;  %3450 = vmax.xlane.f32.xlu1 %v3449_v21  ;;  %v2908_v53 = vpop.f32.mrb[104].mxu1  ;;  %v10064_v56 = vpop.f32.mrb[79].mxu0 }
 0x573   : > { %v13024_v23 = vadd.f32 %v2908_v53, %v12967_v7  ;;  %v10057_v62 = vpop.f32.mrb[105].mxu1  ;;  %v13037_v53 = vadd.f32 %v2962_v43, %v12969_v30 }
 0x574   : > { %v2911_v32 = vpop.f32.mrb[106].mxu1 }
 0x575   : > { %v13030_v9 = vadd.f32 %v2911_v32, %v12969_v30  ;;  %v10058_v24 = vpop.f32.mrb[107].mxu1  ;;  %v3455_v25 = vsel %vm1488_vm3, %v13024_v23, -inf  ;;  %v3464_v61 = vsel %vm1488_vm3, %v13037_v53, -inf }
 0x576   : > { %3453 = vmax.xlane.f32.xlu0 %v3452_v16  ;;  %3456 = vmax.xlane.f32.xlu1 %v3455_v25  ;;  %v3461_v24 = vsel %vm1488_vm3, %v13027_v18, -inf }
 0x577   : > { %v3061_v56 = vpop.f32.mrb[80].mxu0  ;;  %v3458_v45 = vsel %vm1488_vm3, %v13030_v9, -inf }
 0x578   : > { %v10075_v21 = vpop.f32.mrb[81].mxu0 }
 0x579   : > { %v3064_v62 = vpop.f32.mrb[82].mxu0  ;;  %v13047_v21 = vadd.f32 %v3061_v56, %v12967_v7 }
 0x57a   : > { %3459 = vmax.xlane.f32.xlu0 %v3458_v45  ;;  %3462 = vmax.xlane.f32.xlu1 %v3461_v24  ;;  %v3010_v32 = vpop.f32.mrb[108].mxu1  ;;  %v10076_v8 = vpop.f32.mrb[83].mxu0 }
 0x57b   : > { %v13044_v50 = vadd.f32 %v3010_v32, %v12967_v7  ;;  %v10069_v16 = vpop.f32.mrb[109].mxu1  ;;  %v13057_v32 = vadd.f32 %v3064_v62, %v12969_v30 }
 0x57c   : > { %v3013_v25 = vpop.f32.mrb[110].mxu1 }
 0x57d   : > { %v13050_v43 = vadd.f32 %v3013_v25, %v12969_v30  ;;  %v10070_v34 = vpop.f32.mrb[111].mxu1  ;;  %v3467_v45 = vsel %vm1488_vm3, %v13044_v50, -inf  ;;  %v3476_v29 = vsel %vm1488_vm3, %v13057_v32, -inf }
 0x57e   : > { %3465 = vmax.xlane.f32.xlu0 %v3464_v61  ;;  %3468 = vmax.xlane.f32.xlu1 %v3467_v45  ;;  %v3473_v34 = vsel %vm1488_vm3, %v13047_v21, -inf }
 0x57f   : > { %v3163_v8 = vpop.f32.mrb[84].mxu0  ;;  %v3470_v56 = vsel %vm1488_vm3, %v13050_v43, -inf }
 0x580   : > { %v10087_v24 = vpop.f32.mrb[85].mxu0 }
 0x581   : > { %v3166_v16 = vpop.f32.mrb[86].mxu0  ;;  %v13067_v24 = vadd.f32 %v3163_v8, %v12967_v7 }
 0x582   : > { %3471 = vmax.xlane.f32.xlu0 %v3470_v56  ;;  %3474 = vmax.xlane.f32.xlu1 %v3473_v34  ;;  %v3112_v25 = vpop.f32.mrb[112].mxu1  ;;  %v10088_v52 = vpop.f32.mrb[87].mxu0 }
 0x583   : > { %v13064_v60 = vadd.f32 %v3112_v25, %v12967_v7  ;;  %v10081_v61 = vpop.f32.mrb[113].mxu1  ;;  %v13077_v25 = vadd.f32 %v3166_v16, %v12969_v30 }
 0x584   : > { %v3115_v45 = vpop.f32.mrb[114].mxu1 }
 0x585   : > { %v13070_v62 = vadd.f32 %v3115_v45, %v12969_v30  ;;  %v10082_v54 = vpop.f32.mrb[115].mxu1  ;;  %v3479_v56 = vsel %vm1488_vm3, %v13064_v60, -inf  ;;  %v3488_v47 = vsel %vm1488_vm3, %v13077_v25, -inf }
 0x586   : > { %3477 = vmax.xlane.f32.xlu0 %v3476_v29  ;;  %3480 = vmax.xlane.f32.xlu1 %v3479_v56  ;;  %v3485_v54 = vsel %vm1488_vm3, %v13067_v24, -inf }
 0x587   : > { %v3265_v52 = vpop.f32.mrb[88].mxu0  ;;  %v3482_v8 = vsel %vm1488_vm3, %v13070_v62, -inf }
 0x588   : > { %v10099_v34 = vpop.f32.mrb[89].mxu0 }
 0x589   : > { %v3268_v61 = vpop.f32.mrb[90].mxu0  ;;  %v13087_v34 = vadd.f32 %v3265_v52, %v12967_v7 }
 0x58a   : > { %3483 = vmax.xlane.f32.xlu0 %v3482_v8  ;;  %3486 = vmax.xlane.f32.xlu1 %v3485_v54  ;;  %v3214_v45 = vpop.f32.mrb[116].mxu1  ;;  %v10100_v3 = vpop.f32.mrb[91].mxu0 }
 0x58b   : > { %v13084_v42 = vadd.f32 %v3214_v45, %v12967_v7  ;;  %v10093_v29 = vpop.f32.mrb[117].mxu1  ;;  %v13097_v45 = vadd.f32 %v3268_v61, %v12969_v30 }
 0x58c   : > { %v3217_v56 = vpop.f32.mrb[118].mxu1 }
 0x58d   : > { %v13090_v16 = vadd.f32 %v3217_v56, %v12969_v30  ;;  %v10094_v44 = vpop.f32.mrb[119].mxu1  ;;  %v3491_v8 = vsel %vm1488_vm3, %v13084_v42, -inf  ;;  %v3500_v10 = vsel %vm1488_vm3, %v13097_v45, -inf }
 0x58e   : > { %3489 = vmax.xlane.f32.xlu0 %v3488_v47  ;;  %3492 = vmax.xlane.f32.xlu1 %v3491_v8  ;;  %v3497_v44 = vsel %vm1488_vm3, %v13087_v34, -inf }
 0x58f   : > { %v3367_v3 = vpop.f32.mrb[92].mxu0  ;;  %v3494_v52 = vsel %vm1488_vm3, %v13090_v16, -inf }
 0x590   : > { %v10111_v54 = vpop.f32.mrb[93].mxu0 }
 0x591   : > { %v3370_v29 = vpop.f32.mrb[94].mxu0  ;;  %v13107_v54 = vadd.f32 %v3367_v3, %v12967_v7 }
 0x592   : > { %3495 = vmax.xlane.f32.xlu0 %v3494_v52  ;;  %3498 = vmax.xlane.f32.xlu1 %v3497_v44  ;;  %v3316_v56 = vpop.f32.mrb[120].mxu1  ;;  %v10112_v63 = vpop.f32.mrb[95].mxu0 }
 0x593   : > { %v13104_v46 = vadd.f32 %v3316_v56, %v12967_v7  ;;  %v10105_v47 = vpop.f32.mrb[121].mxu1  ;;  %v13117_v63 = vadd.f32 %v3370_v29, %v12969_v30  ;;  %v3509_v3 = vsel %vm1488_vm3, %v13107_v54, -inf }
 0x594   : > { %v3319_v8 = vpop.f32.mrb[122].mxu1 }
 0x595   : > { %v13110_v61 = vadd.f32 %v3319_v8, %v12969_v30  ;;  %v10106_v17 = vpop.f32.mrb[123].mxu1  ;;  %v3503_v52 = vsel %vm1488_vm3, %v13104_v46, -inf  ;;  %v3512_v2 = vsel %vm1488_vm3, %v13117_v63, -inf }
 0x596   : > { %3501 = vmax.xlane.f32.xlu0 %v3500_v10  ;;  %3504 = vmax.xlane.f32.xlu1 %v3503_v52 }
 0x597   : > { %v3506_v44 = vsel %vm1488_vm3, %v13110_v61, -inf }
 0x59a   : > { %3507 = vmax.xlane.f32.xlu0 %v3506_v44  ;;  %v3418_v56 = vpop.f32.mrb[124].mxu1  ;;  %3510 = vmax.xlane.f32.xlu1 %v3509_v3  ;;  %v13143_v3 = vpop.permute.xlu0 %3934 }
 0x59b   : > { %v13124_v17 = vadd.f32 %v3418_v56, %v12967_v7  ;;  %v10117_v47 = vpop.f32.mrb[125].mxu1  ;;  %v13139_v7 = vpop.permute.xlu1 %3887  ;;  %15512 = vst [vmem:[#allocation48_spill] sm:$0xff] %v13143_v3 }
 0x59c   : > { %v3421_v8 = vpop.f32.mrb[126].mxu1 }
 0x59d   : > { %v13127_v10 = vadd.f32 %v3421_v8, %v12969_v30  ;;  %v10118_v52 = vpop.f32.mrb[127].mxu1  ;;  %v3515_v29 = vsel %vm1488_vm3, %v13124_v17, -inf }
 0x59e   : > { %3516 = vmax.xlane.f32.xlu1 %v3515_v29  ;;  %3513 = vmax.xlane.f32.xlu0 %v3512_v2  ;;  %v13147_v47 = vpop.permute.xlu0 %4028 }
 0x59f   : > { %v3518_v44 = vsel %vm1488_vm3, %v13127_v10, -inf  ;;  %v13141_v30 = vpop.permute.xlu1 %3981  ;;  %15514 = vst [vmem:[#allocation50_spill] sm:$0xff] %v13147_v47 }
 0x5a0   : > { %15511 = vst [vmem:[#allocation47_spill] sm:$0xff] %v13141_v30 }
 0x5a2   : > { %3519 = vmax.xlane.f32.xlu0 %v3518_v44  ;;  %v13151_v8 = vpop.permute.xlu0 %4122 }
 0x5a3   : > { %v13145_v56 = vpop.permute.xlu1 %4075  ;;  %15516 = vst [vmem:[#allocation52_spill] sm:$0xff] %v13151_v8 }
 0x5a4   : > { %15513 = vst [vmem:[#allocation49_spill] sm:$0xff] %v13145_v56 }
 0x5a6   : > { %v13155_v29 = vpop.permute.xlu0 %4216 }
 0x5a7   : > { %v13149_v2 = vpop.permute.xlu1 %4169  ;;  %15518 = vst [vmem:[#allocation54_spill] sm:$0xff] %v13155_v29 }
 0x5a8   : > { %15515 = vst [vmem:[#allocation51_spill] sm:$0xff] %v13149_v2 }
 0x5aa   : > { %v13159_v28 = vpop.permute.xlu0 %4357 }
 0x5ab   : > { %v13153_v52 = vpop.permute.xlu1 %4263  ;;  %15520 = vst [vmem:[#allocation56_spill] sm:$0xff] %v13159_v28 }
 0x5ac   : > { %15517 = vst [vmem:[#allocation53_spill] sm:$0xff] %v13153_v52 }
 0x5af   : > { %4498 = vrot.lane.b32.xlu1 %v12095_v40, %s11713_s13  ;;  %v13157_v44 = vpop.permute.xlu1 %4310 }
 0x5b0   : > { %15519 = vst [vmem:[#allocation55_spill] sm:$0xff] %v13157_v44 }
 0x5b3   : > { %v13161_v22 = vpop.permute.xlu1 %4404 }
 0x5b4   : > { %15521 = vst [vmem:[#allocation57_spill] sm:$0xff] %v13161_v22 }
 0x5b8   : > { %4451 = vrot.lane.b32.xlu0 %v12099_v41, %s11713_s13  ;;  %s9502_s13 = sshll.u32 %s11781_s25, 12  ;;  %s9179_s25 = scalar_lea.sflag [#allocation4], %s11962_s16 }
 0x5e8   : > { %v3427_v5 = vpop.xlane.xlu0 %3426 }
 0x5e9   : > { %v3521_v49 = vsub.f32 %v12972_v12, %v3427_v5 }
 0x5ea   : > { %v3430_v1 = vpop.xlane.xlu1 %3429 }
 0x5eb   : > { %v3553_v56 = vmul.f32 1.442695, %v3521_v49  ;;  %v3522_v47 = vsub.f32 %v12975_v51, %v3430_v1 }
 0x5ed   : > { %11125 = vpow2.f32 %v3553_v56  ;;  %v3555_v2 = vmul.f32 1.442695, %v3522_v47 }
 0x5ef   : > { %11127 = vpow2.f32 %v3555_v2 }
 0x5f0   : > { %v3439_v8 = vpop.xlane.xlu1 %3438 }
 0x5f1   : > { %v3525_v52 = vsub.f32 %v12986_v19, %v3439_v8 }
 0x5f3   : > { %v3433_v29 = vpop.xlane.xlu0 %3432  ;;  %v3561_v30 = vmul.f32 1.442695, %v3525_v52 }
 0x5f4   : > { %v3523_v44 = vsub.f32 %v12991_v20, %v3433_v29 }
 0x5f6   : > { %v3557_v28 = vmul.f32 1.442695, %v3523_v44 }
 0x5f7   : > { %v13167_v3 = vpop.eup %11125  ;;  %v3436_v22 = vpop.xlane.xlu0 %3435 }
 0x5f8   : > { %11129 = vpow2.f32 %v3557_v28  ;;  %v3524_v5 = vsub.f32 %v12994_v48, %v3436_v22  ;;  %v3617_v49 = vsel %vm1488_vm3, %v13167_v3, 0.0 }
 0x5f9   : > { %v13172_v1 = vpop.eup %11127  ;;  %3618 = vadd.xlane.f32.xlu1 %v3617_v49  ;;  %11131 = vpow2.f32 %v3561_v30 }
 0x5fa   : > { %v3559_v12 = vmul.f32 1.442695, %v3524_v5  ;;  %v3620_v51 = vsel %vm1488_vm3, %v13172_v1, 0.0 }
 0x5fb   : > { %v3445_v19 = vpop.xlane.xlu1 %3444  ;;  %3621 = vadd.xlane.f32.xlu0 %v3620_v51  ;;  %v3442_v20 = vpop.xlane.xlu0 %3441 }
 0x5fc   : > { %11133 = vpow2.f32 %v3559_v12  ;;  %v3527_v56 = vsub.f32 %v13004_v6, %v3445_v19  ;;  %v3526_v28 = vsub.f32 %v12999_v0, %v3442_v20 }
 0x5fe   : > { %v3565_v22 = vmul.f32 1.442695, %v3527_v56  ;;  %v3563_v48 = vmul.f32 1.442695, %v3526_v28 }
 0x5ff   : > { %v3451_v47 = vpop.xlane.xlu1 %3450  ;;  %v3448_v2 = vpop.xlane.xlu0 %3447 }
 0x600   : > { %11135 = vpow2.f32 %v3565_v22  ;;  %v3529_v8 = vsub.f32 %v13007_v27, %v3451_v47  ;;  %v3528_v30 = vsub.f32 %v13010_v4, %v3448_v2 }
 0x601   : > { %11137 = vpow2.f32 %v3563_v48 }
 0x602   : > { %v13180_v52 = vpop.eup %11129  ;;  %v3569_v29 = vmul.f32 1.442695, %v3529_v8  ;;  %v3567_v44 = vmul.f32 1.442695, %v3528_v30 }
 0x603   : > { %v3457_v5 = vpop.xlane.xlu1 %3456  ;;  %v3454_v49 = vpop.xlane.xlu0 %3453  ;;  %v3623_v6 = vsel %vm1488_vm3, %v13180_v52, 0.0 }
 0x604   : > { %v13184_v0 = vpop.eup %11131  ;;  %11139 = vpow2.f32 %v3569_v29  ;;  %v3531_v12 = vsub.f32 %v13024_v23, %v3457_v5  ;;  %v3530_v51 = vsub.f32 %v13017_v31, %v3454_v49  ;;  %3624 = vadd.xlane.f32.xlu1 %v3623_v6 }
 0x605   : > { %11141 = vpow2.f32 %v3567_v44  ;;  %v3629_v28 = vsel %vm1488_vm3, %v13184_v0, 0.0 }
 0x606   : > { %v13188_v27 = vpop.eup %11133  ;;  %v3573_v4 = vmul.f32 1.442695, %v3531_v12  ;;  %v3571_v19 = vmul.f32 1.442695, %v3530_v51 }
 0x607   : > { %v3463_v20 = vpop.xlane.xlu1 %3462  ;;  %v3460_v56 = vpop.xlane.xlu0 %3459  ;;  %v3626_v22 = vsel %vm1488_vm3, %v13188_v27, 0.0 }
 0x608   : > { %11143 = vpow2.f32 %v3573_v4  ;;  %v3533_v48 = vsub.f32 %v13027_v18, %v3463_v20  ;;  %v3532_v23 = vsub.f32 %v13030_v9, %v3460_v56  ;;  %3630 = vadd.xlane.f32.xlu1 %v3629_v28  ;;  %3627 = vadd.xlane.f32.xlu0 %v3626_v22 }
 0x609   : > { %11145 = vpow2.f32 %v3571_v19 }
 0x60a   : > { %v13196_v31 = vpop.eup %11135  ;;  %v3577_v47 = vmul.f32 1.442695, %v3533_v48  ;;  %v3575_v2 = vmul.f32 1.442695, %v3532_v23 }
 0x60b   : > { %v13198_v8 = vpop.eup %11137  ;;  %v3469_v30 = vpop.xlane.xlu1 %3468  ;;  %v3635_v44 = vsel %vm1488_vm3, %v13196_v31, 0.0 }
 0x60c   : > { %v3466_v29 = vpop.xlane.xlu0 %3465  ;;  %11147 = vpow2.f32 %v3577_v47  ;;  %v3535_v5 = vsub.f32 %v13044_v50, %v3469_v30  ;;  %3636 = vadd.xlane.f32.xlu1 %v3635_v44  ;;  %v3632_v9 = vsel %vm1488_vm3, %v13198_v8, 0.0 }
 0x60d   : > { %v3534_v18 = vsub.f32 %v13037_v53, %v3466_v29  ;;  %11149 = vpow2.f32 %v3575_v2  ;;  %3633 = vadd.xlane.f32.xlu0 %v3632_v9 }
 0x60e   : > { %v13206_v49 = vpop.eup %11139  ;;  %v3581_v6 = vmul.f32 1.442695, %v3535_v5 }
 0x60f   : > { %v3579_v12 = vmul.f32 1.442695, %v3534_v18  ;;  %v13208_v51 = vpop.eup %11141  ;;  %v3475_v4 = vpop.xlane.xlu1 %3474  ;;  %v3641_v20 = vsel %vm1488_vm3, %v13206_v49, 0.0 }
 0x610   : > { %v3472_v19 = vpop.xlane.xlu0 %3471  ;;  %11151 = vpow2.f32 %v3581_v6  ;;  %v3537_v50 = vsub.f32 %v13047_v21, %v3475_v4  ;;  %3642 = vadd.xlane.f32.xlu1 %v3641_v20  ;;  %v3638_v56 = vsel %vm1488_vm3, %v13208_v51, 0.0 }
 0x611   : > { %v3536_v53 = vsub.f32 %v13050_v43, %v3472_v19  ;;  %11153 = vpow2.f32 %v3579_v12  ;;  %3639 = vadd.xlane.f32.xlu0 %v3638_v56 }
 0x612   : > { %v13216_v28 = vpop.eup %11143  ;;  %v3585_v22 = vmul.f32 1.442695, %v3537_v50 }
 0x613   : > { %v3583_v48 = vmul.f32 1.442695, %v3536_v53  ;;  %v13218_v23 = vpop.eup %11145  ;;  %v3481_v47 = vpop.xlane.xlu1 %3480  ;;  %v3647_v30 = vsel %vm1488_vm3, %v13216_v28, 0.0 }
 0x614   : > { %v3478_v2 = vpop.xlane.xlu0 %3477  ;;  %11155 = vpow2.f32 %v3585_v22  ;;  %v3539_v21 = vsub.f32 %v13064_v60, %v3481_v47  ;;  %3648 = vadd.xlane.f32.xlu1 %v3647_v30  ;;  %v3644_v29 = vsel %vm1488_vm3, %v13218_v23, 0.0 }
 0x615   : > { %v3538_v43 = vsub.f32 %v13057_v32, %v3478_v2  ;;  %11157 = vpow2.f32 %v3583_v48  ;;  %3645 = vadd.xlane.f32.xlu0 %v3644_v29 }
 0x616   : > { %v13226_v44 = vpop.eup %11147  ;;  %v3589_v5 = vmul.f32 1.442695, %v3539_v21 }
 0x617   : > { %v3587_v18 = vmul.f32 1.442695, %v3538_v43  ;;  %v13228_v9 = vpop.eup %11149  ;;  %v3487_v6 = vpop.xlane.xlu1 %3486  ;;  %v3653_v4 = vsel %vm1488_vm3, %v13226_v44, 0.0 }
 0x618   : > { %v3484_v12 = vpop.xlane.xlu0 %3483  ;;  %11159 = vpow2.f32 %v3589_v5  ;;  %v3541_v60 = vsub.f32 %v13067_v24, %v3487_v6  ;;  %3654 = vadd.xlane.f32.xlu1 %v3653_v4  ;;  %v3650_v19 = vsel %vm1488_vm3, %v13228_v9, 0.0 }
 0x619   : > { %v3540_v32 = vsub.f32 %v13070_v62, %v3484_v12  ;;  %11161 = vpow2.f32 %v3587_v18  ;;  %3651 = vadd.xlane.f32.xlu0 %v3650_v19 }
 0x61a   : > { %v13236_v20 = vpop.eup %11151  ;;  %v3593_v50 = vmul.f32 1.442695, %v3541_v60 }
 0x61b   : > { %v3591_v53 = vmul.f32 1.442695, %v3540_v32  ;;  %v13238_v56 = vpop.eup %11153  ;;  %v3493_v22 = vpop.xlane.xlu1 %3492  ;;  %v3659_v47 = vsel %vm1488_vm3, %v13236_v20, 0.0 }
 0x61c   : > { %v3490_v48 = vpop.xlane.xlu0 %3489  ;;  %11163 = vpow2.f32 %v3593_v50  ;;  %v3543_v24 = vsub.f32 %v13084_v42, %v3493_v22  ;;  %3660 = vadd.xlane.f32.xlu1 %v3659_v47  ;;  %v3656_v2 = vsel %vm1488_vm3, %v13238_v56, 0.0 }
 0x61d   : > { %v3542_v62 = vsub.f32 %v13077_v25, %v3490_v48  ;;  %11165 = vpow2.f32 %v3591_v53  ;;  %3657 = vadd.xlane.f32.xlu0 %v3656_v2 }
 0x61e   : > { %v13246_v30 = vpop.eup %11155  ;;  %v3597_v21 = vmul.f32 1.442695, %v3543_v24 }
 0x61f   : > { %v3595_v43 = vmul.f32 1.442695, %v3542_v62  ;;  %v13248_v29 = vpop.eup %11157  ;;  %v3499_v5 = vpop.xlane.xlu1 %3498  ;;  %v3665_v6 = vsel %vm1488_vm3, %v13246_v30, 0.0 }
 0x620   : > { %v3496_v18 = vpop.xlane.xlu0 %3495  ;;  %11167 = vpow2.f32 %v3597_v21  ;;  %v3545_v42 = vsub.f32 %v13087_v34, %v3499_v5  ;;  %3666 = vadd.xlane.f32.xlu1 %v3665_v6  ;;  %v3662_v12 = vsel %vm1488_vm3, %v13248_v29, 0.0 }
 0x621   : > { %v3544_v25 = vsub.f32 %v13090_v16, %v3496_v18  ;;  %11169 = vpow2.f32 %v3595_v43  ;;  %3663 = vadd.xlane.f32.xlu0 %v3662_v12 }
 0x622   : > { %v13256_v4 = vpop.eup %11159  ;;  %v3601_v60 = vmul.f32 1.442695, %v3545_v42 }
 0x623   : > { %v3599_v32 = vmul.f32 1.442695, %v3544_v25  ;;  %v13258_v19 = vpop.eup %11161  ;;  %v3505_v50 = vpop.xlane.xlu1 %3504  ;;  %v3671_v22 = vsel %vm1488_vm3, %v13256_v4, 0.0 }
 0x624   : > { %v3502_v53 = vpop.xlane.xlu0 %3501  ;;  %11171 = vpow2.f32 %v3601_v60  ;;  %v3547_v34 = vsub.f32 %v13104_v46, %v3505_v50  ;;  %3672 = vadd.xlane.f32.xlu1 %v3671_v22  ;;  %v3668_v48 = vsel %vm1488_vm3, %v13258_v19, 0.0 }
 0x625   : > { %v3546_v16 = vsub.f32 %v13097_v45, %v3502_v53  ;;  %11173 = vpow2.f32 %v3599_v32  ;;  %3669 = vadd.xlane.f32.xlu0 %v3668_v48 }
 0x626   : > { %v13266_v47 = vpop.eup %11163  ;;  %v3605_v24 = vmul.f32 1.442695, %v3547_v34 }
 0x627   : > { %v3603_v62 = vmul.f32 1.442695, %v3546_v16  ;;  %v13268_v2 = vpop.eup %11165  ;;  %v3511_v21 = vpop.xlane.xlu1 %3510  ;;  %v3677_v5 = vsel %vm1488_vm3, %v13266_v47, 0.0 }
 0x628   : > { %v3508_v43 = vpop.xlane.xlu0 %3507  ;;  %11175 = vpow2.f32 %v3605_v24  ;;  %v3549_v46 = vsub.f32 %v13107_v54, %v3511_v21  ;;  %3678 = vadd.xlane.f32.xlu1 %v3677_v5  ;;  %v3674_v18 = vsel %vm1488_vm3, %v13268_v2, 0.0 }
 0x629   : > { %v3548_v45 = vsub.f32 %v13110_v61, %v3508_v43  ;;  %11177 = vpow2.f32 %v3603_v62  ;;  %3675 = vadd.xlane.f32.xlu0 %v3674_v18 }
 0x62a   : > { %v13276_v6 = vpop.eup %11167  ;;  %v3609_v42 = vmul.f32 1.442695, %v3549_v46 }
 0x62b   : > { %v3607_v25 = vmul.f32 1.442695, %v3548_v45  ;;  %v13278_v12 = vpop.eup %11169  ;;  %v3517_v60 = vpop.xlane.xlu1 %3516  ;;  %v3683_v50 = vsel %vm1488_vm3, %v13276_v6, 0.0 }
 0x62c   : > { %v3514_v32 = vpop.xlane.xlu0 %3513  ;;  %11179 = vpow2.f32 %v3609_v42  ;;  %v3551_v54 = vsub.f32 %v13124_v17, %v3517_v60  ;;  %3684 = vadd.xlane.f32.xlu1 %v3683_v50  ;;  %v3680_v53 = vsel %vm1488_vm3, %v13278_v12, 0.0 }
 0x62d   : > { %v3550_v61 = vsub.f32 %v13117_v63, %v3514_v32  ;;  %11181 = vpow2.f32 %v3607_v25  ;;  %3681 = vadd.xlane.f32.xlu0 %v3680_v53 }
 0x62e   : > { %v13286_v22 = vpop.eup %11171  ;;  %v3613_v34 = vmul.f32 1.442695, %v3551_v54 }
 0x62f   : > { %v3611_v16 = vmul.f32 1.442695, %v3550_v61  ;;  %v13288_v48 = vpop.eup %11173  ;;  %v3689_v62 = vsel %vm1488_vm3, %v13286_v22, 0.0 }
 0x630   : > { %v3520_v24 = vpop.xlane.xlu0 %3519  ;;  %11183 = vpow2.f32 %v3613_v34  ;;  %3690 = vadd.xlane.f32.xlu1 %v3689_v62  ;;  %v3686_v63 = vsel %vm1488_vm3, %v13288_v48, 0.0  ;;  %v13358_v34 = vpop.permute.xlu1 %4498 }
 0x631   : > { %v3552_v17 = vsub.f32 %v13127_v10, %v3520_v24  ;;  %11185 = vpow2.f32 %v3611_v16  ;;  %3687 = vadd.xlane.f32.xlu0 %v3686_v63 }
 0x632   : > { %v13295_v21 = vpop.eup %11175 }
 0x633   : > { %v3615_v43 = vmul.f32 1.442695, %v3552_v17  ;;  %v13297_v5 = vpop.eup %11177  ;;  %v3695_v46 = vsel %vm1488_vm3, %v13295_v21, 0.0 }
 0x634   : > { %3696 = vadd.xlane.f32.xlu1 %v3695_v46  ;;  %v3692_v45 = vsel %vm1488_vm3, %v13297_v5, 0.0  ;;  %v13362_v16 = vpop.permute.xlu0 %4451 }
 0x635   : > { %11187 = vpow2.f32 %v3615_v43  ;;  %3693 = vadd.xlane.f32.xlu0 %v3692_v45 }
 0x636   : > { %v13303_v10 = vpop.eup %11179 }
 0x637   : > { %v13305_v18 = vpop.eup %11181  ;;  %v3701_v42 = vsel %vm1488_vm3, %v13303_v10, 0.0 }
 0x638   : > { %3702 = vadd.xlane.f32.xlu1 %v3701_v42  ;;  %v3698_v25 = vsel %vm1488_vm3, %v13305_v18, 0.0 }
 0x639   : > { %3699 = vadd.xlane.f32.xlu0 %v3698_v25 }
 0x63a   : > { %v13311_v60 = vpop.eup %11183 }
 0x63b   : > { %v13313_v32 = vpop.eup %11185  ;;  %v3707_v50 = vsel %vm1488_vm3, %v13311_v60, 0.0 }
 0x63c   : > { %3708 = vadd.xlane.f32.xlu1 %v3707_v50  ;;  %v3704_v54 = vsel %vm1488_vm3, %v13313_v32, 0.0 }
 0x63d   : > { %3705 = vadd.xlane.f32.xlu0 %v3704_v54 }
 0x63f   : > { %v13319_v61 = vpop.eup %11187 }
 0x640   : > { %v3710_v53 = vsel %vm1488_vm3, %v13319_v61, 0.0 }
 0x641   : > { %3711 = vadd.xlane.f32.xlu0 %v3710_v53 }
 0x64d   : > { %4598 = vrot.lane.b32.xlu1 %v12030_v35, %s11714_s15 }
 0x651   : > { %4649 = vrot.lane.b32.xlu1 %v12053_v57, %s11714_s15 }
 0x655   : > { %4700 = vrot.lane.b32.xlu1 %v12050_v55, %s11714_s15 }
 0x657   : > { %4547 = vrot.lane.b32.xlu0 %v12033_v37, %s11714_s15 }
 0x659   : > { %4751 = vrot.lane.b32.xlu1 %v12073_v13, %s11714_s15 }
 0x65b   : > { %4545 = vrot.lane.b32.xlu0 %v12033_v37, %s11715_s20 }
 0x65d   : > { %4802 = vrot.lane.b32.xlu1 %v12070_v11, %s11714_s15 }
 0x65f   : > { %4596 = vrot.lane.b32.xlu0 %v12030_v35, %s11715_s20 }
 0x661   : > { %4853 = vrot.lane.b32.xlu1 %v12093_v36, %s11714_s15 }
 0x663   : > { %4647 = vrot.lane.b32.xlu0 %v12053_v57, %s11715_s20 }
 0x665   : > { %4904 = vrot.lane.b32.xlu1 %v12090_v33, %s11714_s15 }
 0x667   : > { %4698 = vrot.lane.b32.xlu0 %v12050_v55, %s11715_s20 }
 0x669   : > { %4955 = vrot.lane.b32.xlu1 %v12037_v39, %s11714_s15 }
 0x66b   : > { %4749 = vrot.lane.b32.xlu0 %v12073_v13, %s11715_s20 }
 0x66d   : > { %5006 = vrot.lane.b32.xlu1 %v12035_v38, %s11714_s15 }
 0x66f   : > { %4800 = vrot.lane.b32.xlu0 %v12070_v11, %s11715_s20 }
 0x671   : > { %5057 = vrot.lane.b32.xlu1 %v12057_v59, %s11714_s15 }
 0x673   : > { %4851 = vrot.lane.b32.xlu0 %v12093_v36, %s11715_s20 }
 0x675   : > { %5108 = vrot.lane.b32.xlu1 %v12055_v58, %s11714_s15 }
 0x677   : > { %4902 = vrot.lane.b32.xlu0 %v12090_v33, %s11715_s20 }
 0x679   : > { %5159 = vrot.lane.b32.xlu1 %v12077_v15, %s11714_s15 }
 0x67b   : > { %4953 = vrot.lane.b32.xlu0 %v12037_v39, %s11715_s20 }
 0x67d   : > { %5210 = vrot.lane.b32.xlu1 %v12075_v14, %s11714_s15 }
 0x67f   : > { %5004 = vrot.lane.b32.xlu0 %v12035_v38, %s11715_s20 }
 0x681   : > { %5261 = vrot.lane.b32.xlu1 %v12099_v41, %s11714_s15 }
 0x683   : > { %5055 = vrot.lane.b32.xlu0 %v12057_v59, %s11715_s20 }
 0x685   : > { %5312 = vrot.lane.b32.xlu1 %v12095_v40, %s11714_s15  ;;  %s9193_s15 = sshll.u32 %s15235_s11, 4  ;;  %s15334_s15 = int_to_ptr.vmem [resolvable:$true] %s9193_s15 }
 0x686   : > { %v3619_v24 = vpop.xlane.xlu1 %3618 }
 0x687   : > { %11189 = vrcp.f32 %v3619_v24  ;;  %5106 = vrot.lane.b32.xlu0 %v12055_v58, %s11715_s20 }
 0x688   : > { %v3622_v62 = vpop.xlane.xlu0 %3621 }
 0x689   : > { %11191 = vrcp.f32 %v3622_v62  ;;  %5310 = vrot.lane.b32.xlu1 %v12095_v40, %s11715_s20 }
 0x68b   : > { %5157 = vrot.lane.b32.xlu0 %v12077_v15, %s11715_s20 }
 0x68d   : > { %5729 = vrot.lane.b32.xlu1 %v12033_v37, %s11716_s12 }
 0x68f   : > { %5208 = vrot.lane.b32.xlu0 %v12075_v14, %s11715_s20 }
 0x691   : > { %v11190_v17 = vpop.eup %11189  ;;  %5823 = vrot.lane.b32.xlu1 %v12053_v57, %s11716_s12  ;;  %v3625_v63 = vpop.xlane.xlu1 %3624 }
 0x692   : > { %v3745_v46 = vmul.f32 %v11190_v17, %v13167_v3  ;;  %11193 = vrcp.f32 %v3625_v63 }
 0x693   : > { %v11192_v43 = vpop.eup %11191  ;;  %5259 = vrot.lane.b32.xlu0 %v12099_v41, %s11715_s20 }
 0x694   : > { %v3746_v45 = vmul.f32 %v11192_v43, %v13172_v1 }
 0x695   : > { %5917 = vrot.lane.b32.xlu1 %v12073_v13, %s11716_s12  ;;  %v3631_v42 = vpop.xlane.xlu1 %3630  ;;  %v3628_v25 = vpop.xlane.xlu0 %3627 }
 0x696   : > { %v3777_v50 = vpack.c.bf16 %v3746_v45, %v3745_v46  ;;  %11195 = vrcp.f32 %v3628_v25 }
 0x697   : > { %5776 = vrot.lane.b32.xlu0 %v12030_v35, %s11716_s12  ;;  %11197 = vrcp.f32 %v3631_v42 }
 0x698   : > { %10122 = vmatmul.mubr.msk.bf16.vlgmr.msra.gmra.mrb[96].mxu0 %vm1488_vm3, %v3777_v50 }
 0x699   : > { %10132 = vmatpush3.bf16.msra.mxu0 %v13139_v7  ;;  %6011 = vrot.lane.b32.xlu1 %v12093_v36, %s11716_s12  ;;  %v3637_v3 = vpop.xlane.xlu1 %3636 }
 0x69a   : > { %v3634_v1 = vpop.xlane.xlu0 %3633  ;;  %10133 = vmatprep.mubr.msk.bf16.mxu0 %vm11708_vm1, %v15468_v26  ;;  %10143 = vmatprep.subr.bf16.mxu0 %v15468_v26 }
 0x69b   : > { %11199 = vrcp.f32 %v3634_v1  ;;  %5870 = vrot.lane.b32.xlu0 %v12050_v55, %s11716_s12  ;;  %v15522_v1 = vld [vmem:[#allocation48_spill] sm:$0xff] }
 0x69c   : > { %11201 = vrcp.f32 %v3637_v3  ;;  %v11194_v53 = vpop.eup %11193 }
 0x69d   : > { %6105 = vrot.lane.b32.xlu1 %v12037_v39, %s11716_s12  ;;  %v3643_v54 = vpop.xlane.xlu1 %3642  ;;  %v3747_v17 = vmul.f32 %v11194_v53, %v13180_v52 }
 0x69e   : > { %v3640_v7 = vpop.xlane.xlu0 %3639 }
 0x69f   : > { %11203 = vrcp.f32 %v3640_v7  ;;  %5964 = vrot.lane.b32.xlu0 %v12070_v11, %s11716_s12 }
 0x6a0   : > { %v11196_v24 = vpop.eup %11195  ;;  %11205 = vrcp.f32 %v3643_v54 }
 0x6a1   : > { %6199 = vrot.lane.b32.xlu1 %v12057_v59, %s11716_s12  ;;  %v3649_v62 = vpop.xlane.xlu1 %3648  ;;  %v3748_v63 = vmul.f32 %v11196_v24, %v13188_v27  ;;  %v11198_v46 = vpop.eup %11197 }
 0x6a2   : > { %v3646_v43 = vpop.xlane.xlu0 %3645  ;;  %v3749_v50 = vmul.f32 %v11198_v46, %v13184_v0 }
 0x6a3   : > { %11207 = vrcp.f32 %v3646_v43  ;;  %6058 = vrot.lane.b32.xlu0 %v12090_v33, %s11716_s12  ;;  %v3778_v45 = vpack.c.bf16 %v3748_v63, %v3747_v17  ;;  %v15523_v17 = vld [vmem:[#allocation47_spill] sm:$0xff] }
 0x6a4   : > { %11209 = vrcp.f32 %v3649_v62 }
 0x6a5   : > { %v11200_v42 = vpop.eup %11199  ;;  %6246 = vrot.lane.b32.xlu1 %v12055_v58, %s11716_s12  ;;  %v3655_v25 = vpop.xlane.xlu1 %3654  ;;  %10128 = vmatmul.mubr.msk.bf16.vlgmr.msra.gmra.mrb[128].mxu1 %vm1488_vm3, %v3778_v45 }
 0x6a6   : > { %v3750_v3 = vmul.f32 %v11200_v42, %v13198_v8  ;;  %v3652_v52 = vpop.xlane.xlu0 %3651  ;;  %v11202_v27 = vpop.eup %11201  ;;  %10138 = vmatpush3.bf16.msra.mxu1 %v15522_v1  ;;  %10139 = vmatprep.mubr.msk.bf16.mxu1 %vm11708_vm1, %v15468_v26 }
 0x6a7   : > { %11211 = vrcp.f32 %v3652_v52  ;;  %6152 = vrot.lane.b32.xlu0 %v12035_v38, %s11716_s12  ;;  %10149 = vmatprep.subr.bf16.mxu1 %v15468_v26  ;;  %v3751_v8 = vmul.f32 %v11202_v27, %v13196_v31 }
 0x6a8   : > { %v3779_v54 = vpack.c.bf16 %v3750_v3, %v3749_v50  ;;  %11213 = vrcp.f32 %v3655_v25  ;;  %v15524_v25 = vld [vmem:[#allocation50_spill] sm:$0xff] }
 0x6a9   : > { %v11204_v7 = vpop.eup %11203  ;;  %6340 = vrot.lane.b32.xlu1 %v12075_v14, %s11716_s12  ;;  %v3661_v0 = vpop.xlane.xlu1 %3660 }
 0x6aa   : > { %v3752_v53 = vmul.f32 %v11204_v7, %v13208_v51  ;;  %10134 = vmatmul.mubr.msk.bf16.vlgmr.msra.gmra.mrb[100].mxu0 %vm1488_vm3, %v3779_v54  ;;  %v3658_v24 = vpop.xlane.xlu0 %3657  ;;  %v11206_v62 = vpop.eup %11205  ;;  %v15525_v54 = vld [vmem:[#allocation49_spill] sm:$0xff] }
 0x6ab   : > { %10144 = vmatpush3.bf16.msra.mxu0 %v15523_v17  ;;  %11215 = vrcp.f32 %v3658_v24  ;;  %6293 = vrot.lane.b32.xlu0 %v12077_v15, %s11716_s12  ;;  %v3753_v51 = vmul.f32 %v11206_v62, %v13206_v49  ;;  %v15526_v62 = vld [vmem:[#allocation52_spill] sm:$0xff] }
 0x6ac   : > { %v3780_v63 = vpack.c.bf16 %v3752_v53, %v3751_v8  ;;  %10145 = vmatprep.mubr.msk.bf16.mxu0 %vm11708_vm1, %v15468_v26  ;;  %10155 = vmatprep.subr.bf16.mxu0 %v15468_v26  ;;  %11217 = vrcp.f32 %v3661_v0 }
 0x6ad   : > { %v11208_v43 = vpop.eup %11207  ;;  %v3667_v31 = vpop.xlane.xlu1 %3666 }
 0x6ae   : > { %v3754_v46 = vmul.f32 %v11208_v43, %v13218_v23  ;;  %10140 = vmatmul.mubr.msk.bf16.vlgmr.msra.gmra.mrb[132].mxu1 %vm1488_vm3, %v3780_v63  ;;  %v3664_v45 = vpop.xlane.xlu0 %3663  ;;  %v11210_v42 = vpop.eup %11209 }
 0x6af   : > { %10150 = vmatpush3.bf16.msra.mxu1 %v15524_v25  ;;  %11219 = vrcp.f32 %v3664_v45  ;;  %10151 = vmatprep.mubr.msk.bf16.mxu1 %vm11708_vm1, %v15468_v26  ;;  %v3755_v49 = vmul.f32 %v11210_v42, %v13216_v28 }
 0x6b0   : > { %v3781_v50 = vpack.c.bf16 %v3754_v46, %v3753_v51  ;;  %10161 = vmatprep.subr.bf16.mxu1 %v15468_v26  ;;  %11221 = vrcp.f32 %v3667_v31  ;;  %v15527_v46 = vld [vmem:[#allocation51_spill] sm:$0xff] }
 0x6b1   : > { %v11212_v3 = vpop.eup %11211  ;;  %v3673_v52 = vpop.xlane.xlu1 %3672 }
 0x6b2   : > { %v3756_v23 = vmul.f32 %v11212_v3, %v13228_v9  ;;  %10146 = vmatmul.mubr.msk.bf16.vlgmr.msra.gmra.mrb[104].mxu0 %vm1488_vm3, %v3781_v50  ;;  %v3670_v27 = vpop.xlane.xlu0 %3669  ;;  %v11214_v1 = vpop.eup %11213 }
 0x6b3   : > { %10156 = vmatpush3.bf16.msra.mxu0 %v15525_v54  ;;  %11223 = vrcp.f32 %v3670_v27  ;;  %10157 = vmatprep.mubr.msk.bf16.mxu0 %vm11708_vm1, %v15468_v26  ;;  %v3757_v28 = vmul.f32 %v11214_v1, %v13226_v44 }
 0x6b4   : > { %v3782_v7 = vpack.c.bf16 %v3756_v23, %v3755_v49  ;;  %10167 = vmatprep.subr.bf16.mxu0 %v15468_v26  ;;  %11225 = vrcp.f32 %v3673_v52  ;;  %v15528_v52 = vld [vmem:[#allocation54_spill] sm:$0xff] }
 0x6b5   : > { %v11216_v0 = vpop.eup %11215  ;;  %v3679_v8 = vpop.xlane.xlu1 %3678 }
 0x6b6   : > { %v3758_v9 = vmul.f32 %v11216_v0, %v13238_v56  ;;  %10152 = vmatmul.mubr.msk.bf16.vlgmr.msra.gmra.mrb[136].mxu1 %vm1488_vm3, %v3782_v7  ;;  %v3676_v53 = vpop.xlane.xlu0 %3675  ;;  %v11218_v24 = vpop.eup %11217  ;;  %v15529_v7 = vld [vmem:[#allocation53_spill] sm:$0xff] }
 0x6b7   : > { %10162 = vmatpush3.bf16.msra.mxu1 %v15526_v62  ;;  %11227 = vrcp.f32 %v3676_v53  ;;  %10163 = vmatprep.mubr.msk.bf16.mxu1 %vm11708_vm1, %v15468_v26  ;;  %v3759_v44 = vmul.f32 %v11218_v24, %v13236_v20  ;;  %v15530_v24 = vld [vmem:[#allocation55_spill] sm:$0xff] }
 0x6b8   : > { %v3783_v17 = vpack.c.bf16 %v3758_v9, %v3757_v28  ;;  %10173 = vmatprep.subr.bf16.mxu1 %v15468_v26  ;;  %11229 = vrcp.f32 %v3679_v8 }
 0x6b9   : > { %v11220_v63 = vpop.eup %11219  ;;  %v3685_v43 = vpop.xlane.xlu1 %3684 }
 0x6ba   : > { %v3760_v56 = vmul.f32 %v11220_v63, %v13248_v29  ;;  %10158 = vmatmul.mubr.msk.bf16.vlgmr.msra.gmra.mrb[108].mxu0 %vm1488_vm3, %v3783_v17  ;;  %v3682_v31 = vpop.xlane.xlu0 %3681  ;;  %v11222_v51 = vpop.eup %11221 }
 0x6bb   : > { %10168 = vmatpush3.bf16.msra.mxu0 %v15527_v46  ;;  %11231 = vrcp.f32 %v3682_v31  ;;  %10169 = vmatprep.mubr.msk.bf16.mxu0 %vm11708_vm1, %v15468_v26  ;;  %v3761_v20 = vmul.f32 %v11222_v51, %v13246_v30 }
 0x6bc   : > { %v3784_v45 = vpack.c.bf16 %v3760_v56, %v3759_v44  ;;  %10179 = vmatprep.subr.bf16.mxu0 %v15468_v26  ;;  %11233 = vrcp.f32 %v3685_v43  ;;  %v15531_v56 = vld [vmem:[#allocation56_spill] sm:$0xff] }
 0x6bd   : > { %v11224_v42 = vpop.eup %11223  ;;  %v3691_v25 = vpop.xlane.xlu1 %3690 }
 0x6be   : > { %v3762_v29 = vmul.f32 %v11224_v42, %v13258_v19  ;;  %10164 = vmatmul.mubr.msk.bf16.vlgmr.msra.gmra.mrb[140].mxu1 %vm1488_vm3, %v3784_v45  ;;  %v3688_v50 = vpop.xlane.xlu0 %3687  ;;  %v11226_v3 = vpop.eup %11225 }
 0x6bf   : > { %10174 = vmatpush3.bf16.msra.mxu1 %v15528_v52  ;;  %11235 = vrcp.f32 %v3688_v50  ;;  %10175 = vmatprep.mubr.msk.bf16.mxu1 %vm11708_vm1, %v15468_v26  ;;  %v3763_v30 = vmul.f32 %v11226_v3, %v13256_v4 }
 0x6c0   : > { %v3785_v49 = vpack.c.bf16 %v3762_v29, %v3761_v20  ;;  %10185 = vmatprep.subr.bf16.mxu1 %v15468_v26  ;;  %11237 = vrcp.f32 %v3691_v25  ;;  %v15532_v25 = vld [vmem:[#allocation57_spill] sm:$0xff] }
 0x6c1   : > { %v11228_v23 = vpop.eup %11227  ;;  %v3697_v27 = vpop.xlane.xlu1 %3696 }
 0x6c2   : > { %v3764_v19 = vmul.f32 %v11228_v23, %v13268_v2  ;;  %10170 = vmatmul.mubr.msk.bf16.vlgmr.msra.gmra.mrb[112].mxu0 %vm1488_vm3, %v3785_v49  ;;  %v3694_v1 = vpop.xlane.xlu0 %3693  ;;  %v11230_v54 = vpop.eup %11229 }
 0x6c3   : > { %10180 = vmatpush3.bf16.msra.mxu0 %v15529_v7  ;;  %11239 = vrcp.f32 %v3694_v1  ;;  %10181 = vmatprep.mubr.msk.bf16.mxu0 %vm11708_vm1, %v15468_v26  ;;  %v3765_v4 = vmul.f32 %v11230_v54, %v13266_v47 }
 0x6c4   : > { %v3786_v0 = vpack.c.bf16 %v3764_v19, %v3763_v30  ;;  %10191 = vmatprep.subr.bf16.mxu0 %v15468_v26  ;;  %11241 = vrcp.f32 %v3697_v27 }
 0x6c5   : > { %v11232_v8 = vpop.eup %11231  ;;  %v3703_v28 = vpop.xlane.xlu1 %3702 }
 0x6c6   : > { %v3766_v2 = vmul.f32 %v11232_v8, %v13278_v12  ;;  %10176 = vmatmul.mubr.msk.bf16.vlgmr.msra.gmra.mrb[144].mxu1 %vm1488_vm3, %v3786_v0  ;;  %v3700_v9 = vpop.xlane.xlu0 %3699  ;;  %v11234_v53 = vpop.eup %11233 }
 0x6c7   : > { %10186 = vmatpush3.bf16.msra.mxu1 %v15530_v24  ;;  %11243 = vrcp.f32 %v3700_v9  ;;  %10187 = vmatprep.mubr.msk.bf16.mxu1 %vm11708_vm1, %v15468_v26  ;;  %v3767_v47 = vmul.f32 %v11234_v53, %v13276_v6 }
 0x6c8   : > { %v3787_v62 = vpack.c.bf16 %v3766_v2, %v3765_v4  ;;  %10197 = vmatprep.subr.bf16.mxu1 %v15468_v26  ;;  %11245 = vrcp.f32 %v3703_v28 }
 0x6c9   : > { %v11236_v17 = vpop.eup %11235  ;;  %v3709_v63 = vpop.xlane.xlu1 %3708 }
 0x6ca   : > { %v3768_v12 = vmul.f32 %v11236_v17, %v13288_v48  ;;  %10182 = vmatmul.mubr.msk.bf16.vlgmr.msra.gmra.mrb[116].mxu0 %vm1488_vm3, %v3787_v62  ;;  %v3706_v43 = vpop.xlane.xlu0 %3705  ;;  %v11238_v44 = vpop.eup %11237 }
 0x6cb   : > { %10192 = vmatpush3.bf16.msra.mxu0 %v15531_v56  ;;  %11247 = vrcp.f32 %v3706_v43  ;;  %10193 = vmatprep.mubr.msk.bf16.mxu0 %vm11708_vm1, %v15468_v26  ;;  %v3769_v6 = vmul.f32 %v11238_v44, %v13286_v22 }
 0x6cc   : > { %v3788_v31 = vpack.c.bf16 %v3768_v12, %v3767_v47  ;;  %10203 = vmatprep.subr.bf16.mxu0 %v15468_v26  ;;  %11249 = vrcp.f32 %v3709_v63 }
 0x6cd   : > { %v11240_v51 = vpop.eup %11239  ;;  %v4599_v46 = vpop.permute.xlu1 %4598 }
 0x6ce   : > { %v3770_v48 = vmul.f32 %v11240_v51, %v13297_v5  ;;  %10188 = vmatmul.mubr.msk.bf16.vlgmr.msra.gmra.mrb[148].mxu1 %vm1488_vm3, %v3788_v31  ;;  %v3712_v45 = vpop.xlane.xlu0 %3711  ;;  %v11242_v42 = vpop.eup %11241 }
 0x6cf   : > { %10198 = vmatpush3.bf16.msra.mxu1 %v15532_v25  ;;  %11251 = vrcp.f32 %v3712_v45  ;;  %10199 = vmatprep.mubr.msk.bf16.mxu1 %vm11708_vm1, %v15468_v26  ;;  %v3771_v3 = vmul.f32 %v11242_v42, %v13295_v21 }
 0x6d0   : > { %v3789_v20 = vpack.c.bf16 %v3770_v48, %v3769_v6  ;;  %10209 = vmatprep.subr.bf16.mxu1 %v15468_v26 }
 0x6d1   : > { %v11244_v29 = vpop.eup %11243  ;;  %v4650_v50 = vpop.permute.xlu1 %4649 }
 0x6d2   : > { %v3772_v22 = vmul.f32 %v11244_v29, %v13305_v18  ;;  %10194 = vmatmul.mubr.msk.bf16.vlgmr.msra.gmra.mrb[120].mxu0 %vm1488_vm3, %v3789_v20  ;;  %v4548_v5 = vpop.permute.xlu0 %4547  ;;  %v11246_v52 = vpop.eup %11245  ;;  %v4655_v2 = vsel %vm690_vm2, %v4650_v50, 0 }
 0x6d3   : > { %10204 = vmatpush3.bf16.msra.mxu0 %v13362_v16  ;;  %10205 = vmatprep.mubr.msk.bf16.mxu0 %vm11708_vm1, %v15468_v26  ;;  %v3773_v30 = vmul.f32 %v11246_v52, %v13303_v10  ;;  %v4553_v0 = vsel %vm690_vm2, %v4548_v5, 0 }
 0x6d4   : > { %v3790_v49 = vpack.c.bf16 %v3772_v22, %v3771_v3  ;;  %10215 = vmatprep.subr.bf16.mxu0 %v15468_v26 }
 0x6d5   : > { %v11248_v23 = vpop.eup %11247  ;;  %v4701_v27 = vpop.permute.xlu1 %4700 }
 0x6d6   : > { %v3774_v21 = vmul.f32 %v11248_v23, %v13313_v32  ;;  %10200 = vmatmul.mubr.msk.bf16.vlgmr.msra.gmra.mrb[152].mxu1 %vm1488_vm3, %v3790_v49  ;;  %v4546_v18 = vpop.permute.xlu0 %4545  ;;  %v11250_v19 = vpop.eup %11249  ;;  %v4706_v24 = vsel %vm690_vm2, %v4701_v27, 0 }
 0x6d7   : > { %10210 = vmatpush3.bf16.msra.mxu1 %v13358_v34  ;;  %10211 = vmatprep.mubr.msk.bf16.mxu1 %vm11708_vm1, %v15468_v26  ;;  %v3775_v7 = vmul.f32 %v11250_v19, %v13311_v60  ;;  %v4604_v60 = vsel %vm690_vm2, %v4599_v46, 0 }
 0x6d8   : > { %v3791_v16 = vpack.c.bf16 %v3774_v21, %v3773_v30  ;;  %10221 = vmatprep.subr.bf16.mxu1 %v15468_v26 }
 0x6d9   : > { %v11252_v1 = vpop.eup %11251  ;;  %v4752_v54 = vpop.permute.xlu1 %4751 }
 0x6da   : > { %v3776_v10 = vmul.f32 %v11252_v1, %v13319_v61  ;;  %10206 = vmatmul.mubr.msk.bf16.vlgmr.msra.gmra.mrb[124].mxu0 %vm1488_vm3, %v3791_v16  ;;  %v4597_v32 = vpop.permute.xlu0 %4596  ;;  %v4757_v63 = vsel %vm690_vm2, %v4752_v54, 0 }
 0x6db   : > { %10217 = vmatprep.mubr.msk.bf16.mxu0 %vm11708_vm1, %v15468_v26 }
 0x6dc   : > { %10216 = vmatpush3.bf16.xpose.msra.mxu0 %v4553_v0  ;;  %v3792_v34 = vpack.c.bf16 %v3776_v10, %v3775_v7 }
 0x6dd   : > { %v4803_v8 = vpop.permute.xlu1 %4802  ;;  %10227 = vmatprep.subr.bf16.mxu0 %v15468_v26 }
 0x6de   : > { %10212 = vmatmul.mubr.msk.bf16.vlgmr.msra.gmra.mrb[156].mxu1 %vm1488_vm3, %v3792_v34  ;;  %v4648_v28 = vpop.permute.xlu0 %4647  ;;  %v4808_v43 = vsel %vm690_vm2, %v4803_v8, 0 }
 0x6df   : > { %10223 = vmatprep.mubr.msk.bf16.mxu1 %vm11708_vm1, %v15468_v26 }
 0x6e0   : > { %10222 = vmatpush3.bf16.xpose.msra.mxu1 %v4604_v60 }
 0x6e1   : > { %v4854_v61 = vpop.permute.xlu1 %4853  ;;  %10233 = vmatprep.subr.bf16.mxu1 %v15468_v26 }
 0x6e2   : > { %v4699_v4 = vpop.permute.xlu0 %4698  ;;  %v4859_v31 = vsel %vm690_vm2, %v4854_v61, 0 }
 0x6e3   : > { %10218 = vmatmul.mubr.msk.bf16.vlgmr.msra.gmra.mrb[128].mxu0 %vm690_vm2, %v4546_v18 }
 0x6e4   : > { %10228 = vmatpush3.bf16.xpose.msra.mxu0 %v4655_v2  ;;  %10229 = vmatprep.mubr.msk.bf16.mxu0 %vm11708_vm1, %v15468_v26 }
 0x6e5   : > { %v4905_v9 = vpop.permute.xlu1 %4904  ;;  %10239 = vmatprep.subr.bf16.mxu0 %v15468_v26 }
 0x6e6   : > { %v4750_v53 = vpop.permute.xlu0 %4749  ;;  %v4910_v46 = vsel %vm690_vm2, %v4905_v9, 0 }
 0x6e7   : > { %10224 = vmatmul.mubr.msk.bf16.vlgmr.msra.gmra.mrb[160].mxu1 %vm690_vm2, %v4597_v32 }
 0x6e8   : > { %10234 = vmatpush3.bf16.xpose.msra.mxu1 %v4706_v24  ;;  %10235 = vmatprep.mubr.msk.bf16.mxu1 %vm11708_vm1, %v15468_v26 }
 0x6e9   : > { %v4956_v62 = vpop.permute.xlu1 %4955  ;;  %10245 = vmatprep.subr.bf16.mxu1 %v15468_v26 }
 0x6ea   : > { %v4801_v17 = vpop.permute.xlu0 %4800  ;;  %v4961_v48 = vsel %vm690_vm2, %v4956_v62, 0 }
 0x6eb   : > { %10230 = vmatmul.mubr.msk.bf16.vlgmr.msra.gmra.mrb[132].mxu0 %vm690_vm2, %v4648_v28 }
 0x6ec   : > { %10240 = vmatpush3.bf16.xpose.msra.mxu0 %v4757_v63  ;;  %10241 = vmatprep.mubr.msk.bf16.mxu0 %vm11708_vm1, %v15468_v26 }
 0x6ed   : > { %v5007_v47 = vpop.permute.xlu1 %5006  ;;  %10251 = vmatprep.subr.bf16.mxu0 %v15468_v26 }
 0x6ee   : > { %v4852_v12 = vpop.permute.xlu0 %4851  ;;  %v5012_v25 = vsel %vm690_vm2, %v5007_v47, 0 }
 0x6ef   : > { %10236 = vmatmul.mubr.msk.bf16.vlgmr.msra.gmra.mrb[164].mxu1 %vm690_vm2, %v4699_v4 }
 0x6f0   : > { %10246 = vmatpush3.bf16.xpose.msra.mxu1 %v4808_v43  ;;  %10247 = vmatprep.mubr.msk.bf16.mxu1 %vm11708_vm1, %v15468_v26 }
 0x6f1   : > { %v5058_v44 = vpop.permute.xlu1 %5057  ;;  %10257 = vmatprep.subr.bf16.mxu1 %v15468_v26 }
 0x6f2   : > { %v4903_v56 = vpop.permute.xlu0 %4902  ;;  %v5063_v29 = vsel %vm690_vm2, %v5058_v44, 0 }
 0x6f3   : > { %10242 = vmatmul.mubr.msk.bf16.vlgmr.msra.gmra.mrb[136].mxu0 %vm690_vm2, %v4750_v53 }
 0x6f4   : > { %10252 = vmatpush3.bf16.xpose.msra.mxu0 %v4859_v31  ;;  %10253 = vmatprep.mubr.msk.bf16.mxu0 %vm11708_vm1, %v15468_v26 }
 0x6f5   : > { %10263 = vmatprep.subr.bf16.mxu0 %v15468_v26  ;;  %v5109_v6 = vpop.permute.xlu1 %5108 }
 0x6f6   : > { %v4954_v51 = vpop.permute.xlu0 %4953  ;;  %v5114_v3 = vsel %vm690_vm2, %v5109_v6, 0 }
 0x6f7   : > { %10248 = vmatmul.mubr.msk.bf16.vlgmr.msra.gmra.mrb[168].mxu1 %vm690_vm2, %v4801_v17 }
 0x6f8   : > { %10258 = vmatpush3.bf16.xpose.msra.mxu1 %v4910_v46  ;;  %10259 = vmatprep.mubr.msk.bf16.mxu1 %vm11708_vm1, %v15468_v26 }
 0x6f9   : > { %10269 = vmatprep.subr.bf16.mxu1 %v15468_v26  ;;  %v5160_v42 = vpop.permute.xlu1 %5159 }
 0x6fa   : > { %v5005_v45 = vpop.permute.xlu0 %5004  ;;  %v5165_v52 = vsel %vm690_vm2, %v5160_v42, 0 }
 0x6fb   : > { %10254 = vmatmul.mubr.msk.bf16.vlgmr.msra.gmra.mrb[140].mxu0 %vm690_vm2, %v4852_v12 }
 0x6fc   : > { %10264 = vmatpush3.bf16.xpose.msra.mxu0 %v4961_v48  ;;  %10265 = vmatprep.mubr.msk.bf16.mxu0 %vm11708_vm1, %v15468_v26 }
 0x6fd   : > { %10275 = vmatprep.subr.bf16.mxu0 %v15468_v26  ;;  %v5211_v50 = vpop.permute.xlu1 %5210 }
 0x6fe   : > { %v5056_v20 = vpop.permute.xlu0 %5055  ;;  %v5216_v23 = vsel %vm690_vm2, %v5211_v50, 0 }
 0x6ff   : > { %10260 = vmatmul.mubr.msk.bf16.vlgmr.msra.gmra.mrb[172].mxu1 %vm690_vm2, %v4903_v56 }
 0x700   : > { %10270 = vmatpush3.bf16.xpose.msra.mxu1 %v5012_v25  ;;  %10271 = vmatprep.mubr.msk.bf16.mxu1 %vm11708_vm1, %v15468_v26 }
 0x701   : > { %10281 = vmatprep.subr.bf16.mxu1 %v15468_v26  ;;  %v5262_v5 = vpop.permute.xlu1 %5261 }
 0x702   : > { %v5107_v22 = vpop.permute.xlu0 %5106  ;;  %v5267_v30 = vsel %vm690_vm2, %v5262_v5, 0 }
 0x703   : > { %10266 = vmatmul.mubr.msk.bf16.vlgmr.msra.gmra.mrb[144].mxu0 %vm690_vm2, %v4954_v51  ;;  %v13691_v51 = vld [vmem:[#allocation8 + $0x28] sm:$0xff] }
 0x704   : > { %10276 = vmatpush3.bf16.xpose.msra.mxu0 %v5063_v29  ;;  %10277 = vmatprep.mubr.msk.bf16.mxu0 %vm11708_vm1, %v15468_v26 }
 0x705   : > { %10287 = vmatprep.subr.bf16.mxu0 %v15468_v26  ;;  %v5313_v27 = vpop.permute.xlu1 %5312 }
 0x706   : > { %v5158_v49 = vpop.permute.xlu0 %5157  ;;  %v5318_v19 = vsel %vm690_vm2, %v5313_v27, 0 }
 0x707   : > { %10272 = vmatmul.mubr.msk.bf16.vlgmr.msra.gmra.mrb[176].mxu1 %vm690_vm2, %v5005_v45 }
 0x708   : > { %10282 = vmatpush3.bf16.xpose.msra.mxu1 %v5114_v3  ;;  %10283 = vmatprep.mubr.msk.bf16.mxu1 %vm11708_vm1, %v15468_v26 }
 0x709   : > { %10293 = vmatprep.subr.bf16.mxu1 %v15468_v26  ;;  %v5311_v18 = vpop.permute.xlu1 %5310 }
 0x70a   : > { %v5209_v21 = vpop.permute.xlu0 %5208 }
 0x70b   : > { %10278 = vmatmul.mubr.msk.bf16.vlgmr.msra.gmra.mrb[148].mxu0 %vm690_vm2, %v5056_v20 }
 0x70c   : > { %10288 = vmatpush3.bf16.xpose.msra.mxu0 %v5165_v52  ;;  %10289 = vmatprep.mubr.msk.bf16.mxu0 %vm11708_vm1, %v15468_v26 }
 0x70d   : > { %10299 = vmatprep.subr.bf16.mxu0 %v15468_v26  ;;  %v5730_v1 = vpop.permute.xlu1 %5729 }
 0x70e   : > { %v5260_v16 = vpop.permute.xlu0 %5259 }
 0x70f   : > { %10284 = vmatmul.mubr.msk.bf16.vlgmr.msra.gmra.mrb[180].mxu1 %vm690_vm2, %v5107_v22 }
 0x710   : > { %10294 = vmatpush3.bf16.xpose.msra.mxu1 %v5216_v23  ;;  %10295 = vmatprep.mubr.msk.bf16.mxu1 %vm11708_vm1, %v15468_v26 }
 0x711   : > { %10305 = vmatprep.subr.bf16.mxu1 %v15468_v26 }
 0x712   : > { %v5777_v54 = vpop.permute.xlu0 %5776 }
 0x713   : > { %10290 = vmatmul.mubr.msk.bf16.vlgmr.msra.gmra.mrb[152].mxu0 %vm690_vm2, %v5158_v49 }
 0x714   : > { %10300 = vmatpush3.bf16.xpose.msra.mxu0 %v5267_v30  ;;  %10301 = vmatprep.mubr.msk.bf16.mxu0 %vm11708_vm1, %v15468_v26 }
 0x715   : > { %10311 = vmatprep.subr.bf16.mxu0 %v15468_v26 }
 0x717   : > { %10296 = vmatmul.mubr.msk.bf16.vlgmr.msra.gmra.mrb[184].mxu1 %vm690_vm2, %v5209_v21 }
 0x718   : > { %10306 = vmatpush3.bf16.xpose.msra.mxu1 %v5318_v19  ;;  %10307 = vmatprep.mubr.msk.bf16.mxu1 %vm11708_vm1, %v15468_v26 }
 0x719   : > { %10317 = vmatprep.subr.bf16.mxu1 %v15468_v26 }
 0x71b   : > { %10302 = vmatmul.mubr.msk.bf16.vlgmr.msra.gmra.mrb[156].mxu0 %vm690_vm2, %v5260_v16 }
 0x71c   : > { %10312 = vmatpush3.bf16.msra.mxu0 %v5730_v1  ;;  %10313 = vmatprep.mubr.msk.bf16.mxu0 %vm11708_vm1, %v15468_v26 }
 0x71d   : > { %10323 = vmatprep.subr.bf16.mxu0 %v15468_v26 }
 0x71f   : > { %10308 = vmatmul.mubr.msk.bf16.vlgmr.msra.gmra.mrb[188].mxu1 %vm690_vm2, %v5311_v18 }
 0x720   : > { %10318 = vmatpush3.bf16.msra.mxu1 %v5777_v54  ;;  %10319 = vmatprep.mubr.msk.bf16.mxu1 %vm11708_vm1, %v15468_v26 }
 0x721   : > { %10329 = vmatprep.subr.bf16.mxu1 %v15468_v26 }
 0x76b   : > { %v13593_v7 = vpop.f32.mrb[96].mxu0 }
 0x76c   : > { %15533 = vst [vmem:[#allocation48_spill] sm:$0xff] %v13593_v7  ;;  %v10123_v10 = vpop.f32.mrb[97].mxu0 }
 0x76d   : > { %v13595_v32 = vpop.f32.mrb[98].mxu0 }
 0x76e   : > { %15534 = vst [vmem:[#allocation47_spill] sm:$0xff] %v13595_v32  ;;  %v10124_v34 = vpop.f32.mrb[99].mxu0 }
 0x778   : > { %v13599_v8 = vpop.f32.mrb[128].mxu1 }
 0x779   : > { %15535 = vst [vmem:[#allocation50_spill] sm:$0xff] %v13599_v8  ;;  %v10129_v28 = vpop.f32.mrb[129].mxu1 }
 0x77a   : > { %v13601_v60 = vpop.f32.mrb[130].mxu1 }
 0x77b   : > { %15536 = vst [vmem:[#allocation49_spill] sm:$0xff] %v13601_v60  ;;  %v10130_v4 = vpop.f32.mrb[131].mxu1 }
 0x77d   : > { %v13605_v2 = vpop.f32.mrb[100].mxu0 }
 0x77e   : > { %15537 = vst [vmem:[#allocation52_spill] sm:$0xff] %v13605_v2  ;;  %v10135_v9 = vpop.f32.mrb[101].mxu0 }
 0x77f   : > { %v13607_v53 = vpop.f32.mrb[102].mxu0 }
 0x780   : > { %15538 = vst [vmem:[#allocation51_spill] sm:$0xff] %v13607_v53  ;;  %v10136_v62 = vpop.f32.mrb[103].mxu0 }
 0x781   : > { %v13611_v17 = vpop.f32.mrb[132].mxu1 }
 0x782   : > { %15539 = vst [vmem:[#allocation54_spill] sm:$0xff] %v13611_v17  ;;  %v10141_v63 = vpop.f32.mrb[133].mxu1 }
 0x783   : > { %v13613_v47 = vpop.f32.mrb[134].mxu1 }
 0x784   : > { %15540 = vst [vmem:[#allocation53_spill] sm:$0xff] %v13613_v47  ;;  %v10142_v43 = vpop.f32.mrb[135].mxu1 }
 0x785   : > { %v13617_v44 = vpop.f32.mrb[104].mxu0 }
 0x786   : > { %15541 = vst [vmem:[#allocation55_spill] sm:$0xff] %v13617_v44  ;;  %v10147_v56 = vpop.f32.mrb[105].mxu0 }
 0x787   : > { %v13619_v31 = vpop.f32.mrb[106].mxu0 }
 0x788   : > { %15542 = vst [vmem:[#allocation56_spill] sm:$0xff] %v13619_v31  ;;  %v10148_v46 = vpop.f32.mrb[107].mxu0 }
 0x789   : > { %v13623_v6 = vpop.f32.mrb[136].mxu1 }
 0x78a   : > { %15543 = vst [vmem:[#allocation57_spill] sm:$0xff] %v13623_v6  ;;  %v10153_v48 = vpop.f32.mrb[137].mxu1 }
 0x78b   : > { %v13625_v45 = vpop.f32.mrb[138].mxu1 }
 0x78c   : > { %15544 = vst [vmem:[#allocation58_spill] sm:$0xff] %v13625_v45  ;;  %v10154_v25 = vpop.f32.mrb[139].mxu1 }
 0x78d   : > { %v13629_v20 = vpop.f32.mrb[108].mxu0 }
 0x78e   : > { %15545 = vst [vmem:[#allocation59_spill] sm:$0xff] %v13629_v20  ;;  %v10159_v29 = vpop.f32.mrb[109].mxu0 }
 0x78f   : > { %v13631_v50 = vpop.f32.mrb[110].mxu0 }
 0x790   : > { %15546 = vst [vmem:[#allocation60_spill] sm:$0xff] %v13631_v50  ;;  %v10160_v22 = vpop.f32.mrb[111].mxu0 }
 0x791   : > { %v13635_v5 = vpop.f32.mrb[140].mxu1 }
 0x792   : > { %15547 = vst [vmem:[#allocation61_spill] sm:$0xff] %v13635_v5  ;;  %v10165_v52 = vpop.f32.mrb[141].mxu1 }
 0x793   : > { %v13637_v49 = vpop.f32.mrb[142].mxu1 }
 0x794   : > { %15548 = vst [vmem:[#allocation62_spill] sm:$0xff] %v13637_v49  ;;  %v10166_v27 = vpop.f32.mrb[143].mxu1 }
 0x795   : > { %v13641_v30 = vpop.f32.mrb[112].mxu0 }
 0x796   : > { %15549 = vst [vmem:[#allocation63_spill] sm:$0xff] %v13641_v30  ;;  %v10171_v21 = vpop.f32.mrb[113].mxu0 }
 0x797   : > { %v13643_v18 = vpop.f32.mrb[114].mxu0 }
 0x798   : > { %15550 = vst [vmem:[#allocation64_spill] sm:$0xff] %v13643_v18  ;;  %v10172_v16 = vpop.f32.mrb[115].mxu0 }
 0x799   : > { %v13647_v1 = vpop.f32.mrb[144].mxu1 }
 0x79a   : > { %15551 = vst [vmem:[#allocation65_spill] sm:$0xff] %v13647_v1  ;;  %v10177_v54 = vpop.f32.mrb[145].mxu1 }
 0x79b   : > { %v13649_v10 = vpop.f32.mrb[146].mxu1 }
 0x79c   : > { %15552 = vst [vmem:[#allocation66_spill] sm:$0xff] %v13649_v10  ;;  %v10178_v28 = vpop.f32.mrb[147].mxu1 }
 0x79d   : > { %v13653_v4 = vpop.f32.mrb[116].mxu0 }
 0x79e   : > { %15553 = vst [vmem:[#allocation67_spill] sm:$0xff] %v13653_v4  ;;  %v10183_v9 = vpop.f32.mrb[117].mxu0 }
 0x79f   : > { %v13655_v62 = vpop.f32.mrb[118].mxu0 }
 0x7a0   : > { %15554 = vst [vmem:[#allocation68_spill] sm:$0xff] %v13655_v62  ;;  %v10184_v43 = vpop.f32.mrb[119].mxu0 }
 0x7a1   : > { %v13659_v56 = vpop.f32.mrb[148].mxu1  ;;  %v13689_v43 = vld [vmem:[#allocation8 + $0x20] sm:$0xff] }
 0x7a2   : > { %15555 = vst [vmem:[#allocation69_spill] sm:$0xff] %v13659_v56  ;;  %v10189_v46 = vpop.f32.mrb[149].mxu1 }
 0x7a3   : > { %v13661_v48 = vpop.f32.mrb[150].mxu1 }
 0x7a4   : > { %15556 = vst [vmem:[#allocation70_spill] sm:$0xff] %v13661_v48  ;;  %v10190_v29 = vpop.f32.mrb[151].mxu1 }
 0x7a5   : > { %v13665_v22 = vpop.f32.mrb[120].mxu0 }
 0x7a6   : > { %15557 = vst [vmem:[#allocation71_spill] sm:$0xff] %v13665_v22  ;;  %v10195_v52 = vpop.f32.mrb[121].mxu0 }
 0x7a7   : > { %v13667_v27 = vpop.f32.mrb[122].mxu0 }
 0x7a8   : > { %15558 = vst [vmem:[#allocation72_spill] sm:$0xff] %v13667_v27  ;;  %v10196_v16 = vpop.f32.mrb[123].mxu0 }
 0x7a9   : > { %v13671_v54 = vpop.f32.mrb[152].mxu1 }
 0x7aa   : > { %15559 = vst [vmem:[#allocation73_spill] sm:$0xff] %v13671_v54  ;;  %v10201_v28 = vpop.f32.mrb[153].mxu1 }
 0x7ab   : > { %v13673_v9 = vpop.f32.mrb[154].mxu1 }
 0x7ac   : > { %15560 = vst [vmem:[#allocation74_spill] sm:$0xff] %v13673_v9  ;;  %v10202_v46 = vpop.f32.mrb[155].mxu1 }
 0x7ad   : > { %v13677_v25 = vpop.f32.mrb[124].mxu0 }
 0x7ae   : > { %15561 = vst [vmem:[#allocation75_spill] sm:$0xff] %v13677_v25  ;;  %v10207_v29 = vpop.f32.mrb[125].mxu0 }
 0x7af   : > { %v13679_v63 = vpop.f32.mrb[126].mxu0 }
 0x7b0   : > { %15562 = vst [vmem:[#allocation76_spill] sm:$0xff] %v13679_v63  ;;  %v10208_v19 = vpop.f32.mrb[127].mxu0 }
 0x7b1   : > { %v13683_v21 = vpop.f32.mrb[156].mxu1 }
 0x7b2   : > { %15563 = vst [vmem:[#allocation77_spill] sm:$0xff] %v13683_v21  ;;  %v10213_v16 = vpop.f32.mrb[157].mxu1 }
 0x7b3   : > { %v13685_v3 = vpop.f32.mrb[158].mxu1 }
 0x7b4   : > { %15564 = vst [vmem:[#allocation78_spill] sm:$0xff] %v13685_v3  ;;  %v10214_v34 = vpop.f32.mrb[159].mxu1 }
 0x7b6   : > { %v4589_v46 = vpop.f32.mrb[128].mxu0 }
 0x7b7   : > { %v13694_v29 = vadd.f32 %v4589_v46, %v13689_v43  ;;  %v10219_v23 = vpop.f32.mrb[129].mxu0 }
 0x7b8   : > { %v4592_v52 = vpop.f32.mrb[130].mxu0 }
 0x7b9   : > { %v13697_v19 = vadd.f32 %v4592_v52, %v13691_v51  ;;  %v10220_v16 = vpop.f32.mrb[131].mxu0  ;;  %v5361_v24 = vsel %vm1488_vm3, %v13694_v29, -inf }
 0x7ba   : > { %5362 = vmax.xlane.f32.xlu0 %v5361_v24  ;;  %v4640_v28 = vpop.f32.mrb[160].mxu1 }
 0x7bb   : > { %v13702_v34 = vadd.f32 %v4640_v28, %v13689_v43  ;;  %v10225_v42 = vpop.f32.mrb[161].mxu1  ;;  %v5364_v0 = vsel %vm1488_vm3, %v13697_v19, -inf }
 0x7bc   : > { %5365 = vmax.xlane.f32.xlu1 %v5364_v0  ;;  %v4643_v46 = vpop.f32.mrb[162].mxu1 }
 0x7bd   : > { %v13707_v23 = vadd.f32 %v4643_v46, %v13691_v51  ;;  %v10226_v52 = vpop.f32.mrb[163].mxu1  ;;  %v5367_v16 = vsel %vm1488_vm3, %v13702_v34, -inf }
 0x7be   : > { %5368 = vmax.xlane.f32.xlu0 %v5367_v16  ;;  %v4691_v12 = vpop.f32.mrb[132].mxu0 }
 0x7bf   : > { %v13712_v24 = vadd.f32 %v4691_v12, %v13689_v43  ;;  %v10231_v28 = vpop.f32.mrb[133].mxu0  ;;  %v5370_v0 = vsel %vm1488_vm3, %v13707_v23, -inf }
 0x7c0   : > { %v4694_v61 = vpop.f32.mrb[134].mxu0 }
 0x7c1   : > { %v13715_v42 = vadd.f32 %v4694_v61, %v13691_v51  ;;  %v10232_v21 = vpop.f32.mrb[135].mxu0  ;;  %v5373_v46 = vsel %vm1488_vm3, %v13712_v24, -inf }
 0x7c2   : > { %5371 = vmax.xlane.f32.xlu0 %v5370_v0  ;;  %5374 = vmax.xlane.f32.xlu1 %v5373_v46  ;;  %v4742_v52 = vpop.f32.mrb[164].mxu1 }
 0x7c3   : > { %v13722_v16 = vadd.f32 %v4742_v52, %v13689_v43  ;;  %v10237_v12 = vpop.f32.mrb[165].mxu1  ;;  %v5376_v21 = vsel %vm1488_vm3, %v13715_v42, -inf }
 0x7c4   : > { %v4745_v3 = vpop.f32.mrb[166].mxu1 }
 0x7c5   : > { %v13725_v28 = vadd.f32 %v4745_v3, %v13691_v51  ;;  %v10238_v61 = vpop.f32.mrb[167].mxu1  ;;  %v5379_v25 = vsel %vm1488_vm3, %v13722_v16, -inf }
 0x7c6   : > { %5377 = vmax.xlane.f32.xlu0 %v5376_v21  ;;  %5380 = vmax.xlane.f32.xlu1 %v5379_v25  ;;  %v4793_v0 = vpop.f32.mrb[136].mxu0 }
 0x7c7   : > { %v13732_v46 = vadd.f32 %v4793_v0, %v13689_v43  ;;  %v10243_v52 = vpop.f32.mrb[137].mxu0  ;;  %v5382_v61 = vsel %vm1488_vm3, %v13725_v28, -inf }
 0x7c8   : > { %v4796_v63 = vpop.f32.mrb[138].mxu0 }
 0x7c9   : > { %v13735_v12 = vadd.f32 %v4796_v63, %v13691_v51  ;;  %v10244_v3 = vpop.f32.mrb[139].mxu0  ;;  %v5385_v54 = vsel %vm1488_vm3, %v13732_v46, -inf }
 0x7ca   : > { %5383 = vmax.xlane.f32.xlu0 %v5382_v61  ;;  %5386 = vmax.xlane.f32.xlu1 %v5385_v54  ;;  %v4844_v21 = vpop.f32.mrb[168].mxu1 }
 0x7cb   : > { %v13742_v25 = vadd.f32 %v4844_v21, %v13689_v43  ;;  %v10249_v0 = vpop.f32.mrb[169].mxu1  ;;  %v5388_v3 = vsel %vm1488_vm3, %v13735_v12, -inf }
 0x7cc   : > { %v4847_v9 = vpop.f32.mrb[170].mxu1 }
 0x7cd   : > { %v13745_v52 = vadd.f32 %v4847_v9, %v13691_v51  ;;  %v10250_v63 = vpop.f32.mrb[171].mxu1  ;;  %v5391_v22 = vsel %vm1488_vm3, %v13742_v25, -inf }
 0x7ce   : > { %5389 = vmax.xlane.f32.xlu0 %v5388_v3  ;;  %5392 = vmax.xlane.f32.xlu1 %v5391_v22  ;;  %v4895_v61 = vpop.f32.mrb[140].mxu0 }
 0x7cf   : > { %v13752_v54 = vadd.f32 %v4895_v61, %v13689_v43  ;;  %v10255_v21 = vpop.f32.mrb[141].mxu0  ;;  %v5394_v63 = vsel %vm1488_vm3, %v13745_v52, -inf }
 0x7d0   : > { %v4898_v27 = vpop.f32.mrb[142].mxu0 }
 0x7d1   : > { %v13755_v0 = vadd.f32 %v4898_v27, %v13691_v51  ;;  %v10256_v9 = vpop.f32.mrb[143].mxu0  ;;  %v5397_v56 = vsel %vm1488_vm3, %v13752_v54, -inf }
 0x7d2   : > { %5395 = vmax.xlane.f32.xlu0 %v5394_v63  ;;  %5398 = vmax.xlane.f32.xlu1 %v5397_v56  ;;  %v4946_v3 = vpop.f32.mrb[172].mxu1 }
 0x7d3   : > { %v13762_v22 = vadd.f32 %v4946_v3, %v13689_v43  ;;  %v10261_v61 = vpop.f32.mrb[173].mxu1  ;;  %v5400_v9 = vsel %vm1488_vm3, %v13755_v0, -inf }
 0x7d4   : > { %v4949_v48 = vpop.f32.mrb[174].mxu1 }
 0x7d5   : > { %v13765_v21 = vadd.f32 %v4949_v48, %v13691_v51  ;;  %v10262_v27 = vpop.f32.mrb[175].mxu1  ;;  %v5403_v4 = vsel %vm1488_vm3, %v13762_v22, -inf }
 0x7d6   : > { %5401 = vmax.xlane.f32.xlu0 %v5400_v9  ;;  %5404 = vmax.xlane.f32.xlu1 %v5403_v4  ;;  %v4997_v63 = vpop.f32.mrb[144].mxu0 }
 0x7d7   : > { %v13772_v56 = vadd.f32 %v4997_v63, %v13689_v43  ;;  %v10267_v3 = vpop.f32.mrb[145].mxu0  ;;  %v5406_v27 = vsel %vm1488_vm3, %v13765_v21, -inf }
 0x7d8   : > { %v5000_v62 = vpop.f32.mrb[146].mxu0 }
 0x7d9   : > { %v13775_v61 = vadd.f32 %v5000_v62, %v13691_v51  ;;  %v10268_v48 = vpop.f32.mrb[147].mxu0  ;;  %v5409_v30 = vsel %vm1488_vm3, %v13772_v56, -inf }
 0x7da   : > { %5407 = vmax.xlane.f32.xlu0 %v5406_v27  ;;  %5410 = vmax.xlane.f32.xlu1 %v5409_v30  ;;  %v5048_v9 = vpop.f32.mrb[176].mxu1 }
 0x7db   : > { %v13782_v4 = vadd.f32 %v5048_v9, %v13689_v43  ;;  %v10273_v63 = vpop.f32.mrb[177].mxu1  ;;  %v5412_v48 = vsel %vm1488_vm3, %v13775_v61, -inf }
 0x7dc   : > { %v5051_v18 = vpop.f32.mrb[178].mxu1 }
 0x7dd   : > { %v13785_v3 = vadd.f32 %v5051_v18, %v13691_v51  ;;  %v10274_v62 = vpop.f32.mrb[179].mxu1  ;;  %v5415_v20 = vsel %vm1488_vm3, %v13782_v4, -inf }
 0x7de   : > { %5413 = vmax.xlane.f32.xlu0 %v5412_v48  ;;  %5416 = vmax.xlane.f32.xlu1 %v5415_v20  ;;  %v5099_v27 = vpop.f32.mrb[148].mxu0 }
 0x7df   : > { %v13792_v30 = vadd.f32 %v5099_v27, %v13689_v43  ;;  %v10279_v9 = vpop.f32.mrb[149].mxu0  ;;  %v5418_v62 = vsel %vm1488_vm3, %v13785_v3, -inf }
 0x7e0   : > { %v5102_v50 = vpop.f32.mrb[150].mxu0 }
 0x7e1   : > { %v13795_v63 = vadd.f32 %v5102_v50, %v13691_v51  ;;  %v10280_v18 = vpop.f32.mrb[151].mxu0  ;;  %v5421_v1 = vsel %vm1488_vm3, %v13792_v30, -inf }
 0x7e2   : > { %5419 = vmax.xlane.f32.xlu0 %v5418_v62  ;;  %5422 = vmax.xlane.f32.xlu1 %v5421_v1  ;;  %v5150_v48 = vpop.f32.mrb[180].mxu1 }
 0x7e3   : > { %v13802_v20 = vadd.f32 %v5150_v48, %v13689_v43  ;;  %v10285_v27 = vpop.f32.mrb[181].mxu1  ;;  %v5424_v18 = vsel %vm1488_vm3, %v13795_v63, -inf }
 0x7e4   : > { %v5153_v10 = vpop.f32.mrb[182].mxu1 }
 0x7e5   : > { %v13805_v9 = vadd.f32 %v5153_v10, %v13691_v51  ;;  %v10286_v50 = vpop.f32.mrb[183].mxu1  ;;  %v5427_v44 = vsel %vm1488_vm3, %v13802_v20, -inf }
 0x7e6   : > { %5425 = vmax.xlane.f32.xlu0 %v5424_v18  ;;  %5428 = vmax.xlane.f32.xlu1 %v5427_v44  ;;  %v5201_v62 = vpop.f32.mrb[152].mxu0 }
 0x7e7   : > { %v13812_v1 = vadd.f32 %v5201_v62, %v13689_v43  ;;  %v10291_v48 = vpop.f32.mrb[153].mxu0  ;;  %v5430_v50 = vsel %vm1488_vm3, %v13805_v9, -inf }
 0x7e8   : > { %v5204_v31 = vpop.f32.mrb[154].mxu0 }
 0x7e9   : > { %v13815_v27 = vadd.f32 %v5204_v31, %v13691_v51  ;;  %v10292_v10 = vpop.f32.mrb[155].mxu0  ;;  %v5433_v5 = vsel %vm1488_vm3, %v13812_v1, -inf }
 0x7ea   : > { %5431 = vmax.xlane.f32.xlu0 %v5430_v50  ;;  %5434 = vmax.xlane.f32.xlu1 %v5433_v5  ;;  %v5252_v18 = vpop.f32.mrb[184].mxu1 }
 0x7eb   : > { %v13822_v44 = vadd.f32 %v5252_v18, %v13689_v43  ;;  %v10297_v62 = vpop.f32.mrb[185].mxu1  ;;  %v5436_v10 = vsel %vm1488_vm3, %v13815_v27, -inf }
 0x7ec   : > { %v5255_v49 = vpop.f32.mrb[186].mxu1 }
 0x7ed   : > { %v13825_v48 = vadd.f32 %v5255_v49, %v13691_v51  ;;  %v10298_v31 = vpop.f32.mrb[187].mxu1  ;;  %v5439_v2 = vsel %vm1488_vm3, %v13822_v44, -inf }
 0x7ee   : > { %5437 = vmax.xlane.f32.xlu0 %v5436_v10  ;;  %5440 = vmax.xlane.f32.xlu1 %v5439_v2  ;;  %v5303_v50 = vpop.f32.mrb[156].mxu0 }
 0x7ef   : > { %v13832_v5 = vadd.f32 %v5303_v50, %v13689_v43  ;;  %v10303_v18 = vpop.f32.mrb[157].mxu0  ;;  %v5442_v31 = vsel %vm1488_vm3, %v13825_v48, -inf }
 0x7f0   : > { %v5306_v53 = vpop.f32.mrb[158].mxu0 }
 0x7f1   : > { %v13835_v62 = vadd.f32 %v5306_v53, %v13691_v51  ;;  %v10304_v49 = vpop.f32.mrb[159].mxu0  ;;  %v5445_v6 = vsel %vm1488_vm3, %v13832_v5, -inf }
 0x7f2   : > { %5443 = vmax.xlane.f32.xlu0 %v5442_v31  ;;  %v5354_v45 = vpop.f32.mrb[188].mxu1  ;;  %5446 = vmax.xlane.f32.xlu1 %v5445_v6 }
 0x7f3   : > { %v13842_v2 = vadd.f32 %v5354_v45, %v13689_v43  ;;  %v10309_v10 = vpop.f32.mrb[189].mxu1  ;;  %v5448_v7 = vsel %vm1488_vm3, %v13835_v62, -inf  ;;  %v13861_v43 = vpop.permute.xlu0 %5870 }
 0x7f4   : > { %v5357_v50 = vpop.f32.mrb[190].mxu1  ;;  %15566 = vst [vmem:[#allocation80_spill] sm:$0xff] %v13861_v43 }
 0x7f5   : > { %v13845_v18 = vadd.f32 %v5357_v50, %v13691_v51  ;;  %v10310_v53 = vpop.f32.mrb[191].mxu1  ;;  %v5451_v49 = vsel %vm1488_vm3, %v13842_v2, -inf  ;;  %v13857_v51 = vpop.permute.xlu1 %5823 }
 0x7f6   : > { %5452 = vmax.xlane.f32.xlu1 %v5451_v49  ;;  %5449 = vmax.xlane.f32.xlu0 %v5448_v7 }
 0x7f7   : > { %v5454_v6 = vsel %vm1488_vm3, %v13845_v18, -inf  ;;  %v13865_v10 = vpop.permute.xlu0 %5964 }
 0x7f8   : > { %15568 = vst [vmem:[#allocation82_spill] sm:$0xff] %v13865_v10 }
 0x7f9   : > { %v13859_v45 = vpop.permute.xlu1 %5917 }
 0x7fa   : > { %5455 = vmax.xlane.f32.xlu0 %v5454_v6  ;;  %15565 = vst [vmem:[#allocation79_spill] sm:$0xff] %v13859_v45 }
 0x7fb   : > { %v13869_v50 = vpop.permute.xlu0 %6058 }
 0x7fc   : > { %15570 = vst [vmem:[#allocation84_spill] sm:$0xff] %v13869_v50 }
 0x7fd   : > { %v13863_v31 = vpop.permute.xlu1 %6011 }
 0x7fe   : > { %15567 = vst [vmem:[#allocation81_spill] sm:$0xff] %v13863_v31 }
 0x7ff   : > { %v13873_v49 = vpop.permute.xlu0 %6152 }
 0x800   : > { %15572 = vst [vmem:[#allocation86_spill] sm:$0xff] %v13873_v49 }
 0x801   : > { %v13867_v7 = vpop.permute.xlu1 %6105 }
 0x802   : > { %15569 = vst [vmem:[#allocation83_spill] sm:$0xff] %v13867_v7 }
 0x803   : > { %v13877_v32 = vpop.permute.xlu0 %6293 }
 0x804   : > { %15574 = vst [vmem:[#allocation88_spill] sm:$0xff] %v13877_v32 }
 0x805   : > { %v13871_v53 = vpop.permute.xlu1 %6199 }
 0x806   : > { %15571 = vst [vmem:[#allocation85_spill] sm:$0xff] %v13871_v53 }
 0x807   : > { %6434 = vrot.lane.b32.xlu1 %v12095_v40, %s11716_s12 }
 0x809   : > { %v13875_v6 = vpop.permute.xlu1 %6246 }
 0x80a   : > { %15573 = vst [vmem:[#allocation87_spill] sm:$0xff] %v13875_v6 }
 0x80d   : > { %v13879_v17 = vpop.permute.xlu1 %6340 }
 0x80e   : > { %15575 = vst [vmem:[#allocation89_spill] sm:$0xff] %v13879_v17 }
 0x810   : > { %6387 = vrot.lane.b32.xlu0 %v12099_v41, %s11716_s12 }
 0x847   : > { %v5363_v47 = vpop.xlane.xlu0 %5362 }
 0x848   : > { %v5457_v8 = vsub.f32 %v13694_v29, %v5363_v47 }
 0x849   : > { %v5366_v60 = vpop.xlane.xlu1 %5365 }
 0x84a   : > { %v5489_v31 = vmul.f32 1.442695, %v5457_v8  ;;  %v5458_v10 = vsub.f32 %v13697_v19, %v5366_v60 }
 0x84b   : > { %v5369_v7 = vpop.xlane.xlu0 %5368 }
 0x84c   : > { %11253 = vpow2.f32 %v5489_v31  ;;  %v5491_v50 = vmul.f32 1.442695, %v5458_v10  ;;  %v5459_v53 = vsub.f32 %v13702_v34, %v5369_v7 }
 0x84e   : > { %11255 = vpow2.f32 %v5491_v50  ;;  %v5493_v49 = vmul.f32 1.442695, %v5459_v53 }
 0x84f   : > { %v5375_v45 = vpop.xlane.xlu1 %5374  ;;  %v5372_v6 = vpop.xlane.xlu0 %5371 }
 0x850   : > { %11257 = vpow2.f32 %v5493_v49  ;;  %v5461_v32 = vsub.f32 %v13712_v24, %v5375_v45  ;;  %v5460_v17 = vsub.f32 %v13707_v23, %v5372_v6 }
 0x852   : > { %v5497_v43 = vmul.f32 1.442695, %v5461_v32  ;;  %v5495_v47 = vmul.f32 1.442695, %v5460_v17 }
 0x853   : > { %v5381_v29 = vpop.xlane.xlu1 %5380  ;;  %v5378_v8 = vpop.xlane.xlu0 %5377 }
 0x854   : > { %11259 = vpow2.f32 %v5497_v43  ;;  %v5463_v60 = vsub.f32 %v13722_v16, %v5381_v29  ;;  %v5462_v19 = vsub.f32 %v13715_v42, %v5378_v8 }
 0x855   : > { %11261 = vpow2.f32 %v5495_v47 }
 0x856   : > { %v13888_v34 = vpop.eup %11253  ;;  %v5501_v31 = vmul.f32 1.442695, %v5463_v60  ;;  %v5499_v10 = vmul.f32 1.442695, %v5462_v19 }
 0x857   : > { %v5387_v7 = vpop.xlane.xlu1 %5386  ;;  %v5384_v50 = vpop.xlane.xlu0 %5383  ;;  %v5553_v24 = vsel %vm1488_vm3, %v13888_v34, 0.0 }
 0x858   : > { %v13892_v23 = vpop.eup %11255  ;;  %11263 = vpow2.f32 %v5501_v31  ;;  %v5465_v32 = vsub.f32 %v13732_v46, %v5387_v7  ;;  %v5464_v17 = vsub.f32 %v13725_v28, %v5384_v50  ;;  %5554 = vadd.xlane.f32.xlu1 %v5553_v24 }
 0x859   : > { %11265 = vpow2.f32 %v5499_v10  ;;  %v5556_v42 = vsel %vm1488_vm3, %v13892_v23, 0.0 }
 0x85a   : > { %v13898_v16 = vpop.eup %11257  ;;  %v5505_v45 = vmul.f32 1.442695, %v5465_v32  ;;  %v5503_v43 = vmul.f32 1.442695, %v5464_v17  ;;  %5557 = vadd.xlane.f32.xlu0 %v5556_v42 }
 0x85b   : > { %v5393_v53 = vpop.xlane.xlu1 %5392  ;;  %v5390_v49 = vpop.xlane.xlu0 %5389  ;;  %v5559_v6 = vsel %vm1488_vm3, %v13898_v16, 0.0 }
 0x85c   : > { %11267 = vpow2.f32 %v5505_v45  ;;  %v5467_v46 = vsub.f32 %v13742_v25, %v5393_v53  ;;  %v5466_v28 = vsub.f32 %v13735_v12, %v5390_v49  ;;  %5560 = vadd.xlane.f32.xlu1 %v5559_v6 }
 0x85d   : > { %11269 = vpow2.f32 %v5503_v43 }
 0x85e   : > { %v13904_v47 = vpop.eup %11259  ;;  %v5509_v29 = vmul.f32 1.442695, %v5467_v46  ;;  %v5507_v8 = vmul.f32 1.442695, %v5466_v28 }
 0x85f   : > { %v13906_v60 = vpop.eup %11261  ;;  %v5399_v19 = vpop.xlane.xlu1 %5398  ;;  %v5565_v10 = vsel %vm1488_vm3, %v13904_v47, 0.0 }
 0x860   : > { %v5396_v31 = vpop.xlane.xlu0 %5395  ;;  %11271 = vpow2.f32 %v5509_v29  ;;  %v5469_v7 = vsub.f32 %v13752_v54, %v5399_v19  ;;  %5566 = vadd.xlane.f32.xlu1 %v5565_v10  ;;  %v5562_v12 = vsel %vm1488_vm3, %v13906_v60, 0.0 }
 0x861   : > { %v5468_v25 = vsub.f32 %v13745_v52, %v5396_v31  ;;  %11273 = vpow2.f32 %v5507_v8  ;;  %5563 = vadd.xlane.f32.xlu0 %v5562_v12 }
 0x862   : > { %v13914_v50 = vpop.eup %11263  ;;  %v5513_v24 = vmul.f32 1.442695, %v5469_v7 }
 0x863   : > { %v5511_v32 = vmul.f32 1.442695, %v5468_v25  ;;  %v13916_v17 = vpop.eup %11265  ;;  %v5405_v42 = vpop.xlane.xlu1 %5404  ;;  %v5571_v43 = vsel %vm1488_vm3, %v13914_v50, 0.0 }
 0x864   : > { %v5402_v45 = vpop.xlane.xlu0 %5401  ;;  %11275 = vpow2.f32 %v5513_v24  ;;  %v5471_v52 = vsub.f32 %v13762_v22, %v5405_v42  ;;  %5572 = vadd.xlane.f32.xlu1 %v5571_v43  ;;  %v5568_v53 = vsel %vm1488_vm3, %v13916_v17, 0.0 }
 0x865   : > { %v5470_v54 = vsub.f32 %v13755_v0, %v5402_v45  ;;  %11277 = vpow2.f32 %v5511_v32  ;;  %5569 = vadd.xlane.f32.xlu0 %v5568_v53 }
 0x866   : > { %v13924_v49 = vpop.eup %11267  ;;  %v5517_v6 = vmul.f32 1.442695, %v5471_v52 }
 0x867   : > { %v5515_v46 = vmul.f32 1.442695, %v5470_v54  ;;  %v13926_v28 = vpop.eup %11269  ;;  %v5411_v29 = vpop.xlane.xlu1 %5410  ;;  %v5577_v19 = vsel %vm1488_vm3, %v13924_v49, 0.0 }
 0x868   : > { %v5408_v8 = vpop.xlane.xlu0 %5407  ;;  %11279 = vpow2.f32 %v5517_v6  ;;  %v5473_v0 = vsub.f32 %v13772_v56, %v5411_v29  ;;  %5578 = vadd.xlane.f32.xlu1 %v5577_v19  ;;  %v5574_v31 = vsel %vm1488_vm3, %v13926_v28, 0.0 }
 0x869   : > { %v5472_v22 = vsub.f32 %v13765_v21, %v5408_v8  ;;  %11281 = vpow2.f32 %v5515_v46  ;;  %5575 = vadd.xlane.f32.xlu0 %v5574_v31 }
 0x86a   : > { %v13934_v10 = vpop.eup %11271  ;;  %v5521_v7 = vmul.f32 1.442695, %v5473_v0 }
 0x86b   : > { %v5519_v25 = vmul.f32 1.442695, %v5472_v22  ;;  %v13936_v12 = vpop.eup %11273  ;;  %v5417_v24 = vpop.xlane.xlu1 %5416  ;;  %v5583_v42 = vsel %vm1488_vm3, %v13934_v10, 0.0 }
 0x86c   : > { %v5414_v32 = vpop.xlane.xlu0 %5413  ;;  %11283 = vpow2.f32 %v5521_v7  ;;  %v5475_v21 = vsub.f32 %v13782_v4, %v5417_v24  ;;  %5584 = vadd.xlane.f32.xlu1 %v5583_v42  ;;  %v5580_v45 = vsel %vm1488_vm3, %v13936_v12, 0.0 }
 0x86d   : > { %v5474_v56 = vsub.f32 %v13775_v61, %v5414_v32  ;;  %11285 = vpow2.f32 %v5519_v25  ;;  %5581 = vadd.xlane.f32.xlu0 %v5580_v45 }
 0x86e   : > { %v13944_v43 = vpop.eup %11275  ;;  %v5525_v52 = vmul.f32 1.442695, %v5475_v21 }
 0x86f   : > { %v5523_v54 = vmul.f32 1.442695, %v5474_v56  ;;  %v13946_v53 = vpop.eup %11277  ;;  %v5423_v6 = vpop.xlane.xlu1 %5422  ;;  %v5589_v29 = vsel %vm1488_vm3, %v13944_v43, 0.0 }
 0x870   : > { %v5420_v46 = vpop.xlane.xlu0 %5419  ;;  %11287 = vpow2.f32 %v5525_v52  ;;  %v5477_v61 = vsub.f32 %v13792_v30, %v5423_v6  ;;  %5590 = vadd.xlane.f32.xlu1 %v5589_v29  ;;  %v5586_v8 = vsel %vm1488_vm3, %v13946_v53, 0.0 }
 0x871   : > { %v5476_v4 = vsub.f32 %v13785_v3, %v5420_v46  ;;  %11289 = vpow2.f32 %v5523_v54  ;;  %5587 = vadd.xlane.f32.xlu0 %v5586_v8 }
 0x872   : > { %v13954_v19 = vpop.eup %11279  ;;  %v5529_v0 = vmul.f32 1.442695, %v5477_v61 }
 0x873   : > { %v5527_v22 = vmul.f32 1.442695, %v5476_v4  ;;  %v13956_v31 = vpop.eup %11281  ;;  %v5429_v7 = vpop.xlane.xlu1 %5428  ;;  %v5595_v24 = vsel %vm1488_vm3, %v13954_v19, 0.0 }
 0x874   : > { %v5426_v25 = vpop.xlane.xlu0 %5425  ;;  %11291 = vpow2.f32 %v5529_v0  ;;  %v5479_v3 = vsub.f32 %v13802_v20, %v5429_v7  ;;  %5596 = vadd.xlane.f32.xlu1 %v5595_v24  ;;  %v5592_v32 = vsel %vm1488_vm3, %v13956_v31, 0.0 }
 0x875   : > { %v5478_v30 = vsub.f32 %v13795_v63, %v5426_v25  ;;  %11293 = vpow2.f32 %v5527_v22  ;;  %5593 = vadd.xlane.f32.xlu0 %v5592_v32 }
 0x876   : > { %v13964_v42 = vpop.eup %11283  ;;  %v5533_v21 = vmul.f32 1.442695, %v5479_v3 }
 0x877   : > { %v5531_v56 = vmul.f32 1.442695, %v5478_v30  ;;  %v13966_v45 = vpop.eup %11285  ;;  %v5435_v52 = vpop.xlane.xlu1 %5434  ;;  %v5601_v6 = vsel %vm1488_vm3, %v13964_v42, 0.0 }
 0x878   : > { %v5432_v54 = vpop.xlane.xlu0 %5431  ;;  %11295 = vpow2.f32 %v5533_v21  ;;  %v5481_v63 = vsub.f32 %v13812_v1, %v5435_v52  ;;  %5602 = vadd.xlane.f32.xlu1 %v5601_v6  ;;  %v5598_v46 = vsel %vm1488_vm3, %v13966_v45, 0.0 }
 0x879   : > { %v5480_v20 = vsub.f32 %v13805_v9, %v5432_v54  ;;  %11297 = vpow2.f32 %v5531_v56  ;;  %5599 = vadd.xlane.f32.xlu0 %v5598_v46 }
 0x87a   : > { %v13974_v29 = vpop.eup %11287  ;;  %v5537_v61 = vmul.f32 1.442695, %v5481_v63 }
 0x87b   : > { %v5535_v4 = vmul.f32 1.442695, %v5480_v20  ;;  %v13976_v8 = vpop.eup %11289  ;;  %v5441_v0 = vpop.xlane.xlu1 %5440  ;;  %v5607_v7 = vsel %vm1488_vm3, %v13974_v29, 0.0 }
 0x87c   : > { %v5438_v22 = vpop.xlane.xlu0 %5437  ;;  %11299 = vpow2.f32 %v5537_v61  ;;  %v5483_v9 = vsub.f32 %v13822_v44, %v5441_v0  ;;  %5608 = vadd.xlane.f32.xlu1 %v5607_v7  ;;  %v5604_v25 = vsel %vm1488_vm3, %v13976_v8, 0.0 }
 0x87d   : > { %v5482_v1 = vsub.f32 %v13815_v27, %v5438_v22  ;;  %11301 = vpow2.f32 %v5535_v4  ;;  %5605 = vadd.xlane.f32.xlu0 %v5604_v25 }
 0x87e   : > { %v13984_v24 = vpop.eup %11291  ;;  %v5541_v3 = vmul.f32 1.442695, %v5483_v9 }
 0x87f   : > { %v5539_v30 = vmul.f32 1.442695, %v5482_v1  ;;  %v13986_v32 = vpop.eup %11293  ;;  %v5447_v21 = vpop.xlane.xlu1 %5446  ;;  %v5613_v52 = vsel %vm1488_vm3, %v13984_v24, 0.0 }
 0x880   : > { %v5444_v56 = vpop.xlane.xlu0 %5443  ;;  %11303 = vpow2.f32 %v5541_v3  ;;  %v5485_v27 = vsub.f32 %v13832_v5, %v5447_v21  ;;  %5614 = vadd.xlane.f32.xlu1 %v5613_v52  ;;  %v5610_v54 = vsel %vm1488_vm3, %v13986_v32, 0.0 }
 0x881   : > { %v5484_v44 = vsub.f32 %v13825_v48, %v5444_v56  ;;  %11305 = vpow2.f32 %v5539_v30  ;;  %5611 = vadd.xlane.f32.xlu0 %v5610_v54 }
 0x882   : > { %v13994_v6 = vpop.eup %11295  ;;  %v5545_v63 = vmul.f32 1.442695, %v5485_v27 }
 0x883   : > { %v5543_v20 = vmul.f32 1.442695, %v5484_v44  ;;  %v13996_v46 = vpop.eup %11297  ;;  %v5453_v61 = vpop.xlane.xlu1 %5452  ;;  %v5619_v0 = vsel %vm1488_vm3, %v13994_v6, 0.0 }
 0x884   : > { %v5450_v4 = vpop.xlane.xlu0 %5449  ;;  %11307 = vpow2.f32 %v5545_v63  ;;  %v5487_v48 = vsub.f32 %v13842_v2, %v5453_v61  ;;  %5620 = vadd.xlane.f32.xlu1 %v5619_v0  ;;  %v5616_v22 = vsel %vm1488_vm3, %v13996_v46, 0.0 }
 0x885   : > { %v5486_v5 = vsub.f32 %v13835_v62, %v5450_v4  ;;  %11309 = vpow2.f32 %v5543_v20  ;;  %5617 = vadd.xlane.f32.xlu0 %v5616_v22 }
 0x886   : > { %v14004_v7 = vpop.eup %11299  ;;  %v5549_v9 = vmul.f32 1.442695, %v5487_v48 }
 0x887   : > { %v5547_v1 = vmul.f32 1.442695, %v5486_v5  ;;  %v14006_v25 = vpop.eup %11301  ;;  %v5625_v30 = vsel %vm1488_vm3, %v14004_v7, 0.0 }
 0x888   : > { %v5456_v3 = vpop.xlane.xlu0 %5455  ;;  %11311 = vpow2.f32 %v5549_v9  ;;  %5626 = vadd.xlane.f32.xlu1 %v5625_v30  ;;  %v5622_v62 = vsel %vm1488_vm3, %v14006_v25, 0.0  ;;  %v14081_v9 = vpop.permute.xlu1 %6434 }
 0x889   : > { %v5488_v2 = vsub.f32 %v13845_v18, %v5456_v3  ;;  %11313 = vpow2.f32 %v5547_v1  ;;  %5623 = vadd.xlane.f32.xlu0 %v5622_v62 }
 0x88a   : > { %v14013_v21 = vpop.eup %11303 }
 0x88b   : > { %v5551_v56 = vmul.f32 1.442695, %v5488_v2  ;;  %v14015_v52 = vpop.eup %11305  ;;  %v5631_v27 = vsel %vm1488_vm3, %v14013_v21, 0.0 }
 0x88c   : > { %5632 = vadd.xlane.f32.xlu1 %v5631_v27  ;;  %v5628_v44 = vsel %vm1488_vm3, %v14015_v52, 0.0  ;;  %v14085_v1 = vpop.permute.xlu0 %6387 }
 0x88d   : > { %11315 = vpow2.f32 %v5551_v56  ;;  %5629 = vadd.xlane.f32.xlu0 %v5628_v44 }
 0x88e   : > { %v14021_v18 = vpop.eup %11307 }
 0x88f   : > { %v14023_v54 = vpop.eup %11309  ;;  %v5637_v63 = vsel %vm1488_vm3, %v14021_v18, 0.0 }
 0x890   : > { %5638 = vadd.xlane.f32.xlu1 %v5637_v63  ;;  %v5634_v20 = vsel %vm1488_vm3, %v14023_v54, 0.0 }
 0x891   : > { %5635 = vadd.xlane.f32.xlu0 %v5634_v20 }
 0x892   : > { %v14029_v61 = vpop.eup %11311 }
 0x893   : > { %v14031_v4 = vpop.eup %11313  ;;  %v5643_v0 = vsel %vm1488_vm3, %v14029_v61, 0.0 }
 0x894   : > { %5644 = vadd.xlane.f32.xlu1 %v5643_v0  ;;  %v5640_v48 = vsel %vm1488_vm3, %v14031_v4, 0.0 }
 0x895   : > { %5641 = vadd.xlane.f32.xlu0 %v5640_v48 }
 0x897   : > { %v14037_v5 = vpop.eup %11315 }
 0x898   : > { %v5646_v22 = vsel %vm1488_vm3, %v14037_v5, 0.0 }
 0x899   : > { %5647 = vadd.xlane.f32.xlu0 %v5646_v22 }
 0x8a5   : > { %6534 = vrot.lane.b32.xlu1 %v12030_v35, %s11717_s7 }
 0x8a9   : > { %6585 = vrot.lane.b32.xlu1 %v12053_v57, %s11717_s7 }
 0x8ad   : > { %6636 = vrot.lane.b32.xlu1 %v12050_v55, %s11717_s7 }
 0x8af   : > { %6483 = vrot.lane.b32.xlu0 %v12033_v37, %s11717_s7 }
 0x8b1   : > { %6687 = vrot.lane.b32.xlu1 %v12073_v13, %s11717_s7 }
 0x8b3   : > { %6481 = vrot.lane.b32.xlu0 %v12033_v37, %s11718_s26 }
 0x8b5   : > { %6738 = vrot.lane.b32.xlu1 %v12070_v11, %s11717_s7 }
 0x8b7   : > { %6532 = vrot.lane.b32.xlu0 %v12030_v35, %s11718_s26 }
 0x8b9   : > { %6789 = vrot.lane.b32.xlu1 %v12093_v36, %s11717_s7 }
 0x8bb   : > { %6583 = vrot.lane.b32.xlu0 %v12053_v57, %s11718_s26 }
 0x8bd   : > { %6840 = vrot.lane.b32.xlu1 %v12090_v33, %s11717_s7 }
 0x8bf   : > { %6634 = vrot.lane.b32.xlu0 %v12050_v55, %s11718_s26 }
 0x8c1   : > { %6891 = vrot.lane.b32.xlu1 %v12037_v39, %s11717_s7 }
 0x8c3   : > { %6685 = vrot.lane.b32.xlu0 %v12073_v13, %s11718_s26 }
 0x8c5   : > { %6942 = vrot.lane.b32.xlu1 %v12035_v38, %s11717_s7 }
 0x8c7   : > { %6736 = vrot.lane.b32.xlu0 %v12070_v11, %s11718_s26 }
 0x8c9   : > { %6993 = vrot.lane.b32.xlu1 %v12057_v59, %s11717_s7 }
 0x8cb   : > { %6787 = vrot.lane.b32.xlu0 %v12093_v36, %s11718_s26 }
 0x8cd   : > { %7044 = vrot.lane.b32.xlu1 %v12055_v58, %s11717_s7 }
 0x8cf   : > { %6838 = vrot.lane.b32.xlu0 %v12090_v33, %s11718_s26 }
 0x8d1   : > { %7095 = vrot.lane.b32.xlu1 %v12077_v15, %s11717_s7 }
 0x8d3   : > { %6889 = vrot.lane.b32.xlu0 %v12037_v39, %s11718_s26 }
 0x8d5   : > { %7146 = vrot.lane.b32.xlu1 %v12075_v14, %s11717_s7 }
 0x8d7   : > { %6940 = vrot.lane.b32.xlu0 %v12035_v38, %s11718_s26 }
 0x8d9   : > { %7197 = vrot.lane.b32.xlu1 %v12099_v41, %s11717_s7 }
 0x8db   : > { %6991 = vrot.lane.b32.xlu0 %v12057_v59, %s11718_s26 }
 0x8dd   : > { %7248 = vrot.lane.b32.xlu1 %v12095_v40, %s11717_s7  ;;  %s15329_s7 = scalar_lea.hbm %s15389_s6, %s9502_s13 }
 0x8df   : > { %7042 = vrot.lane.b32.xlu0 %v12055_v58, %s11718_s26 }
 0x8e1   : > { %7246 = vrot.lane.b32.xlu1 %v12095_v40, %s11718_s26 }
 0x8e3   : > { %7093 = vrot.lane.b32.xlu0 %v12077_v15, %s11718_s26 }
 0x8e5   : > { %v5555_v3 = vpop.xlane.xlu1 %5554  ;;  %7665 = vrot.lane.b32.xlu1 %v12033_v37, %s11719_s18 }
 0x8e6   : > { %11317 = vrcp.f32 %v5555_v3 }
 0x8e7   : > { %7144 = vrot.lane.b32.xlu0 %v12075_v14, %s11718_s26  ;;  %v5558_v30 = vpop.xlane.xlu0 %5557 }
 0x8e8   : > { %11319 = vrcp.f32 %v5558_v30 }
 0x8e9   : > { %7759 = vrot.lane.b32.xlu1 %v12053_v57, %s11719_s18  ;;  %v5561_v2 = vpop.xlane.xlu1 %5560 }
 0x8ea   : > { %11321 = vrcp.f32 %v5561_v2  ;;  %v15576_v2 = vld [vmem:[#allocation80_spill] sm:$0xff] }
 0x8eb   : > { %7195 = vrot.lane.b32.xlu0 %v12099_v41, %s11718_s26  ;;  %s11623_s26 = scalar_lea.vmem %s15334_s15, 4096 }
 0x8ec   : > { %p11624_p10 = scmp.ne.s32.totalorder %s15334_s15, %s11623_s26 }
 0x8ed   : > { %7853 = vrot.lane.b32.xlu1 %v12073_v13, %s11719_s18  ;;  %v5567_v62 = vpop.xlane.xlu1 %5566 }
 0x8ee   : > { %v5564_v56 = vpop.xlane.xlu0 %5563  ;;  %p11625_p3 = pnand %p11624_p10, %p11911_p5 }
 0x8ef   : > { %11323 = vrcp.f32 %v5564_v56  ;;  %7712 = vrot.lane.b32.xlu0 %v12030_v35, %s11719_s18 }
 0x8f0   : > { %v11318_v37 = vpop.eup %11317  ;;  %11325 = vrcp.f32 %v5567_v62  ;;  %p11626_p7 = pneg %p11625_p3 }
 0x8f1   : > { %7947 = vrot.lane.b32.xlu1 %v12093_v36, %s11719_s18  ;;  %v5573_v57 = vpop.xlane.xlu1 %5572  ;;  %v5681_v63 = vmul.f32 %v11318_v37, %v13888_v34 }
 0x8f2   : > { %v11320_v27 = vpop.eup %11319  ;;  %v5570_v44 = vpop.xlane.xlu0 %5569 }
 0x8f3   : > { %v5682_v20 = vmul.f32 %v11320_v27, %v13892_v23  ;;  %11327 = vrcp.f32 %v5570_v44  ;;  %7806 = vrot.lane.b32.xlu0 %v12050_v55, %s11719_s18 }
 0x8f4   : > { %11329 = vrcp.f32 %v5573_v57  ;;  %v11322_v48 = vpop.eup %11321  ;;  %v15577_v57 = vld [vmem:[#allocation79_spill] sm:$0xff] }
 0x8f5   : > { %8041 = vrot.lane.b32.xlu1 %v12037_v39, %s11719_s18  ;;  %v5579_v35 = vpop.xlane.xlu1 %5578  ;;  %v5713_v13 = vpack.c.bf16 %v5682_v20, %v5681_v63  ;;  %v5683_v36 = vmul.f32 %v11322_v48, %v13898_v16 }
 0x8f6   : > { %v5576_v0 = vpop.xlane.xlu0 %5575 }
 0x8f7   : > { %11331 = vrcp.f32 %v5576_v0  ;;  %7900 = vrot.lane.b32.xlu0 %v12070_v11, %s11719_s18  ;;  %10314 = vmatmul.mubr.msk.bf16.vlgmr.msra.gmra.mrb[160].mxu0 %vm1488_vm3, %v5713_v13 }
 0x8f8   : > { %10324 = vmatpush3.bf16.msra.mxu0 %v13857_v51  ;;  %10325 = vmatprep.mubr.msk.bf16.mxu0 %vm11708_vm1, %v15468_v26  ;;  %11333 = vrcp.f32 %v5579_v35  ;;  %v15578_v35 = vld [vmem:[#allocation82_spill] sm:$0xff] }
 0x8f9   : > { %v11324_v55 = vpop.eup %11323  ;;  %8135 = vrot.lane.b32.xlu1 %v12057_v59, %s11719_s18  ;;  %v5585_v39 = vpop.xlane.xlu1 %5584  ;;  %10335 = vmatprep.subr.bf16.mxu0 %v15468_v26 }
 0x8fa   : > { %v5684_v34 = vmul.f32 %v11324_v55, %v13906_v60  ;;  %v5582_v11 = vpop.xlane.xlu0 %5581  ;;  %v11326_v23 = vpop.eup %11325 }
 0x8fb   : > { %11335 = vrcp.f32 %v5582_v11  ;;  %7994 = vrot.lane.b32.xlu0 %v12090_v33, %s11719_s18  ;;  %v5685_v3 = vmul.f32 %v11326_v23, %v13904_v47 }
 0x8fc   : > { %v5714_v51 = vpack.c.bf16 %v5684_v34, %v5683_v36  ;;  %11337 = vrcp.f32 %v5585_v39  ;;  %v15579_v36 = vld [vmem:[#allocation81_spill] sm:$0xff] }
 0x8fd   : > { %v11328_v22 = vpop.eup %11327  ;;  %8182 = vrot.lane.b32.xlu1 %v12055_v58, %s11719_s18  ;;  %v5591_v59 = vpop.xlane.xlu1 %5590 }
 0x8fe   : > { %v5686_v30 = vmul.f32 %v11328_v22, %v13916_v17  ;;  %10320 = vmatmul.mubr.msk.bf16.vlgmr.msra.gmra.mrb[192].mxu1 %vm1488_vm3, %v5714_v51  ;;  %v5588_v16 = vpop.xlane.xlu0 %5587  ;;  %v11330_v60 = vpop.eup %11329 }
 0x8ff   : > { %10330 = vmatpush3.bf16.msra.mxu1 %v15576_v2  ;;  %11339 = vrcp.f32 %v5588_v16  ;;  %8088 = vrot.lane.b32.xlu0 %v12035_v38, %s11719_s18  ;;  %v5687_v17 = vmul.f32 %v11330_v60, %v13914_v50 }
 0x900   : > { %v5715_v33 = vpack.c.bf16 %v5686_v30, %v5685_v3  ;;  %10331 = vmatprep.mubr.msk.bf16.mxu1 %vm11708_vm1, %v15468_v26  ;;  %10341 = vmatprep.subr.bf16.mxu1 %v15468_v26  ;;  %11341 = vrcp.f32 %v5591_v59  ;;  %v15580_v59 = vld [vmem:[#allocation84_spill] sm:$0xff] }
 0x901   : > { %v11332_v58 = vpop.eup %11331  ;;  %v5597_v47 = vpop.xlane.xlu1 %5596 }
 0x902   : > { %v5688_v62 = vmul.f32 %v11332_v58, %v13926_v28  ;;  %10326 = vmatmul.mubr.msk.bf16.vlgmr.msra.gmra.mrb[164].mxu0 %vm1488_vm3, %v5715_v33  ;;  %v5594_v56 = vpop.xlane.xlu0 %5593  ;;  %v11334_v37 = vpop.eup %11333  ;;  %v15581_v33 = vld [vmem:[#allocation83_spill] sm:$0xff] }
 0x903   : > { %10336 = vmatpush3.bf16.msra.mxu0 %v15577_v57  ;;  %11343 = vrcp.f32 %v5594_v56  ;;  %10337 = vmatprep.mubr.msk.bf16.mxu0 %vm11708_vm1, %v15468_v26  ;;  %v5689_v50 = vmul.f32 %v11334_v37, %v13924_v49  ;;  %v15582_v37 = vld [vmem:[#allocation86_spill] sm:$0xff] }
 0x904   : > { %v5716_v38 = vpack.c.bf16 %v5688_v62, %v5687_v17  ;;  %10347 = vmatprep.subr.bf16.mxu0 %v15468_v26  ;;  %11345 = vrcp.f32 %v5597_v47 }
 0x905   : > { %v11336_v27 = vpop.eup %11335  ;;  %v5603_v44 = vpop.xlane.xlu1 %5602 }
 0x906   : > { %v5690_v28 = vmul.f32 %v11336_v27, %v13936_v12  ;;  %10332 = vmatmul.mubr.msk.bf16.vlgmr.msra.gmra.mrb[196].mxu1 %vm1488_vm3, %v5716_v38  ;;  %v5600_v63 = vpop.xlane.xlu0 %5599  ;;  %v11338_v20 = vpop.eup %11337 }
 0x907   : > { %10342 = vmatpush3.bf16.msra.mxu1 %v15578_v35  ;;  %11347 = vrcp.f32 %v5600_v63  ;;  %10343 = vmatprep.mubr.msk.bf16.mxu1 %vm11708_vm1, %v15468_v26  ;;  %v5691_v49 = vmul.f32 %v11338_v20, %v13934_v10 }
 0x908   : > { %v5717_v13 = vpack.c.bf16 %v5690_v28, %v5689_v50  ;;  %10353 = vmatprep.subr.bf16.mxu1 %v15468_v26  ;;  %11349 = vrcp.f32 %v5603_v44  ;;  %v15583_v28 = vld [vmem:[#allocation85_spill] sm:$0xff] }
 0x909   : > { %v11340_v0 = vpop.eup %11339  ;;  %v5609_v48 = vpop.xlane.xlu1 %5608 }
 0x90a   : > { %v5692_v12 = vmul.f32 %v11340_v0, %v13946_v53  ;;  %10338 = vmatmul.mubr.msk.bf16.vlgmr.msra.gmra.mrb[168].mxu0 %vm1488_vm3, %v5717_v13  ;;  %v5606_v55 = vpop.xlane.xlu0 %5605  ;;  %v11342_v39 = vpop.eup %11341 }
 0x90b   : > { %10348 = vmatpush3.bf16.msra.mxu0 %v15579_v36  ;;  %11351 = vrcp.f32 %v5606_v55  ;;  %10349 = vmatprep.mubr.msk.bf16.mxu0 %vm11708_vm1, %v15468_v26  ;;  %v5693_v10 = vmul.f32 %v11342_v39, %v13944_v43 }
 0x90c   : > { %v5718_v34 = vpack.c.bf16 %v5692_v12, %v5691_v49  ;;  %10359 = vmatprep.subr.bf16.mxu0 %v15468_v26  ;;  %11353 = vrcp.f32 %v5609_v48  ;;  %v15584_v48 = vld [vmem:[#allocation87_spill] sm:$0xff] }
 0x90d   : > { %v11344_v11 = vpop.eup %11343  ;;  %v5615_v23 = vpop.xlane.xlu1 %5614 }
 0x90e   : > { %v5694_v53 = vmul.f32 %v11344_v11, %v13956_v31  ;;  %10344 = vmatmul.mubr.msk.bf16.vlgmr.msra.gmra.mrb[200].mxu1 %vm1488_vm3, %v5718_v34  ;;  %v5612_v51 = vpop.xlane.xlu0 %5611  ;;  %v11346_v22 = vpop.eup %11345  ;;  %v15585_v34 = vld [vmem:[#allocation88_spill] sm:$0xff] }
 0x90f   : > { %10354 = vmatpush3.bf16.msra.mxu1 %v15580_v59  ;;  %11355 = vrcp.f32 %v5612_v51  ;;  %10355 = vmatprep.mubr.msk.bf16.mxu1 %vm11708_vm1, %v15468_v26  ;;  %v5695_v43 = vmul.f32 %v11346_v22, %v13954_v19  ;;  %v15586_v22 = vld [vmem:[#allocation89_spill] sm:$0xff] }
 0x910   : > { %v5719_v3 = vpack.c.bf16 %v5694_v53, %v5693_v10  ;;  %10365 = vmatprep.subr.bf16.mxu1 %v15468_v26  ;;  %11357 = vrcp.f32 %v5615_v23 }
 0x911   : > { %v11348_v30 = vpop.eup %11347  ;;  %v5621_v16 = vpop.xlane.xlu1 %5620 }
 0x912   : > { %v5696_v31 = vmul.f32 %v11348_v30, %v13966_v45  ;;  %10350 = vmatmul.mubr.msk.bf16.vlgmr.msra.gmra.mrb[172].mxu0 %vm1488_vm3, %v5719_v3  ;;  %v5618_v60 = vpop.xlane.xlu0 %5617  ;;  %v11350_v2 = vpop.eup %11349 }
 0x913   : > { %10360 = vmatpush3.bf16.msra.mxu0 %v15581_v33  ;;  %11359 = vrcp.f32 %v5618_v60  ;;  %10361 = vmatprep.mubr.msk.bf16.mxu0 %vm11708_vm1, %v15468_v26  ;;  %v5697_v19 = vmul.f32 %v11350_v2, %v13964_v42 }
 0x914   : > { %v5720_v58 = vpack.c.bf16 %v5696_v31, %v5695_v43  ;;  %10371 = vmatprep.subr.bf16.mxu0 %v15468_v26  ;;  %11361 = vrcp.f32 %v5621_v16 }
 0x915   : > { %v11352_v47 = vpop.eup %11351  ;;  %v5627_v17 = vpop.xlane.xlu1 %5626 }
 0x916   : > { %v5698_v45 = vmul.f32 %v11352_v47, %v13976_v8  ;;  %10356 = vmatmul.mubr.msk.bf16.vlgmr.msra.gmra.mrb[204].mxu1 %vm1488_vm3, %v5720_v58  ;;  %v5624_v62 = vpop.xlane.xlu0 %5623  ;;  %v11354_v56 = vpop.eup %11353 }
 0x917   : > { %10366 = vmatpush3.bf16.msra.mxu1 %v15582_v37  ;;  %11363 = vrcp.f32 %v5624_v62  ;;  %10367 = vmatprep.mubr.msk.bf16.mxu1 %vm11708_vm1, %v15468_v26  ;;  %v5699_v42 = vmul.f32 %v11354_v56, %v13974_v29 }
 0x918   : > { %v5721_v57 = vpack.c.bf16 %v5698_v45, %v5697_v19  ;;  %10377 = vmatprep.subr.bf16.mxu1 %v15468_v26  ;;  %11365 = vrcp.f32 %v5627_v17 }
 0x919   : > { %v11356_v38 = vpop.eup %11355  ;;  %v5633_v27 = vpop.xlane.xlu1 %5632 }
 0x91a   : > { %v5700_v8 = vmul.f32 %v11356_v38, %v13986_v32  ;;  %10362 = vmatmul.mubr.msk.bf16.vlgmr.msra.gmra.mrb[176].mxu0 %vm1488_vm3, %v5721_v57  ;;  %v5630_v44 = vpop.xlane.xlu0 %5629  ;;  %v11358_v50 = vpop.eup %11357 }
 0x91b   : > { %10372 = vmatpush3.bf16.msra.mxu0 %v15583_v28  ;;  %11367 = vrcp.f32 %v5630_v44  ;;  %10373 = vmatprep.mubr.msk.bf16.mxu0 %vm11708_vm1, %v15468_v26  ;;  %v5701_v29 = vmul.f32 %v11358_v50, %v13984_v24 }
 0x91c   : > { %v5722_v63 = vpack.c.bf16 %v5700_v8, %v5699_v42  ;;  %10383 = vmatprep.subr.bf16.mxu0 %v15468_v26  ;;  %11369 = vrcp.f32 %v5633_v27 }
 0x91d   : > { %v11360_v20 = vpop.eup %11359  ;;  %v5639_v35 = vpop.xlane.xlu1 %5638 }
 0x91e   : > { %v5702_v32 = vmul.f32 %v11360_v20, %v13996_v46  ;;  %10368 = vmatmul.mubr.msk.bf16.vlgmr.msra.gmra.mrb[208].mxu1 %vm1488_vm3, %v5722_v63  ;;  %v5636_v13 = vpop.xlane.xlu0 %5635  ;;  %v11362_v0 = vpop.eup %11361 }
 0x91f   : > { %10378 = vmatpush3.bf16.msra.mxu1 %v15584_v48  ;;  %11371 = vrcp.f32 %v5636_v13  ;;  %10379 = vmatprep.mubr.msk.bf16.mxu1 %vm11708_vm1, %v15468_v26  ;;  %v5703_v24 = vmul.f32 %v11362_v0, %v13994_v6 }
 0x920   : > { %v5723_v49 = vpack.c.bf16 %v5702_v32, %v5701_v29  ;;  %10389 = vmatprep.subr.bf16.mxu1 %v15468_v26  ;;  %11373 = vrcp.f32 %v5639_v35 }
 0x921   : > { %v11364_v12 = vpop.eup %11363  ;;  %v5645_v55 = vpop.xlane.xlu1 %5644 }
 0x922   : > { %v5704_v46 = vmul.f32 %v11364_v12, %v14006_v25  ;;  %10374 = vmatmul.mubr.msk.bf16.vlgmr.msra.gmra.mrb[180].mxu0 %vm1488_vm3, %v5723_v49  ;;  %v5642_v39 = vpop.xlane.xlu0 %5641  ;;  %v11366_v36 = vpop.eup %11365 }
 0x923   : > { %10384 = vmatpush3.bf16.msra.mxu0 %v15585_v34  ;;  %11375 = vrcp.f32 %v5642_v39  ;;  %10385 = vmatprep.mubr.msk.bf16.mxu0 %vm11708_vm1, %v15468_v26  ;;  %v5705_v6 = vmul.f32 %v11366_v36, %v14004_v7 }
 0x924   : > { %v5724_v11 = vpack.c.bf16 %v5704_v46, %v5703_v24  ;;  %10395 = vmatprep.subr.bf16.mxu0 %v15468_v26  ;;  %11377 = vrcp.f32 %v5645_v55 }
 0x925   : > { %v11368_v23 = vpop.eup %11367  ;;  %v6535_v10 = vpop.permute.xlu1 %6534 }
 0x926   : > { %v5706_v25 = vmul.f32 %v11368_v23, %v14015_v52  ;;  %10380 = vmatmul.mubr.msk.bf16.vlgmr.msra.gmra.mrb[212].mxu1 %vm1488_vm3, %v5724_v11  ;;  %v5648_v53 = vpop.xlane.xlu0 %5647  ;;  %v11370_v51 = vpop.eup %11369 }
 0x927   : > { %10390 = vmatpush3.bf16.msra.mxu1 %v15586_v22  ;;  %11379 = vrcp.f32 %v5648_v53  ;;  %10391 = vmatprep.mubr.msk.bf16.mxu1 %vm11708_vm1, %v15468_v26  ;;  %v5707_v16 = vmul.f32 %v11370_v51, %v14013_v21 }
 0x928   : > { %v5725_v59 = vpack.c.bf16 %v5706_v25, %v5705_v6  ;;  %10401 = vmatprep.subr.bf16.mxu1 %v15468_v26 }
 0x929   : > { %v11372_v3 = vpop.eup %11371  ;;  %v6586_v30 = vpop.permute.xlu1 %6585 }
 0x92a   : > { %v5708_v7 = vmul.f32 %v11372_v3, %v14023_v54  ;;  %10386 = vmatmul.mubr.msk.bf16.vlgmr.msra.gmra.mrb[184].mxu0 %vm1488_vm3, %v5725_v59  ;;  %v6484_v52 = vpop.permute.xlu0 %6483  ;;  %v11374_v43 = vpop.eup %11373  ;;  %v6591_v57 = vsel %vm690_vm2, %v6586_v30, 0 }
 0x92b   : > { %10396 = vmatpush3.bf16.msra.mxu0 %v14085_v1  ;;  %10397 = vmatprep.mubr.msk.bf16.mxu0 %vm11708_vm1, %v15468_v26  ;;  %v5709_v33 = vmul.f32 %v11374_v43, %v14021_v18  ;;  %v6489_v45 = vsel %vm690_vm2, %v6484_v52, 0 }
 0x92c   : > { %v5726_v31 = vpack.c.bf16 %v5708_v7, %v5707_v16  ;;  %10407 = vmatprep.subr.bf16.mxu0 %v15468_v26 }
 0x92d   : > { %v11376_v60 = vpop.eup %11375  ;;  %v6637_v2 = vpop.permute.xlu1 %6636 }
 0x92e   : > { %v5710_v21 = vmul.f32 %v11376_v60, %v14031_v4  ;;  %10392 = vmatmul.mubr.msk.bf16.vlgmr.msra.gmra.mrb[216].mxu1 %vm1488_vm3, %v5726_v31  ;;  %v6482_v54 = vpop.permute.xlu0 %6481  ;;  %v11378_v58 = vpop.eup %11377  ;;  %v6642_v42 = vsel %vm690_vm2, %v6637_v2, 0 }
 0x92f   : > { %10402 = vmatpush3.bf16.msra.mxu1 %v14081_v9  ;;  %10403 = vmatprep.mubr.msk.bf16.mxu1 %vm11708_vm1, %v15468_v26  ;;  %v5711_v19 = vmul.f32 %v11378_v58, %v14029_v61  ;;  %v6540_v61 = vsel %vm690_vm2, %v6535_v10, 0 }
 0x930   : > { %v5727_v1 = vpack.c.bf16 %v5710_v21, %v5709_v33  ;;  %10413 = vmatprep.subr.bf16.mxu1 %v15468_v26 }
 0x931   : > { %v11380_v47 = vpop.eup %11379  ;;  %v6688_v17 = vpop.permute.xlu1 %6687 }
 0x932   : > { %v5712_v18 = vmul.f32 %v11380_v47, %v14037_v5  ;;  %10398 = vmatmul.mubr.msk.bf16.vlgmr.msra.gmra.mrb[188].mxu0 %vm1488_vm3, %v5727_v1  ;;  %v6533_v4 = vpop.permute.xlu0 %6532  ;;  %v6693_v50 = vsel %vm690_vm2, %v6688_v17, 0 }
 0x933   : > { %10409 = vmatprep.mubr.msk.bf16.mxu0 %vm11708_vm1, %v15468_v26 }
 0x934   : > { %10408 = vmatpush3.bf16.xpose.msra.mxu0 %v6489_v45  ;;  %v5728_v9 = vpack.c.bf16 %v5712_v18, %v5711_v19 }
 0x935   : > { %v6739_v62 = vpop.permute.xlu1 %6738  ;;  %10419 = vmatprep.subr.bf16.mxu0 %v15468_v26 }
 0x936   : > { %10404 = vmatmul.mubr.msk.bf16.vlgmr.msra.gmra.mrb[220].mxu1 %vm1488_vm3, %v5728_v9  ;;  %v6584_v56 = vpop.permute.xlu0 %6583  ;;  %v6744_v20 = vsel %vm690_vm2, %v6739_v62, 0 }
 0x937   : > { %10415 = vmatprep.mubr.msk.bf16.mxu1 %vm11708_vm1, %v15468_v26 }
 0x938   : > { %10414 = vmatpush3.bf16.xpose.msra.mxu1 %v6540_v61 }
 0x939   : > { %v6790_v5 = vpop.permute.xlu1 %6789  ;;  %10425 = vmatprep.subr.bf16.mxu1 %v15468_v26 }
 0x93a   : > { %v6635_v37 = vpop.permute.xlu0 %6634  ;;  %v6795_v32 = vsel %vm690_vm2, %v6790_v5, 0 }
 0x93b   : > { %10410 = vmatmul.mubr.msk.bf16.vlgmr.msra.gmra.mrb[192].mxu0 %vm690_vm2, %v6482_v54 }
 0x93c   : > { %10420 = vmatpush3.bf16.xpose.msra.mxu0 %v6591_v57  ;;  %10421 = vmatprep.mubr.msk.bf16.mxu0 %vm11708_vm1, %v15468_v26 }
 0x93d   : > { %v6841_v38 = vpop.permute.xlu1 %6840  ;;  %10431 = vmatprep.subr.bf16.mxu0 %v15468_v26 }
 0x93e   : > { %v6686_v27 = vpop.permute.xlu0 %6685  ;;  %v6846_v0 = vsel %vm690_vm2, %v6841_v38, 0 }
 0x93f   : > { %10416 = vmatmul.mubr.msk.bf16.vlgmr.msra.gmra.mrb[224].mxu1 %vm690_vm2, %v6533_v4 }
 0x940   : > { %10426 = vmatpush3.bf16.xpose.msra.mxu1 %v6642_v42  ;;  %10427 = vmatprep.mubr.msk.bf16.mxu1 %vm11708_vm1, %v15468_v26 }
 0x941   : > { %v6892_v8 = vpop.permute.xlu1 %6891  ;;  %10437 = vmatprep.subr.bf16.mxu1 %v15468_v26 }
 0x942   : > { %v6737_v44 = vpop.permute.xlu0 %6736  ;;  %v6897_v49 = vsel %vm690_vm2, %v6892_v8, 0 }
 0x943   : > { %10422 = vmatmul.mubr.msk.bf16.vlgmr.msra.gmra.mrb[196].mxu0 %vm690_vm2, %v6584_v56 }
 0x944   : > { %10432 = vmatpush3.bf16.xpose.msra.mxu0 %v6693_v50  ;;  %10433 = vmatprep.mubr.msk.bf16.mxu0 %vm11708_vm1, %v15468_v26 }
 0x945   : > { %v6943_v28 = vpop.permute.xlu1 %6942  ;;  %10443 = vmatprep.subr.bf16.mxu0 %v15468_v26 }
 0x946   : > { %v6788_v63 = vpop.permute.xlu0 %6787  ;;  %v6948_v24 = vsel %vm690_vm2, %v6943_v28, 0 }
 0x947   : > { %10428 = vmatmul.mubr.msk.bf16.vlgmr.msra.gmra.mrb[228].mxu1 %vm690_vm2, %v6635_v37 }
 0x948   : > { %10438 = vmatpush3.bf16.xpose.msra.mxu1 %v6744_v20  ;;  %10439 = vmatprep.mubr.msk.bf16.mxu1 %vm11708_vm1, %v15468_v26 }
 0x949   : > { %v6994_v35 = vpop.permute.xlu1 %6993  ;;  %10449 = vmatprep.subr.bf16.mxu1 %v15468_v26 }
 0x94a   : > { %v6839_v29 = vpop.permute.xlu0 %6838  ;;  %v6999_v39 = vsel %vm690_vm2, %v6994_v35, 0 }
 0x94b   : > { %10434 = vmatmul.mubr.msk.bf16.vlgmr.msra.gmra.mrb[200].mxu0 %vm690_vm2, %v6686_v27 }
 0x94c   : > { %10444 = vmatpush3.bf16.xpose.msra.mxu0 %v6795_v32  ;;  %10445 = vmatprep.mubr.msk.bf16.mxu0 %vm11708_vm1, %v15468_v26 }
 0x94d   : > { %10455 = vmatprep.subr.bf16.mxu0 %v15468_v26  ;;  %v7045_v48 = vpop.permute.xlu1 %7044 }
 0x94e   : > { %v6890_v13 = vpop.permute.xlu0 %6889  ;;  %v7050_v34 = vsel %vm690_vm2, %v7045_v48, 0 }
 0x94f   : > { %10440 = vmatmul.mubr.msk.bf16.vlgmr.msra.gmra.mrb[232].mxu1 %vm690_vm2, %v6737_v44 }
 0x950   : > { %10450 = vmatpush3.bf16.xpose.msra.mxu1 %v6846_v0  ;;  %10451 = vmatprep.mubr.msk.bf16.mxu1 %vm11708_vm1, %v15468_v26 }
 0x951   : > { %10461 = vmatprep.subr.bf16.mxu1 %v15468_v26  ;;  %v7096_v55 = vpop.permute.xlu1 %7095 }
 0x952   : > { %v6941_v12 = vpop.permute.xlu0 %6940  ;;  %v7101_v10 = vsel %vm690_vm2, %v7096_v55, 0 }
 0x953   : > { %10446 = vmatmul.mubr.msk.bf16.vlgmr.msra.gmra.mrb[204].mxu0 %vm690_vm2, %v6788_v63 }
 0x954   : > { %10456 = vmatpush3.bf16.xpose.msra.mxu0 %v6897_v49  ;;  %10457 = vmatprep.mubr.msk.bf16.mxu0 %vm11708_vm1, %v15468_v26 }
 0x955   : > { %10467 = vmatprep.subr.bf16.mxu0 %v15468_v26  ;;  %v7147_v36 = vpop.permute.xlu1 %7146 }
 0x956   : > { %v6992_v46 = vpop.permute.xlu0 %6991  ;;  %v7152_v25 = vsel %vm690_vm2, %v7147_v36, 0 }
 0x957   : > { %10452 = vmatmul.mubr.msk.bf16.vlgmr.msra.gmra.mrb[236].mxu1 %vm690_vm2, %v6839_v29 }
 0x958   : > { %10462 = vmatpush3.bf16.xpose.msra.mxu1 %v6948_v24  ;;  %10463 = vmatprep.mubr.msk.bf16.mxu1 %vm11708_vm1, %v15468_v26 }
 0x959   : > { %10473 = vmatprep.subr.bf16.mxu1 %v15468_v26  ;;  %v7198_v23 = vpop.permute.xlu1 %7197 }
 0x95a   : > { %v7043_v11 = vpop.permute.xlu0 %7042  ;;  %v7203_v51 = vsel %vm690_vm2, %v7198_v23, 0 }
 0x95b   : > { %10458 = vmatmul.mubr.msk.bf16.vlgmr.msra.gmra.mrb[208].mxu0 %vm690_vm2, %v6890_v13 }
 0x95c   : > { %10468 = vmatpush3.bf16.xpose.msra.mxu0 %v6999_v39  ;;  %10469 = vmatprep.mubr.msk.bf16.mxu0 %vm11708_vm1, %v15468_v26 }
 0x95d   : > { %10479 = vmatprep.subr.bf16.mxu0 %v15468_v26  ;;  %v7249_v53 = vpop.permute.xlu1 %7248 }
 0x95e   : > { %v7094_v6 = vpop.permute.xlu0 %7093  ;;  %v7254_v3 = vsel %vm690_vm2, %v7249_v53, 0 }
 0x95f   : > { %10464 = vmatmul.mubr.msk.bf16.vlgmr.msra.gmra.mrb[240].mxu1 %vm690_vm2, %v6941_v12 }
 0x960   : > { %10474 = vmatpush3.bf16.xpose.msra.mxu1 %v7050_v34  ;;  %10475 = vmatprep.mubr.msk.bf16.mxu1 %vm11708_vm1, %v15468_v26 }
 0x961   : > { %10485 = vmatprep.subr.bf16.mxu1 %v15468_v26  ;;  %v7247_v59 = vpop.permute.xlu1 %7246 }
 0x962   : > { %v7145_v22 = vpop.permute.xlu0 %7144 }
 0x963   : > { %10470 = vmatmul.mubr.msk.bf16.vlgmr.msra.gmra.mrb[212].mxu0 %vm690_vm2, %v6992_v46 }
 0x964   : > { %10480 = vmatpush3.bf16.xpose.msra.mxu0 %v7101_v10  ;;  %10481 = vmatprep.mubr.msk.bf16.mxu0 %vm11708_vm1, %v15468_v26 }
 0x965   : > { %10491 = vmatprep.subr.bf16.mxu0 %v15468_v26  ;;  %v7666_v16 = vpop.permute.xlu1 %7665 }
 0x966   : > { %v7196_v30 = vpop.permute.xlu0 %7195 }
 0x967   : > { %10476 = vmatmul.mubr.msk.bf16.vlgmr.msra.gmra.mrb[244].mxu1 %vm690_vm2, %v7043_v11 }
 0x968   : > { %10486 = vmatpush3.bf16.xpose.msra.mxu1 %v7152_v25  ;;  %10487 = vmatprep.mubr.msk.bf16.mxu1 %vm11708_vm1, %v15468_v26 }
 0x969   : > { %10497 = vmatprep.subr.bf16.mxu1 %v15468_v26 }
 0x96a   : > { %v7713_v7 = vpop.permute.xlu0 %7712 }
 0x96b   : > { %10482 = vmatmul.mubr.msk.bf16.vlgmr.msra.gmra.mrb[216].mxu0 %vm690_vm2, %v7094_v6 }
 0x96c   : > { %10492 = vmatpush3.bf16.xpose.msra.mxu0 %v7203_v51  ;;  %10493 = vmatprep.mubr.msk.bf16.mxu0 %vm11708_vm1, %v15468_v26 }
 0x96d   : > { %10503 = vmatprep.subr.bf16.mxu0 %v15468_v26 }
 0x96f   : > { %10488 = vmatmul.mubr.msk.bf16.vlgmr.msra.gmra.mrb[248].mxu1 %vm690_vm2, %v7145_v22 }
 0x970   : > { %10498 = vmatpush3.bf16.xpose.msra.mxu1 %v7254_v3  ;;  %10499 = vmatprep.mubr.msk.bf16.mxu1 %vm11708_vm1, %v15468_v26 }
 0x971   : > { %10509 = vmatprep.subr.bf16.mxu1 %v15468_v26 }
 0x973   : > { %10494 = vmatmul.mubr.msk.bf16.vlgmr.msra.gmra.mrb[220].mxu0 %vm690_vm2, %v7196_v30 }
 0x974   : > { %10504 = vmatpush3.bf16.msra.mxu0 %v7666_v16  ;;  %10505 = vmatprep.mubr.msk.bf16.mxu0 %vm11708_vm1, %v15468_v26 }
 0x975   : > { %10515 = vmatprep.subr.bf16.mxu0 %v15468_v26 }
 0x977   : > { %10500 = vmatmul.mubr.msk.bf16.vlgmr.msra.gmra.mrb[252].mxu1 %vm690_vm2, %v7247_v59 }
 0x978   : > { %10510 = vmatpush3.bf16.msra.mxu1 %v7713_v7  ;;  %10511 = vmatprep.mubr.msk.bf16.mxu1 %vm11708_vm1, %v15468_v26 }
 0x979   : > { %10521 = vmatprep.subr.bf16.mxu1 %v15468_v26 }
 0x9ca   : > { %v14307_v52 = vpop.f32.mrb[160].mxu0 }
 0x9cb   : > { %v10315_v43 = vpop.f32.mrb[161].mxu0 }
 0x9cc   : > { %v14309_v31 = vpop.f32.mrb[162].mxu0 }
 0x9cd   : > { %v10316_v2 = vpop.f32.mrb[163].mxu0 }
 0x9d1   : > { %v14313_v33 = vpop.f32.mrb[192].mxu1 }
 0x9d2   : > { %v10321_v21 = vpop.f32.mrb[193].mxu1 }
 0x9d3   : > { %v14315_v54 = vpop.f32.mrb[194].mxu1 }
 0x9d4   : > { %v10322_v1 = vpop.f32.mrb[195].mxu1 }
 0x9d5   : > { %v14319_v47 = vpop.f32.mrb[164].mxu0 }
 0x9d6   : > { %v10327_v17 = vpop.f32.mrb[165].mxu0 }
 0x9d7   : > { %v14321_v19 = vpop.f32.mrb[166].mxu0 }
 0x9d8   : > { %v10328_v4 = vpop.f32.mrb[167].mxu0 }
 0x9d9   : > { %v14325_v45 = vpop.f32.mrb[196].mxu1 }
 0x9da   : > { %v10333_v9 = vpop.f32.mrb[197].mxu1 }
 0x9db   : > { %v14327_v62 = vpop.f32.mrb[198].mxu1 }
 0x9dc   : > { %v10334_v61 = vpop.f32.mrb[199].mxu1 }
 0x9dd   : > { %v14331_v5 = vpop.f32.mrb[168].mxu0 }
 0x9de   : > { %v10339_v37 = vpop.f32.mrb[169].mxu0 }
 0x9df   : > { %v14333_v57 = vpop.f32.mrb[170].mxu0 }
 0x9e0   : > { %v10340_v27 = vpop.f32.mrb[171].mxu0 }
 0x9e1   : > { %v14337_v42 = vpop.f32.mrb[200].mxu1 }
 0x9e2   : > { %v10345_v8 = vpop.f32.mrb[201].mxu1 }
 0x9e3   : > { %v14339_v44 = vpop.f32.mrb[202].mxu1 }
 0x9e4   : > { %v10346_v28 = vpop.f32.mrb[203].mxu1 }
 0x9e5   : > { %v14343_v63 = vpop.f32.mrb[172].mxu0 }
 0x9e6   : > { %v10351_v20 = vpop.f32.mrb[173].mxu0 }
 0x9e7   : > { %v14345_v35 = vpop.f32.mrb[174].mxu0 }
 0x9e8   : > { %v10352_v32 = vpop.f32.mrb[175].mxu0 }
 0x9e9   : > { %v14349_v13 = vpop.f32.mrb[204].mxu1 }
 0x9ea   : > { %v10357_v0 = vpop.f32.mrb[205].mxu1 }
 0x9eb   : > { %v14351_v48 = vpop.f32.mrb[206].mxu1 }
 0x9ec   : > { %v10358_v12 = vpop.f32.mrb[207].mxu1 }
 0x9ed   : > { %v14355_v55 = vpop.f32.mrb[176].mxu0 }
 0x9ee   : > { %15587 = vst [vmem:[#allocation80_spill] sm:$0xff] %v14355_v55  ;;  %v10363_v24 = vpop.f32.mrb[177].mxu0 }
 0x9ef   : > { %v14357_v46 = vpop.f32.mrb[178].mxu0 }
 0x9f0   : > { %15588 = vst [vmem:[#allocation79_spill] sm:$0xff] %v14357_v46  ;;  %v10364_v36 = vpop.f32.mrb[179].mxu0 }
 0x9f1   : > { %v14361_v34 = vpop.f32.mrb[208].mxu1 }
 0x9f2   : > { %15589 = vst [vmem:[#allocation82_spill] sm:$0xff] %v14361_v34  ;;  %v10369_v11 = vpop.f32.mrb[209].mxu1 }
 0x9f3   : > { %v14363_v23 = vpop.f32.mrb[210].mxu1 }
 0x9f4   : > { %15590 = vst [vmem:[#allocation81_spill] sm:$0xff] %v14363_v23  ;;  %v10370_v6 = vpop.f32.mrb[211].mxu1 }
 0x9f5   : > { %v14367_v25 = vpop.f32.mrb[180].mxu0 }
 0x9f6   : > { %15591 = vst [vmem:[#allocation84_spill] sm:$0xff] %v14367_v25  ;;  %v10375_v53 = vpop.f32.mrb[181].mxu0 }
 0x9f7   : > { %v14369_v51 = vpop.f32.mrb[182].mxu0 }
 0x9f8   : > { %15592 = vst [vmem:[#allocation83_spill] sm:$0xff] %v14369_v51  ;;  %v10376_v59 = vpop.f32.mrb[183].mxu0 }
 0x9f9   : > { %v14373_v3 = vpop.f32.mrb[212].mxu1  ;;  %v14403_v59 = vld [vmem:[#allocation8 + $0x30] sm:$0xff] }
 0x9fa   : > { %15593 = vst [vmem:[#allocation86_spill] sm:$0xff] %v14373_v3  ;;  %v10381_v30 = vpop.f32.mrb[213].mxu1 }
 0x9fb   : > { %v14375_v16 = vpop.f32.mrb[214].mxu1 }
 0x9fc   : > { %15594 = vst [vmem:[#allocation85_spill] sm:$0xff] %v14375_v16  ;;  %v10382_v43 = vpop.f32.mrb[215].mxu1 }
 0x9fd   : > { %v14379_v2 = vpop.f32.mrb[184].mxu0  ;;  %v14405_v43 = vld [vmem:[#allocation8 + $0x38] sm:$0xff] }
 0x9fe   : > { %15595 = vst [vmem:[#allocation87_spill] sm:$0xff] %v14379_v2  ;;  %v10387_v21 = vpop.f32.mrb[185].mxu0 }
 0x9ff   : > { %v14381_v1 = vpop.f32.mrb[186].mxu0 }
 0xa00   : > { %15596 = vst [vmem:[#allocation88_spill] sm:$0xff] %v14381_v1  ;;  %v10388_v4 = vpop.f32.mrb[187].mxu0 }
 0xa01   : > { %v14385_v9 = vpop.f32.mrb[216].mxu1 }
 0xa02   : > { %15597 = vst [vmem:[#allocation89_spill] sm:$0xff] %v14385_v9  ;;  %v10393_v61 = vpop.f32.mrb[217].mxu1 }
 0xa03   : > { %v14387_v37 = vpop.f32.mrb[218].mxu1 }
 0xa04   : > { %15598 = vst [vmem:[#allocation90_spill] sm:$0xff] %v14387_v37  ;;  %v10394_v8 = vpop.f32.mrb[219].mxu1 }
 0xa05   : > { %v14391_v28 = vpop.f32.mrb[188].mxu0 }
 0xa06   : > { %15599 = vst [vmem:[#allocation91_spill] sm:$0xff] %v14391_v28  ;;  %v10399_v20 = vpop.f32.mrb[189].mxu0 }
 0xa07   : > { %v14393_v32 = vpop.f32.mrb[190].mxu0 }
 0xa08   : > { %15600 = vst [vmem:[#allocation92_spill] sm:$0xff] %v14393_v32  ;;  %v10400_v12 = vpop.f32.mrb[191].mxu0 }
 0xa09   : > { %v14397_v24 = vpop.f32.mrb[220].mxu1 }
 0xa0a   : > { %15601 = vst [vmem:[#allocation93_spill] sm:$0xff] %v14397_v24  ;;  %v10405_v36 = vpop.f32.mrb[221].mxu1 }
 0xa0b   : > { %v14399_v11 = vpop.f32.mrb[222].mxu1 }
 0xa0c   : > { %15602 = vst [vmem:[#allocation94_spill] sm:$0xff] %v14399_v11  ;;  %v10406_v53 = vpop.f32.mrb[223].mxu1 }
 0xa0e   : > { %v6525_v30 = vpop.f32.mrb[192].mxu0 }
 0xa0f   : > { %v14408_v21 = vadd.f32 %v6525_v30, %v14403_v59  ;;  %v10411_v4 = vpop.f32.mrb[193].mxu0 }
 0xa10   : > { %v6528_v61 = vpop.f32.mrb[194].mxu0 }
 0xa11   : > { %v14411_v8 = vadd.f32 %v6528_v61, %v14405_v43  ;;  %v10412_v20 = vpop.f32.mrb[195].mxu0  ;;  %v7297_v12 = vsel %vm1488_vm3, %v14408_v21, -inf }
 0xa12   : > { %7298 = vmax.xlane.f32.xlu0 %v7297_v12  ;;  %v6576_v36 = vpop.f32.mrb[224].mxu1 }
 0xa13   : > { %v14416_v53 = vadd.f32 %v6576_v36, %v14403_v59  ;;  %v10417_v6 = vpop.f32.mrb[225].mxu1  ;;  %v7300_v0 = vsel %vm1488_vm3, %v14411_v8, -inf }
 0xa14   : > { %7301 = vmax.xlane.f32.xlu1 %v7300_v0  ;;  %v6579_v30 = vpop.f32.mrb[226].mxu1 }
 0xa15   : > { %v14421_v4 = vadd.f32 %v6579_v30, %v14405_v43  ;;  %v10418_v61 = vpop.f32.mrb[227].mxu1  ;;  %v7303_v20 = vsel %vm1488_vm3, %v14416_v53, -inf }
 0xa16   : > { %7304 = vmax.xlane.f32.xlu0 %v7303_v20  ;;  %v6627_v27 = vpop.f32.mrb[196].mxu0 }
 0xa17   : > { %v14426_v12 = vadd.f32 %v6627_v27, %v14403_v59  ;;  %v10423_v36 = vpop.f32.mrb[197].mxu0  ;;  %v7306_v0 = vsel %vm1488_vm3, %v14421_v4, -inf }
 0xa18   : > { %v6630_v17 = vpop.f32.mrb[198].mxu0 }
 0xa19   : > { %v14429_v6 = vadd.f32 %v6630_v17, %v14405_v43  ;;  %v10424_v7 = vpop.f32.mrb[199].mxu0  ;;  %v7309_v30 = vsel %vm1488_vm3, %v14426_v12, -inf }
 0xa1a   : > { %7307 = vmax.xlane.f32.xlu0 %v7306_v0  ;;  %7310 = vmax.xlane.f32.xlu1 %v7309_v30  ;;  %v6678_v61 = vpop.f32.mrb[228].mxu1 }
 0xa1b   : > { %v14436_v20 = vadd.f32 %v6678_v61, %v14403_v59  ;;  %v10429_v27 = vpop.f32.mrb[229].mxu1  ;;  %v7312_v7 = vsel %vm1488_vm3, %v14429_v6, -inf }
 0xa1c   : > { %v6681_v22 = vpop.f32.mrb[230].mxu1 }
 0xa1d   : > { %v14439_v36 = vadd.f32 %v6681_v22, %v14405_v43  ;;  %v10430_v17 = vpop.f32.mrb[231].mxu1  ;;  %v7315_v10 = vsel %vm1488_vm3, %v14436_v20, -inf }
 0xa1e   : > { %7313 = vmax.xlane.f32.xlu0 %v7312_v7  ;;  %7316 = vmax.xlane.f32.xlu1 %v7315_v10  ;;  %v6729_v0 = vpop.f32.mrb[200].mxu0 }
 0xa1f   : > { %v14446_v30 = vadd.f32 %v6729_v0, %v14403_v59  ;;  %v10435_v61 = vpop.f32.mrb[201].mxu0  ;;  %v7318_v17 = vsel %vm1488_vm3, %v14439_v36, -inf }
 0xa20   : > { %v6732_v39 = vpop.f32.mrb[202].mxu0 }
 0xa21   : > { %v14449_v27 = vadd.f32 %v6732_v39, %v14405_v43  ;;  %v10436_v22 = vpop.f32.mrb[203].mxu0  ;;  %v7321_v29 = vsel %vm1488_vm3, %v14446_v30, -inf }
 0xa22   : > { %7319 = vmax.xlane.f32.xlu0 %v7318_v17  ;;  %7322 = vmax.xlane.f32.xlu1 %v7321_v29  ;;  %v6780_v7 = vpop.f32.mrb[232].mxu1 }
 0xa23   : > { %v14456_v10 = vadd.f32 %v6780_v7, %v14403_v59  ;;  %v10441_v0 = vpop.f32.mrb[233].mxu1  ;;  %v7324_v22 = vsel %vm1488_vm3, %v14449_v27, -inf }
 0xa24   : > { %v6783_v38 = vpop.f32.mrb[234].mxu1 }
 0xa25   : > { %v14459_v61 = vadd.f32 %v6783_v38, %v14405_v43  ;;  %v10442_v39 = vpop.f32.mrb[235].mxu1  ;;  %v7327_v49 = vsel %vm1488_vm3, %v14456_v10, -inf }
 0xa26   : > { %7325 = vmax.xlane.f32.xlu0 %v7324_v22  ;;  %7328 = vmax.xlane.f32.xlu1 %v7327_v49  ;;  %v6831_v17 = vpop.f32.mrb[204].mxu0 }
 0xa27   : > { %v14466_v29 = vadd.f32 %v6831_v17, %v14403_v59  ;;  %v10447_v7 = vpop.f32.mrb[205].mxu0  ;;  %v7330_v39 = vsel %vm1488_vm3, %v14459_v61, -inf }
 0xa28   : > { %v6834_v18 = vpop.f32.mrb[206].mxu0 }
 0xa29   : > { %v14469_v0 = vadd.f32 %v6834_v18, %v14405_v43  ;;  %v10448_v38 = vpop.f32.mrb[207].mxu0  ;;  %v7333_v50 = vsel %vm1488_vm3, %v14466_v29, -inf }
 0xa2a   : > { %7331 = vmax.xlane.f32.xlu0 %v7330_v39  ;;  %7334 = vmax.xlane.f32.xlu1 %v7333_v50  ;;  %v6882_v22 = vpop.f32.mrb[236].mxu1 }
 0xa2b   : > { %v14476_v49 = vadd.f32 %v6882_v22, %v14403_v59  ;;  %v10453_v17 = vpop.f32.mrb[237].mxu1  ;;  %v7336_v38 = vsel %vm1488_vm3, %v14469_v0, -inf }
 0xa2c   : > { %v6885_v60 = vpop.f32.mrb[238].mxu1 }
 0xa2d   : > { %v14479_v7 = vadd.f32 %v6885_v60, %v14405_v43  ;;  %v10454_v18 = vpop.f32.mrb[239].mxu1  ;;  %v7339_v56 = vsel %vm1488_vm3, %v14476_v49, -inf }
 0xa2e   : > { %7337 = vmax.xlane.f32.xlu0 %v7336_v38  ;;  %7340 = vmax.xlane.f32.xlu1 %v7339_v56  ;;  %v6933_v39 = vpop.f32.mrb[208].mxu0 }
 0xa2f   : > { %v14486_v50 = vadd.f32 %v6933_v39, %v14403_v59  ;;  %v10459_v22 = vpop.f32.mrb[209].mxu0  ;;  %v7342_v18 = vsel %vm1488_vm3, %v14479_v7, -inf }
 0xa30   : > { %v6936_v58 = vpop.f32.mrb[210].mxu0 }
 0xa31   : > { %v14489_v17 = vadd.f32 %v6936_v58, %v14405_v43  ;;  %v10460_v60 = vpop.f32.mrb[211].mxu0  ;;  %v7345_v24 = vsel %vm1488_vm3, %v14486_v50, -inf }
 0xa32   : > { %7343 = vmax.xlane.f32.xlu0 %v7342_v18  ;;  %7346 = vmax.xlane.f32.xlu1 %v7345_v24  ;;  %v6984_v38 = vpop.f32.mrb[240].mxu1 }
 0xa33   : > { %v14496_v56 = vadd.f32 %v6984_v38, %v14403_v59  ;;  %v10465_v39 = vpop.f32.mrb[241].mxu1  ;;  %v7348_v60 = vsel %vm1488_vm3, %v14489_v17, -inf }
 0xa34   : > { %v6987_v11 = vpop.f32.mrb[242].mxu1 }
 0xa35   : > { %v14499_v22 = vadd.f32 %v6987_v11, %v14405_v43  ;;  %v10466_v58 = vpop.f32.mrb[243].mxu1  ;;  %v7351_v28 = vsel %vm1488_vm3, %v14496_v56, -inf }
 0xa36   : > { %7349 = vmax.xlane.f32.xlu0 %v7348_v60  ;;  %7352 = vmax.xlane.f32.xlu1 %v7351_v28  ;;  %v7035_v18 = vpop.f32.mrb[212].mxu0 }
 0xa37   : > { %v14506_v24 = vadd.f32 %v7035_v18, %v14403_v59  ;;  %v10471_v38 = vpop.f32.mrb[213].mxu0  ;;  %v7354_v58 = vsel %vm1488_vm3, %v14499_v22, -inf }
 0xa38   : > { %v7038_v32 = vpop.f32.mrb[214].mxu0 }
 0xa39   : > { %v14509_v39 = vadd.f32 %v7038_v32, %v14405_v43  ;;  %v10472_v11 = vpop.f32.mrb[215].mxu0  ;;  %v7357_v9 = vsel %vm1488_vm3, %v14506_v24, -inf }
 0xa3a   : > { %7355 = vmax.xlane.f32.xlu0 %v7354_v58  ;;  %7358 = vmax.xlane.f32.xlu1 %v7357_v9  ;;  %v7086_v60 = vpop.f32.mrb[244].mxu1 }
 0xa3b   : > { %v14516_v28 = vadd.f32 %v7086_v60, %v14403_v59  ;;  %v10477_v18 = vpop.f32.mrb[245].mxu1  ;;  %v7360_v11 = vsel %vm1488_vm3, %v14509_v39, -inf }
 0xa3c   : > { %v7089_v37 = vpop.f32.mrb[246].mxu1 }
 0xa3d   : > { %v14519_v38 = vadd.f32 %v7089_v37, %v14405_v43  ;;  %v10478_v32 = vpop.f32.mrb[247].mxu1  ;;  %v7363_v2 = vsel %vm1488_vm3, %v14516_v28, -inf }
 0xa3e   : > { %7361 = vmax.xlane.f32.xlu0 %v7360_v11  ;;  %7364 = vmax.xlane.f32.xlu1 %v7363_v2  ;;  %v7137_v58 = vpop.f32.mrb[216].mxu0 }
 0xa3f   : > { %v14526_v9 = vadd.f32 %v7137_v58, %v14403_v59  ;;  %v10483_v60 = vpop.f32.mrb[217].mxu0  ;;  %v7366_v32 = vsel %vm1488_vm3, %v14519_v38, -inf }
 0xa40   : > { %v7140_v1 = vpop.f32.mrb[218].mxu0 }
 0xa41   : > { %v14529_v18 = vadd.f32 %v7140_v1, %v14405_v43  ;;  %v10484_v37 = vpop.f32.mrb[219].mxu0  ;;  %v7369_v3 = vsel %vm1488_vm3, %v14526_v9, -inf }
 0xa42   : > { %7367 = vmax.xlane.f32.xlu0 %v7366_v32  ;;  %7370 = vmax.xlane.f32.xlu1 %v7369_v3  ;;  %v7188_v11 = vpop.f32.mrb[248].mxu1 }
 0xa43   : > { %v14536_v2 = vadd.f32 %v7188_v11, %v14403_v59  ;;  %v10489_v58 = vpop.f32.mrb[249].mxu1  ;;  %v7372_v37 = vsel %vm1488_vm3, %v14529_v18, -inf }
 0xa44   : > { %v7191_v16 = vpop.f32.mrb[250].mxu1 }
 0xa45   : > { %v14539_v60 = vadd.f32 %v7191_v16, %v14405_v43  ;;  %v10490_v1 = vpop.f32.mrb[251].mxu1  ;;  %v7375_v25 = vsel %vm1488_vm3, %v14536_v2, -inf }
 0xa46   : > { %7373 = vmax.xlane.f32.xlu0 %v7372_v37  ;;  %7376 = vmax.xlane.f32.xlu1 %v7375_v25  ;;  %v7239_v32 = vpop.f32.mrb[220].mxu0 }
 0xa47   : > { %v14546_v3 = vadd.f32 %v7239_v32, %v14403_v59  ;;  %v10495_v11 = vpop.f32.mrb[221].mxu0  ;;  %v7378_v1 = vsel %vm1488_vm3, %v14539_v60, -inf }
 0xa48   : > { %v7242_v51 = vpop.f32.mrb[222].mxu0 }
 0xa49   : > { %v14549_v58 = vadd.f32 %v7242_v51, %v14405_v43  ;;  %v10496_v16 = vpop.f32.mrb[223].mxu0  ;;  %v7381_v34 = vsel %vm1488_vm3, %v14546_v3, -inf }
 0xa4a   : > { %7379 = vmax.xlane.f32.xlu0 %v7378_v1  ;;  %v7290_v23 = vpop.f32.mrb[252].mxu1  ;;  %7382 = vmax.xlane.f32.xlu1 %v7381_v34 }
 0xa4b   : > { %v14556_v25 = vadd.f32 %v7290_v23, %v14403_v59  ;;  %v10501_v37 = vpop.f32.mrb[253].mxu1  ;;  %v7384_v55 = vsel %vm1488_vm3, %v14549_v58, -inf  ;;  %v14571_v23 = vpop.permute.xlu1 %7759 }
 0xa4c   : > { %v7293_v32 = vpop.f32.mrb[254].mxu1  ;;  %15603 = vst [vmem:[#allocation95_spill] sm:$0xff] %v14571_v23 }
 0xa4d   : > { %v14559_v11 = vadd.f32 %v7293_v32, %v14405_v43  ;;  %v10502_v51 = vpop.f32.mrb[255].mxu1  ;;  %v7387_v16 = vsel %vm1488_vm3, %v14556_v25, -inf  ;;  %v14575_v43 = vpop.permute.xlu0 %7806 }
 0xa4e   : > { %7388 = vmax.xlane.f32.xlu1 %v7387_v16  ;;  %7385 = vmax.xlane.f32.xlu0 %v7384_v55  ;;  %15605 = vst [vmem:[#allocation97_spill] sm:$0xff] %v14575_v43 }
 0xa4f   : > { %v7390_v34 = vsel %vm1488_vm3, %v14559_v11, -inf  ;;  %v14573_v59 = vpop.permute.xlu1 %7853 }
 0xa50   : > { %15604 = vst [vmem:[#allocation96_spill] sm:$0xff] %v14573_v59 }
 0xa51   : > { %v14579_v37 = vpop.permute.xlu0 %7900 }
 0xa52   : > { %7391 = vmax.xlane.f32.xlu0 %v7390_v34  ;;  %15607 = vst [vmem:[#allocation99_spill] sm:$0xff] %v14579_v37 }
 0xa53   : > { %v14577_v1 = vpop.permute.xlu1 %7947 }
 0xa54   : > { %15606 = vst [vmem:[#allocation98_spill] sm:$0xff] %v14577_v1 }
 0xa55   : > { %v14583_v32 = vpop.permute.xlu0 %7994 }
 0xa56   : > { %15609 = vst [vmem:[#allocation101_spill] sm:$0xff] %v14583_v32 }
 0xa57   : > { %v14581_v55 = vpop.permute.xlu1 %8041 }
 0xa58   : > { %15608 = vst [vmem:[#allocation100_spill] sm:$0xff] %v14581_v55 }
 0xa5b   : > { %v14585_v51 = vpop.permute.xlu1 %8135 }
 0xa5c   : > { %15610 = vst [vmem:[#allocation102_spill] sm:$0xff] %v14585_v51 }
 0xa5f   : > { %8276 = vrot.lane.b32.xlu1 %v12075_v14, %s11719_s18  ;;  %v14587_v14 = vpop.permute.xlu0 %8088  ;;  %v14589_v16 = vpop.permute.xlu1 %8182 }
 0xa60   : > { %15611 = vst [vmem:[#allocation103_spill] sm:$0xff] %v14587_v14  ;;  %15612 = vst [vmem:[#allocation104_spill] sm:$0xff] %v14589_v16 }
 0xa68   : > { %8229 = vrot.lane.b32.xlu0 %v12077_v15, %s11719_s18 }
 0xa9f   : > { %v7299_v15 = vpop.xlane.xlu0 %7298 }
 0xaa0   : > { %v7393_v34 = vsub.f32 %v14408_v21, %v7299_v15 }
 0xaa1   : > { %v7302_v46 = vpop.xlane.xlu1 %7301 }
 0xaa2   : > { %v7425_v59 = vmul.f32 1.442695, %v7393_v34  ;;  %v7394_v43 = vsub.f32 %v14411_v8, %v7302_v46 }
 0xaa3   : > { %v7305_v1 = vpop.xlane.xlu0 %7304 }
 0xaa4   : > { %11381 = vpow2.f32 %v7425_v59  ;;  %v7427_v37 = vmul.f32 1.442695, %v7394_v43  ;;  %v7395_v55 = vsub.f32 %v14416_v53, %v7305_v1 }
 0xaa6   : > { %11383 = vpow2.f32 %v7427_v37  ;;  %v7429_v32 = vmul.f32 1.442695, %v7395_v55 }
 0xaa7   : > { %v7311_v26 = vpop.xlane.xlu1 %7310  ;;  %v7308_v51 = vpop.xlane.xlu0 %7307 }
 0xaa8   : > { %11385 = vpow2.f32 %v7429_v32  ;;  %v7397_v14 = vsub.f32 %v14426_v12, %v7311_v26  ;;  %v7396_v16 = vsub.f32 %v14421_v4, %v7308_v51 }
 0xaaa   : > { %v7433_v23 = vmul.f32 1.442695, %v7397_v14  ;;  %v7431_v21 = vmul.f32 1.442695, %v7396_v16 }
 0xaab   : > { %v7317_v15 = vpop.xlane.xlu1 %7316  ;;  %v7314_v34 = vpop.xlane.xlu0 %7313 }
 0xaac   : > { %11387 = vpow2.f32 %v7433_v23  ;;  %v7399_v46 = vsub.f32 %v14436_v20, %v7317_v15  ;;  %v7398_v8 = vsub.f32 %v14429_v6, %v7314_v34 }
 0xaad   : > { %11389 = vpow2.f32 %v7431_v21 }
 0xaae   : > { %v14598_v53 = vpop.eup %11381  ;;  %v7437_v59 = vmul.f32 1.442695, %v7399_v46  ;;  %v7435_v43 = vmul.f32 1.442695, %v7398_v8 }
 0xaaf   : > { %v7323_v1 = vpop.xlane.xlu1 %7322  ;;  %v7320_v37 = vpop.xlane.xlu0 %7319  ;;  %v7489_v26 = vsel %vm1488_vm3, %v14598_v53, 0.0 }
 0xab0   : > { %v14602_v4 = vpop.eup %11383  ;;  %11391 = vpow2.f32 %v7437_v59  ;;  %v7401_v12 = vsub.f32 %v14446_v30, %v7323_v1  ;;  %v7400_v23 = vsub.f32 %v14439_v36, %v7320_v37  ;;  %7490 = vadd.xlane.f32.xlu1 %v7489_v26 }
 0xab1   : > { %11393 = vpow2.f32 %v7435_v43  ;;  %v7492_v6 = vsel %vm1488_vm3, %v14602_v4, 0.0 }
 0xab2   : > { %v14608_v20 = vpop.eup %11385  ;;  %v7441_v55 = vmul.f32 1.442695, %v7401_v12  ;;  %v7439_v32 = vmul.f32 1.442695, %v7400_v23  ;;  %7493 = vadd.xlane.f32.xlu0 %v7492_v6 }
 0xab3   : > { %v7329_v51 = vpop.xlane.xlu1 %7328  ;;  %v7326_v14 = vpop.xlane.xlu0 %7325  ;;  %v7495_v16 = vsel %vm1488_vm3, %v14608_v20, 0.0 }
 0xab4   : > { %11395 = vpow2.f32 %v7441_v55  ;;  %v7403_v30 = vsub.f32 %v14456_v10, %v7329_v51  ;;  %v7402_v36 = vsub.f32 %v14449_v27, %v7326_v14  ;;  %7496 = vadd.xlane.f32.xlu1 %v7495_v16 }
 0xab5   : > { %11397 = vpow2.f32 %v7439_v32 }
 0xab6   : > { %v14614_v21 = vpop.eup %11387  ;;  %v7445_v15 = vmul.f32 1.442695, %v7403_v30  ;;  %v7443_v34 = vmul.f32 1.442695, %v7402_v36 }
 0xab7   : > { %v14616_v46 = vpop.eup %11389  ;;  %v7335_v8 = vpop.xlane.xlu1 %7334  ;;  %v7501_v43 = vsel %vm1488_vm3, %v14614_v21, 0.0 }
 0xab8   : > { %v7332_v59 = vpop.xlane.xlu0 %7331  ;;  %11399 = vpow2.f32 %v7445_v15  ;;  %v7405_v1 = vsub.f32 %v14466_v29, %v7335_v8  ;;  %7502 = vadd.xlane.f32.xlu1 %v7501_v43  ;;  %v7498_v27 = vsel %vm1488_vm3, %v14616_v46, 0.0 }
 0xab9   : > { %v7404_v10 = vsub.f32 %v14459_v61, %v7332_v59  ;;  %11401 = vpow2.f32 %v7443_v34  ;;  %7499 = vadd.xlane.f32.xlu0 %v7498_v27 }
 0xaba   : > { %v14624_v37 = vpop.eup %11391  ;;  %v7449_v26 = vmul.f32 1.442695, %v7405_v1 }
 0xabb   : > { %v7447_v12 = vmul.f32 1.442695, %v7404_v10  ;;  %v14626_v23 = vpop.eup %11393  ;;  %v7341_v6 = vpop.xlane.xlu1 %7340  ;;  %v7507_v32 = vsel %vm1488_vm3, %v14624_v37, 0.0 }
 0xabc   : > { %v7338_v55 = vpop.xlane.xlu0 %7337  ;;  %11403 = vpow2.f32 %v7449_v26  ;;  %v7407_v61 = vsub.f32 %v14476_v49, %v7341_v6  ;;  %7508 = vadd.xlane.f32.xlu1 %v7507_v32  ;;  %v7504_v51 = vsel %vm1488_vm3, %v14626_v23, 0.0 }
 0xabd   : > { %v7406_v29 = vsub.f32 %v14469_v0, %v7338_v55  ;;  %11405 = vpow2.f32 %v7447_v12  ;;  %7505 = vadd.xlane.f32.xlu0 %v7504_v51 }
 0xabe   : > { %v14634_v14 = vpop.eup %11395  ;;  %v7453_v16 = vmul.f32 1.442695, %v7407_v61 }
 0xabf   : > { %v7451_v30 = vmul.f32 1.442695, %v7406_v29  ;;  %v14636_v36 = vpop.eup %11397  ;;  %v7347_v15 = vpop.xlane.xlu1 %7346  ;;  %v7513_v8 = vsel %vm1488_vm3, %v14634_v14, 0.0 }
 0xac0   : > { %v7344_v34 = vpop.xlane.xlu0 %7343  ;;  %11407 = vpow2.f32 %v7453_v16  ;;  %v7409_v0 = vsub.f32 %v14486_v50, %v7347_v15  ;;  %7514 = vadd.xlane.f32.xlu1 %v7513_v8  ;;  %v7510_v59 = vsel %vm1488_vm3, %v14636_v36, 0.0 }
 0xac1   : > { %v7408_v49 = vsub.f32 %v14479_v7, %v7344_v34  ;;  %11409 = vpow2.f32 %v7451_v30  ;;  %7511 = vadd.xlane.f32.xlu0 %v7510_v59 }
 0xac2   : > { %v14644_v43 = vpop.eup %11399  ;;  %v7457_v1 = vmul.f32 1.442695, %v7409_v0 }
 0xac3   : > { %v7455_v10 = vmul.f32 1.442695, %v7408_v49  ;;  %v14646_v27 = vpop.eup %11401  ;;  %v7353_v26 = vpop.xlane.xlu1 %7352  ;;  %v7519_v6 = vsel %vm1488_vm3, %v14644_v43, 0.0 }
 0xac4   : > { %v7350_v12 = vpop.xlane.xlu0 %7349  ;;  %11411 = vpow2.f32 %v7457_v1  ;;  %v7411_v7 = vsub.f32 %v14496_v56, %v7353_v26  ;;  %7520 = vadd.xlane.f32.xlu1 %v7519_v6  ;;  %v7516_v55 = vsel %vm1488_vm3, %v14646_v27, 0.0 }
 0xac5   : > { %v7410_v50 = vsub.f32 %v14489_v17, %v7350_v12  ;;  %11413 = vpow2.f32 %v7455_v10  ;;  %7517 = vadd.xlane.f32.xlu0 %v7516_v55 }
 0xac6   : > { %v14654_v32 = vpop.eup %11403  ;;  %v7461_v61 = vmul.f32 1.442695, %v7411_v7 }
 0xac7   : > { %v7459_v29 = vmul.f32 1.442695, %v7410_v50  ;;  %v14656_v51 = vpop.eup %11405  ;;  %v7359_v16 = vpop.xlane.xlu1 %7358  ;;  %v7525_v15 = vsel %vm1488_vm3, %v14654_v32, 0.0 }
 0xac8   : > { %v7356_v30 = vpop.xlane.xlu0 %7355  ;;  %11415 = vpow2.f32 %v7461_v61  ;;  %v7413_v17 = vsub.f32 %v14506_v24, %v7359_v16  ;;  %7526 = vadd.xlane.f32.xlu1 %v7525_v15  ;;  %v7522_v34 = vsel %vm1488_vm3, %v14656_v51, 0.0 }
 0xac9   : > { %v7412_v56 = vsub.f32 %v14499_v22, %v7356_v30  ;;  %11417 = vpow2.f32 %v7459_v29  ;;  %7523 = vadd.xlane.f32.xlu0 %v7522_v34 }
 0xaca   : > { %v14664_v8 = vpop.eup %11407  ;;  %v7465_v0 = vmul.f32 1.442695, %v7413_v17 }
 0xacb   : > { %v7463_v49 = vmul.f32 1.442695, %v7412_v56  ;;  %v14666_v59 = vpop.eup %11409  ;;  %v7365_v1 = vpop.xlane.xlu1 %7364  ;;  %v7531_v26 = vsel %vm1488_vm3, %v14664_v8, 0.0 }
 0xacc   : > { %v7362_v10 = vpop.xlane.xlu0 %7361  ;;  %11419 = vpow2.f32 %v7465_v0  ;;  %v7415_v22 = vsub.f32 %v14516_v28, %v7365_v1  ;;  %7532 = vadd.xlane.f32.xlu1 %v7531_v26  ;;  %v7528_v12 = vsel %vm1488_vm3, %v14666_v59, 0.0 }
 0xacd   : > { %v7414_v24 = vsub.f32 %v14509_v39, %v7362_v10  ;;  %11421 = vpow2.f32 %v7463_v49  ;;  %7529 = vadd.xlane.f32.xlu0 %v7528_v12 }
 0xace   : > { %v14674_v6 = vpop.eup %11411  ;;  %v7469_v7 = vmul.f32 1.442695, %v7415_v22 }
 0xacf   : > { %v7467_v50 = vmul.f32 1.442695, %v7414_v24  ;;  %v14676_v55 = vpop.eup %11413  ;;  %v7371_v61 = vpop.xlane.xlu1 %7370  ;;  %v7537_v16 = vsel %vm1488_vm3, %v14674_v6, 0.0 }
 0xad0   : > { %v7368_v29 = vpop.xlane.xlu0 %7367  ;;  %11423 = vpow2.f32 %v7469_v7  ;;  %v7417_v39 = vsub.f32 %v14526_v9, %v7371_v61  ;;  %7538 = vadd.xlane.f32.xlu1 %v7537_v16  ;;  %v7534_v30 = vsel %vm1488_vm3, %v14676_v55, 0.0 }
 0xad1   : > { %v7416_v28 = vsub.f32 %v14519_v38, %v7368_v29  ;;  %11425 = vpow2.f32 %v7467_v50  ;;  %7535 = vadd.xlane.f32.xlu0 %v7534_v30 }
 0xad2   : > { %v14684_v15 = vpop.eup %11415  ;;  %v7473_v17 = vmul.f32 1.442695, %v7417_v39 }
 0xad3   : > { %v7471_v56 = vmul.f32 1.442695, %v7416_v28  ;;  %v14686_v34 = vpop.eup %11417  ;;  %v7377_v0 = vpop.xlane.xlu1 %7376  ;;  %v7543_v1 = vsel %vm1488_vm3, %v14684_v15, 0.0 }
 0xad4   : > { %v7374_v49 = vpop.xlane.xlu0 %7373  ;;  %11427 = vpow2.f32 %v7473_v17  ;;  %v7419_v38 = vsub.f32 %v14536_v2, %v7377_v0  ;;  %7544 = vadd.xlane.f32.xlu1 %v7543_v1  ;;  %v7540_v10 = vsel %vm1488_vm3, %v14686_v34, 0.0 }
 0xad5   : > { %v7418_v9 = vsub.f32 %v14529_v18, %v7374_v49  ;;  %11429 = vpow2.f32 %v7471_v56  ;;  %7541 = vadd.xlane.f32.xlu0 %v7540_v10 }
 0xad6   : > { %v14694_v26 = vpop.eup %11419  ;;  %v7477_v22 = vmul.f32 1.442695, %v7419_v38 }
 0xad7   : > { %v7475_v24 = vmul.f32 1.442695, %v7418_v9  ;;  %v14696_v12 = vpop.eup %11421  ;;  %v7383_v7 = vpop.xlane.xlu1 %7382  ;;  %v7549_v61 = vsel %vm1488_vm3, %v14694_v26, 0.0 }
 0xad8   : > { %v7380_v50 = vpop.xlane.xlu0 %7379  ;;  %11431 = vpow2.f32 %v7477_v22  ;;  %v7421_v18 = vsub.f32 %v14546_v3, %v7383_v7  ;;  %7550 = vadd.xlane.f32.xlu1 %v7549_v61  ;;  %v7546_v29 = vsel %vm1488_vm3, %v14696_v12, 0.0 }
 0xad9   : > { %v7420_v2 = vsub.f32 %v14539_v60, %v7380_v50  ;;  %11433 = vpow2.f32 %v7475_v24  ;;  %7547 = vadd.xlane.f32.xlu0 %v7546_v29 }
 0xada   : > { %v14704_v16 = vpop.eup %11423  ;;  %v7481_v39 = vmul.f32 1.442695, %v7421_v18 }
 0xadb   : > { %v7479_v28 = vmul.f32 1.442695, %v7420_v2  ;;  %v14706_v30 = vpop.eup %11425  ;;  %v7389_v17 = vpop.xlane.xlu1 %7388  ;;  %v7555_v0 = vsel %vm1488_vm3, %v14704_v16, 0.0 }
 0xadc   : > { %v7386_v56 = vpop.xlane.xlu0 %7385  ;;  %11435 = vpow2.f32 %v7481_v39  ;;  %v7423_v60 = vsub.f32 %v14556_v25, %v7389_v17  ;;  %7556 = vadd.xlane.f32.xlu1 %v7555_v0  ;;  %v7552_v49 = vsel %vm1488_vm3, %v14706_v30, 0.0 }
 0xadd   : > { %v7422_v3 = vsub.f32 %v14549_v58, %v7386_v56  ;;  %11437 = vpow2.f32 %v7479_v28  ;;  %7553 = vadd.xlane.f32.xlu0 %v7552_v49 }
 0xade   : > { %v14714_v1 = vpop.eup %11427  ;;  %v7485_v38 = vmul.f32 1.442695, %v7423_v60 }
 0xadf   : > { %v7483_v9 = vmul.f32 1.442695, %v7422_v3  ;;  %v14716_v10 = vpop.eup %11429  ;;  %v7561_v24 = vsel %vm1488_vm3, %v14714_v1, 0.0 }
 0xae0   : > { %v7392_v22 = vpop.xlane.xlu0 %7391  ;;  %11439 = vpow2.f32 %v7485_v38  ;;  %7562 = vadd.xlane.f32.xlu1 %v7561_v24  ;;  %v7558_v58 = vsel %vm1488_vm3, %v14716_v10, 0.0  ;;  %v15613_v38 = vld [vmem:[#allocation49_spill] sm:$0xff]  ;;  %v15616_v24 = vpack.i.bf16 %v14315_v54, %v14313_v33  ;;  %v15624_v33 = vpack.i.bf16 %v14309_v31, %v14307_v52  ;;  %v15633_v31 = vld [vmem:[#allocation62_spill] sm:$0xff] }
 0xae1   : > { %v7424_v25 = vsub.f32 %v14559_v11, %v7392_v22  ;;  %11441 = vpow2.f32 %v7483_v9  ;;  %7559 = vadd.xlane.f32.xlu0 %v7558_v58  ;;  %v15614_v9 = vld [vmem:[#allocation50_spill] sm:$0xff]  ;;  %v15626_v54 = vld [vmem:[#allocation57_spill] sm:$0xff]  ;;  %v15632_v52 = vpack.i.bf16 %v14321_v19, %v14319_v47  ;;  %v15640_v47 = vpack.i.bf16 %v14333_v57, %v14331_v5  ;;  %v14827_v57 = vpop.permute.xlu1 %8276 }
 0xae2   : > { %v14723_v7 = vpop.eup %11431  ;;  %v15615_v22 = vpack.i.bf16 %v15613_v38, %v15614_v9  ;;  %v15618_v58 = vld [vmem:[#allocation54_spill] sm:$0xff]  ;;  %v15636_v9 = vld [vmem:[#allocation56_spill] sm:$0xff] }
 0xae3   : > { %v7487_v50 = vmul.f32 1.442695, %v7424_v25  ;;  %v14725_v61 = vpop.eup %11433  ;;  %v7567_v18 = vsel %vm1488_vm3, %v14723_v7, 0.0  ;;  %v15617_v25 = vld [vmem:[#allocation53_spill] sm:$0xff]  ;;  %v15641_v19 = vld [vmem:[#allocation66_spill] sm:$0xff] }
 0xae4   : > { %7568 = vadd.xlane.f32.xlu1 %v7567_v18  ;;  %v7564_v2 = vsel %vm1488_vm3, %v14725_v61, 0.0  ;;  %v15621_v18 = vld [vmem:[#allocation48_spill] sm:$0xff] }
 0xae5   : > { %11443 = vpow2.f32 %v7487_v50  ;;  %7565 = vadd.xlane.f32.xlu0 %v7564_v2  ;;  %v15619_v50 = vpack.i.bf16 %v15617_v25, %v15618_v58  ;;  %v15644_v58 = vld [vmem:[#allocation60_spill] sm:$0xff] }
 0xae6   : > { %v14731_v11 = vpop.eup %11435 }
 0xae7   : > { %v14733_v29 = vpop.eup %11437  ;;  %v7573_v39 = vsel %vm1488_vm3, %v14731_v11, 0.0 }
 0xae8   : > { %7574 = vadd.xlane.f32.xlu1 %v7573_v39  ;;  %v7570_v28 = vsel %vm1488_vm3, %v14733_v29, 0.0  ;;  %v15623_v39 = vpack.i.bf16 %v14327_v62, %v14325_v45  ;;  %v15631_v45 = vpack.i.bf16 %v14339_v44, %v14337_v42  ;;  %v15634_v62 = vld [vmem:[#allocation61_spill] sm:$0xff]  ;;  %v15639_v42 = vpack.i.bf16 %v14351_v48, %v14349_v13  ;;  %v15648_v48 = vld [vmem:[#allocation64_spill] sm:$0xff] }
 0xae9   : > { %7571 = vadd.xlane.f32.xlu0 %v7570_v28  ;;  %v15635_v38 = vpack.i.bf16 %v15633_v31, %v15634_v62  ;;  %v15642_v44 = vld [vmem:[#allocation65_spill] sm:$0xff]  ;;  %v15647_v13 = vpack.i.bf16 %v14345_v35, %v14343_v63 }
 0xaea   : > { %v14739_v17 = vpop.eup %11439  ;;  %v15643_v25 = vpack.i.bf16 %v15641_v19, %v15642_v44 }
 0xaeb   : > { %v14741_v56 = vpop.eup %11441  ;;  %v7579_v0 = vsel %vm1488_vm3, %v14739_v17, 0.0 }
 0xaec   : > { %7580 = vadd.xlane.f32.xlu1 %v7579_v0  ;;  %v7576_v60 = vsel %vm1488_vm3, %v14741_v56, 0.0  ;;  %v15628_v0 = vld [vmem:[#allocation51_spill] sm:$0xff] }
 0xaed   : > { %7577 = vadd.xlane.f32.xlu0 %v7576_v60  ;;  %v15629_v60 = vld [vmem:[#allocation52_spill] sm:$0xff] }
 0xaef   : > { %v14747_v3 = vpop.eup %11443 }
 0xaf0   : > { %v7582_v49 = vsel %vm1488_vm3, %v14747_v3, 0.0 }
 0xaf1   : > { %7583 = vadd.xlane.f32.xlu0 %v7582_v49  ;;  %v15630_v49 = vpack.i.bf16 %v15628_v0, %v15629_v60 }
 0xafd   : > { %8370 = vrot.lane.b32.xlu1 %v12095_v40, %s11719_s18  ;;  %v15620_v40 = vld [vmem:[#allocation47_spill] sm:$0xff] }
 0xafe   : > { %v15622_v2 = vpack.i.bf16 %v15620_v40, %v15621_v18  ;;  %v15649_v18 = vld [vmem:[#allocation63_spill] sm:$0xff] }
 0xaff   : > { %v15650_v5 = vpack.i.bf16 %v15648_v48, %v15649_v18  ;;  %v15653_v18 = vld [vmem:[#allocation97_spill] sm:$0xff] }
 0xb01   : > { %10743 = vrot.lane.b32.xlu1 %v15615_v22, %s11720_s8  ;;  %v15637_v22 = vld [vmem:[#allocation55_spill] sm:$0xff] }
 0xb05   : > { %10753 = vrot.lane.b32.xlu1 %v15616_v24, %s11721_s27  ;;  %v15638_v24 = vpack.i.bf16 %v15636_v9, %v15637_v22  ;;  %v15651_v9 = vld [vmem:[#allocation95_spill] sm:$0xff]  ;;  %v15652_v22 = vmov 0.0  }
 0xb07   : > { %8323 = vrot.lane.b32.xlu0 %v12099_v41, %s11719_s18  ;;  %v15625_v41 = vld [vmem:[#allocation58_spill] sm:$0xff]  ;;  %s11723_s18 = smov [#allocation10]  }
 0xb08   : > { %v15627_v28 = vpack.i.bf16 %v15625_v41, %v15626_v54 }
 0xb09   : > { %10763 = vrot.lane.b32.xlu1 %v15619_v50, %s11720_s8  ;;  %v15645_v50 = vld [vmem:[#allocation59_spill] sm:$0xff] }
 0xb0a   : > { %v15646_v40 = vpack.i.bf16 %v15644_v58, %v15645_v50 }
 0xb0b   : > { %10738 = vrot.lane.b32.xlu0 %v15622_v2, %s11720_s8  ;;  %v14829_v2 = vpop.permute.xlu0 %8229 }
 0xb0d   : > { %10773 = vrot.lane.b32.xlu1 %v15623_v39, %s11721_s27 }
 0xb0f   : > { %10748 = vrot.lane.b32.xlu0 %v15624_v33, %s11721_s27 }
 0xb11   : > { %10783 = vrot.lane.b32.xlu1 %v15627_v28, %s11720_s8 }
 0xb13   : > { %10758 = vrot.lane.b32.xlu0 %v15630_v49, %s11720_s8 }
 0xb15   : > { %10793 = vrot.lane.b32.xlu1 %v15631_v45, %s11721_s27 }
 0xb17   : > { %10768 = vrot.lane.b32.xlu0 %v15632_v52, %s11721_s27 }
 0xb19   : > { %10803 = vrot.lane.b32.xlu1 %v15635_v38, %s11720_s8 }
 0xb1b   : > { %10778 = vrot.lane.b32.xlu0 %v15638_v24, %s11720_s8 }
 0xb1d   : > { %10813 = vrot.lane.b32.xlu1 %v15639_v42, %s11721_s27 }
 0xb1f   : > { %10788 = vrot.lane.b32.xlu0 %v15640_v47, %s11721_s27 }
 0xb21   : > { %10823 = vrot.lane.b32.xlu1 %v15643_v25, %s11720_s8 }
 0xb23   : > { %10798 = vrot.lane.b32.xlu0 %v15646_v40, %s11720_s8 }
 0xb27   : > { %10808 = vrot.lane.b32.xlu0 %v15647_v13, %s11721_s27 }
 0xb2b   : > { %10818 = vrot.lane.b32.xlu0 %v15650_v5, %s11720_s8 }
 0xb3d   : > { %v7491_v39 = vpop.xlane.xlu1 %7490 }
 0xb3e   : > { %11445 = vrcp.f32 %v7491_v39 }
 0xb3f   : > { %v7494_v33 = vpop.xlane.xlu0 %7493 }
 0xb40   : > { %11447 = vrcp.f32 %v7494_v33 }
 0xb41   : > { %v7497_v41 = vpop.xlane.xlu1 %7496 }
 0xb42   : > { %11449 = vrcp.f32 %v7497_v41  ;;  %v15654_v41 = vld [vmem:[#allocation96_spill] sm:$0xff] }
 0xb45   : > { %v7503_v54 = vpop.xlane.xlu1 %7502 }
 0xb46   : > { %v7500_v28 = vpop.xlane.xlu0 %7499 }
 0xb47   : > { %11451 = vrcp.f32 %v7500_v28 }
 0xb48   : > { %v11446_v63 = vpop.eup %11445  ;;  %11453 = vrcp.f32 %v7503_v54 }
 0xb49   : > { %v7509_v35 = vpop.xlane.xlu1 %7508  ;;  %v7617_v49 = vmul.f32 %v11446_v63, %v14598_v53 }
 0xb4a   : > { %v11448_v0 = vpop.eup %11447  ;;  %v7506_v60 = vpop.xlane.xlu0 %7505 }
 0xb4b   : > { %v7618_v45 = vmul.f32 %v11448_v0, %v14602_v4  ;;  %11455 = vrcp.f32 %v7506_v60  ;;  %v15655_v60 = vld [vmem:[#allocation99_spill] sm:$0xff] }
 0xb4c   : > { %11457 = vrcp.f32 %v7509_v35  ;;  %v11450_v38 = vpop.eup %11449 }
 0xb4d   : > { %v7515_v52 = vpop.xlane.xlu1 %7514  ;;  %v7649_v31 = vpack.c.bf16 %v7618_v45, %v7617_v49  ;;  %v7619_v53 = vmul.f32 %v11450_v38, %v14608_v20  ;;  %v15656_v38 = vld [vmem:[#allocation98_spill] sm:$0xff] }
 0xb4e   : > { %v7512_v62 = vpop.xlane.xlu0 %7511 }
 0xb4f   : > { %11459 = vrcp.f32 %v7512_v62  ;;  %10506 = vmatmul.mubr.msk.bf16.vlgmr.msra.gmra.mrb[224].mxu0 %vm1488_vm3, %v7649_v31 }
 0xb50   : > { %10516 = vmatpush3.bf16.msra.mxu0 %v15651_v9  ;;  %10517 = vmatprep.mubr.msk.bf16.mxu0 %vm11708_vm1, %v15652_v22  ;;  %11461 = vrcp.f32 %v7515_v52 }
 0xb51   : > { %v11452_v24 = vpop.eup %11451  ;;  %v7521_v42 = vpop.xlane.xlu1 %7520  ;;  %10527 = vmatprep.subr.bf16.mxu0 %v15652_v22 }
 0xb52   : > { %v7620_v4 = vmul.f32 %v11452_v24, %v14616_v46  ;;  %v7518_v47 = vpop.xlane.xlu0 %7517  ;;  %v11454_v19 = vpop.eup %11453 }
 0xb53   : > { %11463 = vrcp.f32 %v7518_v47  ;;  %v7621_v50 = vmul.f32 %v11454_v19, %v14614_v21  ;;  %v15657_v47 = vld [vmem:[#allocation101_spill] sm:$0xff] }
 0xb54   : > { %v7650_v44 = vpack.c.bf16 %v7620_v4, %v7619_v53  ;;  %11465 = vrcp.f32 %v7521_v42 }
 0xb55   : > { %v11456_v25 = vpop.eup %11455  ;;  %v7527_v58 = vpop.xlane.xlu1 %7526 }
 0xb56   : > { %v7622_v40 = vmul.f32 %v11456_v25, %v14626_v23  ;;  %10512 = vmatmul.mubr.msk.bf16.vlgmr.msra.gmra.mrb[0].mxu1 %vm1488_vm3, %v7650_v44  ;;  %v7524_v13 = vpop.xlane.xlu0 %7523  ;;  %v11458_v48 = vpop.eup %11457 }
 0xb57   : > { %10522 = vmatpush3.bf16.msra.mxu1 %v15653_v18  ;;  %11467 = vrcp.f32 %v7524_v13  ;;  %10523 = vmatprep.mubr.msk.bf16.mxu1 %vm11708_vm1, %v15652_v22  ;;  %v7623_v21 = vmul.f32 %v11458_v48, %v14624_v37 }
 0xb58   : > { %v7651_v20 = vpack.c.bf16 %v7622_v40, %v7621_v50  ;;  %10533 = vmatprep.subr.bf16.mxu1 %v15652_v22  ;;  %11469 = vrcp.f32 %v7527_v58  ;;  %v15658_v40 = vld [vmem:[#allocation100_spill] sm:$0xff] }
 0xb59   : > { %v11460_v46 = vpop.eup %11459  ;;  %v7533_v5 = vpop.xlane.xlu1 %7532 }
 0xb5a   : > { %v7624_v23 = vmul.f32 %v11460_v46, %v14636_v36  ;;  %10518 = vmatmul.mubr.msk.bf16.vlgmr.msra.gmra.mrb[228].mxu0 %vm1488_vm3, %v7651_v20  ;;  %v7530_v39 = vpop.xlane.xlu0 %7529  ;;  %v11462_v33 = vpop.eup %11461 }
 0xb5b   : > { %10528 = vmatpush3.bf16.msra.mxu0 %v15654_v41  ;;  %11471 = vrcp.f32 %v7530_v39  ;;  %10529 = vmatprep.mubr.msk.bf16.mxu0 %vm11708_vm1, %v15652_v22  ;;  %v7625_v37 = vmul.f32 %v11462_v33, %v14634_v14 }
 0xb5c   : > { %v7652_v54 = vpack.c.bf16 %v7624_v23, %v7623_v21  ;;  %10539 = vmatprep.subr.bf16.mxu0 %v15652_v22  ;;  %11473 = vrcp.f32 %v7533_v5  ;;  %v15659_v5 = vld [vmem:[#allocation103_spill] sm:$0xff] }
 0xb5d   : > { %v11464_v28 = vpop.eup %11463  ;;  %v7539_v63 = vpop.xlane.xlu1 %7538 }
 0xb5e   : > { %v7626_v36 = vmul.f32 %v11464_v28, %v14646_v27  ;;  %10524 = vmatmul.mubr.msk.bf16.vlgmr.msra.gmra.mrb[4].mxu1 %vm1488_vm3, %v7652_v54  ;;  %v7536_v35 = vpop.xlane.xlu0 %7535  ;;  %v11466_v0 = vpop.eup %11465  ;;  %v15660_v54 = vld [vmem:[#allocation102_spill] sm:$0xff] }
 0xb5f   : > { %10534 = vmatpush3.bf16.msra.mxu1 %v15655_v60  ;;  %11475 = vrcp.f32 %v7536_v35  ;;  %10535 = vmatprep.mubr.msk.bf16.mxu1 %vm11708_vm1, %v15652_v22  ;;  %v7627_v14 = vmul.f32 %v11466_v0, %v14644_v43  ;;  %v15661_v0 = vld [vmem:[#allocation104_spill] sm:$0xff] }
 0xb60   : > { %v7653_v49 = vpack.c.bf16 %v7626_v36, %v7625_v37  ;;  %10545 = vmatprep.subr.bf16.mxu1 %v15652_v22  ;;  %11477 = vrcp.f32 %v7539_v63 }
 0xb61   : > { %v11468_v45 = vpop.eup %11467  ;;  %v7545_v52 = vpop.xlane.xlu1 %7544 }
 0xb62   : > { %v7628_v27 = vmul.f32 %v11468_v45, %v14656_v51  ;;  %10530 = vmatmul.mubr.msk.bf16.vlgmr.msra.gmra.mrb[232].mxu0 %vm1488_vm3, %v7653_v49  ;;  %v7542_v31 = vpop.xlane.xlu0 %7541  ;;  %v11470_v62 = vpop.eup %11469 }
 0xb63   : > { %10540 = vmatpush3.bf16.msra.mxu0 %v15656_v38  ;;  %11479 = vrcp.f32 %v7542_v31  ;;  %10541 = vmatprep.mubr.msk.bf16.mxu0 %vm11708_vm1, %v15652_v22  ;;  %v7629_v43 = vmul.f32 %v11470_v62, %v14654_v32 }
 0xb64   : > { %v7654_v9 = vpack.c.bf16 %v7628_v27, %v7627_v14  ;;  %10551 = vmatprep.subr.bf16.mxu0 %v15652_v22  ;;  %11481 = vrcp.f32 %v7545_v52 }
 0xb65   : > { %v11472_v24 = vpop.eup %11471  ;;  %v7551_v42 = vpop.xlane.xlu1 %7550 }
 0xb66   : > { %v7630_v51 = vmul.f32 %v11472_v24, %v14666_v59  ;;  %10536 = vmatmul.mubr.msk.bf16.vlgmr.msra.gmra.mrb[8].mxu1 %vm1488_vm3, %v7654_v9  ;;  %v7548_v53 = vpop.xlane.xlu0 %7547  ;;  %v11474_v4 = vpop.eup %11473 }
 0xb67   : > { %10546 = vmatpush3.bf16.msra.mxu1 %v15657_v47  ;;  %11483 = vrcp.f32 %v7548_v53  ;;  %10547 = vmatprep.mubr.msk.bf16.mxu1 %vm11708_vm1, %v15652_v22  ;;  %v7631_v32 = vmul.f32 %v11474_v4, %v14664_v8 }
 0xb68   : > { %v7655_v19 = vpack.c.bf16 %v7630_v51, %v7629_v43  ;;  %10557 = vmatprep.subr.bf16.mxu1 %v15652_v22  ;;  %11485 = vrcp.f32 %v7551_v42 }
 0xb69   : > { %v11476_v44 = vpop.eup %11475  ;;  %v7557_v25 = vpop.xlane.xlu1 %7556 }
 0xb6a   : > { %v7632_v59 = vmul.f32 %v11476_v44, %v14676_v55  ;;  %10542 = vmatmul.mubr.msk.bf16.vlgmr.msra.gmra.mrb[236].mxu0 %vm1488_vm3, %v7655_v19  ;;  %v7554_v58 = vpop.xlane.xlu0 %7553  ;;  %v11478_v50 = vpop.eup %11477 }
 0xb6b   : > { %10552 = vmatpush3.bf16.msra.mxu0 %v15658_v40  ;;  %11487 = vrcp.f32 %v7554_v58  ;;  %10553 = vmatprep.mubr.msk.bf16.mxu0 %vm11708_vm1, %v15652_v22  ;;  %v7633_v8 = vmul.f32 %v11478_v50, %v14674_v6 }
 0xb6c   : > { %v7656_v13 = vpack.c.bf16 %v7632_v59, %v7631_v32  ;;  %10563 = vmatprep.subr.bf16.mxu0 %v15652_v22  ;;  %11489 = vrcp.f32 %v7557_v25 }
 0xb6d   : > { %v11480_v48 = vpop.eup %11479  ;;  %v7563_v18 = vpop.xlane.xlu1 %7562 }
 0xb6e   : > { %v7634_v55 = vmul.f32 %v11480_v48, %v14686_v34  ;;  %10548 = vmatmul.mubr.msk.bf16.vlgmr.msra.gmra.mrb[12].mxu1 %vm1488_vm3, %v7656_v13  ;;  %v7560_v20 = vpop.xlane.xlu0 %7559  ;;  %v11482_v46 = vpop.eup %11481  ;;  %v15662_v13 = vld [vmem:[#allocation79_spill] sm:$0xff]  ;;  %v15663_v48 = vld [vmem:[#allocation80_spill] sm:$0xff] }
 0xb6f   : > { %10558 = vmatpush3.bf16.msra.mxu1 %v15659_v5  ;;  %11491 = vrcp.f32 %v7560_v20  ;;  %10559 = vmatprep.mubr.msk.bf16.mxu1 %vm11708_vm1, %v15652_v22  ;;  %v7635_v6 = vmul.f32 %v11482_v46, %v14684_v15 }
 0xb70   : > { %v7657_v21 = vpack.c.bf16 %v7634_v55, %v7633_v8  ;;  %10569 = vmatprep.subr.bf16.mxu1 %v15652_v22  ;;  %11493 = vrcp.f32 %v7563_v18  ;;  %v15664_v18 = vpack.i.bf16 %v15662_v13, %v15663_v48 }
 0xb71   : > { %v11484_v23 = vpop.eup %11483  ;;  %v7569_v39 = vpop.xlane.xlu1 %7568 }
 0xb72   : > { %v7636_v34 = vmul.f32 %v11484_v23, %v14696_v12  ;;  %10554 = vmatmul.mubr.msk.bf16.vlgmr.msra.gmra.mrb[240].mxu0 %vm1488_vm3, %v7657_v21  ;;  %v7566_v33 = vpop.xlane.xlu0 %7565  ;;  %v11486_v41 = vpop.eup %11485 }
 0xb73   : > { %10564 = vmatpush3.bf16.msra.mxu0 %v15660_v54  ;;  %11495 = vrcp.f32 %v7566_v33  ;;  %10565 = vmatprep.mubr.msk.bf16.mxu0 %vm11708_vm1, %v15652_v22  ;;  %v7637_v15 = vmul.f32 %v11486_v41, %v14694_v26 }
 0xb74   : > { %v7658_v28 = vpack.c.bf16 %v7636_v34, %v7635_v6  ;;  %10575 = vmatprep.subr.bf16.mxu0 %v15652_v22  ;;  %11497 = vrcp.f32 %v7569_v39  ;;  %v15665_v6 = vld [vmem:[#allocation81_spill] sm:$0xff]  ;;  %v15666_v34 = vld [vmem:[#allocation82_spill] sm:$0xff] }
 0xb75   : > { %v11488_v63 = vpop.eup %11487  ;;  %v7575_v37 = vpop.xlane.xlu1 %7574  ;;  %v15667_v33 = vpack.i.bf16 %v15665_v6, %v15666_v34  ;;  %v15689_v6 = vld [vmem:[#allocation90_spill] sm:$0xff]  ;;  %v15690_v34 = vld [vmem:[#allocation89_spill] sm:$0xff] }
 0xb76   : > { %v7638_v12 = vmul.f32 %v11488_v63, %v14706_v30  ;;  %10560 = vmatmul.mubr.msk.bf16.vlgmr.msra.gmra.mrb[16].mxu1 %vm1488_vm3, %v7658_v28  ;;  %v7572_v36 = vpop.xlane.xlu0 %7571  ;;  %v11490_v35 = vpop.eup %11489 }
 0xb77   : > { %10570 = vmatpush3.bf16.msra.mxu1 %v15661_v0  ;;  %11499 = vrcp.f32 %v7572_v36  ;;  %10571 = vmatprep.mubr.msk.bf16.mxu1 %vm11708_vm1, %v15652_v22  ;;  %v7639_v45 = vmul.f32 %v11490_v35, %v14704_v16 }
 0xb78   : > { %v7659_v60 = vpack.c.bf16 %v7638_v12, %v7637_v15  ;;  %10581 = vmatprep.subr.bf16.mxu1 %v15652_v22  ;;  %11501 = vrcp.f32 %v7575_v37  ;;  %v15668_v15 = vld [vmem:[#allocation68_spill] sm:$0xff]  ;;  %v15669_v12 = vld [vmem:[#allocation67_spill] sm:$0xff] }
 0xb79   : > { %v11492_v49 = vpop.eup %11491  ;;  %v7581_v30 = vpop.xlane.xlu1 %7580  ;;  %v15670_v36 = vpack.i.bf16 %v15668_v15, %v15669_v12  ;;  %v15692_v15 = vld [vmem:[#allocation76_spill] sm:$0xff]  ;;  %v15693_v12 = vld [vmem:[#allocation75_spill] sm:$0xff] }
 0xb7a   : > { %v7640_v26 = vmul.f32 %v11492_v49, %v14716_v10  ;;  %10566 = vmatmul.mubr.msk.bf16.vlgmr.msra.gmra.mrb[244].mxu0 %vm1488_vm3, %v7659_v60  ;;  %v7578_v52 = vpop.xlane.xlu0 %7577  ;;  %v11494_v14 = vpop.eup %11493 }
 0xb7b   : > { %10576 = vmatpush3.bf16.msra.mxu0 %v14829_v2  ;;  %11503 = vrcp.f32 %v7578_v52  ;;  %10577 = vmatprep.mubr.msk.bf16.mxu0 %vm11708_vm1, %v15652_v22  ;;  %v7641_v16 = vmul.f32 %v11494_v14, %v14714_v1 }
 0xb7c   : > { %v7660_v27 = vpack.c.bf16 %v7640_v26, %v7639_v45  ;;  %10587 = vmatprep.subr.bf16.mxu0 %v15652_v22  ;;  %11505 = vrcp.f32 %v7581_v30  ;;  %v15671_v26 = vld [vmem:[#allocation70_spill] sm:$0xff]  ;;  %v15672_v30 = vld [vmem:[#allocation69_spill] sm:$0xff] }
 0xb7d   : > { %v11496_v31 = vpop.eup %11495  ;;  %v8371_v4 = vpop.permute.xlu1 %8370  ;;  %v15673_v52 = vpack.i.bf16 %v15671_v26, %v15672_v30  ;;  %v15695_v26 = vld [vmem:[#allocation78_spill] sm:$0xff]  ;;  %v15696_v30 = vld [vmem:[#allocation77_spill] sm:$0xff] }
 0xb7e   : > { %v7642_v10 = vmul.f32 %v11496_v31, %v14725_v61  ;;  %10572 = vmatmul.mubr.msk.bf16.vlgmr.msra.gmra.mrb[20].mxu1 %vm1488_vm3, %v7660_v27  ;;  %v7584_v62 = vpop.xlane.xlu0 %7583  ;;  %v11498_v38 = vpop.eup %11497 }
 0xb7f   : > { %10582 = vmatpush3.bf16.msra.mxu1 %v14827_v57  ;;  %11507 = vrcp.f32 %v7584_v62  ;;  %10583 = vmatprep.mubr.msk.bf16.mxu1 %vm11708_vm1, %v15652_v22  ;;  %v7643_v24 = vmul.f32 %v11498_v38, %v14723_v7  ;;  %v15674_v62 = vld [vmem:[#allocation83_spill] sm:$0xff]  ;;  %v15675_v38 = vld [vmem:[#allocation84_spill] sm:$0xff] }
 0xb80   : > { %v7661_v2 = vpack.c.bf16 %v7642_v10, %v7641_v16  ;;  %10593 = vmatprep.subr.bf16.mxu1 %v15652_v22 }
 0xb81   : > { %v11500_v9 = vpop.eup %11499 }
 0xb82   : > { %v7644_v1 = vmul.f32 %v11500_v9, %v14733_v29  ;;  %10578 = vmatmul.mubr.msk.bf16.vlgmr.msra.gmra.mrb[248].mxu0 %vm1488_vm3, %v7661_v2  ;;  %v8324_v61 = vpop.permute.xlu0 %8323  ;;  %v11502_v42 = vpop.eup %11501  ;;  %v15676_v2 = vpack.i.bf16 %v15674_v62, %v15675_v38  ;;  %v15698_v62 = vld [vmem:[#allocation92_spill] sm:$0xff]  ;;  %v15699_v38 = vld [vmem:[#allocation91_spill] sm:$0xff] }
 0xb83   : > { %10588 = vmatpush3.bf16.msra.mxu0 %v8324_v61  ;;  %10589 = vmatprep.mubr.msk.bf16.mxu0 %vm11708_vm1, %v15652_v22  ;;  %v7645_v51 = vmul.f32 %v11502_v42, %v14731_v11  ;;  %v10995_v11 = vld [vmem:[#allocation7] sm:$0xff]  }
 0xb84   : > { %v7662_v57 = vpack.c.bf16 %v7644_v1, %v7643_v24  ;;  %10599 = vmatprep.subr.bf16.mxu0 %v10995_v11 }
 0xb85   : > { %v11504_v43 = vpop.eup %11503 }
 0xb86   : > { %v7646_v53 = vmul.f32 %v11504_v43, %v14741_v56  ;;  %10584 = vmatmul.mubr.msk.bf16.vlgmr.msra.gmra.mrb[24].mxu1 %vm1488_vm3, %v7662_v57  ;;  %v11506_v7 = vpop.eup %11505  ;;  %v10996_v56 = vld [vmem:[#allocation7 + $0x8] sm:$0xff]   ;;  %v15677_v57 = vld [vmem:[#allocation85_spill] sm:$0xff] }
 0xb87   : > { %10594 = vmatpush3.bf16.msra.mxu1 %v8371_v4  ;;  %10595 = vmatprep.mubr.msk.bf16.mxu1 %vm11708_vm1, %v15652_v22  ;;  %v7647_v19 = vmul.f32 %v11506_v7, %v14739_v17  ;;  %v15678_v43 = vld [vmem:[#allocation86_spill] sm:$0xff] }
 0xb88   : > { %v7663_v29 = vpack.c.bf16 %v7646_v53, %v7645_v51  ;;  %v15679_v51 = vpack.i.bf16 %v15677_v57, %v15678_v43  ;;  %v15701_v57 = vld [vmem:[#allocation94_spill] sm:$0xff]  ;;  %v15702_v43 = vld [vmem:[#allocation93_spill] sm:$0xff] }
 0xb89   : > { %v11508_v47 = vpop.eup %11507 }
 0xb8a   : > { %v7648_v44 = vmul.f32 %v11508_v47, %v14747_v3  ;;  %10590 = vmatmul.mubr.msk.bf16.vlgmr.msra.gmra.mrb[252].mxu0 %vm1488_vm3, %v7663_v29 }
 0xb8b   : > { %10600 = vmatpush3.bf16.msra.mxu0 %v10995_v11 }
 0xb8c   : > { %v7664_v25 = vpack.c.bf16 %v7648_v44, %v7647_v19  ;;  %10601 = vmatprep.subr.bf16.mxu0 %v10996_v56  ;;  %v15680_v19 = vld [vmem:[#allocation72_spill] sm:$0xff]  ;;  %v15681_v44 = vld [vmem:[#allocation71_spill] sm:$0xff] }
 0xb8e   : > { %10596 = vmatmul.mubr.msk.bf16.vlgmr.msra.gmra.mrb[28].mxu1 %vm1488_vm3, %v7664_v25  ;;  %v15682_v25 = vpack.i.bf16 %v15680_v19, %v15681_v44  ;;  %v10744_v44 = vpop.permute.xlu1 %10743 }
 0xb8f   : > { %10602 = vmatpush3.bf16.msra.mxu0 %v10996_v56 }
 0xc22   : > { %v7705_v32 = vpop.f32.mrb[224].mxu0 }
 0xc23   : > { %v10507_v59 = vpop.f32.mrb[225].mxu0 }
 0xc24   : > { %v7708_v58 = vpop.f32.mrb[226].mxu0 }
 0xc25   : > { %v10827_v22 = vpack.i.bf16 %v7708_v58, %v7705_v32  ;;  %v10508_v50 = vpop.f32.mrb[227].mxu0 }
 0xc26   : > { %v15684_v50 = vld [vmem:[#allocation73_spill] sm:$0xff] }
 0xc27   : > { %10828 = vrot.lane.b32.xlu0 %v10827_v22, %s11722_s29  ;;  %v15683_v22 = vld [vmem:[#allocation74_spill] sm:$0xff] }
 0xc29   : > { %v7752_v17 = vpop.f32.mrb[0].mxu1 }
 0xc2a   : > { %v10513_v3 = vpop.f32.mrb[1].mxu1 }
 0xc2b   : > { %v7755_v40 = vpop.f32.mrb[2].mxu1  ;;  %10833 = vrot.lane.b32.xlu0 %v15664_v18, %s11721_s27 }
 0xc2c   : > { %v10837_v8 = vpack.i.bf16 %v7755_v40, %v7752_v17  ;;  %v10514_v55 = vpop.f32.mrb[3].mxu1  ;;  %v15685_v17 = vpack.i.bf16 %v15683_v22, %v15684_v50 }
 0xc2d   : > { %v7799_v20 = vpop.f32.mrb[228].mxu0  ;;  %v15687_v55 = vld [vmem:[#allocation87_spill] sm:$0xff] }
 0xc2e   : > { %10838 = vrot.lane.b32.xlu1 %v10837_v8, %s11722_s29  ;;  %v10519_v46 = vpop.f32.mrb[229].mxu0  ;;  %v15686_v8 = vld [vmem:[#allocation88_spill] sm:$0xff] }
 0xc2f   : > { %v7802_v5 = vpop.f32.mrb[230].mxu0 }
 0xc30   : > { %v10847_v21 = vpack.i.bf16 %v7802_v5, %v7799_v20  ;;  %v10520_v23 = vpop.f32.mrb[231].mxu0  ;;  %v15688_v20 = vpack.i.bf16 %v15686_v8, %v15687_v55 }
 0xc31   : > { %v7846_v39 = vpop.f32.mrb[4].mxu1 }
 0xc32   : > { %10843 = vrot.lane.b32.xlu1 %v15667_v33, %s11721_s27  ;;  %10848 = vrot.lane.b32.xlu0 %v10847_v21, %s11722_s29  ;;  %v10525_v41 = vpop.f32.mrb[5].mxu1  ;;  %v15691_v33 = vpack.i.bf16 %v15689_v6, %v15690_v34 }
 0xc33   : > { %v7849_v54 = vpop.f32.mrb[6].mxu1 }
 0xc34   : > { %v10857_v28 = vpack.i.bf16 %v7849_v54, %v7846_v39  ;;  %v10526_v63 = vpop.f32.mrb[7].mxu1 }
 0xc35   : > { %v7893_v37 = vpop.f32.mrb[232].mxu0 }
 0xc36   : > { %10853 = vrot.lane.b32.xlu0 %v15670_v36, %s11720_s8  ;;  %10858 = vrot.lane.b32.xlu1 %v10857_v28, %s11722_s29  ;;  %v10531_v35 = vpop.f32.mrb[233].mxu0  ;;  %v15694_v36 = vpack.i.bf16 %v15692_v15, %v15693_v12 }
 0xc37   : > { %v7896_v0 = vpop.f32.mrb[234].mxu0 }
 0xc38   : > { %v10867_v60 = vpack.i.bf16 %v7896_v0, %v7893_v37  ;;  %v10532_v49 = vpop.f32.mrb[235].mxu0 }
 0xc39   : > { %v7940_v45 = vpop.f32.mrb[8].mxu1 }
 0xc3a   : > { %10863 = vrot.lane.b32.xlu1 %v15673_v52, %s11720_s8  ;;  %10868 = vrot.lane.b32.xlu0 %v10867_v60, %s11722_s29  ;;  %v10537_v14 = vpop.f32.mrb[9].mxu1  ;;  %v15697_v52 = vpack.i.bf16 %v15695_v26, %v15696_v30 }
 0xc3b   : > { %v7943_v27 = vpop.f32.mrb[10].mxu1 }
 0xc3c   : > { %v10877_v31 = vpack.i.bf16 %v7943_v27, %v7940_v45  ;;  %v10538_v16 = vpop.f32.mrb[11].mxu1 }
 0xc3d   : > { %v7987_v10 = vpop.f32.mrb[236].mxu0 }
 0xc3e   : > { %10873 = vrot.lane.b32.xlu0 %v15676_v2, %s11721_s27  ;;  %10878 = vrot.lane.b32.xlu1 %v10877_v31, %s11722_s29  ;;  %v10543_v9 = vpop.f32.mrb[237].mxu0  ;;  %v15700_v2 = vpack.i.bf16 %v15698_v62, %v15699_v38 }
 0xc3f   : > { %v7990_v24 = vpop.f32.mrb[238].mxu0 }
 0xc40   : > { %v10887_v1 = vpack.i.bf16 %v7990_v24, %v7987_v10  ;;  %v10544_v61 = vpop.f32.mrb[239].mxu0 }
 0xc41   : > { %v8034_v42 = vpop.f32.mrb[12].mxu1 }
 0xc42   : > { %10883 = vrot.lane.b32.xlu1 %v15679_v51, %s11721_s27  ;;  %10888 = vrot.lane.b32.xlu0 %v10887_v1, %s11722_s29  ;;  %v10549_v53 = vpop.f32.mrb[13].mxu1  ;;  %v15703_v51 = vpack.i.bf16 %v15701_v57, %v15702_v43 }
 0xc43   : > { %v8037_v4 = vpop.f32.mrb[14].mxu1 }
 0xc44   : > { %v10897_v7 = vpack.i.bf16 %v8037_v4, %v8034_v42  ;;  %v10550_v29 = vpop.f32.mrb[15].mxu1 }
 0xc45   : > { %v8081_v47 = vpop.f32.mrb[240].mxu0 }
 0xc46   : > { %10893 = vrot.lane.b32.xlu0 %v15682_v25, %s11720_s8  ;;  %10898 = vrot.lane.b32.xlu1 %v10897_v7, %s11722_s29  ;;  %v10555_v11 = vpop.f32.mrb[241].mxu0 }
 0xc47   : > { %v8084_v56 = vpop.f32.mrb[242].mxu0  ;;  %v10754_v11 = vpop.permute.xlu1 %10753 }
 0xc48   : > { %v10907_v32 = vpack.i.bf16 %v8084_v56, %v8081_v47  ;;  %v10556_v59 = vpop.f32.mrb[243].mxu0  ;;  %v10739_v47 = vpop.permute.xlu0 %10738 }
 0xc49   : > { %v8128_v58 = vpop.f32.mrb[16].mxu1  ;;  %v10740_v8 = vunpack.i.l.bf16 %v10739_v47 }
 0xc4a   : > { %10903 = vrot.lane.b32.xlu1 %v15685_v17, %s11720_s8  ;;  %10908 = vrot.lane.b32.xlu0 %v10907_v32, %s11722_s29  ;;  %v10561_v3 = vpop.f32.mrb[17].mxu1 }
 0xc4b   : > { %v8131_v40 = vpop.f32.mrb[18].mxu1  ;;  %v15003_v32 = vpop.permute.xlu1 %10763 }
 0xc4c   : > { %v10917_v13 = vpack.i.bf16 %v8131_v40, %v8128_v58  ;;  %v10562_v48 = vpop.f32.mrb[19].mxu1  ;;  %v10749_v19 = vpop.permute.xlu0 %10748 }
 0xc4d   : > { %v8175_v18 = vpop.f32.mrb[244].mxu0 }
 0xc4e   : > { %10913 = vrot.lane.b32.xlu0 %v15688_v20, %s11721_s27  ;;  %10918 = vrot.lane.b32.xlu1 %v10917_v13, %s11722_s29  ;;  %v10567_v46 = vpop.f32.mrb[245].mxu0  ;;  %v10751_v20 = vunpack.i.h.bf16 %v10749_v19 }
 0xc4f   : > { %v8178_v5 = vpop.f32.mrb[246].mxu0  ;;  %v15007_v58 = vpop.permute.xlu1 %10773  ;;  %v10750_v46 = vunpack.i.l.bf16 %v10749_v19 }
 0xc50   : > { %v10927_v21 = vpack.i.bf16 %v8178_v5, %v8175_v18  ;;  %v10568_v23 = vpop.f32.mrb[247].mxu0  ;;  %v10759_v25 = vpop.permute.xlu0 %10758  ;;  %v10741_v18 = vunpack.i.h.bf16 %v10739_v47  ;;  %v10776_v19 = vunpack.i.h.bf16 %v15007_v58 }
 0xc51   : > { %v8222_v39 = vpop.f32.mrb[20].mxu1 }
 0xc52   : > { %10923 = vrot.lane.b32.xlu1 %v15691_v33, %s11721_s27  ;;  %10928 = vrot.lane.b32.xlu0 %v10927_v21, %s11722_s29  ;;  %v10573_v41 = vpop.f32.mrb[21].mxu1  ;;  %v15704_v21 = vld [vmem:[#allocation15_spill] sm:$0xff] }
 0xc53   : > { %v8225_v54 = vpop.f32.mrb[22].mxu1  ;;  %v15011_v50 = vpop.permute.xlu1 %10783  ;;  %v8802_v23 = vsel %vm690_vm2, %v15704_v21, %v10741_v18  ;;  %v15710_v18 = vld [vmem:[#allocation22_spill] sm:$0xff] }
 0xc54   : > { %v10937_v28 = vpack.i.bf16 %v8225_v54, %v8222_v39  ;;  %v10574_v63 = vpop.f32.mrb[23].mxu1  ;;  %v10769_v56 = vpop.permute.xlu0 %10768  ;;  %v15705_v39 = vld [vmem:[#allocation18_spill] sm:$0xff]  ;;  %v8834_v54 = vsel %vm1488_vm3, %v8802_v23, %v10751_v20  ;;  %v15711_v20 = vld [vmem:[#allocation21_spill] sm:$0xff] }
 0xc55   : > { %v8269_v37 = vpop.f32.mrb[248].mxu0  ;;  %v8801_v6 = vsel %vm690_vm2, %v15705_v39, %v10740_v8  ;;  %v10745_v63 = vunpack.i.l.bf16 %v10744_v44  ;;  %v10771_v38 = vunpack.i.h.bf16 %v10769_v56 }
 0xc56   : > { %10933 = vrot.lane.b32.xlu0 %v15694_v36, %s11720_s8  ;;  %10938 = vrot.lane.b32.xlu1 %v10937_v28, %s11722_s29  ;;  %v10579_v35 = vpop.f32.mrb[249].mxu0  ;;  %v8833_v41 = vsel %vm1488_vm3, %v8801_v6, %v10750_v46  ;;  %v10746_v28 = vunpack.i.h.bf16 %v10744_v44  ;;  %v10775_v44 = vunpack.i.l.bf16 %v15007_v58 }
 0xc57   : > { %v8272_v0 = vpop.f32.mrb[250].mxu0  ;;  %v15015_v3 = vpop.permute.xlu1 %10793  ;;  %v10756_v35 = vunpack.i.h.bf16 %v10754_v11 }
 0xc58   : > { %v10947_v60 = vpack.i.bf16 %v8272_v0, %v8269_v37  ;;  %v10580_v49 = vpop.f32.mrb[251].mxu0  ;;  %v15005_v59 = vpop.permute.xlu0 %10778  ;;  %v10755_v0 = vunpack.i.l.bf16 %v10754_v11 }
 0xc59   : > { %v8316_v45 = vpop.f32.mrb[24].mxu1  ;;  %v10781_v58 = vunpack.i.h.bf16 %v15005_v59  ;;  %v10780_v39 = vunpack.i.l.bf16 %v15005_v59  ;;  %v10785_v59 = vunpack.i.l.bf16 %v15011_v50 }
 0xc5a   : > { %10943 = vrot.lane.b32.xlu1 %v15697_v52, %s11720_s8  ;;  %10948 = vrot.lane.b32.xlu0 %v10947_v60, %s11722_s29  ;;  %v10585_v14 = vpop.f32.mrb[25].mxu1  ;;  %v15706_v60 = vld [vmem:[#allocation16_spill] sm:$0xff] }
 0xc5b   : > { %v8319_v27 = vpop.f32.mrb[26].mxu1  ;;  %v15019_v13 = vpop.permute.xlu1 %10803  ;;  %v8804_v49 = vsel %vm690_vm2, %v15706_v60, %v10746_v28  ;;  %v10761_v14 = vunpack.i.h.bf16 %v10759_v25  ;;  %v15712_v60 = vld [vmem:[#allocation23_spill] sm:$0xff] }
 0xc5c   : > { %v10957_v31 = vpack.i.bf16 %v8319_v27, %v8316_v45  ;;  %v10586_v16 = vpop.f32.mrb[27].mxu1  ;;  %v15009_v22 = vpop.permute.xlu0 %10788  ;;  %v15707_v45 = vld [vmem:[#allocation24_spill] sm:$0xff]  ;;  %v10760_v27 = vunpack.i.l.bf16 %v10759_v25  ;;  %v8836_v62 = vsel %vm1488_vm3, %v8804_v49, %v10756_v35  ;;  %v8810_v49 = vsel %vm690_vm2, %v15712_v60, %v10781_v58 }
 0xc5d   : > { %v8363_v10 = vpop.f32.mrb[252].mxu0  ;;  %v8803_v26 = vsel %vm690_vm2, %v15707_v45, %v10745_v63  ;;  %v10790_v28 = vunpack.i.l.bf16 %v15009_v22  ;;  %v15713_v45 = vld [vmem:[#allocation19_spill] sm:$0xff] }
 0xc5e   : > { %10953 = vrot.lane.b32.xlu0 %v15700_v2, %s11721_s27  ;;  %10958 = vrot.lane.b32.xlu1 %v10957_v31, %s11722_s29  ;;  %v10591_v9 = vpop.f32.mrb[253].mxu0  ;;  %v10770_v2 = vunpack.i.l.bf16 %v10769_v56 }
 0xc5f   : > { %v8366_v24 = vpop.f32.mrb[254].mxu0  ;;  %v15023_v55 = vpop.permute.xlu1 %10813 }
 0xc60   : > { %v10967_v1 = vpack.i.bf16 %v8366_v24, %v8363_v10  ;;  %v10592_v61 = vpop.f32.mrb[255].mxu0  ;;  %v15013_v17 = vpop.permute.xlu0 %10798  ;;  %v8835_v10 = vsel %vm1488_vm3, %v8803_v26, %v10755_v0 }
 0xc61   : > { %v8410_v42 = vpop.f32.mrb[28].mxu1  ;;  %v10765_v61 = vunpack.i.l.bf16 %v15003_v32 }
 0xc62   : > { %10963 = vrot.lane.b32.xlu1 %v15703_v51, %s11721_s27  ;;  %v10597_v53 = vpop.f32.mrb[29].mxu1  ;;  %10968 = vrot.lane.b32.xlu0 %v10967_v1, %s11722_s29  ;;  %v10766_v1 = vunpack.i.h.bf16 %v15003_v32  ;;  %v15708_v51 = vld [vmem:[#allocation17_spill] sm:$0xff]  ;;  %s11627_s27 = sshll.u32 %s11723_s18, 4  ;;  %s11628_s27 = int_to_ptr.vmem [resolvable:$false] %s11627_s27 }
 0xc63   : > { %v8413_v4 = vpop.f32.mrb[30].mxu1  ;;  %v15031_v37 = vpop.permute.xlu1 %10823  ;;  %v8806_v53 = vsel %vm690_vm2, %v15708_v51, %v10761_v14  ;;  %v8807_v46 = vsel %vm690_vm2, %v15711_v20, %v10765_v61  ;;  %v10796_v14 = vunpack.i.h.bf16 %v15015_v3  ;;  %p11630_p12 = scmp.lt.s32.totalorder %s15334_s15, %s11628_s27 }
 0xc64   : > { %v10972_v7 = vpack.i.bf16 %v8413_v4, %v8410_v42  ;;  %v10598_v29 = vpop.f32.mrb[31].mxu1  ;;  %v15017_v40 = vpop.permute.xlu0 %10808  ;;  %v15709_v4 = vld [vmem:[#allocation20_spill] sm:$0xff]  ;;  %v8838_v11 = vsel %vm1488_vm3, %v8806_v53, %v10771_v38  ;;  %v8808_v8 = vsel %vm690_vm2, %v15710_v18, %v10766_v1 }
 0xc66   : > { %10973 = vrot.lane.b32.xlu1 %v10972_v7, %s11722_s29  ;;  %v8805_v7 = vsel %vm690_vm2, %v15709_v4, %v10760_v27  ;;  %v10795_v27 = vunpack.i.l.bf16 %v15015_v3  ;;  %v10801_v3 = vunpack.i.h.bf16 %v15013_v17  ;;  %s11629_s29 = scalar_lea.vmem %s11628_s27, 8192 }
 0xc67   : > { %v8837_v25 = vsel %vm1488_vm3, %v8805_v7, %v10770_v2  ;;  %v15715_v2 = vld [vmem:[#allocation25_spill] sm:$0xff]  ;;  %v10811_v7 = vunpack.i.h.bf16 %v15017_v40  ;;  %p11631_p1 = scmp.lt.s32.totalorder %s11629_s29, %s11623_s26 }
 0xc68   : > { %v15021_v48 = vpop.permute.xlu0 %10818 }
 0xc69   : > { %p11632_p2 = por %p11631_p1, %p11630_p12 }
 0xc6b   : > { %p11633_p4 = pnand %p11632_p2, %p11626_p7 }
 0xc99   : > { %v10829_v5 = vpop.permute.xlu0 %10828 }
 0xc9a   : > { %v10831_v34 = vunpack.i.h.bf16 %v10829_v5  ;;  %v10830_v33 = vunpack.i.l.bf16 %v10829_v5 }
 0xc9c   : > { %v8866_v15 = vsel %vm8865_vm4, %v8833_v41, %v10830_v33  ;;  %v8867_v12 = vsel %vm8865_vm4, %v8834_v54, %v10831_v34  ;;  %v8839_v33 = vsel %vm1488_vm3, %v8807_v46, %v10775_v44  ;;  %v8840_v41 = vsel %vm1488_vm3, %v8808_v8, %v10776_v19  ;;  %v15717_v8 = vld [vmem:[#allocation27_spill] sm:$0xff] }
 0xc9d   : > { %v8898_v36 = vpack.c.bf16 %v8867_v12, %v8866_v15  ;;  %v15040_v30 = vpop.permute.xlu0 %10833  ;;  %v10791_v54 = vunpack.i.h.bf16 %v15009_v22  ;;  %v10786_v12 = vunpack.i.h.bf16 %v15011_v50  ;;  %v8809_v22 = vsel %vm690_vm2, %v15713_v45, %v10780_v39 }
 0xc9e   : > { %v10806_v44 = vunpack.i.h.bf16 %v15019_v13  ;;  %v10835_v45 = vunpack.i.l.bf16 %v15040_v30 }
 0xc9f   : > { %10603 = vmatprep.mubr.msk.bf16.mxu0 %vm453_vm0, %v8898_v36  ;;  %v8842_v50 = vsel %vm1488_vm3, %v8810_v49, %v10791_v54  ;;  %v10836_v49 = vunpack.i.h.bf16 %v15040_v30 }
 0xca0   : > { %v10839_v52 = vpop.permute.xlu1 %10838 }
 0xca1   : > { %v10841_v31 = vunpack.i.h.bf16 %v10839_v52  ;;  %v10840_v16 = vunpack.i.l.bf16 %v10839_v52 }
 0xca3   : > { %v8869_v9 = vsel %vm8865_vm4, %v8836_v62, %v10841_v31  ;;  %v8868_v24 = vsel %vm8865_vm4, %v8835_v10, %v10840_v16  ;;  %v8841_v31 = vsel %vm1488_vm3, %v8809_v22, %v10790_v28  ;;  %v15714_v62 = vld [vmem:[#allocation26_spill] sm:$0xff] }
 0xca4   : > { %v8899_v42 = vpack.c.bf16 %v8869_v9, %v8868_v24  ;;  %v15048_v57 = vpop.permute.xlu1 %10843  ;;  %v10849_v43 = vpop.permute.xlu0 %10848  ;;  %v8812_v38 = vsel %vm690_vm2, %v15714_v62, %v10786_v12  ;;  %v8811_v9 = vsel %vm690_vm2, %v15715_v2, %v10785_v59  ;;  %v10820_v12 = vunpack.i.l.bf16 %v15021_v48 }
 0xca5   : > { %v10851_v29 = vunpack.i.h.bf16 %v10849_v43  ;;  %v10850_v47 = vunpack.i.l.bf16 %v10849_v43  ;;  %v8843_v53 = vsel %vm1488_vm3, %v8811_v9, %v10795_v27  ;;  %v8844_v4 = vsel %vm1488_vm3, %v8812_v38, %v10796_v14 }
 0xca6   : > { %10604 = vmatmul.mubr.msk.bf16.vlgmr.msra.gmra.mrb[0].mxu0 %vm453_vm0, %v8899_v42  ;;  %v10800_v42 = vunpack.i.l.bf16 %v15013_v17  ;;  %v10805_v17 = vunpack.i.l.bf16 %v15019_v13 }
 0xca7   : > { %v8870_v56 = vsel %vm8865_vm4, %v8837_v25, %v10850_v47  ;;  %v8871_v32 = vsel %vm8865_vm4, %v8838_v11, %v10851_v29  ;;  %v10810_v29 = vunpack.i.l.bf16 %v15017_v40 }
 0xca8   : > { %v8900_v5 = vpack.c.bf16 %v8871_v32, %v8870_v56  ;;  %v10859_v21 = vpop.permute.xlu1 %10858  ;;  %v15065_v23 = vpop.permute.xlu0 %10853  ;;  %v15716_v32 = vld [vmem:[#allocation28_spill] sm:$0xff]  ;;  %v8813_v40 = vsel %vm690_vm2, %v15717_v8, %v10800_v42 }
 0xca9   : > { %v10861_v6 = vunpack.i.h.bf16 %v10859_v21  ;;  %v10860_v34 = vunpack.i.l.bf16 %v10859_v21  ;;  %v8814_v18 = vsel %vm690_vm2, %v15716_v32, %v10801_v3  ;;  %v10815_v21 = vunpack.i.l.bf16 %v15023_v55  ;;  %v15724_v8 = vld [vmem:[#allocation36_spill] sm:$0xff] }
 0xcaa   : > { %10607 = vmatprep.mubr.msk.bf16.mxu0 %vm453_vm0, %v8900_v5  ;;  %v10816_v5 = vunpack.i.h.bf16 %v15023_v55  ;;  %v8845_v58 = vsel %vm1488_vm3, %v8813_v40, %v10810_v29  ;;  %v8846_v13 = vsel %vm1488_vm3, %v8814_v18, %v10811_v7  ;;  %v10821_v55 = vunpack.i.h.bf16 %v15021_v48  ;;  %v15722_v7 = vld [vmem:[#allocation34_spill] sm:$0xff] }
 0xcab   : > { %v8873_v63 = vsel %vm8865_vm4, %v8840_v41, %v10861_v6  ;;  %v8872_v15 = vsel %vm8865_vm4, %v8839_v33, %v10860_v34  ;;  %v15718_v34 = vld [vmem:[#allocation30_spill] sm:$0xff]  ;;  %v15719_v41 = vld [vmem:[#allocation29_spill] sm:$0xff]  ;;  %v10825_v48 = vunpack.i.l.bf16 %v15031_v37  ;;  %v10856_v42 = vunpack.i.h.bf16 %v15065_v23 }
 0xcac   : > { %v8901_v36 = vpack.c.bf16 %v8873_v63, %v8872_v15  ;;  %v15078_v35 = vpop.permute.xlu1 %10863  ;;  %v10869_v0 = vpop.permute.xlu0 %10868  ;;  %v8816_v33 = vsel %vm690_vm2, %v15718_v34, %v10806_v44  ;;  %v8815_v54 = vsel %vm690_vm2, %v15719_v41, %v10805_v17 }
 0xcad   : > { %v10871_v26 = vunpack.i.h.bf16 %v10869_v0  ;;  %v10870_v52 = vunpack.i.l.bf16 %v10869_v0  ;;  %v8847_v0 = vsel %vm1488_vm3, %v8815_v54, %v10815_v21  ;;  %v8848_v60 = vsel %vm1488_vm3, %v8816_v33, %v10816_v5 }
 0xcae   : > { %10608 = vmatmul.mubr.msk.bf16.gmra.mrb[4].mxu0 %vm453_vm0, %v8901_v36  ;;  %v8822_v40 = vsel %vm690_vm2, %v15724_v8, %v10856_v42 }
 0xcaf   : > { %v8874_v16 = vsel %vm8865_vm4, %v8841_v31, %v10870_v52  ;;  %v8875_v10 = vsel %vm8865_vm4, %v8842_v50, %v10871_v26  ;;  %v10826_v52 = vunpack.i.h.bf16 %v15031_v37  ;;  %v15720_v50 = vld [vmem:[#allocation32_spill] sm:$0xff]  ;;  %v10845_v37 = vunpack.i.l.bf16 %v15048_v57 }
 0xcb0   : > { %v8902_v24 = vpack.c.bf16 %v8875_v10, %v8874_v16  ;;  %v10879_v1 = vpop.permute.xlu1 %10878  ;;  %v15095_v61 = vpop.permute.xlu0 %10873  ;;  %v8818_v16 = vsel %vm690_vm2, %v15720_v50, %v10821_v55  ;;  %v15721_v10 = vld [vmem:[#allocation31_spill] sm:$0xff]  ;;  %v15728_v50 = vld [vmem:[#allocation40_spill] sm:$0xff] }
 0xcb1   : > { %v10881_v43 = vunpack.i.h.bf16 %v10879_v1  ;;  %v10880_v51 = vunpack.i.l.bf16 %v10879_v1  ;;  %v8817_v30 = vsel %vm690_vm2, %v15721_v10, %v10820_v12  ;;  %v8850_v9 = vsel %vm1488_vm3, %v8818_v16, %v10836_v49  ;;  %v15727_v49 = vld [vmem:[#allocation37_spill] sm:$0xff]  ;;  %v15729_v10 = vld [vmem:[#allocation39_spill] sm:$0xff] }
 0xcb2   : > { %10611 = vmatprep.mubr.msk.bf16.mxu0 %vm453_vm0, %v8902_v24  ;;  %v8849_v2 = vsel %vm1488_vm3, %v8817_v30, %v10835_v45  ;;  %v10846_v24 = vunpack.i.h.bf16 %v15048_v57  ;;  %v8820_v29 = vsel %vm690_vm2, %v15722_v7, %v10826_v52  ;;  %v10875_v32 = vunpack.i.l.bf16 %v15095_v61 }
 0xcb3   : > { %v8877_v47 = vsel %vm8865_vm4, %v8844_v4, %v10881_v43  ;;  %v8876_v19 = vsel %vm8865_vm4, %v8843_v53, %v10880_v51  ;;  %v10855_v43 = vunpack.i.l.bf16 %v15065_v23 }
 0xcb4   : > { %v8903_v25 = vpack.c.bf16 %v8877_v47, %v8876_v19  ;;  %v15108_v11 = vpop.permute.xlu1 %10883  ;;  %v10889_v56 = vpop.permute.xlu0 %10888  ;;  %v15723_v47 = vld [vmem:[#allocation33_spill] sm:$0xff]  ;;  %v8852_v17 = vsel %vm1488_vm3, %v8820_v29, %v10846_v24 }
 0xcb5   : > { %v10891_v20 = vunpack.i.h.bf16 %v10889_v56  ;;  %v10890_v46 = vunpack.i.l.bf16 %v10889_v56  ;;  %v8819_v19 = vsel %vm690_vm2, %v15723_v47, %v10825_v48  ;;  %v10876_v56 = vunpack.i.h.bf16 %v15095_v61 }
 0xcb6   : > { %10612 = vmatmul.mubr.msk.bf16.gmra.mrb[8].mxu0 %vm453_vm0, %v8903_v25  ;;  %v8851_v25 = vsel %vm1488_vm3, %v8819_v19, %v10845_v37  ;;  %v10886_v41 = vunpack.i.h.bf16 %v15108_v11  ;;  %v10885_v54 = vunpack.i.l.bf16 %v15108_v11 }
 0xcb7   : > { %v8878_v39 = vsel %vm8865_vm4, %v8845_v58, %v10890_v46  ;;  %v8879_v6 = vsel %vm8865_vm4, %v8846_v13, %v10891_v20  ;;  %v15725_v20 = vld [vmem:[#allocation35_spill] sm:$0xff]  ;;  %v10866_v13 = vunpack.i.h.bf16 %v15078_v35  ;;  %v8854_v33 = vsel %vm1488_vm3, %v8822_v40, %v10876_v56 }
 0xcb8   : > { %v8904_v28 = vpack.c.bf16 %v8879_v6, %v8878_v39  ;;  %v10899_v63 = vpop.permute.xlu1 %10898  ;;  %v15125_v15 = vpop.permute.xlu0 %10893  ;;  %v8821_v46 = vsel %vm690_vm2, %v15725_v20, %v10855_v43  ;;  %v10865_v39 = vunpack.i.l.bf16 %v15078_v35 }
 0xcb9   : > { %v10901_v59 = vunpack.i.h.bf16 %v10899_v63  ;;  %v10900_v36 = vunpack.i.l.bf16 %v10899_v63  ;;  %v8853_v34 = vsel %vm1488_vm3, %v8821_v46, %v10875_v32  ;;  %v10896_v55 = vunpack.i.h.bf16 %v15125_v15 }
 0xcba   : > { %10615 = vmatprep.mubr.msk.bf16.mxu0 %vm453_vm0, %v8904_v28  ;;  %v10895_v35 = vunpack.i.l.bf16 %v15125_v15  ;;  %v8823_v45 = vsel %vm690_vm2, %v15727_v49, %v10865_v39 }
 0xcbb   : > { %v8881_v22 = vsel %vm8865_vm4, %v8848_v60, %v10901_v59  ;;  %v8880_v26 = vsel %vm8865_vm4, %v8847_v0, %v10900_v36  ;;  %v15726_v0 = vld [vmem:[#allocation38_spill] sm:$0xff]  ;;  %v8855_v52 = vsel %vm1488_vm3, %v8823_v45, %v10885_v54  ;;  %v8826_v16 = vsel %vm690_vm2, %v15728_v50, %v10896_v55  ;;  %v15735_v45 = vld [vmem:[#allocation45_spill] sm:$0xff]  ;;  %v15231_v50 = vld [vmem:[%s15387_s4] ss:$0 sm:$0xff] }
 0xcbc   : > { %v8905_v14 = vpack.c.bf16 %v8881_v22, %v8880_v26  ;;  %v15138_v27 = vpop.permute.xlu1 %10903  ;;  %v10909_v31 = vpop.permute.xlu0 %10908  ;;  %v8824_v60 = vsel %vm690_vm2, %v15726_v0, %v10866_v13  ;;  %v8825_v30 = vsel %vm690_vm2, %v15729_v10, %v10895_v35 }
 0xcbd   : > { %v10911_v62 = vunpack.i.h.bf16 %v10909_v31  ;;  %v10910_v38 = vunpack.i.l.bf16 %v10909_v31  ;;  %v8856_v26 = vsel %vm1488_vm3, %v8824_v60, %v10886_v41  ;;  %v10905_v24 = vunpack.i.l.bf16 %v15138_v27  ;;  %v15734_v60 = vld [vmem:[#allocation46_spill] sm:$0xff] }
 0xcbe   : > { %10616 = vmatmul.mubr.msk.bf16.gmra.mrb[12].mxu0 %vm453_vm0, %v8905_v14 }
 0xcbf   : > { %v8882_v1 = vsel %vm8865_vm4, %v8849_v2, %v10910_v38  ;;  %v8883_v3 = vsel %vm8865_vm4, %v8850_v9, %v10911_v62  ;;  %v10906_v9 = vunpack.i.h.bf16 %v15138_v27  ;;  %v15730_v27 = vld [vmem:[#allocation42_spill] sm:$0xff] }
 0xcc0   : > { %v8906_v51 = vpack.c.bf16 %v8883_v3, %v8882_v1  ;;  %v10919_v53 = vpop.permute.xlu1 %10918  ;;  %v10914_v4 = vpop.permute.xlu0 %10913 }
 0xcc1   : > { %v10921_v57 = vunpack.i.h.bf16 %v10919_v53  ;;  %v10920_v44 = vunpack.i.l.bf16 %v10919_v53  ;;  %v10916_v48 = vunpack.i.h.bf16 %v10914_v4  ;;  %v10915_v14 = vunpack.i.l.bf16 %v10914_v4 }
 0xcc2   : > { %10619 = vmatprep.mubr.msk.bf16.mxu0 %vm453_vm0, %v8906_v51 }
 0xcc3   : > { %v8885_v23 = vsel %vm8865_vm4, %v8852_v17, %v10921_v57  ;;  %v8884_v18 = vsel %vm8865_vm4, %v8851_v25, %v10920_v44  ;;  %v8857_v3 = vsel %vm1488_vm3, %v8825_v30, %v10915_v14  ;;  %v8858_v42 = vsel %vm1488_vm3, %v8826_v16, %v10916_v48  ;;  %v15731_v17 = vld [vmem:[#allocation41_spill] sm:$0xff] }
 0xcc4   : > { %v8907_v5 = vpack.c.bf16 %v8885_v23, %v8884_v18  ;;  %v10924_v21 = vpop.permute.xlu1 %10923  ;;  %v10929_v58 = vpop.permute.xlu0 %10928  ;;  %v8828_v44 = vsel %vm690_vm2, %v15730_v27, %v10906_v9  ;;  %v8827_v25 = vsel %vm690_vm2, %v15731_v17, %v10905_v24 }
 0xcc5   : > { %v10931_v61 = vunpack.i.h.bf16 %v10929_v58  ;;  %v10930_v6 = vunpack.i.l.bf16 %v10929_v58  ;;  %v10926_v43 = vunpack.i.h.bf16 %v10924_v21  ;;  %v10925_v51 = vunpack.i.l.bf16 %v10924_v21  ;;  %v15733_v58 = vld [vmem:[#allocation43_spill] sm:$0xff] }
 0xcc6   : > { %10620 = vmatmul.mubr.msk.bf16.gmra.mrb[16].mxu0 %vm453_vm0, %v8907_v5  ;;  %v15732_v5 = vld [vmem:[#allocation44_spill] sm:$0xff] }
 0xcc7   : > { %v8886_v28 = vsel %vm8865_vm4, %v8853_v34, %v10930_v6  ;;  %v8887_v63 = vsel %vm8865_vm4, %v8854_v33, %v10931_v61  ;;  %v8860_v23 = vsel %vm1488_vm3, %v8828_v44, %v10926_v43  ;;  %v8859_v18 = vsel %vm1488_vm3, %v8827_v25, %v10925_v51 }
 0xcc8   : > { %v8908_v12 = vpack.c.bf16 %v8887_v63, %v8886_v28  ;;  %v10939_v59 = vpop.permute.xlu1 %10938  ;;  %v10934_v36 = vpop.permute.xlu0 %10933 }
 0xcc9   : > { %v10941_v11 = vunpack.i.h.bf16 %v10939_v59  ;;  %v10940_v22 = vunpack.i.l.bf16 %v10939_v59  ;;  %v10936_v7 = vunpack.i.h.bf16 %v10934_v36  ;;  %v10935_v29 = vunpack.i.l.bf16 %v10934_v36 }
 0xcca   : > { %10623 = vmatprep.mubr.msk.bf16.mxu0 %vm453_vm0, %v8908_v12 }
 0xccb   : > { %v8889_v15 = vsel %vm8865_vm4, %v8856_v26, %v10941_v11  ;;  %v8888_v31 = vsel %vm8865_vm4, %v8855_v52, %v10940_v22  ;;  %v8830_v21 = vsel %vm690_vm2, %v15732_v5, %v10936_v7  ;;  %v8829_v13 = vsel %vm690_vm2, %v15733_v58, %v10935_v29 }
 0xccc   : > { %v8909_v62 = vpack.c.bf16 %v8889_v15, %v8888_v31  ;;  %v10944_v38 = vpop.permute.xlu1 %10943  ;;  %v10949_v2 = vpop.permute.xlu0 %10948 }
 0xccd   : > { %v10951_v37 = vunpack.i.h.bf16 %v10949_v2  ;;  %v10950_v1 = vunpack.i.l.bf16 %v10949_v2  ;;  %v10946_v34 = vunpack.i.h.bf16 %v10944_v38  ;;  %v10945_v33 = vunpack.i.l.bf16 %v10944_v38 }
 0xcce   : > { %10624 = vmatmul.mubr.msk.bf16.gmra.mrb[20].mxu0 %vm453_vm0, %v8909_v62 }
 0xccf   : > { %v8890_v53 = vsel %vm8865_vm4, %v8857_v3, %v10950_v1  ;;  %v8891_v4 = vsel %vm8865_vm4, %v8858_v42, %v10951_v37  ;;  %v8832_v49 = vsel %vm690_vm2, %v15734_v60, %v10946_v34  ;;  %v8831_v11 = vsel %vm690_vm2, %v15735_v45, %v10945_v33 }
 0xcd0   : > { %v8910_v47 = vpack.c.bf16 %v8891_v4, %v8890_v53  ;;  %v10959_v19 = vpop.permute.xlu1 %10958  ;;  %v10954_v57 = vpop.permute.xlu0 %10953 }
 0xcd1   : > { %v10961_v56 = vunpack.i.h.bf16 %v10959_v19  ;;  %v10960_v32 = vunpack.i.l.bf16 %v10959_v19  ;;  %v10956_v8 = vunpack.i.h.bf16 %v10954_v57  ;;  %v10955_v40 = vunpack.i.l.bf16 %v10954_v57 }
 0xcd2   : > { %10627 = vmatprep.mubr.msk.bf16.mxu0 %vm453_vm0, %v8910_v47 }
 0xcd3   : > { %v8893_v20 = vsel %vm8865_vm4, %v8860_v23, %v10961_v56  ;;  %v8892_v46 = vsel %vm8865_vm4, %v8859_v18, %v10960_v32  ;;  %v8861_v28 = vsel %vm1488_vm3, %v8829_v13, %v10955_v40  ;;  %v8862_v63 = vsel %vm1488_vm3, %v8830_v21, %v10956_v8 }
 0xcd4   : > { %v8911_v39 = vpack.c.bf16 %v8893_v20, %v8892_v46  ;;  %v10964_v61 = vpop.permute.xlu1 %10963  ;;  %v10969_v6 = vpop.permute.xlu0 %10968 }
 0xcd5   : > { %v10971_v41 = vunpack.i.h.bf16 %v10969_v6  ;;  %v10970_v54 = vunpack.i.l.bf16 %v10969_v6  ;;  %v10966_v55 = vunpack.i.h.bf16 %v10964_v61  ;;  %v10965_v35 = vunpack.i.l.bf16 %v10964_v61 }
 0xcd6   : > { %10628 = vmatmul.mubr.msk.bf16.gmra.mrb[24].mxu0 %vm453_vm0, %v8911_v39 }
 0xcd7   : > { %v8894_v12 = vsel %vm8865_vm4, %v8861_v28, %v10970_v54  ;;  %v8895_v59 = vsel %vm8865_vm4, %v8862_v63, %v10971_v41  ;;  %v8864_v52 = vsel %vm1488_vm3, %v8832_v49, %v10966_v55  ;;  %v8863_v48 = vsel %vm1488_vm3, %v8831_v11, %v10965_v35 }
 0xcd8   : > { %v8912_v36 = vpack.c.bf16 %v8895_v59, %v8894_v12  ;;  %v10974_v0 = vpop.permute.xlu1 %10973 }
 0xcd9   : > { %v10976_v22 = vunpack.i.h.bf16 %v10974_v0  ;;  %v10975_v26 = vunpack.i.l.bf16 %v10974_v0 }
 0xcda   : > { %10631 = vmatprep.mubr.msk.bf16.mxu0 %vm453_vm0, %v8912_v36 }
 0xcdb   : > { %v8897_v14 = vsel %vm8865_vm4, %v8864_v52, %v10976_v22  ;;  %v8896_v15 = vsel %vm8865_vm4, %v8863_v48, %v10975_v26 }
 0xcdc   : > { %v8913_v31 = vpack.c.bf16 %v8897_v14, %v8896_v15 }
 0xcde   : > { %10632 = vmatmul.mubr.msk.bf16.gmra.mrb[28].mxu0 %vm453_vm0, %v8913_v31 }
 0xd79   : > { %v10605_v16 = vpop.f32.mrb[0].mxu0 }
 0xd7a   : > { %v9028_v10 = vadd.f32 %v10605_v16, %v15231_v50  ;;  %v9019_v30 = vpop.f32.mrb[1].mxu0 }
 0xd7b   : > { %v9020_v62 = vadd.f32 %v15231_v50, %v9019_v30  ;;  %v10606_v38 = vpop.f32.mrb[2].mxu0 }
 0xd7c   : > { %9148 = vst.msk [vmem:[%s15235_s11 + $0x10] sm:$0xff] %vm453_vm0, %v9028_v10  ;;  %v9031_v2 = vadd.f32 %v10606_v38, %v15231_v50  ;;  %v9022_v9 = vpop.f32.mrb[3].mxu0 }
 0xd7d   : > { %9146 = vst.msk [vmem:[%s15235_s11] sm:$0xff] %vm453_vm0, %v9020_v62  ;;  %v9023_v24 = vadd.f32 %v15231_v50, %v9022_v9 }
 0xd7e   : > { %9149 = vst.msk [vmem:[%s15235_s11 + $0x18] sm:$0xff] %vm453_vm0, %v9031_v2 }
 0xd7f   : > { %9147 = vst.msk [vmem:[%s15235_s11 + $0x8] sm:$0xff] %vm453_vm0, %v9023_v24 }
 0xd81   : > { %v10609_v37 = vpop.f32.mrb[4].mxu0 }
 0xd82   : > { %v9044_v1 = vadd.f32 %v10609_v37, %v15231_v50  ;;  %v9035_v3 = vpop.f32.mrb[5].mxu0 }
 0xd83   : > { %v9036_v42 = vadd.f32 %v15231_v50, %v9035_v3  ;;  %v10610_v43 = vpop.f32.mrb[6].mxu0 }
 0xd84   : > { %9152 = vst.msk [vmem:[%s15235_s11 + $0x30] sm:$0xff] %vm453_vm0, %v9044_v1  ;;  %v9047_v51 = vadd.f32 %v10610_v43, %v15231_v50  ;;  %v9038_v53 = vpop.f32.mrb[7].mxu0 }
 0xd85   : > { %9150 = vst.msk [vmem:[%s15235_s11 + $0x20] sm:$0xff] %vm453_vm0, %v9036_v42  ;;  %v9039_v4 = vadd.f32 %v15231_v50, %v9038_v53 }
 0xd86   : > { %9153 = vst.msk [vmem:[%s15235_s11 + $0x38] sm:$0xff] %vm453_vm0, %v9047_v51 }
 0xd87   : > { %9151 = vst.msk [vmem:[%s15235_s11 + $0x28] sm:$0xff] %vm453_vm0, %v9039_v4 }
 0xd89   : > { %v10613_v7 = vpop.f32.mrb[8].mxu0 }
 0xd8a   : > { %v9060_v29 = vadd.f32 %v10613_v7, %v15231_v50  ;;  %v9051_v47 = vpop.f32.mrb[9].mxu0 }
 0xd8b   : > { %v9052_v19 = vadd.f32 %v15231_v50, %v9051_v47  ;;  %v10614_v57 = vpop.f32.mrb[10].mxu0 }
 0xd8c   : > { %9156 = vst.msk [vmem:[%s15235_s11 + $0x50] sm:$0xff] %vm453_vm0, %v9060_v29  ;;  %v9063_v27 = vadd.f32 %v10614_v57, %v15231_v50  ;;  %v9054_v44 = vpop.f32.mrb[11].mxu0 }
 0xd8d   : > { %9154 = vst.msk [vmem:[%s15235_s11 + $0x40] sm:$0xff] %vm453_vm0, %v9052_v19  ;;  %v9055_v17 = vadd.f32 %v15231_v50, %v9054_v44 }
 0xd8e   : > { %9157 = vst.msk [vmem:[%s15235_s11 + $0x58] sm:$0xff] %vm453_vm0, %v9063_v27 }
 0xd8f   : > { %9155 = vst.msk [vmem:[%s15235_s11 + $0x48] sm:$0xff] %vm453_vm0, %v9055_v17 }
 0xd91   : > { %v10617_v25 = vpop.f32.mrb[12].mxu0 }
 0xd92   : > { %v9076_v56 = vadd.f32 %v10617_v25, %v15231_v50  ;;  %v9067_v32 = vpop.f32.mrb[13].mxu0 }
 0xd93   : > { %v9068_v23 = vadd.f32 %v15231_v50, %v9067_v32  ;;  %v10618_v18 = vpop.f32.mrb[14].mxu0 }
 0xd94   : > { %9160 = vst.msk [vmem:[%s15235_s11 + $0x70] sm:$0xff] %vm453_vm0, %v9076_v56  ;;  %v9079_v8 = vadd.f32 %v10618_v18, %v15231_v50  ;;  %v9070_v40 = vpop.f32.mrb[15].mxu0 }
 0xd95   : > { %9158 = vst.msk [vmem:[%s15235_s11 + $0x60] sm:$0xff] %vm453_vm0, %v9068_v23  ;;  %v9071_v20 = vadd.f32 %v15231_v50, %v9070_v40 }
 0xd96   : > { %9161 = vst.msk [vmem:[%s15235_s11 + $0x78] sm:$0xff] %vm453_vm0, %v9079_v8 }
 0xd97   : > { %9159 = vst.msk [vmem:[%s15235_s11 + $0x68] sm:$0xff] %vm453_vm0, %v9071_v20 }
 0xd99   : > { %v10621_v46 = vpop.f32.mrb[16].mxu0 }
 0xd9a   : > { %v9092_v5 = vadd.f32 %v10621_v46, %v15231_v50  ;;  %v9083_v21 = vpop.f32.mrb[17].mxu0 }
 0xd9b   : > { %v9084_v58 = vadd.f32 %v15231_v50, %v9083_v21  ;;  %v10622_v13 = vpop.f32.mrb[18].mxu0 }
 0xd9c   : > { %9164 = vst.msk [vmem:[%s15235_s11 + $0x90] sm:$0xff] %vm453_vm0, %v9092_v5  ;;  %v9095_v39 = vadd.f32 %v10622_v13, %v15231_v50  ;;  %v9086_v61 = vpop.f32.mrb[19].mxu0 }
 0xd9d   : > { %9162 = vst.msk [vmem:[%s15235_s11 + $0x80] sm:$0xff] %vm453_vm0, %v9084_v58  ;;  %v9087_v6 = vadd.f32 %v15231_v50, %v9086_v61 }
 0xd9e   : > { %9165 = vst.msk [vmem:[%s15235_s11 + $0x98] sm:$0xff] %vm453_vm0, %v9095_v39 }
 0xd9f   : > { %9163 = vst.msk [vmem:[%s15235_s11 + $0x88] sm:$0xff] %vm453_vm0, %v9087_v6 }
 0xda1   : > { %v10625_v34 = vpop.f32.mrb[20].mxu0 }
 0xda2   : > { %v9108_v33 = vadd.f32 %v10625_v34, %v15231_v50  ;;  %v9099_v41 = vpop.f32.mrb[21].mxu0 }
 0xda3   : > { %v9100_v54 = vadd.f32 %v15231_v50, %v9099_v41  ;;  %v10626_v28 = vpop.f32.mrb[22].mxu0 }
 0xda4   : > { %9168 = vst.msk [vmem:[%s15235_s11 + $0xb0] sm:$0xff] %vm453_vm0, %v9108_v33  ;;  %v9111_v63 = vadd.f32 %v10626_v28, %v15231_v50  ;;  %v9102_v55 = vpop.f32.mrb[23].mxu0 }
 0xda5   : > { %9166 = vst.msk [vmem:[%s15235_s11 + $0xa0] sm:$0xff] %vm453_vm0, %v9100_v54  ;;  %v9103_v35 = vadd.f32 %v15231_v50, %v9102_v55 }
 0xda6   : > { %9169 = vst.msk [vmem:[%s15235_s11 + $0xb8] sm:$0xff] %vm453_vm0, %v9111_v63 }
 0xda7   : > { %9167 = vst.msk [vmem:[%s15235_s11 + $0xa8] sm:$0xff] %vm453_vm0, %v9103_v35 }
 0xda9   : > { %v10629_v12 = vpop.f32.mrb[24].mxu0 }
 0xdaa   : > { %v9124_v59 = vadd.f32 %v10629_v12, %v15231_v50  ;;  %v9115_v36 = vpop.f32.mrb[25].mxu0 }
 0xdab   : > { %v9116_v0 = vadd.f32 %v15231_v50, %v9115_v36  ;;  %v10630_v60 = vpop.f32.mrb[26].mxu0 }
 0xdac   : > { %9172 = vst.msk [vmem:[%s15235_s11 + $0xd0] sm:$0xff] %vm453_vm0, %v9124_v59  ;;  %v9127_v49 = vadd.f32 %v10630_v60, %v15231_v50  ;;  %v9118_v45 = vpop.f32.mrb[27].mxu0 }
 0xdad   : > { %9170 = vst.msk [vmem:[%s15235_s11 + $0xc0] sm:$0xff] %vm453_vm0, %v9116_v0  ;;  %v9119_v11 = vadd.f32 %v15231_v50, %v9118_v45 }
 0xdae   : > { %9173 = vst.msk [vmem:[%s15235_s11 + $0xd8] sm:$0xff] %vm453_vm0, %v9127_v49 }
 0xdaf   : > { %9171 = vst.msk [vmem:[%s15235_s11 + $0xc8] sm:$0xff] %vm453_vm0, %v9119_v11 }
 0xdb1   : > { %v10633_v22 = vpop.f32.mrb[28].mxu0 }
 0xdb2   : > { %v9140_v26 = vadd.f32 %v10633_v22, %v15231_v50  ;;  %v9131_v52 = vpop.f32.mrb[29].mxu0 }
 0xdb3   : > { %v9132_v48 = vadd.f32 %v15231_v50, %v9131_v52  ;;  %v10634_v14 = vpop.f32.mrb[30].mxu0 }
 0xdb4   : > { %9176 = vst.msk [vmem:[%s15235_s11 + $0xf0] sm:$0xff] %vm453_vm0, %v9140_v26  ;;  %v9143_v15 = vadd.f32 %v10634_v14, %v15231_v50  ;;  %v9134_v31 = vpop.f32.mrb[31].mxu0 }
 0xdb5   : > { %9174 = vst.msk [vmem:[%s15235_s11 + $0xe0] sm:$0xff] %vm453_vm0, %v9132_v48  ;;  %v9135_v16 = vadd.f32 %v15231_v50, %v9134_v31 }
 0xdb6   : > { %9177 = vst.msk [vmem:[%s15235_s11 + $0xf8] sm:$0xff] %vm453_vm0, %v9143_v15 }
 0xdb7   : > { %9175 = vst.msk [vmem:[%s15235_s11 + $0xe8] sm:$0xff] %vm453_vm0, %v9135_v16 }
 0xdb8   : > { %11636 = shalt.err (!%p11633_p4)
}
 0xdb9   : > { %s11637_s30 = scalar_lea.hbm %s15329_s7, 4096  ;;  %s11641_s11 = scalar_lea.hbm %s15389_s6, 8192 }
 0xdba   : > { %p11638_p9 = scmp.ne.s32.totalorder %s15329_s7, %s11637_s30  ;;  %p11642_p8 = scmp.lt.u32.totalorder %s15329_s7, %s15389_s6 }
 0xdbb   : > { %p11643_p13 = scmp.lt.u32.totalorder %s11641_s11, %s11637_s30  ;;  %p11645_p10 = scmp.lt.u32.totalorder %s11637_s30, %s15329_s7 }
 0xdbc   : > { %p11639_p0 = pnand %p11638_p9, %p11911_p5 }
 0xdbd   : > { %p11644_p6 = por %p11643_p13, %p11642_p8 }
 0xdbe   : > { %p11640_p11 = pneg %p11639_p0 }
 0xdbf   : > { %p11646_p3 = por %p11645_p10, %p11644_p6 }
 0xdc1   : > { %p11647_p7 = pnand %p11646_p3, %p11640_p11 }
 0xdc3   : > { %11650 = shalt.err (!%p11647_p7)
}
 0xdc4   : > { %s11724_s12 = smov 128  }
 0xdc5   : > { %10653 = dma.vmem_to_hbm [thread:$0]  (%p11911_p5), %s15334_s15, 4096, %s15329_s7, %s9179_s25, %s11724_s12, %s11724_s12, %s11720_s8  }
 0xdc6 PF: > { %s9208_s26 = sand.u32 1, %s11685_s21   ;;  %p15736_p12 = scmp.ne.s32.totalorder %s15445_s28, 0 }
 0xdc7   : > { %p15737_p1 = scmp.ge.s32.totalorder %s11697_s24, 2  ;;  %s9209_s18 = scalar_lea.sflag [#allocation4], %s9208_s26 }
 0xdc9   : > { %p10670_p2 = pnand %p15737_p1, %p15736_p12 }
 0xdcb   : > { %11680 = dma.done.wait (!%p10670_p2), %s9209_s18, 4096  }
 0xdcc   : > { %11682 = vsyncadd (!%p10670_p2), %s9209_s18, 4294963200  ;;  %p21_p4 = scmp.ge.s32.totalorder %s11897_s14, 4   ;;  %s15738_s21 = smov %s11689_s22 }
 0xdcd   : > { %s15739_s22 = smov %s11693_s23  ;;  %s15740_s23 = smov %s11907_s17 }
 0xdce   : > { %s15741_s24 = smov %s11897_s14  ;;  %23 = sbr.rel (!%p21_p4) target bundleno = 7 (0x7), region = 101 }
 0xdd5   :  { %9214 = vsyncpa [#allocation3], 1 }
 0xdd6   :  { %9216 = vsyncpa [#allocation3 + $0x1], 1 }
 0xdd7   :  { %9217 = vsyncpa [#allocation6], 1 }
 0xdd8   :  { %9218 = vsyncpa [#allocation9], 1 }
 0xdd9   :  { %9219 = vsyncpa [#allocation4], 1 }
 0xdda   :  { %9221 = vsyncpa [#allocation4 + $0x1], 1 }

</bundles_post_ra>
